<compile_context>
chip_gen: v5e
topology: v5e:2x2
jax: 0.10.0
libtpu: 0.0.40
codegen_flags: <defaults>
</compile_context>

<pallas_src>
import jax
import jax.numpy as jnp
from jax.experimental import pallas as pl
from jax.experimental.pallas import tpu as pltpu

SEQ_LEN = 60          # time steps seen by the PyTorch module
L_PAD = 64            # padded sequence length (multiple of 8 sublanes)
NUM_INPUTS = 12
NUM_CHANNELS = (32, 64, 128)
KERNEL_SIZE = 5
FC_HIDDEN = 128
NUM_CLASSES = 2
C_PAD = 128           # all channel dims padded to a full 128-lane vreg
BATCH = 2

CONV_SCALE = 0.05     # synthetic init scales (keep activations O(0.1) so the
BIAS_SCALE = 0.01     # numeric self-check is meaningful, not bias-dominated)
FC_SCALE = 0.02


# ----------------------------------------------------------------------------
# Pallas kernels
# ----------------------------------------------------------------------------
def _tcn_fused_kernel(x_ref, conv_w_ref, conv_b_ref, down_w_ref, down_b_ref, o_ref):
    """All 3 TemporalBlocks fused.  Activations are (B*L_PAD, 128) f32 values."""
    m = x_ref.shape[0]
    # Row index within each sample (batch is folded into sublanes).  Built once.
    rid = jax.lax.broadcasted_iota(jnp.int32, (m, 1), 0) % L_PAD
    valid_row = rid < SEQ_LEN

    def causal_conv(h, w, b, dilation):
        # h: (m, 128) f32, w: (K*128, 128) bf16, b: (1, 128) f32
        pieces = []
        for k in range(KERNEL_SIZE):
            shift = (KERNEL_SIZE - 1 - k) * dilation       # tap k reads x[t - shift]
            if shift == 0:
                piece = h
            else:
                rolled = pltpu.roll(h, shift=shift, axis=0)  # XLU sublane rotate
                # zero rows that would otherwise read across the sample boundary
                piece = jnp.where(rid >= shift, rolled, 0.0)
            pieces.append(piece.astype(jnp.bfloat16))
        stacked = jnp.concatenate(pieces, axis=-1)           # (m, K*128), lane-aligned
        return jnp.dot(stacked, w, preferred_element_type=jnp.float32) + b

    h = x_ref[...]                                           # (m, 128) f32
    for i, dilation in enumerate((1, 2, 4)):                 # dilation = 2**block
        # conv1 + chomp + relu   (dropout: eval-mode no-op)
        y = jnp.maximum(
            causal_conv(h, conv_w_ref[2 * i], conv_b_ref[2 * i], dilation), 0.0)
        # conv2 + chomp + relu
        y = jnp.maximum(
            causal_conv(y, conv_w_ref[2 * i + 1], conv_b_ref[2 * i + 1], dilation), 0.0)
        # 1x1 downsample residual
        res = jnp.dot(h.astype(jnp.bfloat16), down_w_ref[i],
                      preferred_element_type=jnp.float32) + down_b_ref[i]
        # final relu; keep pad rows (t >= 60) exactly zero
        h = jnp.where(valid_row, jnp.maximum(y + res, 0.0), 0.0)
    o_ref[...] = h


def _fc_head_kernel(x_ref, w1_ref, b1_ref, w2_ref, b2_ref, o_ref):
    """fc1 -> relu -> fc2 (fc2 output zero-padded to 128 lanes)."""
    h = jnp.dot(x_ref[...].astype(jnp.bfloat16), w1_ref[...],
                preferred_element_type=jnp.float32) + b1_ref[...]
    h = jnp.maximum(h, 0.0)
    o_ref[...] = jnp.dot(h.astype(jnp.bfloat16), w2_ref[...],
                         preferred_element_type=jnp.float32) + b2_ref[...]


# ----------------------------------------------------------------------------
# Wrappers
# ----------------------------------------------------------------------------
def tcn_fused(x_stacked, params):
    m = x_stacked.shape[0]
    vmem = pl.BlockSpec(memory_space=pltpu.MemorySpace.VMEM)
    return pl.pallas_call(
        _tcn_fused_kernel,
        out_shape=jax.ShapeDtypeStruct((m, C_PAD), jnp.float32),
        in_specs=[vmem] * 5,
        out_specs=vmem,
    )(x_stacked, params["conv_w"], params["conv_b"],
      params["down_w"], params["down_b"])


def fc_head(flat, params):
    b_ = flat.shape[0]
    vmem = pl.BlockSpec(memory_space=pltpu.MemorySpace.VMEM)
    return pl.pallas_call(
        _fc_head_kernel,
        out_shape=jax.ShapeDtypeStruct((b_, C_PAD), jnp.float32),
        in_specs=[vmem] * 5,
        out_specs=vmem,
    )(flat, params["fc1_w"], params["fc1_b"], params["fc2_w"], params["fc2_b"])


# ----------------------------------------------------------------------------
# Parameters (deterministic, synthetic; stored pre-padded / pre-reshaped)
# ----------------------------------------------------------------------------
def init_params(key):
    keys = iter(jax.random.split(key, 24))
    chans = (NUM_INPUTS,) + NUM_CHANNELS
    n_blocks = len(NUM_CHANNELS)

    conv_w = jnp.zeros((2 * n_blocks, KERNEL_SIZE * C_PAD, C_PAD), jnp.float32)
    conv_b = jnp.zeros((2 * n_blocks, 1, C_PAD), jnp.float32)
    down_w = jnp.zeros((n_blocks, C_PAD, C_PAD), jnp.float32)
    down_b = jnp.zeros((n_blocks, 1, C_PAD), jnp.float32)

    def embed_conv(buf, idx, w_pt):
        # w_pt: PyTorch Conv1d layout (Cout, Cin, K).  im2col layout is
        # (K, C_PAD, C_PAD) -> (K*C_PAD, C_PAD), tap k multiplying x[t-(K-1-k)*d].
        cout, cin, k = w_pt.shape
        w = jnp.transpose(w_pt, (2, 1, 0))                       # (K, Cin, Cout)
        full = jnp.zeros((k, C_PAD, C_PAD), jnp.float32).at[:, :cin, :cout].set(w)
        return buf.at[idx].set(full.reshape(k * C_PAD, C_PAD))

    for i, (cin, cout) in enumerate(zip(chans[:-1], chans[1:])):
        w1 = CONV_SCALE * jax.random.normal(next(keys), (cout, cin, KERNEL_SIZE), jnp.float32)
        b1 = BIAS_SCALE * jax.random.normal(next(keys), (cout,), jnp.float32)
        w2 = CONV_SCALE * jax.random.normal(next(keys), (cout, cout, KERNEL_SIZE), jnp.float32)
        b2 = BIAS_SCALE * jax.random.normal(next(keys), (cout,), jnp.float32)
        wd = CONV_SCALE * jax.random.normal(next(keys), (cout, cin, 1), jnp.float32)
        bd = BIAS_SCALE * jax.random.normal(next(keys), (cout,), jnp.float32)
        conv_w = embed_conv(conv_w, 2 * i, w1)
        conv_w = embed_conv(conv_w, 2 * i + 1, w2)
        conv_b = conv_b.at[2 * i, 0, :cout].set(b1)
        conv_b = conv_b.at[2 * i + 1, 0, :cout].set(b2)
        down_w = down_w.at[i, :cin, :cout].set(jnp.transpose(wd[:, :, 0], (1, 0)))
        down_b = down_b.at[i, 0, :cout].set(bd)

    c_last = NUM_CHANNELS[-1]
    to_linear = c_last * SEQ_LEN                                   # 7680 (_to_linear)
    fc1_w = FC_SCALE * jax.random.normal(next(keys), (FC_HIDDEN, to_linear), jnp.float32)
    fc1_b = BIAS_SCALE * jax.random.normal(next(keys), (FC_HIDDEN,), jnp.float32)
    fc2_w = FC_SCALE * jax.random.normal(next(keys), (NUM_CLASSES, FC_HIDDEN), jnp.float32)
    fc2_b = BIAS_SCALE * jax.random.normal(next(keys), (NUM_CLASSES,), jnp.float32)
    # PyTorch flatten index is c*60 + t; our flatten is t*128 + c -> permute fc1 columns.
    fc1_w_tc = (fc1_w.reshape(FC_HIDDEN, c_last, SEQ_LEN)
                .transpose(2, 1, 0).reshape(SEQ_LEN * c_last, FC_HIDDEN))
    # Lane-dense fc2: pad the 2 output classes to 128 (sliced off in the wrapper).
    fc2_w_pad = jnp.zeros((FC_HIDDEN, C_PAD), jnp.float32).at[:, :NUM_CLASSES].set(fc2_w.T)
    fc2_b_pad = jnp.zeros((1, C_PAD), jnp.float32).at[0, :NUM_CLASSES].set(fc2_b)

    return dict(
        conv_w=conv_w.astype(jnp.bfloat16), conv_b=conv_b,
        down_w=down_w.astype(jnp.bfloat16), down_b=down_b,
        fc1_w=fc1_w_tc.astype(jnp.bfloat16), fc1_b=fc1_b.reshape(1, FC_HIDDEN),
        fc2_w=fc2_w_pad.astype(jnp.bfloat16), fc2_b=fc2_b_pad,
    )


# ----------------------------------------------------------------------------
# Forward pass (matches CNNModelWithTCN.forward)
# ----------------------------------------------------------------------------
def forward(params, x):
    # x: (B, 60, 12) — the same tensor the PyTorch module receives.
    b_ = x.shape[0]
    # Zero-pad seq 60 -> 64 rows and channels 12 -> 128 lanes; fold batch into sublanes.
    xp = jnp.zeros((b_, L_PAD, C_PAD), jnp.float32)
    xp = xp.at[:, :SEQ_LEN, :NUM_INPUTS].set(x.astype(jnp.float32))
    h = tcn_fused(xp.reshape(b_ * L_PAD, C_PAD), params)            # (B*64, 128)
    h = h.reshape(b_, L_PAD, C_PAD)[:, :SEQ_LEN, :]                 # (B, 60, 128)
    flat = h.reshape(b_, SEQ_LEN * C_PAD)                           # idx = t*128 + c
    logits_padded = fc_head(flat, params)                           # (B, 128)
    return logits_padded[:, :NUM_CLASSES]


# ----------------------------------------------------------------------------
# Pure-JAX float32 reference (for the in-script numerical self-check)
# ----------------------------------------------------------------------------
def reference_forward(params, x):
    b_ = x.shape[0]
    h = jnp.zeros((b_, SEQ_LEN, C_PAD), jnp.float32).at[:, :, :NUM_INPUTS].set(
        x.astype(jnp.float32))
    for i in range(len(NUM_CHANNELS)):
        d = 2 ** i

        def cconv(inp, w_flat, b, d=d):
            w = w_flat.astype(jnp.float32).reshape(KERNEL_SIZE, C_PAD, C_PAD)
            out = jnp.zeros_like(inp)
            for k in range(KERNEL_SIZE):
                s = (KERNEL_SIZE - 1 - k) * d
                xs = jnp.pad(inp, ((0, 0), (s, 0), (0, 0)))[:, :SEQ_LEN, :]
                out = out + jnp.einsum("blc,co->blo", xs, w[k], precision="highest")
            return out + b

        y = jax.nn.relu(cconv(h, params["conv_w"][2 * i], params["conv_b"][2 * i]))
        y = jax.nn.relu(cconv(y, params["conv_w"][2 * i + 1], params["conv_b"][2 * i + 1]))
        res = jnp.einsum("blc,co->blo", h, params["down_w"][i].astype(jnp.float32),
                         precision="highest") + params["down_b"][i]
        h = jax.nn.relu(y + res)
    flat = h.reshape(b_, SEQ_LEN * C_PAD)
    z = jax.nn.relu(jnp.dot(flat, params["fc1_w"].astype(jnp.float32),
                            precision="highest") + params["fc1_b"])
    z = jnp.dot(z, params["fc2_w"].astype(jnp.float32),
                precision="highest") + params["fc2_b"]
    return z[:, :NUM_CLASSES]


if __name__ == "__main__":
    key = jax.random.PRNGKey(0)
    pkey, xkey = jax.random.split(key)
    params = init_params(pkey)
    x = jax.random.normal(xkey, (BATCH, SEQ_LEN, NUM_INPUTS), jnp.float32)

    out = jax.block_until_ready(jax.jit(forward)(params, x))
    assert out.shape == (BATCH, NUM_CLASSES), out.shape
    assert bool(jnp.all(jnp.isfinite(out)))

    ref = jax.block_until_ready(jax.jit(reference_forward)(params, x))
    if not bool(jnp.allclose(out, ref, rtol=1e-1, atol=1e-2)):
        raise AssertionError(
            f"kernel mismatch vs reference: max abs err = {float(jnp.max(jnp.abs(out - ref)))}")

    print("KERNEL_OK")
</pallas_src>

<mosaic_0001>
module attributes {stable_mosaic.version = 11 : i64} {
  func.func @_tcn_fused_kernel(%arg0: memref<128x128xf32, #tpu.memory_space<vmem>>, %arg1: memref<6x640x128xbf16, #tpu.memory_space<vmem>>, %arg2: memref<6x1x128xf32, #tpu.memory_space<vmem>>, %arg3: memref<3x128x128xbf16, #tpu.memory_space<vmem>>, %arg4: memref<3x1x128xf32, #tpu.memory_space<vmem>>, %arg5: memref<128x128xf32, #tpu.memory_space<vmem>>) attributes {dimension_semantics = [], scalar_prefetch = 0 : i64, scratch_operands = 0 : i64, tpu.core_type = #tpu.core_type<tc>} {
    %0 = tpu.iota {dimensions = array<i32: 0>} : vector<128x1xi32>
    %c64_i32 = arith.constant 64 : i32
    %c0_i32 = arith.constant 0 : i32
    %1 = arith.cmpi eq, %c64_i32, %c0_i32 : i32
    %c1_i32 = arith.constant 1 : i32
    %2 = arith.select %1, %c1_i32, %c64_i32 : i32
    %3 = vector.broadcast %2 : i32 to vector<128x1xi32>
    %4 = arith.remsi %0, %3 : vector<128x1xi32>
    %c0_i32_0 = arith.constant 0 : i32
    %5 = vector.broadcast %c0_i32_0 : i32 to vector<128x1xi32>
    %6 = arith.cmpi ne, %4, %5 : vector<128x1xi32>
    %c0_i32_1 = arith.constant 0 : i32
    %7 = vector.broadcast %c0_i32_1 : i32 to vector<128x1xi32>
    %8 = arith.cmpi slt, %4, %7 : vector<128x1xi32>
    %c0_i32_2 = arith.constant 0 : i32
    %9 = arith.cmpi slt, %2, %c0_i32_2 : i32
    %10 = vector.broadcast %9 : i1 to vector<128x1xi1>
    %11 = vector.broadcast %10 : vector<128x1xi1> to vector<128x1xi1>
    %12 = arith.xori %8, %11 : vector<128x1xi1>
    %13 = arith.andi %12, %6 : vector<128x1xi1>
    %14 = vector.broadcast %2 : i32 to vector<128x1xi32>
    %15 = arith.addi %4, %14 : vector<128x1xi32>
    %16 = arith.select %13, %15, %4 : vector<128x1xi1>, vector<128x1xi32>
    %c60_i32 = arith.constant 60 : i32
    %17 = vector.broadcast %c60_i32 : i32 to vector<128x1xi32>
    %18 = arith.cmpi slt, %16, %17 : vector<128x1xi32>
    %c0 = arith.constant 0 : index
    %c0_3 = arith.constant 0 : index
    %19 = vector.load %arg0[%c0, %c0_3] : memref<128x128xf32, #tpu.memory_space<vmem>>, vector<128x128xf32>
    %c0_4 = arith.constant 0 : index
    %c0_5 = arith.constant 0 : index
    %c0_6 = arith.constant 0 : index
    %20 = vector.load %arg1[%c0_4, %c0_5, %c0_6] : memref<6x640x128xbf16, #tpu.memory_space<vmem>>, vector<1x640x128xbf16>
    %21 = vector.shape_cast %20 : vector<1x640x128xbf16> to vector<640x128xbf16>
    %c0_7 = arith.constant 0 : index
    %c0_8 = arith.constant 0 : index
    %c0_9 = arith.constant 0 : index
    %22 = vector.load %arg2[%c0_7, %c0_8, %c0_9] : memref<6x1x128xf32, #tpu.memory_space<vmem>>, vector<1x1x128xf32>
    %23 = vector.shape_cast %22 : vector<1x1x128xf32> to vector<1x128xf32>
    %c4_i32 = arith.constant 4 : i32
    %24 = tpu.dynamic_rotate %19 by %c4_i32 dim 0 : vector<128x128xf32>, i32 -> vector<128x128xf32>
    %c4_i32_10 = arith.constant 4 : i32
    %25 = vector.broadcast %c4_i32_10 : i32 to vector<128x1xi32>
    %26 = arith.cmpi sge, %16, %25 : vector<128x1xi32>
    %cst = arith.constant 0.000000e+00 : f32
    %27 = vector.shape_cast %26 : vector<128x1xi1> to vector<128x1xi1>
    %28 = vector.broadcast %27 : vector<128x1xi1> to vector<128x128xi1>
    %29 = vector.broadcast %cst : f32 to vector<128x128xf32>
    %30 = arith.select %28, %24, %29 : vector<128x128xi1>, vector<128x128xf32>
    %31 = arith.truncf %30 : vector<128x128xf32> to vector<128x128xbf16>
    %c3_i32 = arith.constant 3 : i32
    %32 = tpu.dynamic_rotate %19 by %c3_i32 dim 0 : vector<128x128xf32>, i32 -> vector<128x128xf32>
    %c3_i32_11 = arith.constant 3 : i32
    %33 = vector.broadcast %c3_i32_11 : i32 to vector<128x1xi32>
    %34 = arith.cmpi sge, %16, %33 : vector<128x1xi32>
    %cst_12 = arith.constant 0.000000e+00 : f32
    %35 = vector.shape_cast %34 : vector<128x1xi1> to vector<128x1xi1>
    %36 = vector.broadcast %35 : vector<128x1xi1> to vector<128x128xi1>
    %37 = vector.broadcast %cst_12 : f32 to vector<128x128xf32>
    %38 = arith.select %36, %32, %37 : vector<128x128xi1>, vector<128x128xf32>
    %39 = arith.truncf %38 : vector<128x128xf32> to vector<128x128xbf16>
    %c2_i32 = arith.constant 2 : i32
    %40 = tpu.dynamic_rotate %19 by %c2_i32 dim 0 : vector<128x128xf32>, i32 -> vector<128x128xf32>
    %c2_i32_13 = arith.constant 2 : i32
    %41 = vector.broadcast %c2_i32_13 : i32 to vector<128x1xi32>
    %42 = arith.cmpi sge, %16, %41 : vector<128x1xi32>
    %cst_14 = arith.constant 0.000000e+00 : f32
    %43 = vector.shape_cast %42 : vector<128x1xi1> to vector<128x1xi1>
    %44 = vector.broadcast %43 : vector<128x1xi1> to vector<128x128xi1>
    %45 = vector.broadcast %cst_14 : f32 to vector<128x128xf32>
    %46 = arith.select %44, %40, %45 : vector<128x128xi1>, vector<128x128xf32>
    %47 = arith.truncf %46 : vector<128x128xf32> to vector<128x128xbf16>
    %c1_i32_15 = arith.constant 1 : i32
    %48 = tpu.dynamic_rotate %19 by %c1_i32_15 dim 0 : vector<128x128xf32>, i32 -> vector<128x128xf32>
    %c1_i32_16 = arith.constant 1 : i32
    %49 = vector.broadcast %c1_i32_16 : i32 to vector<128x1xi32>
    %50 = arith.cmpi sge, %16, %49 : vector<128x1xi32>
    %cst_17 = arith.constant 0.000000e+00 : f32
    %51 = vector.shape_cast %50 : vector<128x1xi1> to vector<128x1xi1>
    %52 = vector.broadcast %51 : vector<128x1xi1> to vector<128x128xi1>
    %53 = vector.broadcast %cst_17 : f32 to vector<128x128xf32>
    %54 = arith.select %52, %48, %53 : vector<128x128xi1>, vector<128x128xf32>
    %55 = arith.truncf %54 : vector<128x128xf32> to vector<128x128xbf16>
    %56 = arith.truncf %19 : vector<128x128xf32> to vector<128x128xbf16>
    %57 = tpu.concatenate %31, %39, %47, %55, %56 in 1 : vector<128x128xbf16>, vector<128x128xbf16>, vector<128x128xbf16>, vector<128x128xbf16>, vector<128x128xbf16> -> vector<128x640xbf16>
    %cst_18 = arith.constant dense<0.000000e+00> : vector<128x128xf32>
    %58 = tpu.matmul %57, %21, %cst_18 {dimension_numbers = #tpu.dot_dimension_numbers<[1], [0], [0], [1], [0, 0, 1, 1], [], []>} : vector<128x640xbf16>, vector<640x128xbf16>, vector<128x128xf32> -> vector<128x128xf32>
    %59 = vector.broadcast %23 : vector<1x128xf32> to vector<128x128xf32>
    %60 = arith.addf %58, %59 : vector<128x128xf32>
    %cst_19 = arith.constant 0.000000e+00 : f32
    %61 = vector.broadcast %cst_19 : f32 to vector<128x128xf32>
    %62 = arith.maximumf %60, %61 : vector<128x128xf32>
    %c1 = arith.constant 1 : index
    %c0_20 = arith.constant 0 : index
    %c0_21 = arith.constant 0 : index
    %63 = vector.load %arg1[%c1, %c0_20, %c0_21] : memref<6x640x128xbf16, #tpu.memory_space<vmem>>, vector<1x640x128xbf16>
    %64 = vector.shape_cast %63 : vector<1x640x128xbf16> to vector<640x128xbf16>
    %c1_22 = arith.constant 1 : index
    %c0_23 = arith.constant 0 : index
    %c0_24 = arith.constant 0 : index
    %65 = vector.load %arg2[%c1_22, %c0_23, %c0_24] : memref<6x1x128xf32, #tpu.memory_space<vmem>>, vector<1x1x128xf32>
    %66 = vector.shape_cast %65 : vector<1x1x128xf32> to vector<1x128xf32>
    %c4_i32_25 = arith.constant 4 : i32
    %67 = tpu.dynamic_rotate %62 by %c4_i32_25 dim 0 : vector<128x128xf32>, i32 -> vector<128x128xf32>
    %c4_i32_26 = arith.constant 4 : i32
    %68 = vector.broadcast %c4_i32_26 : i32 to vector<128x1xi32>
    %69 = arith.cmpi sge, %16, %68 : vector<128x1xi32>
    %cst_27 = arith.constant 0.000000e+00 : f32
    %70 = vector.shape_cast %69 : vector<128x1xi1> to vector<128x1xi1>
    %71 = vector.broadcast %70 : vector<128x1xi1> to vector<128x128xi1>
    %72 = vector.broadcast %cst_27 : f32 to vector<128x128xf32>
    %73 = arith.select %71, %67, %72 : vector<128x128xi1>, vector<128x128xf32>
    %74 = arith.truncf %73 : vector<128x128xf32> to vector<128x128xbf16>
    %c3_i32_28 = arith.constant 3 : i32
    %75 = tpu.dynamic_rotate %62 by %c3_i32_28 dim 0 : vector<128x128xf32>, i32 -> vector<128x128xf32>
    %c3_i32_29 = arith.constant 3 : i32
    %76 = vector.broadcast %c3_i32_29 : i32 to vector<128x1xi32>
    %77 = arith.cmpi sge, %16, %76 : vector<128x1xi32>
    %cst_30 = arith.constant 0.000000e+00 : f32
    %78 = vector.shape_cast %77 : vector<128x1xi1> to vector<128x1xi1>
    %79 = vector.broadcast %78 : vector<128x1xi1> to vector<128x128xi1>
    %80 = vector.broadcast %cst_30 : f32 to vector<128x128xf32>
    %81 = arith.select %79, %75, %80 : vector<128x128xi1>, vector<128x128xf32>
    %82 = arith.truncf %81 : vector<128x128xf32> to vector<128x128xbf16>
    %c2_i32_31 = arith.constant 2 : i32
    %83 = tpu.dynamic_rotate %62 by %c2_i32_31 dim 0 : vector<128x128xf32>, i32 -> vector<128x128xf32>
    %c2_i32_32 = arith.constant 2 : i32
    %84 = vector.broadcast %c2_i32_32 : i32 to vector<128x1xi32>
    %85 = arith.cmpi sge, %16, %84 : vector<128x1xi32>
    %cst_33 = arith.constant 0.000000e+00 : f32
    %86 = vector.shape_cast %85 : vector<128x1xi1> to vector<128x1xi1>
    %87 = vector.broadcast %86 : vector<128x1xi1> to vector<128x128xi1>
    %88 = vector.broadcast %cst_33 : f32 to vector<128x128xf32>
    %89 = arith.select %87, %83, %88 : vector<128x128xi1>, vector<128x128xf32>
    %90 = arith.truncf %89 : vector<128x128xf32> to vector<128x128xbf16>
    %c1_i32_34 = arith.constant 1 : i32
    %91 = tpu.dynamic_rotate %62 by %c1_i32_34 dim 0 : vector<128x128xf32>, i32 -> vector<128x128xf32>
    %c1_i32_35 = arith.constant 1 : i32
    %92 = vector.broadcast %c1_i32_35 : i32 to vector<128x1xi32>
    %93 = arith.cmpi sge, %16, %92 : vector<128x1xi32>
    %cst_36 = arith.constant 0.000000e+00 : f32
    %94 = vector.shape_cast %93 : vector<128x1xi1> to vector<128x1xi1>
    %95 = vector.broadcast %94 : vector<128x1xi1> to vector<128x128xi1>
    %96 = vector.broadcast %cst_36 : f32 to vector<128x128xf32>
    %97 = arith.select %95, %91, %96 : vector<128x128xi1>, vector<128x128xf32>
    %98 = arith.truncf %97 : vector<128x128xf32> to vector<128x128xbf16>
    %99 = arith.truncf %62 : vector<128x128xf32> to vector<128x128xbf16>
    %100 = tpu.concatenate %74, %82, %90, %98, %99 in 1 : vector<128x128xbf16>, vector<128x128xbf16>, vector<128x128xbf16>, vector<128x128xbf16>, vector<128x128xbf16> -> vector<128x640xbf16>
    %cst_37 = arith.constant dense<0.000000e+00> : vector<128x128xf32>
    %101 = tpu.matmul %100, %64, %cst_37 {dimension_numbers = #tpu.dot_dimension_numbers<[1], [0], [0], [1], [0, 0, 1, 1], [], []>} : vector<128x640xbf16>, vector<640x128xbf16>, vector<128x128xf32> -> vector<128x128xf32>
    %102 = vector.broadcast %66 : vector<1x128xf32> to vector<128x128xf32>
    %103 = arith.addf %101, %102 : vector<128x128xf32>
    %cst_38 = arith.constant 0.000000e+00 : f32
    %104 = vector.broadcast %cst_38 : f32 to vector<128x128xf32>
    %105 = arith.maximumf %103, %104 : vector<128x128xf32>
    %106 = arith.truncf %19 : vector<128x128xf32> to vector<128x128xbf16>
    %c0_39 = arith.constant 0 : index
    %c0_40 = arith.constant 0 : index
    %c0_41 = arith.constant 0 : index
    %107 = vector.load %arg3[%c0_39, %c0_40, %c0_41] : memref<3x128x128xbf16, #tpu.memory_space<vmem>>, vector<1x128x128xbf16>
    %108 = vector.shape_cast %107 : vector<1x128x128xbf16> to vector<128x128xbf16>
    %cst_42 = arith.constant dense<0.000000e+00> : vector<128x128xf32>
    %109 = tpu.matmul %106, %108, %cst_42 {dimension_numbers = #tpu.dot_dimension_numbers<[1], [0], [0], [1], [0, 0, 1, 1], [], []>} : vector<128x128xbf16>, vector<128x128xbf16>, vector<128x128xf32> -> vector<128x128xf32>
    %c0_43 = arith.constant 0 : index
    %c0_44 = arith.constant 0 : index
    %c0_45 = arith.constant 0 : index
    %110 = vector.load %arg4[%c0_43, %c0_44, %c0_45] : memref<3x1x128xf32, #tpu.memory_space<vmem>>, vector<1x1x128xf32>
    %111 = vector.shape_cast %110 : vector<1x1x128xf32> to vector<1x128xf32>
    %112 = vector.broadcast %111 : vector<1x128xf32> to vector<128x128xf32>
    %113 = arith.addf %109, %112 : vector<128x128xf32>
    %114 = arith.addf %105, %113 : vector<128x128xf32>
    %cst_46 = arith.constant 0.000000e+00 : f32
    %115 = vector.broadcast %cst_46 : f32 to vector<128x128xf32>
    %116 = arith.maximumf %114, %115 : vector<128x128xf32>
    %cst_47 = arith.constant 0.000000e+00 : f32
    %117 = vector.shape_cast %18 : vector<128x1xi1> to vector<128x1xi1>
    %118 = vector.broadcast %117 : vector<128x1xi1> to vector<128x128xi1>
    %119 = vector.broadcast %cst_47 : f32 to vector<128x128xf32>
    %120 = arith.select %118, %116, %119 : vector<128x128xi1>, vector<128x128xf32>
    %c2 = arith.constant 2 : index
    %c0_48 = arith.constant 0 : index
    %c0_49 = arith.constant 0 : index
    %121 = vector.load %arg1[%c2, %c0_48, %c0_49] : memref<6x640x128xbf16, #tpu.memory_space<vmem>>, vector<1x640x128xbf16>
    %122 = vector.shape_cast %121 : vector<1x640x128xbf16> to vector<640x128xbf16>
    %c2_50 = arith.constant 2 : index
    %c0_51 = arith.constant 0 : index
    %c0_52 = arith.constant 0 : index
    %123 = vector.load %arg2[%c2_50, %c0_51, %c0_52] : memref<6x1x128xf32, #tpu.memory_space<vmem>>, vector<1x1x128xf32>
    %124 = vector.shape_cast %123 : vector<1x1x128xf32> to vector<1x128xf32>
    %c8_i32 = arith.constant 8 : i32
    %125 = tpu.dynamic_rotate %120 by %c8_i32 dim 0 : vector<128x128xf32>, i32 -> vector<128x128xf32>
    %c8_i32_53 = arith.constant 8 : i32
    %126 = vector.broadcast %c8_i32_53 : i32 to vector<128x1xi32>
    %127 = arith.cmpi sge, %16, %126 : vector<128x1xi32>
    %cst_54 = arith.constant 0.000000e+00 : f32
    %128 = vector.shape_cast %127 : vector<128x1xi1> to vector<128x1xi1>
    %129 = vector.broadcast %128 : vector<128x1xi1> to vector<128x128xi1>
    %130 = vector.broadcast %cst_54 : f32 to vector<128x128xf32>
    %131 = arith.select %129, %125, %130 : vector<128x128xi1>, vector<128x128xf32>
    %132 = arith.truncf %131 : vector<128x128xf32> to vector<128x128xbf16>
    %c6_i32 = arith.constant 6 : i32
    %133 = tpu.dynamic_rotate %120 by %c6_i32 dim 0 : vector<128x128xf32>, i32 -> vector<128x128xf32>
    %c6_i32_55 = arith.constant 6 : i32
    %134 = vector.broadcast %c6_i32_55 : i32 to vector<128x1xi32>
    %135 = arith.cmpi sge, %16, %134 : vector<128x1xi32>
    %cst_56 = arith.constant 0.000000e+00 : f32
    %136 = vector.shape_cast %135 : vector<128x1xi1> to vector<128x1xi1>
    %137 = vector.broadcast %136 : vector<128x1xi1> to vector<128x128xi1>
    %138 = vector.broadcast %cst_56 : f32 to vector<128x128xf32>
    %139 = arith.select %137, %133, %138 : vector<128x128xi1>, vector<128x128xf32>
    %140 = arith.truncf %139 : vector<128x128xf32> to vector<128x128xbf16>
    %c4_i32_57 = arith.constant 4 : i32
    %141 = tpu.dynamic_rotate %120 by %c4_i32_57 dim 0 : vector<128x128xf32>, i32 -> vector<128x128xf32>
    %c4_i32_58 = arith.constant 4 : i32
    %142 = vector.broadcast %c4_i32_58 : i32 to vector<128x1xi32>
    %143 = arith.cmpi sge, %16, %142 : vector<128x1xi32>
    %cst_59 = arith.constant 0.000000e+00 : f32
    %144 = vector.shape_cast %143 : vector<128x1xi1> to vector<128x1xi1>
    %145 = vector.broadcast %144 : vector<128x1xi1> to vector<128x128xi1>
    %146 = vector.broadcast %cst_59 : f32 to vector<128x128xf32>
    %147 = arith.select %145, %141, %146 : vector<128x128xi1>, vector<128x128xf32>
    %148 = arith.truncf %147 : vector<128x128xf32> to vector<128x128xbf16>
    %c2_i32_60 = arith.constant 2 : i32
    %149 = tpu.dynamic_rotate %120 by %c2_i32_60 dim 0 : vector<128x128xf32>, i32 -> vector<128x128xf32>
    %c2_i32_61 = arith.constant 2 : i32
    %150 = vector.broadcast %c2_i32_61 : i32 to vector<128x1xi32>
    %151 = arith.cmpi sge, %16, %150 : vector<128x1xi32>
    %cst_62 = arith.constant 0.000000e+00 : f32
    %152 = vector.shape_cast %151 : vector<128x1xi1> to vector<128x1xi1>
    %153 = vector.broadcast %152 : vector<128x1xi1> to vector<128x128xi1>
    %154 = vector.broadcast %cst_62 : f32 to vector<128x128xf32>
    %155 = arith.select %153, %149, %154 : vector<128x128xi1>, vector<128x128xf32>
    %156 = arith.truncf %155 : vector<128x128xf32> to vector<128x128xbf16>
    %157 = arith.truncf %120 : vector<128x128xf32> to vector<128x128xbf16>
    %158 = tpu.concatenate %132, %140, %148, %156, %157 in 1 : vector<128x128xbf16>, vector<128x128xbf16>, vector<128x128xbf16>, vector<128x128xbf16>, vector<128x128xbf16> -> vector<128x640xbf16>
    %cst_63 = arith.constant dense<0.000000e+00> : vector<128x128xf32>
    %159 = tpu.matmul %158, %122, %cst_63 {dimension_numbers = #tpu.dot_dimension_numbers<[1], [0], [0], [1], [0, 0, 1, 1], [], []>} : vector<128x640xbf16>, vector<640x128xbf16>, vector<128x128xf32> -> vector<128x128xf32>
    %160 = vector.broadcast %124 : vector<1x128xf32> to vector<128x128xf32>
    %161 = arith.addf %159, %160 : vector<128x128xf32>
    %cst_64 = arith.constant 0.000000e+00 : f32
    %162 = vector.broadcast %cst_64 : f32 to vector<128x128xf32>
    %163 = arith.maximumf %161, %162 : vector<128x128xf32>
    %c3 = arith.constant 3 : index
    %c0_65 = arith.constant 0 : index
    %c0_66 = arith.constant 0 : index
    %164 = vector.load %arg1[%c3, %c0_65, %c0_66] : memref<6x640x128xbf16, #tpu.memory_space<vmem>>, vector<1x640x128xbf16>
    %165 = vector.shape_cast %164 : vector<1x640x128xbf16> to vector<640x128xbf16>
    %c3_67 = arith.constant 3 : index
    %c0_68 = arith.constant 0 : index
    %c0_69 = arith.constant 0 : index
    %166 = vector.load %arg2[%c3_67, %c0_68, %c0_69] : memref<6x1x128xf32, #tpu.memory_space<vmem>>, vector<1x1x128xf32>
    %167 = vector.shape_cast %166 : vector<1x1x128xf32> to vector<1x128xf32>
    %c8_i32_70 = arith.constant 8 : i32
    %168 = tpu.dynamic_rotate %163 by %c8_i32_70 dim 0 : vector<128x128xf32>, i32 -> vector<128x128xf32>
    %c8_i32_71 = arith.constant 8 : i32
    %169 = vector.broadcast %c8_i32_71 : i32 to vector<128x1xi32>
    %170 = arith.cmpi sge, %16, %169 : vector<128x1xi32>
    %cst_72 = arith.constant 0.000000e+00 : f32
    %171 = vector.shape_cast %170 : vector<128x1xi1> to vector<128x1xi1>
    %172 = vector.broadcast %171 : vector<128x1xi1> to vector<128x128xi1>
    %173 = vector.broadcast %cst_72 : f32 to vector<128x128xf32>
    %174 = arith.select %172, %168, %173 : vector<128x128xi1>, vector<128x128xf32>
    %175 = arith.truncf %174 : vector<128x128xf32> to vector<128x128xbf16>
    %c6_i32_73 = arith.constant 6 : i32
    %176 = tpu.dynamic_rotate %163 by %c6_i32_73 dim 0 : vector<128x128xf32>, i32 -> vector<128x128xf32>
    %c6_i32_74 = arith.constant 6 : i32
    %177 = vector.broadcast %c6_i32_74 : i32 to vector<128x1xi32>
    %178 = arith.cmpi sge, %16, %177 : vector<128x1xi32>
    %cst_75 = arith.constant 0.000000e+00 : f32
    %179 = vector.shape_cast %178 : vector<128x1xi1> to vector<128x1xi1>
    %180 = vector.broadcast %179 : vector<128x1xi1> to vector<128x128xi1>
    %181 = vector.broadcast %cst_75 : f32 to vector<128x128xf32>
    %182 = arith.select %180, %176, %181 : vector<128x128xi1>, vector<128x128xf32>
    %183 = arith.truncf %182 : vector<128x128xf32> to vector<128x128xbf16>
    %c4_i32_76 = arith.constant 4 : i32
    %184 = tpu.dynamic_rotate %163 by %c4_i32_76 dim 0 : vector<128x128xf32>, i32 -> vector<128x128xf32>
    %c4_i32_77 = arith.constant 4 : i32
    %185 = vector.broadcast %c4_i32_77 : i32 to vector<128x1xi32>
    %186 = arith.cmpi sge, %16, %185 : vector<128x1xi32>
    %cst_78 = arith.constant 0.000000e+00 : f32
    %187 = vector.shape_cast %186 : vector<128x1xi1> to vector<128x1xi1>
    %188 = vector.broadcast %187 : vector<128x1xi1> to vector<128x128xi1>
    %189 = vector.broadcast %cst_78 : f32 to vector<128x128xf32>
    %190 = arith.select %188, %184, %189 : vector<128x128xi1>, vector<128x128xf32>
    %191 = arith.truncf %190 : vector<128x128xf32> to vector<128x128xbf16>
    %c2_i32_79 = arith.constant 2 : i32
    %192 = tpu.dynamic_rotate %163 by %c2_i32_79 dim 0 : vector<128x128xf32>, i32 -> vector<128x128xf32>
    %c2_i32_80 = arith.constant 2 : i32
    %193 = vector.broadcast %c2_i32_80 : i32 to vector<128x1xi32>
    %194 = arith.cmpi sge, %16, %193 : vector<128x1xi32>
    %cst_81 = arith.constant 0.000000e+00 : f32
    %195 = vector.shape_cast %194 : vector<128x1xi1> to vector<128x1xi1>
    %196 = vector.broadcast %195 : vector<128x1xi1> to vector<128x128xi1>
    %197 = vector.broadcast %cst_81 : f32 to vector<128x128xf32>
    %198 = arith.select %196, %192, %197 : vector<128x128xi1>, vector<128x128xf32>
    %199 = arith.truncf %198 : vector<128x128xf32> to vector<128x128xbf16>
    %200 = arith.truncf %163 : vector<128x128xf32> to vector<128x128xbf16>
    %201 = tpu.concatenate %175, %183, %191, %199, %200 in 1 : vector<128x128xbf16>, vector<128x128xbf16>, vector<128x128xbf16>, vector<128x128xbf16>, vector<128x128xbf16> -> vector<128x640xbf16>
    %cst_82 = arith.constant dense<0.000000e+00> : vector<128x128xf32>
    %202 = tpu.matmul %201, %165, %cst_82 {dimension_numbers = #tpu.dot_dimension_numbers<[1], [0], [0], [1], [0, 0, 1, 1], [], []>} : vector<128x640xbf16>, vector<640x128xbf16>, vector<128x128xf32> -> vector<128x128xf32>
    %203 = vector.broadcast %167 : vector<1x128xf32> to vector<128x128xf32>
    %204 = arith.addf %202, %203 : vector<128x128xf32>
    %cst_83 = arith.constant 0.000000e+00 : f32
    %205 = vector.broadcast %cst_83 : f32 to vector<128x128xf32>
    %206 = arith.maximumf %204, %205 : vector<128x128xf32>
    %207 = arith.truncf %120 : vector<128x128xf32> to vector<128x128xbf16>
    %c1_84 = arith.constant 1 : index
    %c0_85 = arith.constant 0 : index
    %c0_86 = arith.constant 0 : index
    %208 = vector.load %arg3[%c1_84, %c0_85, %c0_86] : memref<3x128x128xbf16, #tpu.memory_space<vmem>>, vector<1x128x128xbf16>
    %209 = vector.shape_cast %208 : vector<1x128x128xbf16> to vector<128x128xbf16>
    %cst_87 = arith.constant dense<0.000000e+00> : vector<128x128xf32>
    %210 = tpu.matmul %207, %209, %cst_87 {dimension_numbers = #tpu.dot_dimension_numbers<[1], [0], [0], [1], [0, 0, 1, 1], [], []>} : vector<128x128xbf16>, vector<128x128xbf16>, vector<128x128xf32> -> vector<128x128xf32>
    %c1_88 = arith.constant 1 : index
    %c0_89 = arith.constant 0 : index
    %c0_90 = arith.constant 0 : index
    %211 = vector.load %arg4[%c1_88, %c0_89, %c0_90] : memref<3x1x128xf32, #tpu.memory_space<vmem>>, vector<1x1x128xf32>
    %212 = vector.shape_cast %211 : vector<1x1x128xf32> to vector<1x128xf32>
    %213 = vector.broadcast %212 : vector<1x128xf32> to vector<128x128xf32>
    %214 = arith.addf %210, %213 : vector<128x128xf32>
    %215 = arith.addf %206, %214 : vector<128x128xf32>
    %cst_91 = arith.constant 0.000000e+00 : f32
    %216 = vector.broadcast %cst_91 : f32 to vector<128x128xf32>
    %217 = arith.maximumf %215, %216 : vector<128x128xf32>
    %cst_92 = arith.constant 0.000000e+00 : f32
    %218 = vector.shape_cast %18 : vector<128x1xi1> to vector<128x1xi1>
    %219 = vector.broadcast %218 : vector<128x1xi1> to vector<128x128xi1>
    %220 = vector.broadcast %cst_92 : f32 to vector<128x128xf32>
    %221 = arith.select %219, %217, %220 : vector<128x128xi1>, vector<128x128xf32>
    %c4 = arith.constant 4 : index
    %c0_93 = arith.constant 0 : index
    %c0_94 = arith.constant 0 : index
    %222 = vector.load %arg1[%c4, %c0_93, %c0_94] : memref<6x640x128xbf16, #tpu.memory_space<vmem>>, vector<1x640x128xbf16>
    %223 = vector.shape_cast %222 : vector<1x640x128xbf16> to vector<640x128xbf16>
    %c4_95 = arith.constant 4 : index
    %c0_96 = arith.constant 0 : index
    %c0_97 = arith.constant 0 : index
    %224 = vector.load %arg2[%c4_95, %c0_96, %c0_97] : memref<6x1x128xf32, #tpu.memory_space<vmem>>, vector<1x1x128xf32>
    %225 = vector.shape_cast %224 : vector<1x1x128xf32> to vector<1x128xf32>
    %c16_i32 = arith.constant 16 : i32
    %226 = tpu.dynamic_rotate %221 by %c16_i32 dim 0 : vector<128x128xf32>, i32 -> vector<128x128xf32>
    %c16_i32_98 = arith.constant 16 : i32
    %227 = vector.broadcast %c16_i32_98 : i32 to vector<128x1xi32>
    %228 = arith.cmpi sge, %16, %227 : vector<128x1xi32>
    %cst_99 = arith.constant 0.000000e+00 : f32
    %229 = vector.shape_cast %228 : vector<128x1xi1> to vector<128x1xi1>
    %230 = vector.broadcast %229 : vector<128x1xi1> to vector<128x128xi1>
    %231 = vector.broadcast %cst_99 : f32 to vector<128x128xf32>
    %232 = arith.select %230, %226, %231 : vector<128x128xi1>, vector<128x128xf32>
    %233 = arith.truncf %232 : vector<128x128xf32> to vector<128x128xbf16>
    %c12_i32 = arith.constant 12 : i32
    %234 = tpu.dynamic_rotate %221 by %c12_i32 dim 0 : vector<128x128xf32>, i32 -> vector<128x128xf32>
    %c12_i32_100 = arith.constant 12 : i32
    %235 = vector.broadcast %c12_i32_100 : i32 to vector<128x1xi32>
    %236 = arith.cmpi sge, %16, %235 : vector<128x1xi32>
    %cst_101 = arith.constant 0.000000e+00 : f32
    %237 = vector.shape_cast %236 : vector<128x1xi1> to vector<128x1xi1>
    %238 = vector.broadcast %237 : vector<128x1xi1> to vector<128x128xi1>
    %239 = vector.broadcast %cst_101 : f32 to vector<128x128xf32>
    %240 = arith.select %238, %234, %239 : vector<128x128xi1>, vector<128x128xf32>
    %241 = arith.truncf %240 : vector<128x128xf32> to vector<128x128xbf16>
    %c8_i32_102 = arith.constant 8 : i32
    %242 = tpu.dynamic_rotate %221 by %c8_i32_102 dim 0 : vector<128x128xf32>, i32 -> vector<128x128xf32>
    %c8_i32_103 = arith.constant 8 : i32
    %243 = vector.broadcast %c8_i32_103 : i32 to vector<128x1xi32>
    %244 = arith.cmpi sge, %16, %243 : vector<128x1xi32>
    %cst_104 = arith.constant 0.000000e+00 : f32
    %245 = vector.shape_cast %244 : vector<128x1xi1> to vector<128x1xi1>
    %246 = vector.broadcast %245 : vector<128x1xi1> to vector<128x128xi1>
    %247 = vector.broadcast %cst_104 : f32 to vector<128x128xf32>
    %248 = arith.select %246, %242, %247 : vector<128x128xi1>, vector<128x128xf32>
    %249 = arith.truncf %248 : vector<128x128xf32> to vector<128x128xbf16>
    %c4_i32_105 = arith.constant 4 : i32
    %250 = tpu.dynamic_rotate %221 by %c4_i32_105 dim 0 : vector<128x128xf32>, i32 -> vector<128x128xf32>
    %c4_i32_106 = arith.constant 4 : i32
    %251 = vector.broadcast %c4_i32_106 : i32 to vector<128x1xi32>
    %252 = arith.cmpi sge, %16, %251 : vector<128x1xi32>
    %cst_107 = arith.constant 0.000000e+00 : f32
    %253 = vector.shape_cast %252 : vector<128x1xi1> to vector<128x1xi1>
    %254 = vector.broadcast %253 : vector<128x1xi1> to vector<128x128xi1>
    %255 = vector.broadcast %cst_107 : f32 to vector<128x128xf32>
    %256 = arith.select %254, %250, %255 : vector<128x128xi1>, vector<128x128xf32>
    %257 = arith.truncf %256 : vector<128x128xf32> to vector<128x128xbf16>
    %258 = arith.truncf %221 : vector<128x128xf32> to vector<128x128xbf16>
    %259 = tpu.concatenate %233, %241, %249, %257, %258 in 1 : vector<128x128xbf16>, vector<128x128xbf16>, vector<128x128xbf16>, vector<128x128xbf16>, vector<128x128xbf16> -> vector<128x640xbf16>
    %cst_108 = arith.constant dense<0.000000e+00> : vector<128x128xf32>
    %260 = tpu.matmul %259, %223, %cst_108 {dimension_numbers = #tpu.dot_dimension_numbers<[1], [0], [0], [1], [0, 0, 1, 1], [], []>} : vector<128x640xbf16>, vector<640x128xbf16>, vector<128x128xf32> -> vector<128x128xf32>
    %261 = vector.broadcast %225 : vector<1x128xf32> to vector<128x128xf32>
    %262 = arith.addf %260, %261 : vector<128x128xf32>
    %cst_109 = arith.constant 0.000000e+00 : f32
    %263 = vector.broadcast %cst_109 : f32 to vector<128x128xf32>
    %264 = arith.maximumf %262, %263 : vector<128x128xf32>
    %c5 = arith.constant 5 : index
    %c0_110 = arith.constant 0 : index
    %c0_111 = arith.constant 0 : index
    %265 = vector.load %arg1[%c5, %c0_110, %c0_111] : memref<6x640x128xbf16, #tpu.memory_space<vmem>>, vector<1x640x128xbf16>
    %266 = vector.shape_cast %265 : vector<1x640x128xbf16> to vector<640x128xbf16>
    %c5_112 = arith.constant 5 : index
    %c0_113 = arith.constant 0 : index
    %c0_114 = arith.constant 0 : index
    %267 = vector.load %arg2[%c5_112, %c0_113, %c0_114] : memref<6x1x128xf32, #tpu.memory_space<vmem>>, vector<1x1x128xf32>
    %268 = vector.shape_cast %267 : vector<1x1x128xf32> to vector<1x128xf32>
    %c16_i32_115 = arith.constant 16 : i32
    %269 = tpu.dynamic_rotate %264 by %c16_i32_115 dim 0 : vector<128x128xf32>, i32 -> vector<128x128xf32>
    %c16_i32_116 = arith.constant 16 : i32
    %270 = vector.broadcast %c16_i32_116 : i32 to vector<128x1xi32>
    %271 = arith.cmpi sge, %16, %270 : vector<128x1xi32>
    %cst_117 = arith.constant 0.000000e+00 : f32
    %272 = vector.shape_cast %271 : vector<128x1xi1> to vector<128x1xi1>
    %273 = vector.broadcast %272 : vector<128x1xi1> to vector<128x128xi1>
    %274 = vector.broadcast %cst_117 : f32 to vector<128x128xf32>
    %275 = arith.select %273, %269, %274 : vector<128x128xi1>, vector<128x128xf32>
    %276 = arith.truncf %275 : vector<128x128xf32> to vector<128x128xbf16>
    %c12_i32_118 = arith.constant 12 : i32
    %277 = tpu.dynamic_rotate %264 by %c12_i32_118 dim 0 : vector<128x128xf32>, i32 -> vector<128x128xf32>
    %c12_i32_119 = arith.constant 12 : i32
    %278 = vector.broadcast %c12_i32_119 : i32 to vector<128x1xi32>
    %279 = arith.cmpi sge, %16, %278 : vector<128x1xi32>
    %cst_120 = arith.constant 0.000000e+00 : f32
    %280 = vector.shape_cast %279 : vector<128x1xi1> to vector<128x1xi1>
    %281 = vector.broadcast %280 : vector<128x1xi1> to vector<128x128xi1>
    %282 = vector.broadcast %cst_120 : f32 to vector<128x128xf32>
    %283 = arith.select %281, %277, %282 : vector<128x128xi1>, vector<128x128xf32>
    %284 = arith.truncf %283 : vector<128x128xf32> to vector<128x128xbf16>
    %c8_i32_121 = arith.constant 8 : i32
    %285 = tpu.dynamic_rotate %264 by %c8_i32_121 dim 0 : vector<128x128xf32>, i32 -> vector<128x128xf32>
    %c8_i32_122 = arith.constant 8 : i32
    %286 = vector.broadcast %c8_i32_122 : i32 to vector<128x1xi32>
    %287 = arith.cmpi sge, %16, %286 : vector<128x1xi32>
    %cst_123 = arith.constant 0.000000e+00 : f32
    %288 = vector.shape_cast %287 : vector<128x1xi1> to vector<128x1xi1>
    %289 = vector.broadcast %288 : vector<128x1xi1> to vector<128x128xi1>
    %290 = vector.broadcast %cst_123 : f32 to vector<128x128xf32>
    %291 = arith.select %289, %285, %290 : vector<128x128xi1>, vector<128x128xf32>
    %292 = arith.truncf %291 : vector<128x128xf32> to vector<128x128xbf16>
    %c4_i32_124 = arith.constant 4 : i32
    %293 = tpu.dynamic_rotate %264 by %c4_i32_124 dim 0 : vector<128x128xf32>, i32 -> vector<128x128xf32>
    %c4_i32_125 = arith.constant 4 : i32
    %294 = vector.broadcast %c4_i32_125 : i32 to vector<128x1xi32>
    %295 = arith.cmpi sge, %16, %294 : vector<128x1xi32>
    %cst_126 = arith.constant 0.000000e+00 : f32
    %296 = vector.shape_cast %295 : vector<128x1xi1> to vector<128x1xi1>
    %297 = vector.broadcast %296 : vector<128x1xi1> to vector<128x128xi1>
    %298 = vector.broadcast %cst_126 : f32 to vector<128x128xf32>
    %299 = arith.select %297, %293, %298 : vector<128x128xi1>, vector<128x128xf32>
    %300 = arith.truncf %299 : vector<128x128xf32> to vector<128x128xbf16>
    %301 = arith.truncf %264 : vector<128x128xf32> to vector<128x128xbf16>
    %302 = tpu.concatenate %276, %284, %292, %300, %301 in 1 : vector<128x128xbf16>, vector<128x128xbf16>, vector<128x128xbf16>, vector<128x128xbf16>, vector<128x128xbf16> -> vector<128x640xbf16>
    %cst_127 = arith.constant dense<0.000000e+00> : vector<128x128xf32>
    %303 = tpu.matmul %302, %266, %cst_127 {dimension_numbers = #tpu.dot_dimension_numbers<[1], [0], [0], [1], [0, 0, 1, 1], [], []>} : vector<128x640xbf16>, vector<640x128xbf16>, vector<128x128xf32> -> vector<128x128xf32>
    %304 = vector.broadcast %268 : vector<1x128xf32> to vector<128x128xf32>
    %305 = arith.addf %303, %304 : vector<128x128xf32>
    %cst_128 = arith.constant 0.000000e+00 : f32
    %306 = vector.broadcast %cst_128 : f32 to vector<128x128xf32>
    %307 = arith.maximumf %305, %306 : vector<128x128xf32>
    %308 = arith.truncf %221 : vector<128x128xf32> to vector<128x128xbf16>
    %c2_129 = arith.constant 2 : index
    %c0_130 = arith.constant 0 : index
    %c0_131 = arith.constant 0 : index
    %309 = vector.load %arg3[%c2_129, %c0_130, %c0_131] : memref<3x128x128xbf16, #tpu.memory_space<vmem>>, vector<1x128x128xbf16>
    %310 = vector.shape_cast %309 : vector<1x128x128xbf16> to vector<128x128xbf16>
    %cst_132 = arith.constant dense<0.000000e+00> : vector<128x128xf32>
    %311 = tpu.matmul %308, %310, %cst_132 {dimension_numbers = #tpu.dot_dimension_numbers<[1], [0], [0], [1], [0, 0, 1, 1], [], []>} : vector<128x128xbf16>, vector<128x128xbf16>, vector<128x128xf32> -> vector<128x128xf32>
    %c2_133 = arith.constant 2 : index
    %c0_134 = arith.constant 0 : index
    %c0_135 = arith.constant 0 : index
    %312 = vector.load %arg4[%c2_133, %c0_134, %c0_135] : memref<3x1x128xf32, #tpu.memory_space<vmem>>, vector<1x1x128xf32>
    %313 = vector.shape_cast %312 : vector<1x1x128xf32> to vector<1x128xf32>
    %314 = vector.broadcast %313 : vector<1x128xf32> to vector<128x128xf32>
    %315 = arith.addf %311, %314 : vector<128x128xf32>
    %316 = arith.addf %307, %315 : vector<128x128xf32>
    %cst_136 = arith.constant 0.000000e+00 : f32
    %317 = vector.broadcast %cst_136 : f32 to vector<128x128xf32>
    %318 = arith.maximumf %316, %317 : vector<128x128xf32>
    %cst_137 = arith.constant 0.000000e+00 : f32
    %319 = vector.shape_cast %18 : vector<128x1xi1> to vector<128x1xi1>
    %320 = vector.broadcast %319 : vector<128x1xi1> to vector<128x128xi1>
    %321 = vector.broadcast %cst_137 : f32 to vector<128x128xf32>
    %322 = arith.select %320, %318, %321 : vector<128x128xi1>, vector<128x128xf32>
    %c0_138 = arith.constant 0 : index
    %c0_139 = arith.constant 0 : index
    %323 = vector.load %arg5[%c0_138, %c0_139] : memref<128x128xf32, #tpu.memory_space<vmem>>, vector<128x128xf32>
    tpu.vector_store %arg5[%c0_138, %c0_139], %322 {strides = array<i32>} : memref<128x128xf32, #tpu.memory_space<vmem>>, vector<128x128xf32>,
    return
  }
}

module attributes {stable_mosaic.version = 11 : i64} {
  func.func @_fc_head_kernel(%arg0: memref<2x7680xf32, #tpu.memory_space<vmem>>, %arg1: memref<7680x128xbf16, #tpu.memory_space<vmem>>, %arg2: memref<1x128xf32, #tpu.memory_space<vmem>>, %arg3: memref<128x128xbf16, #tpu.memory_space<vmem>>, %arg4: memref<1x128xf32, #tpu.memory_space<vmem>>, %arg5: memref<2x128xf32, #tpu.memory_space<vmem>>) attributes {dimension_semantics = [], scalar_prefetch = 0 : i64, scratch_operands = 0 : i64, tpu.core_type = #tpu.core_type<tc>} {
    %c0 = arith.constant 0 : index
    %c0_0 = arith.constant 0 : index
    %0 = vector.load %arg0[%c0, %c0_0] : memref<2x7680xf32, #tpu.memory_space<vmem>>, vector<2x7680xf32>
    %1 = arith.truncf %0 : vector<2x7680xf32> to vector<2x7680xbf16>
    %c0_1 = arith.constant 0 : index
    %c0_2 = arith.constant 0 : index
    %2 = vector.load %arg1[%c0_1, %c0_2] : memref<7680x128xbf16, #tpu.memory_space<vmem>>, vector<7680x128xbf16>
    %cst = arith.constant dense<0.000000e+00> : vector<2x128xf32>
    %3 = tpu.matmul %1, %2, %cst {dimension_numbers = #tpu.dot_dimension_numbers<[1], [0], [0], [1], [0, 0, 1, 1], [], []>} : vector<2x7680xbf16>, vector<7680x128xbf16>, vector<2x128xf32> -> vector<2x128xf32>
    %c0_3 = arith.constant 0 : index
    %c0_4 = arith.constant 0 : index
    %4 = vector.load %arg2[%c0_3, %c0_4] : memref<1x128xf32, #tpu.memory_space<vmem>>, vector<1x128xf32>
    %5 = vector.broadcast %4 : vector<1x128xf32> to vector<2x128xf32>
    %6 = arith.addf %3, %5 : vector<2x128xf32>
    %cst_5 = arith.constant 0.000000e+00 : f32
    %7 = vector.broadcast %cst_5 : f32 to vector<2x128xf32>
    %8 = arith.maximumf %6, %7 : vector<2x128xf32>
    %9 = arith.truncf %8 : vector<2x128xf32> to vector<2x128xbf16>
    %c0_6 = arith.constant 0 : index
    %c0_7 = arith.constant 0 : index
    %10 = vector.load %arg3[%c0_6, %c0_7] : memref<128x128xbf16, #tpu.memory_space<vmem>>, vector<128x128xbf16>
    %cst_8 = arith.constant dense<0.000000e+00> : vector<2x128xf32>
    %11 = tpu.matmul %9, %10, %cst_8 {dimension_numbers = #tpu.dot_dimension_numbers<[1], [0], [0], [1], [0, 0, 1, 1], [], []>} : vector<2x128xbf16>, vector<128x128xbf16>, vector<2x128xf32> -> vector<2x128xf32>
    %c0_9 = arith.constant 0 : index
    %c0_10 = arith.constant 0 : index
    %12 = vector.load %arg4[%c0_9, %c0_10] : memref<1x128xf32, #tpu.memory_space<vmem>>, vector<1x128xf32>
    %13 = vector.broadcast %12 : vector<1x128xf32> to vector<2x128xf32>
    %14 = arith.addf %11, %13 : vector<2x128xf32>
    %c0_11 = arith.constant 0 : index
    %c0_12 = arith.constant 0 : index
    %15 = vector.load %arg5[%c0_11, %c0_12] : memref<2x128xf32, #tpu.memory_space<vmem>>, vector<2x128xf32>
    tpu.vector_store %arg5[%c0_11, %c0_12], %14 {strides = array<i32>} : memref<2x128xf32, #tpu.memory_space<vmem>>, vector<2x128xf32>,
    return
  }
}

</mosaic_0001>

<bundles_post_ra>
// kernel: forward.3
= control target key start
LH: loop header
LB: loop body
LE: loop exit
PB: predicated region body
PF: predicated region fallthrough
CT: control target
= control target key end

     0   :  { %10 = vsyncpa [#allocation3], 0  ;;  %s7742_s0 = inlined_call_operand.vmem [shape: f32[2,7680], index: 0, kind: input, shape index: {}]   ;;  %s7743_s1 = inlined_call_operand.hbm [shape: bf16[7680,128], index: 1, kind: input, shape index: {}]   ;;  %s7744_s2 = inlined_call_operand.hbm [shape: f32[1,128], index: 2, kind: input, shape index: {}]   ;;  %s7745_s3 = inlined_call_operand.hbm [shape: bf16[128,128], index: 3, kind: input, shape index: {}]   ;;  %s7746_s4 = inlined_call_operand.hbm [shape: f32[1,128], index: 4, kind: input, shape index: {}]   ;;  %s7747_s5 = inlined_call_operand.hbm [shape: f32[2,128], index: 5, kind: output, shape index: {}]  }
   0x1   :  { %11 = vsyncpa [#allocation6], 0 }
   0x2   :  { %12 = vsyncpa [#allocation9], 0  ;;  %s34_s20 = sshll.u32 %s7744_s2, 4  ;;  %s35_s20 = int_to_ptr.hbm [resolvable:$true] %s34_s20 }
   0x3   :  { %13 = vsyncpa [#allocation4], 0  ;;  %s7610_s21 = smov [#allocation5]   ;;  %s20_s25 = sshll.u32 %s7743_s1, 4  ;;  %s21_s25 = int_to_ptr.hbm [resolvable:$true] %s20_s25 }
   0x4   :  { %s36_s22 = sshll.u32 %s7610_s21, 4  ;;  %s7611_s26 = smov [#allocation2]   ;;  %s37_s22 = int_to_ptr.vmem [resolvable:$true] %s36_s22 }
   0x5   :  { %39 = dma.hbm_to_vmem [thread:$0]  %s35_s20, 16, %s37_s22, [#allocation6]  }
   0x6   :  { %s22_s27 = sshll.u32 %s7611_s26, 4  ;;  %s7612_s28 = smov 64   ;;  %s23_s27 = int_to_ptr.vmem [resolvable:$true] %s22_s27 }
   0x7   :  { %s7613_s29 = smov 4   ;;  %s44_s2 = sshll.u32 %s7745_s3, 4  ;;  %s45_s2 = int_to_ptr.hbm [resolvable:$true] %s44_s2 }
   0x8   :  { %28 = dma.hbm_to_vmem [thread:$0]  %s21_s25, 61440, %s23_s27, [#allocation3], %s7612_s28, %s7612_s28, %s7613_s29  }
   0x9   :  { %s7614_s7 = smov [#allocation7]   ;;  %s58_s1 = sshll.u32 %s7746_s4, 4  ;;  %s59_s1 = int_to_ptr.hbm [resolvable:$true] %s58_s1 }
   0xa   :  { %s46_s8 = sshll.u32 %s7614_s7, 4  ;;  %s7615_s11 = smov [#allocation8]   ;;  %s47_s8 = int_to_ptr.vmem [resolvable:$true] %s46_s8 }
   0xb   :  { %52 = dma.hbm_to_vmem [thread:$0]  %s45_s2, 1024, %s47_s8, [#allocation6], %s7612_s28, %s7612_s28, %s7613_s29  }
   0xc   :  { %s60_s12 = sshll.u32 %s7615_s11, 4  ;;  %s61_s12 = int_to_ptr.vmem [resolvable:$true] %s60_s12 }
   0xd   :  { %63 = dma.hbm_to_vmem [thread:$0]  %s59_s1, 16, %s61_s12, [#allocation9]  }
   0xe   :  { %7602 = dma.done.wait [#allocation3], 61440  }
   0xf   :  { %7603 = vsyncadd [#allocation3], 4294905856 }
  0x10   :  { %7604 = dma.done.wait [#allocation6], 1040  }
  0x11   :  { %7605 = vsyncadd [#allocation6], 4294966256 }
  0x12   :  { %7606 = dma.done.wait [#allocation9], 16  }
  0x13   :  { %7607 = vsyncadd [#allocation9], 4294967280  ;;  %v6992_v0 = vld [vmem:[#allocation2 + $0x38] sm:$0xff]  ;;  %v6991_v4 = vld [vmem:[#allocation2 + $0x30] sm:$0xff]  ;;  %s5021_s15 = sshll.u32 %s7747_s5, 4  ;;  %s5022_s15 = int_to_ptr.hbm [resolvable:$true] %s5021_s15 }
  0x14   :  { %v7000_v1 = vld [vmem:[#allocation2 + $0x78] sm:$0xff]  ;;  %4150 = vmatpush.bf16.msra.mxu0 %v6992_v0  ;;  %v6999_v5 = vld [vmem:[#allocation2 + $0x70] sm:$0xff]  ;;  %v6990_v8 = vld [vmem:[#allocation2 + $0x28] sm:$0xff] }
  0x15   :  { %v7008_v2 = vld [vmem:[#allocation2 + $0xb8] sm:$0xff]  ;;  %4163 = vmatpush.bf16.msra.mxu1 %v7000_v1  ;;  %v7007_v6 = vld [vmem:[#allocation2 + $0xb0] sm:$0xff]  ;;  %v6998_v9 = vld [vmem:[#allocation2 + $0x68] sm:$0xff] }
  0x16   :  { %v7016_v3 = vld [vmem:[#allocation2 + $0xf8] sm:$0xff]  ;;  %4176 = vmatpush.bf16.msra.mxu2 %v7008_v2  ;;  %v7015_v7 = vld [vmem:[#allocation2 + $0xf0] sm:$0xff]  ;;  %v7006_v10 = vld [vmem:[#allocation2 + $0xa8] sm:$0xff] }
  0x17   :  { %4189 = vmatpush.bf16.msra.mxu3 %v7016_v3  ;;  %v7014_v11 = vld [vmem:[#allocation2 + $0xe8] sm:$0xff]  ;;  %v6989_v12 = vld [vmem:[#allocation2 + $0x20] sm:$0xff]  ;;  %v6988_v16 = vld [vmem:[#allocation2 + $0x18] sm:$0xff] }
  0x18   :  { %4151 = vmatpush.bf16.msra.mxu0 %v6991_v4  ;;  %v6997_v13 = vld [vmem:[#allocation2 + $0x60] sm:$0xff]  ;;  %v6996_v17 = vld [vmem:[#allocation2 + $0x58] sm:$0xff]  ;;  %v6987_v20 = vld [vmem:[#allocation2 + $0x10] sm:$0xff] }
  0x19   :  { %4164 = vmatpush.bf16.msra.mxu1 %v6999_v5  ;;  %v7005_v14 = vld [vmem:[#allocation2 + $0xa0] sm:$0xff]  ;;  %v7004_v18 = vld [vmem:[#allocation2 + $0x98] sm:$0xff]  ;;  %v6995_v21 = vld [vmem:[#allocation2 + $0x50] sm:$0xff] }
  0x1a   :  { %4177 = vmatpush.bf16.msra.mxu2 %v7007_v6  ;;  %v7013_v15 = vld [vmem:[#allocation2 + $0xe0] sm:$0xff]  ;;  %v7012_v19 = vld [vmem:[#allocation2 + $0xd8] sm:$0xff]  ;;  %v7003_v23 = vld [vmem:[#allocation2 + $0x90] sm:$0xff] }
  0x1b   :  { %4190 = vmatpush.bf16.msra.mxu3 %v7015_v7  ;;  %v80_v22 = vld [vmem:[%s7742_s0] sm:$0xff]  ;;  %v7011_v24 = vld [vmem:[#allocation2 + $0xd0] sm:$0xff]  ;;  %v6986_v25 = vld [vmem:[#allocation2 + $0x8] sm:$0xff] }
  0x1c   :  { %4152 = vmatpush.bf16.msra.mxu0 %v6990_v8  ;;  %110 = vst [vmem:[#allocation1] ss:$4 sm:$0xff] %v80_v22  ;;  %v6994_v26 = vld [vmem:[#allocation2 + $0x48] sm:$0xff]  ;;  %v6985_v29 = vld [vmem:[#allocation2] sm:$0xff]  ;;  %v7024_v38 = vld [vmem:[#allocation2 + $0x138] sm:$0xff] }
  0x1d   :  { %4165 = vmatpush.bf16.msra.mxu1 %v6998_v9  ;;  %v7002_v27 = vld [vmem:[#allocation2 + $0x88] sm:$0xff]  ;;  %v6993_v30 = vld [vmem:[#allocation2 + $0x40] sm:$0xff]  ;;  %v7032_v39 = vld [vmem:[#allocation2 + $0x178] sm:$0xff] }
  0x1e   :  { %4178 = vmatpush.bf16.msra.mxu2 %v7006_v10  ;;  %v7010_v28 = vld [vmem:[#allocation2 + $0xc8] sm:$0xff]  ;;  %v7001_v31 = vld [vmem:[#allocation2 + $0x80] sm:$0xff]  ;;  %v7040_v40 = vld [vmem:[#allocation2 + $0x1b8] sm:$0xff] }
  0x1f   :  { %4191 = vmatpush.bf16.msra.mxu3 %v7014_v11  ;;  %v7009_v33 = vld [vmem:[#allocation2 + $0xc0] sm:$0xff]  ;;  %v82_v35 = vld [vmem:[%s7742_s0 + $0x10] sm:$0xff]  ;;  %v7048_v41 = vld [vmem:[#allocation2 + $0x1f8] sm:$0xff] }
  0x20   :  { %4153 = vmatpush.bf16.msra.mxu0 %v6989_v12  ;;  %v81_v42 = vld [vmem:[%s7742_s0 + $0x8] sm:$0xff]  ;;  %v7023_v47 = vld [vmem:[#allocation2 + $0x130] sm:$0xff]  ;;  %v7022_v51 = vld [vmem:[#allocation2 + $0x128] sm:$0xff] }
  0x21   :  { %4166 = vmatpush.bf16.msra.mxu1 %v6997_v13  ;;  %112 = vst [vmem:[#allocation1 + $0x20] ss:$4 sm:$0xff] %v81_v42  ;;  %v7031_v48 = vld [vmem:[#allocation2 + $0x170] sm:$0xff]  ;;  %v7030_v52 = vld [vmem:[#allocation2 + $0x168] sm:$0xff]  ;;  %v7021_v55 = vld [vmem:[#allocation2 + $0x120] sm:$0xff] }
  0x22   :  { %4179 = vmatpush.bf16.msra.mxu2 %v7005_v14  ;;  %v7039_v49 = vld [vmem:[#allocation2 + $0x1b0] sm:$0xff]  ;;  %v7038_v53 = vld [vmem:[#allocation2 + $0x1a8] sm:$0xff]  ;;  %v7029_v57 = vld [vmem:[#allocation2 + $0x160] sm:$0xff] }
  0x23   :  { %4192 = vmatpush.bf16.msra.mxu3 %v7013_v15  ;;  %v115_v32 = vld.sshfl [vmem:[#allocation1 + $0x10] sm:$0xff pattern:$0x73625140]  ;;  %v113_v34 = vld.sshfl [vmem:[#allocation1] sm:$0xff pattern:$0x73625140] }
  0x24   :  { %4154 = vmatpush.bf16.msra.mxu0 %v6988_v16  ;;  %v116_v36 = vld.sshfl [vmem:[#allocation1 + $0x18] sm:$0xff pattern:$0x73625140]  ;;  %v114_v37 = vld.sshfl [vmem:[#allocation1 + $0x8] sm:$0xff pattern:$0x73625140]  ;;  %v248_v43 = vpack.c.bf16 %v115_v32, %v115_v32  ;;  %v246_v44 = vpack.c.bf16 %v113_v34, %v113_v34 }
  0x25   :  { %4167 = vmatpush.bf16.msra.mxu1 %v6996_v17  ;;  %121 = vst [vmem:[#allocation1] ss:$4 sm:$0xff] %v82_v35  ;;  %v249_v45 = vpack.c.bf16 %v116_v36, %v116_v36  ;;  %v247_v46 = vpack.c.bf16 %v114_v37, %v114_v37  ;;  %v7047_v50 = vld [vmem:[#allocation2 + $0x1f0] sm:$0xff]  ;;  %v7046_v54 = vld [vmem:[#allocation2 + $0x1e8] sm:$0xff]  ;;  %v7037_v62 = vld [vmem:[#allocation2 + $0x1a0] sm:$0xff] }
  0x26   :  { %4180 = vmatpush.bf16.msra.mxu2 %v7004_v18  ;;  %v83_v59 = vld [vmem:[%s7742_s0 + $0x18] sm:$0xff]  ;;  %v7045_v63 = vld [vmem:[#allocation2 + $0x1e0] sm:$0xff]  ;;  %v7020_v0 = vld [vmem:[#allocation2 + $0x118] sm:$0xff] }
  0x27   :  { %4193 = vmatpush.bf16.msra.mxu3 %v7012_v19  ;;  %v7028_v1 = vld [vmem:[#allocation2 + $0x158] sm:$0xff]  ;;  %v7019_v4 = vld [vmem:[#allocation2 + $0x110] sm:$0xff]  ;;  %v7018_v8 = vld [vmem:[#allocation2 + $0x108] sm:$0xff] }
  0x28   :  { %4155 = vmatpush.bf16.msra.mxu0 %v6987_v20  ;;  %v7668_v56 = vld.sshfl [vmem:[#allocation1 + $0x30] sm:$0xff pattern:$0x73625140]  ;;  %v7670_v58 = vld.sshfl [vmem:[#allocation1 + $0x20] sm:$0xff pattern:$0x73625140] }
  0x29   :  { %4168 = vmatpush.bf16.msra.mxu1 %v6995_v21  ;;  %v120_v60 = vld.sshfl [vmem:[#allocation1 + $0x38] sm:$0xff pattern:$0x73625140]  ;;  %v118_v61 = vld.sshfl [vmem:[#allocation1 + $0x28] sm:$0xff pattern:$0x73625140]  ;;  %v252_v20 = vpack.c.bf16 %v7668_v56, %v7668_v56  ;;  %v250_v21 = vpack.c.bf16 %v7670_v58, %v7670_v58 }
  0x2a   :  { %4181 = vmatpush.bf16.msra.mxu2 %v7003_v23  ;;  %122 = vst [vmem:[#allocation1 + $0x20] ss:$4 sm:$0xff] %v83_v59  ;;  %v7036_v2 = vld [vmem:[#allocation2 + $0x198] sm:$0xff]  ;;  %v7027_v5 = vld [vmem:[#allocation2 + $0x150] sm:$0xff]  ;;  %v7026_v9 = vld [vmem:[#allocation2 + $0x148] sm:$0xff]  ;;  %v253_v22 = vpack.c.bf16 %v120_v60, %v120_v60  ;;  %v251_v23 = vpack.c.bf16 %v118_v61, %v118_v61 }
  0x2b   :  { %4194 = vmatpush.bf16.msra.mxu3 %v7011_v24  ;;  %v7044_v3 = vld [vmem:[#allocation2 + $0x1d8] sm:$0xff]  ;;  %v7035_v6 = vld [vmem:[#allocation2 + $0x190] sm:$0xff]  ;;  %v7034_v10 = vld [vmem:[#allocation2 + $0x188] sm:$0xff] }
  0x2c   :  { %4156 = vmatpush.bf16.msra.mxu0 %v6986_v25  ;;  %v7043_v7 = vld [vmem:[#allocation2 + $0x1d0] sm:$0xff]  ;;  %v7042_v11 = vld [vmem:[#allocation2 + $0x1c8] sm:$0xff]  ;;  %v7017_v12 = vld [vmem:[#allocation2 + $0x100] sm:$0xff] }
  0x2d   :  { %4169 = vmatpush.bf16.msra.mxu1 %v6994_v26  ;;  %v7025_v13 = vld [vmem:[#allocation2 + $0x140] sm:$0xff]  ;;  %v7056_v16 = vld [vmem:[#allocation2 + $0x238] sm:$0xff]  ;;  %v7055_v24 = vld [vmem:[#allocation2 + $0x230] sm:$0xff] }
  0x2e   :  { %4182 = vmatpush.bf16.msra.mxu2 %v7002_v27  ;;  %v7033_v14 = vld [vmem:[#allocation2 + $0x180] sm:$0xff]  ;;  %v7064_v17 = vld [vmem:[#allocation2 + $0x278] sm:$0xff]  ;;  %v7063_v25 = vld [vmem:[#allocation2 + $0x270] sm:$0xff] }
  0x2f   :  { %4195 = vmatpush.bf16.msra.mxu3 %v7010_v28  ;;  %v7041_v15 = vld [vmem:[#allocation2 + $0x1c0] sm:$0xff]  ;;  %v7072_v18 = vld [vmem:[#allocation2 + $0x2b8] sm:$0xff]  ;;  %v7071_v26 = vld [vmem:[#allocation2 + $0x2b0] sm:$0xff] }
  0x30   :  { %4157 = vmatpush.bf16.msra.mxu0 %v6985_v29  ;;  %v7080_v19 = vld [vmem:[#allocation2 + $0x2f8] sm:$0xff]  ;;  %v7079_v27 = vld [vmem:[#allocation2 + $0x2f0] sm:$0xff]  ;;  %v7054_v28 = vld [vmem:[#allocation2 + $0x228] sm:$0xff] }
  0x31   :  { %4170 = vmatpush.bf16.msra.mxu1 %v6993_v30  ;;  %v7062_v29 = vld [vmem:[#allocation2 + $0x268] sm:$0xff]  ;;  %v7053_v32 = vld [vmem:[#allocation2 + $0x220] sm:$0xff]  ;;  %v7052_v36 = vld [vmem:[#allocation2 + $0x218] sm:$0xff] }
  0x32   :  { %4183 = vmatpush.bf16.msra.mxu2 %v7001_v31  ;;  %v7070_v30 = vld [vmem:[#allocation2 + $0x2a8] sm:$0xff]  ;;  %v7069_v34 = vld [vmem:[#allocation2 + $0x2a0] sm:$0xff]  ;;  %v7060_v37 = vld [vmem:[#allocation2 + $0x258] sm:$0xff] }
  0x33   :  { %4196 = vmatpush.bf16.msra.mxu3 %v7009_v33  ;;  %4158 = vmatmul.bf16.vlgmr.msra.gmra.mxu0 %v246_v44  ;;  %v7078_v31 = vld [vmem:[#allocation2 + $0x2e8] sm:$0xff]  ;;  %v7061_v33 = vld [vmem:[#allocation2 + $0x260] sm:$0xff]  ;;  %v7067_v42 = vld [vmem:[#allocation2 + $0x290] sm:$0xff] }
  0x34   :  { %4202 = vmatpush.bf16.msrb.mxu0 %v7024_v38  ;;  %4171 = vmatmul.bf16.vlgmr.msra.gmra.mxu1 %v247_v46  ;;  %v7077_v35 = vld [vmem:[#allocation2 + $0x2e0] sm:$0xff]  ;;  %v7068_v38 = vld [vmem:[#allocation2 + $0x298] sm:$0xff]  ;;  %v7050_v44 = vld [vmem:[#allocation2 + $0x208] sm:$0xff] }
  0x35   :  { %4215 = vmatpush.bf16.msrb.mxu1 %v7032_v39  ;;  %4184 = vmatmul.bf16.vlgmr.msra.gmra.mxu2 %v248_v43  ;;  %v7076_v39 = vld [vmem:[#allocation2 + $0x2d8] sm:$0xff]  ;;  %v7075_v43 = vld [vmem:[#allocation2 + $0x2d0] sm:$0xff]  ;;  %v7066_v46 = vld [vmem:[#allocation2 + $0x288] sm:$0xff] }
  0x36   :  { %4228 = vmatpush.bf16.msrb.mxu2 %v7040_v40  ;;  %4197 = vmatmul.bf16.vlgmr.msra.gmra.mxu3 %v249_v45  ;;  %v7051_v40 = vld [vmem:[#allocation2 + $0x210] sm:$0xff]  ;;  %v7058_v45 = vld [vmem:[#allocation2 + $0x248] sm:$0xff]  ;;  %v124_v56 = vld.sshfl [vmem:[#allocation1 + $0x8] sm:$0xff pattern:$0x73625140] }
  0x37   :  { %4241 = vmatpush.bf16.msrb.mxu3 %v7048_v41  ;;  %v7059_v41 = vld [vmem:[#allocation2 + $0x250] sm:$0xff]  ;;  %v7104_v58 = vld [vmem:[#allocation2 + $0x3b8] sm:$0xff] }
  0x38   :  { %4203 = vmatpush.bf16.msrb.mxu0 %v7023_v47  ;;  %v7074_v47 = vld [vmem:[#allocation2 + $0x2c8] sm:$0xff]  ;;  %v7112_v59 = vld [vmem:[#allocation2 + $0x3f8] sm:$0xff] }
  0x39   :  { %4216 = vmatpush.bf16.msrb.mxu1 %v7031_v48  ;;  %v7049_v48 = vld [vmem:[#allocation2 + $0x200] sm:$0xff] }
  0x3a   :  { %4229 = vmatpush.bf16.msrb.mxu2 %v7039_v49  ;;  %v7057_v49 = vld [vmem:[#allocation2 + $0x240] sm:$0xff] }
  0x3b   :  { %4242 = vmatpush.bf16.msrb.mxu3 %v7047_v50  ;;  %v7065_v50 = vld [vmem:[#allocation2 + $0x280] sm:$0xff] }
  0x3c   :  { %4204 = vmatpush.bf16.msrb.mxu0 %v7022_v51  ;;  %v7073_v51 = vld [vmem:[#allocation2 + $0x2c0] sm:$0xff] }
  0x3d   :  { %4217 = vmatpush.bf16.msrb.mxu1 %v7030_v52  ;;  %v7088_v52 = vld [vmem:[#allocation2 + $0x338] sm:$0xff] }
  0x3e   :  { %4230 = vmatpush.bf16.msrb.mxu2 %v7038_v53  ;;  %v7096_v53 = vld [vmem:[#allocation2 + $0x378] sm:$0xff] }
  0x3f   :  { %4243 = vmatpush.bf16.msrb.mxu3 %v7046_v54  ;;  %v123_v54 = vld.sshfl [vmem:[#allocation1] sm:$0xff pattern:$0x73625140] }
  0x40   :  { %4205 = vmatpush.bf16.msrb.mxu0 %v7021_v55  ;;  %v125_v55 = vld.sshfl [vmem:[#allocation1 + $0x10] sm:$0xff pattern:$0x73625140]  ;;  %v254_v60 = vpack.c.bf16 %v123_v54, %v123_v54  ;;  %v7124_v54 = vld [vmem:[#allocation2 + $0x458] sm:$0xff] }
  0x41   :  { %4218 = vmatpush.bf16.msrb.mxu1 %v7029_v57  ;;  %v126_v57 = vld.sshfl [vmem:[#allocation1 + $0x18] sm:$0xff pattern:$0x73625140]  ;;  %v256_v61 = vpack.c.bf16 %v125_v55, %v125_v55  ;;  %v7132_v55 = vld [vmem:[#allocation2 + $0x498] sm:$0xff] }
  0x42   :  { %4231 = vmatpush.bf16.msrb.mxu2 %v7037_v62  ;;  %v255_v62 = vpack.c.bf16 %v124_v56, %v124_v56  ;;  %v7140_v56 = vld [vmem:[#allocation2 + $0x4d8] sm:$0xff] }
  0x43   :  { %4244 = vmatpush.bf16.msrb.mxu3 %v7045_v63  ;;  %v257_v63 = vpack.c.bf16 %v126_v57, %v126_v57  ;;  %v7115_v57 = vld [vmem:[#allocation2 + $0x410] sm:$0xff] }
  0x44   :  { %4206 = vmatpush.bf16.msrb.mxu0 %v7020_v0  ;;  %v7087_v0 = vld [vmem:[#allocation2 + $0x330] sm:$0xff] }
  0x45   :  { %4219 = vmatpush.bf16.msrb.mxu1 %v7028_v1  ;;  %v7095_v1 = vld [vmem:[#allocation2 + $0x370] sm:$0xff] }
  0x46   :  { %4232 = vmatpush.bf16.msrb.mxu2 %v7036_v2  ;;  %v7103_v2 = vld [vmem:[#allocation2 + $0x3b0] sm:$0xff] }
  0x47   :  { %4245 = vmatpush.bf16.msrb.mxu3 %v7044_v3  ;;  %v7111_v3 = vld [vmem:[#allocation2 + $0x3f0] sm:$0xff] }
  0x48   :  { %4207 = vmatpush.bf16.msrb.mxu0 %v7019_v4  ;;  %v7086_v4 = vld [vmem:[#allocation2 + $0x328] sm:$0xff] }
  0x49   :  { %4220 = vmatpush.bf16.msrb.mxu1 %v7027_v5  ;;  %v7094_v5 = vld [vmem:[#allocation2 + $0x368] sm:$0xff] }
  0x4a   :  { %4233 = vmatpush.bf16.msrb.mxu2 %v7035_v6  ;;  %v7102_v6 = vld [vmem:[#allocation2 + $0x3a8] sm:$0xff] }
  0x4b   :  { %4246 = vmatpush.bf16.msrb.mxu3 %v7043_v7  ;;  %v7110_v7 = vld [vmem:[#allocation2 + $0x3e8] sm:$0xff] }
  0x4c   :  { %4208 = vmatpush.bf16.msrb.mxu0 %v7018_v8  ;;  %v7085_v8 = vld [vmem:[#allocation2 + $0x320] sm:$0xff] }
  0x4d   :  { %4221 = vmatpush.bf16.msrb.mxu1 %v7026_v9  ;;  %v7093_v9 = vld [vmem:[#allocation2 + $0x360] sm:$0xff] }
  0x4e   :  { %4234 = vmatpush.bf16.msrb.mxu2 %v7034_v10  ;;  %v7101_v10 = vld [vmem:[#allocation2 + $0x3a0] sm:$0xff] }
  0x4f   :  { %4247 = vmatpush.bf16.msrb.mxu3 %v7042_v11  ;;  %v7109_v11 = vld [vmem:[#allocation2 + $0x3e0] sm:$0xff] }
  0x50   :  { %4209 = vmatpush.bf16.msrb.mxu0 %v7017_v12  ;;  %v7084_v12 = vld [vmem:[#allocation2 + $0x318] sm:$0xff] }
  0x51   :  { %4222 = vmatpush.bf16.msrb.mxu1 %v7025_v13  ;;  %v7092_v13 = vld [vmem:[#allocation2 + $0x358] sm:$0xff] }
  0x52   :  { %4235 = vmatpush.bf16.msrb.mxu2 %v7033_v14  ;;  %v7100_v14 = vld [vmem:[#allocation2 + $0x398] sm:$0xff] }
  0x53   :  { %4248 = vmatpush.bf16.msrb.mxu3 %v7041_v15  ;;  %4210 = vmatmul.bf16.vlgmr.msrb.gmra.mxu0 %v250_v21  ;;  %v7108_v15 = vld [vmem:[#allocation2 + $0x3d8] sm:$0xff]  ;;  %v7090_v21 = vld [vmem:[#allocation2 + $0x348] sm:$0xff] }
  0x54   :  { %4254 = vmatpush.bf16.msra.mxu0 %v7056_v16  ;;  %4223 = vmatmul.bf16.vlgmr.msrb.gmra.mxu1 %v251_v23  ;;  %v7083_v16 = vld [vmem:[#allocation2 + $0x310] sm:$0xff]  ;;  %v7098_v23 = vld [vmem:[#allocation2 + $0x388] sm:$0xff] }
  0x55   :  { %4267 = vmatpush.bf16.msra.mxu1 %v7064_v17  ;;  %4236 = vmatmul.bf16.vlgmr.msrb.gmra.mxu2 %v252_v20  ;;  %v7091_v17 = vld [vmem:[#allocation2 + $0x350] sm:$0xff]  ;;  %v7082_v20 = vld [vmem:[#allocation2 + $0x308] sm:$0xff] }
  0x56   :  { %4280 = vmatpush.bf16.msra.mxu2 %v7072_v18  ;;  %4249 = vmatmul.bf16.vlgmr.msrb.gmra.mxu3 %v253_v22  ;;  %v7099_v18 = vld [vmem:[#allocation2 + $0x390] sm:$0xff]  ;;  %v84_v22 = vld [vmem:[%s7742_s0 + $0x20] sm:$0xff] }
  0x57   :  { %4293 = vmatpush.bf16.msra.mxu3 %v7080_v19  ;;  %v7107_v19 = vld [vmem:[#allocation2 + $0x3d0] sm:$0xff]  ;;  %131 = vst [vmem:[#allocation1] ss:$4 sm:$0xff] %v84_v22  ;;  %v7150_v22 = vld [vmem:[#allocation2 + $0x528] sm:$0xff] }
  0x58   :  { %4255 = vmatpush.bf16.msra.mxu0 %v7055_v24  ;;  %v7106_v24 = vld [vmem:[#allocation2 + $0x3c8] sm:$0xff] }
  0x59   :  { %4268 = vmatpush.bf16.msra.mxu1 %v7063_v25  ;;  %v7081_v25 = vld [vmem:[#allocation2 + $0x300] sm:$0xff] }
  0x5a   :  { %4281 = vmatpush.bf16.msra.mxu2 %v7071_v26  ;;  %v7089_v26 = vld [vmem:[#allocation2 + $0x340] sm:$0xff] }
  0x5b   :  { %4294 = vmatpush.bf16.msra.mxu3 %v7079_v27  ;;  %v7097_v27 = vld [vmem:[#allocation2 + $0x380] sm:$0xff] }
  0x5c   :  { %4256 = vmatpush.bf16.msra.mxu0 %v7054_v28  ;;  %v7105_v28 = vld [vmem:[#allocation2 + $0x3c0] sm:$0xff] }
  0x5d   :  { %4269 = vmatpush.bf16.msra.mxu1 %v7062_v29  ;;  %v7120_v29 = vld [vmem:[#allocation2 + $0x438] sm:$0xff] }
  0x5e   :  { %4282 = vmatpush.bf16.msra.mxu2 %v7070_v30  ;;  %v7128_v30 = vld [vmem:[#allocation2 + $0x478] sm:$0xff] }
  0x5f   :  { %4295 = vmatpush.bf16.msra.mxu3 %v7078_v31  ;;  %v127_v31 = vld.sshfl [vmem:[#allocation1 + $0x20] sm:$0xff pattern:$0x73625140] }
  0x60   :  { %4257 = vmatpush.bf16.msra.mxu0 %v7053_v32  ;;  %v129_v32 = vld.sshfl [vmem:[#allocation1 + $0x30] sm:$0xff pattern:$0x73625140] }
  0x61   :  { %4270 = vmatpush.bf16.msra.mxu1 %v7061_v33  ;;  %v128_v33 = vld.sshfl [vmem:[#allocation1 + $0x28] sm:$0xff pattern:$0x73625140] }
  0x62   :  { %4283 = vmatpush.bf16.msra.mxu2 %v7069_v34  ;;  %v130_v34 = vld.sshfl [vmem:[#allocation1 + $0x38] sm:$0xff pattern:$0x73625140] }
  0x63   :  { %4296 = vmatpush.bf16.msra.mxu3 %v7077_v35  ;;  %v7136_v35 = vld [vmem:[#allocation2 + $0x4b8] sm:$0xff] }
  0x64   :  { %4258 = vmatpush.bf16.msra.mxu0 %v7052_v36  ;;  %v7144_v36 = vld [vmem:[#allocation2 + $0x4f8] sm:$0xff] }
  0x65   :  { %4271 = vmatpush.bf16.msra.mxu1 %v7060_v37  ;;  %v258_v37 = vpack.c.bf16 %v127_v31, %v127_v31 }
  0x66   :  { %4284 = vmatpush.bf16.msra.mxu2 %v7068_v38  ;;  %v260_v38 = vpack.c.bf16 %v129_v32, %v129_v32  ;;  %v7165_v32 = vld [vmem:[#allocation2 + $0x5a0] sm:$0xff] }
  0x67   :  { %4297 = vmatpush.bf16.msra.mxu3 %v7076_v39  ;;  %v259_v39 = vpack.c.bf16 %v128_v33, %v128_v33  ;;  %v7173_v33 = vld [vmem:[#allocation2 + $0x5e0] sm:$0xff] }
  0x68   :  { %4259 = vmatpush.bf16.msra.mxu0 %v7051_v40  ;;  %v261_v40 = vpack.c.bf16 %v130_v34, %v130_v34 }
  0x69   :  { %4272 = vmatpush.bf16.msra.mxu1 %v7059_v41  ;;  %v7119_v41 = vld [vmem:[#allocation2 + $0x430] sm:$0xff] }
  0x6a   :  { %4285 = vmatpush.bf16.msra.mxu2 %v7067_v42  ;;  %v7127_v42 = vld [vmem:[#allocation2 + $0x470] sm:$0xff] }
  0x6b   :  { %4298 = vmatpush.bf16.msra.mxu3 %v7075_v43  ;;  %v7135_v43 = vld [vmem:[#allocation2 + $0x4b0] sm:$0xff] }
  0x6c   :  { %4260 = vmatpush.bf16.msra.mxu0 %v7050_v44  ;;  %v7143_v44 = vld [vmem:[#allocation2 + $0x4f0] sm:$0xff] }
  0x6d   :  { %4273 = vmatpush.bf16.msra.mxu1 %v7058_v45  ;;  %v7118_v45 = vld [vmem:[#allocation2 + $0x428] sm:$0xff] }
  0x6e   :  { %4286 = vmatpush.bf16.msra.mxu2 %v7066_v46  ;;  %v7126_v46 = vld [vmem:[#allocation2 + $0x468] sm:$0xff] }
  0x6f   :  { %4299 = vmatpush.bf16.msra.mxu3 %v7074_v47  ;;  %v7134_v47 = vld [vmem:[#allocation2 + $0x4a8] sm:$0xff] }
  0x70   :  { %4261 = vmatpush.bf16.msra.mxu0 %v7049_v48  ;;  %v7142_v48 = vld [vmem:[#allocation2 + $0x4e8] sm:$0xff] }
  0x71   :  { %4274 = vmatpush.bf16.msra.mxu1 %v7057_v49  ;;  %v7117_v49 = vld [vmem:[#allocation2 + $0x420] sm:$0xff] }
  0x72   :  { %4287 = vmatpush.bf16.msra.mxu2 %v7065_v50  ;;  %v7125_v50 = vld [vmem:[#allocation2 + $0x460] sm:$0xff] }
  0x73   :  { %4300 = vmatpush.bf16.msra.mxu3 %v7073_v51  ;;  %4262 = vmatmul.bf16.vlgmr.msra.gmra.mxu0 %v254_v60  ;;  %v7133_v51 = vld [vmem:[#allocation2 + $0x4a0] sm:$0xff]  ;;  %v7139_v60 = vld [vmem:[#allocation2 + $0x4d0] sm:$0xff] }
  0x74   :  { %4306 = vmatpush.bf16.msrb.mxu0 %v7088_v52  ;;  %4275 = vmatmul.bf16.vlgmr.msra.gmra.mxu1 %v255_v62  ;;  %v7141_v52 = vld [vmem:[#allocation2 + $0x4e0] sm:$0xff]  ;;  %v7122_v62 = vld [vmem:[#allocation2 + $0x448] sm:$0xff] }
  0x75   :  { %4319 = vmatpush.bf16.msrb.mxu1 %v7096_v53  ;;  %4288 = vmatmul.bf16.vlgmr.msra.gmra.mxu2 %v256_v61  ;;  %v7116_v53 = vld [vmem:[#allocation2 + $0x418] sm:$0xff]  ;;  %v7114_v61 = vld [vmem:[#allocation2 + $0x408] sm:$0xff] }
  0x76   :  { %4332 = vmatpush.bf16.msrb.mxu2 %v7104_v58  ;;  %4301 = vmatmul.bf16.vlgmr.msra.gmra.mxu3 %v257_v63  ;;  %v7123_v58 = vld [vmem:[#allocation2 + $0x450] sm:$0xff]  ;;  %v85_v63 = vld [vmem:[%s7742_s0 + $0x28] sm:$0xff] }
  0x77   :  { %4345 = vmatpush.bf16.msrb.mxu3 %v7112_v59  ;;  %v7131_v59 = vld [vmem:[#allocation2 + $0x490] sm:$0xff]  ;;  %132 = vst [vmem:[#allocation1 + $0x20] ss:$4 sm:$0xff] %v85_v63 }
  0x78   :  { %4307 = vmatpush.bf16.msrb.mxu0 %v7087_v0  ;;  %v7130_v0 = vld [vmem:[#allocation2 + $0x488] sm:$0xff] }
  0x79   :  { %4320 = vmatpush.bf16.msrb.mxu1 %v7095_v1  ;;  %v7138_v1 = vld [vmem:[#allocation2 + $0x4c8] sm:$0xff] }
  0x7a   :  { %4333 = vmatpush.bf16.msrb.mxu2 %v7103_v2  ;;  %v7113_v2 = vld [vmem:[#allocation2 + $0x400] sm:$0xff] }
  0x7b   :  { %4346 = vmatpush.bf16.msrb.mxu3 %v7111_v3  ;;  %v7121_v3 = vld [vmem:[#allocation2 + $0x440] sm:$0xff] }
  0x7c   :  { %4308 = vmatpush.bf16.msrb.mxu0 %v7086_v4  ;;  %v7129_v4 = vld [vmem:[#allocation2 + $0x480] sm:$0xff] }
  0x7d   :  { %4321 = vmatpush.bf16.msrb.mxu1 %v7094_v5  ;;  %v7137_v5 = vld [vmem:[#allocation2 + $0x4c0] sm:$0xff] }
  0x7e   :  { %4334 = vmatpush.bf16.msrb.mxu2 %v7102_v6  ;;  %v7152_v6 = vld [vmem:[#allocation2 + $0x538] sm:$0xff]  ;;  %v139_v63 = vld.sshfl [vmem:[#allocation1 + $0x30] sm:$0xff pattern:$0x73625140] }
  0x7f   :  { %4347 = vmatpush.bf16.msrb.mxu3 %v7110_v7  ;;  %v7160_v7 = vld [vmem:[#allocation2 + $0x578] sm:$0xff] }
  0x80   :  { %4309 = vmatpush.bf16.msrb.mxu0 %v7085_v8  ;;  %v133_v8 = vld.sshfl [vmem:[#allocation1] sm:$0xff pattern:$0x73625140] }
  0x81   :  { %4322 = vmatpush.bf16.msrb.mxu1 %v7093_v9  ;;  %v135_v9 = vld.sshfl [vmem:[#allocation1 + $0x10] sm:$0xff pattern:$0x73625140] }
  0x82   :  { %4335 = vmatpush.bf16.msrb.mxu2 %v7101_v10  ;;  %v134_v10 = vld.sshfl [vmem:[#allocation1 + $0x8] sm:$0xff pattern:$0x73625140] }
  0x83   :  { %4348 = vmatpush.bf16.msrb.mxu3 %v7109_v11  ;;  %v136_v11 = vld.sshfl [vmem:[#allocation1 + $0x18] sm:$0xff pattern:$0x73625140] }
  0x84   :  { %4310 = vmatpush.bf16.msrb.mxu0 %v7084_v12  ;;  %v7168_v12 = vld [vmem:[#allocation2 + $0x5b8] sm:$0xff] }
  0x85   :  { %4323 = vmatpush.bf16.msrb.mxu1 %v7092_v13  ;;  %v7176_v13 = vld [vmem:[#allocation2 + $0x5f8] sm:$0xff] }
  0x86   :  { %4336 = vmatpush.bf16.msrb.mxu2 %v7100_v14  ;;  %v262_v14 = vpack.c.bf16 %v133_v8, %v133_v8  ;;  %v7183_v8 = vld [vmem:[#allocation2 + $0x630] sm:$0xff] }
  0x87   :  { %4349 = vmatpush.bf16.msrb.mxu3 %v7108_v15  ;;  %v264_v15 = vpack.c.bf16 %v135_v9, %v135_v9  ;;  %v7191_v9 = vld [vmem:[#allocation2 + $0x670] sm:$0xff] }
  0x88   :  { %4311 = vmatpush.bf16.msrb.mxu0 %v7083_v16  ;;  %v263_v16 = vpack.c.bf16 %v134_v10, %v134_v10  ;;  %v7199_v10 = vld [vmem:[#allocation2 + $0x6b0] sm:$0xff] }
  0x89   :  { %4324 = vmatpush.bf16.msrb.mxu1 %v7091_v17  ;;  %v265_v17 = vpack.c.bf16 %v136_v11, %v136_v11  ;;  %v7207_v11 = vld [vmem:[#allocation2 + $0x6f0] sm:$0xff] }
  0x8a   :  { %4337 = vmatpush.bf16.msrb.mxu2 %v7099_v18  ;;  %v7151_v18 = vld [vmem:[#allocation2 + $0x530] sm:$0xff] }
  0x8b   :  { %4350 = vmatpush.bf16.msrb.mxu3 %v7107_v19  ;;  %v7159_v19 = vld [vmem:[#allocation2 + $0x570] sm:$0xff] }
  0x8c   :  { %4312 = vmatpush.bf16.msrb.mxu0 %v7082_v20  ;;  %v7167_v20 = vld [vmem:[#allocation2 + $0x5b0] sm:$0xff] }
  0x8d   :  { %4325 = vmatpush.bf16.msrb.mxu1 %v7090_v21  ;;  %v7175_v21 = vld [vmem:[#allocation2 + $0x5f0] sm:$0xff] }
  0x8e   :  { %4338 = vmatpush.bf16.msrb.mxu2 %v7098_v23  ;;  %v7158_v23 = vld [vmem:[#allocation2 + $0x568] sm:$0xff] }
  0x8f   :  { %4351 = vmatpush.bf16.msrb.mxu3 %v7106_v24  ;;  %v7480_v24 = vld [vmem:[#allocation5] ss:$0 sm:$0xff] }
  0x90   :  { %4313 = vmatpush.bf16.msrb.mxu0 %v7081_v25  ;;  %v7166_v25 = vld [vmem:[#allocation2 + $0x5a8] sm:$0xff] }
  0x91   :  { %4326 = vmatpush.bf16.msrb.mxu1 %v7089_v26  ;;  %v7174_v26 = vld [vmem:[#allocation2 + $0x5e8] sm:$0xff] }
  0x92   :  { %4339 = vmatpush.bf16.msrb.mxu2 %v7097_v27 }
  0x93   :  { %4352 = vmatpush.bf16.msrb.mxu3 %v7105_v28  ;;  %4314 = vmatmul.bf16.vlgmr.msrb.gmra.mxu0 %v258_v37  ;;  %v7149_v28 = vld [vmem:[#allocation2 + $0x520] sm:$0xff]  ;;  %v7164_v37 = vld [vmem:[#allocation2 + $0x598] sm:$0xff] }
  0x94   :  { %4358 = vmatpush.bf16.msra.mxu0 %v7120_v29  ;;  %4327 = vmatmul.bf16.vlgmr.msrb.gmra.mxu1 %v259_v39  ;;  %v7157_v29 = vld [vmem:[#allocation2 + $0x560] sm:$0xff] }
  0x95   :  { %4371 = vmatpush.bf16.msra.mxu1 %v7128_v30  ;;  %4340 = vmatmul.bf16.vlgmr.msrb.gmra.mxu2 %v260_v38  ;;  %v7172_v38 = vld [vmem:[#allocation2 + $0x5d8] sm:$0xff] }
  0x96   :  { %4384 = vmatpush.bf16.msra.mxu2 %v7136_v35  ;;  %4353 = vmatmul.bf16.vlgmr.msrb.gmra.mxu3 %v261_v40  ;;  %v7148_v35 = vld [vmem:[#allocation2 + $0x518] sm:$0xff] }
  0x97   :  { %4397 = vmatpush.bf16.msra.mxu3 %v7144_v36  ;;  %v7156_v36 = vld [vmem:[#allocation2 + $0x558] sm:$0xff] }
  0x98   :  { %4359 = vmatpush.bf16.msra.mxu0 %v7119_v41 }
  0x99   :  { %4372 = vmatpush.bf16.msra.mxu1 %v7127_v42 }
  0x9a   :  { %4385 = vmatpush.bf16.msra.mxu2 %v7135_v43  ;;  %v7147_v43 = vld [vmem:[#allocation2 + $0x510] sm:$0xff] }
  0x9b   :  { %4398 = vmatpush.bf16.msra.mxu3 %v7143_v44  ;;  %v7155_v44 = vld [vmem:[#allocation2 + $0x550] sm:$0xff] }
  0x9c   :  { %4360 = vmatpush.bf16.msra.mxu0 %v7118_v45 }
  0x9d   :  { %4373 = vmatpush.bf16.msra.mxu1 %v7126_v46 }
  0x9e   :  { %4386 = vmatpush.bf16.msra.mxu2 %v7134_v47  ;;  %v7163_v47 = vld [vmem:[#allocation2 + $0x590] sm:$0xff] }
  0x9f   :  { %4399 = vmatpush.bf16.msra.mxu3 %v7142_v48  ;;  %v7171_v48 = vld [vmem:[#allocation2 + $0x5d0] sm:$0xff] }
  0xa0   :  { %4361 = vmatpush.bf16.msra.mxu0 %v7117_v49  ;;  %v7146_v49 = vld [vmem:[#allocation2 + $0x508] sm:$0xff] }
  0xa1   :  { %4374 = vmatpush.bf16.msra.mxu1 %v7125_v50  ;;  %v7154_v50 = vld [vmem:[#allocation2 + $0x548] sm:$0xff] }
  0xa2   :  { %4387 = vmatpush.bf16.msra.mxu2 %v7133_v51  ;;  %v86_v51 = vld [vmem:[%s7742_s0 + $0x30] sm:$0xff] }
  0xa3   :  { %4400 = vmatpush.bf16.msra.mxu3 %v7141_v52  ;;  %v7162_v52 = vld [vmem:[#allocation2 + $0x588] sm:$0xff]  ;;  %141 = vst [vmem:[#allocation1] ss:$4 sm:$0xff] %v86_v51 }
  0xa4   :  { %4362 = vmatpush.bf16.msra.mxu0 %v7116_v53  ;;  %v7170_v53 = vld [vmem:[#allocation2 + $0x5c8] sm:$0xff] }
  0xa5   :  { %4375 = vmatpush.bf16.msra.mxu1 %v7124_v54 }
  0xa6   :  { %4388 = vmatpush.bf16.msra.mxu2 %v7132_v55 }
  0xa7   :  { %4401 = vmatpush.bf16.msra.mxu3 %v7140_v56  ;;  %v7145_v56 = vld [vmem:[#allocation2 + $0x500] sm:$0xff] }
  0xa8   :  { %4363 = vmatpush.bf16.msra.mxu0 %v7115_v57  ;;  %v7153_v57 = vld [vmem:[#allocation2 + $0x540] sm:$0xff] }
  0xa9   :  { %4376 = vmatpush.bf16.msra.mxu1 %v7123_v58  ;;  %v7161_v58 = vld [vmem:[#allocation2 + $0x580] sm:$0xff] }
  0xaa   :  { %4389 = vmatpush.bf16.msra.mxu2 %v7131_v59  ;;  %v7169_v59 = vld [vmem:[#allocation2 + $0x5c0] sm:$0xff]  ;;  %v143_v51 = vld.sshfl [vmem:[#allocation1] sm:$0xff pattern:$0x73625140] }
  0xab   :  { %4402 = vmatpush.bf16.msra.mxu3 %v7139_v60  ;;  %v7184_v60 = vld [vmem:[#allocation2 + $0x638] sm:$0xff] }
  0xac   :  { %4364 = vmatpush.bf16.msra.mxu0 %v7114_v61  ;;  %v7192_v61 = vld [vmem:[#allocation2 + $0x678] sm:$0xff] }
  0xad   :  { %4377 = vmatpush.bf16.msra.mxu1 %v7122_v62  ;;  %v137_v62 = vld.sshfl [vmem:[#allocation1 + $0x20] sm:$0xff pattern:$0x73625140] }
  0xae   :  { %4390 = vmatpush.bf16.msra.mxu2 %v7130_v0  ;;  %v138_v0 = vld.sshfl [vmem:[#allocation1 + $0x28] sm:$0xff pattern:$0x73625140] }
  0xaf   :  { %4403 = vmatpush.bf16.msra.mxu3 %v7138_v1  ;;  %v140_v1 = vld.sshfl [vmem:[#allocation1 + $0x38] sm:$0xff pattern:$0x73625140] }
  0xb0   :  { %4365 = vmatpush.bf16.msra.mxu0 %v7113_v2  ;;  %v4159_v27 = vpop.f32.mrf.mxu0  ;;  %v7200_v2 = vld [vmem:[#allocation2 + $0x6b8] sm:$0xff] }
  0xb1   :  { %4378 = vmatpush.bf16.msra.mxu1 %v7121_v3  ;;  %v4160_v30 = vadd.f32 %v7480_v24, %v4159_v27  ;;  %v4172_v31 = vpop.f32.mrf.mxu1  ;;  %v7208_v3 = vld [vmem:[#allocation2 + $0x6f8] sm:$0xff] }
  0xb2   :  { %4391 = vmatpush.bf16.msra.mxu2 %v7129_v4  ;;  %v266_v4 = vpack.c.bf16 %v137_v62, %v137_v62  ;;  %v7180_v24 = vld [vmem:[#allocation2 + $0x618] sm:$0xff]  ;;  %v7223_v62 = vld [vmem:[#allocation2 + $0x770] sm:$0xff] }
  0xb3   :  { %4404 = vmatpush.bf16.msra.mxu3 %v7137_v5  ;;  %4366 = vmatmul.bf16.vlgmr.msra.gmra.mxu0 %v262_v14  ;;  %v4173_v34 = vadd.f32 %v4172_v31, %v4160_v30  ;;  %v268_v5 = vpack.c.bf16 %v139_v63, %v139_v63  ;;  %v7198_v14 = vld [vmem:[#allocation2 + $0x6a8] sm:$0xff]  ;;  %v7204_v27 = vld [vmem:[#allocation2 + $0x6d8] sm:$0xff]  ;;  %v7231_v63 = vld [vmem:[#allocation2 + $0x7b0] sm:$0xff] }
  0xb4   :  { %4410 = vmatpush.bf16.msrb.mxu0 %v7152_v6  ;;  %4379 = vmatmul.bf16.vlgmr.msra.gmra.mxu1 %v263_v16  ;;  %v267_v6 = vpack.c.bf16 %v138_v0, %v138_v0  ;;  %v7239_v0 = vld [vmem:[#allocation2 + $0x7f0] sm:$0xff] }
  0xb5   :  { %4423 = vmatpush.bf16.msrb.mxu1 %v7160_v7  ;;  %4392 = vmatmul.bf16.vlgmr.msra.gmra.mxu2 %v264_v15  ;;  %v269_v7 = vpack.c.bf16 %v140_v1, %v140_v1  ;;  %v7206_v15 = vld [vmem:[#allocation2 + $0x6e8] sm:$0xff] }
  0xb6   :  { %4436 = vmatpush.bf16.msrb.mxu2 %v7168_v12  ;;  %4405 = vmatmul.bf16.vlgmr.msra.gmra.mxu3 %v265_v17  ;;  %v7182_v12 = vld [vmem:[#allocation2 + $0x628] sm:$0xff]  ;;  %v7181_v17 = vld [vmem:[#allocation2 + $0x620] sm:$0xff] }
  0xb7   :  { %4449 = vmatpush.bf16.msrb.mxu3 %v7176_v13  ;;  %v7190_v13 = vld [vmem:[#allocation2 + $0x668] sm:$0xff] }
  0xb8   :  { %4411 = vmatpush.bf16.msrb.mxu0 %v7151_v18  ;;  %v4185_v39 = vpop.f32.mrf.mxu2  ;;  %v4161_v42 = vpop.f32.mrf.mxu0  ;;  %v7189_v18 = vld [vmem:[#allocation2 + $0x660] sm:$0xff]  ;;  %v7214_v1 = vld [vmem:[#allocation2 + $0x728] sm:$0xff] }
  0xb9   :  { %4424 = vmatpush.bf16.msrb.mxu1 %v7159_v19  ;;  %v4186_v40 = vadd.f32 %v4185_v39, %v4173_v34  ;;  %v4198_v41 = vpop.f32.mrf.mxu3  ;;  %v4174_v46 = vpop.f32.mrf.mxu1  ;;  %v7186_v39 = vld [vmem:[#allocation2 + $0x648] sm:$0xff] }
  0xba   :  { %4437 = vmatpush.bf16.msrb.mxu2 %v7167_v20  ;;  %v7202_v42 = vld [vmem:[#allocation2 + $0x6c8] sm:$0xff]  ;;  %v7185_v46 = vld [vmem:[#allocation2 + $0x640] sm:$0xff] }
  0xbb   :  { %4450 = vmatpush.bf16.msrb.mxu3 %v7175_v21  ;;  %v7685_v45 = vadd.f32 %v4198_v41, %v4186_v40  ;;  %v7197_v21 = vld [vmem:[#allocation2 + $0x6a0] sm:$0xff]  ;;  %v87_v40 = vld [vmem:[%s7742_s0 + $0x38] sm:$0xff]  ;;  %v7194_v41 = vld [vmem:[#allocation2 + $0x688] sm:$0xff] }
  0xbc   :  { %4412 = vmatpush.bf16.msrb.mxu0 %v7150_v22  ;;  %v7205_v22 = vld [vmem:[#allocation2 + $0x6e0] sm:$0xff]  ;;  %142 = vst [vmem:[#allocation1 + $0x20] ss:$4 sm:$0xff] %v87_v40 }
  0xbd   :  { %4425 = vmatpush.bf16.msrb.mxu1 %v7158_v23 }
  0xbe   :  { %4438 = vmatpush.bf16.msrb.mxu2 %v7166_v25  ;;  %v7188_v25 = vld [vmem:[#allocation2 + $0x658] sm:$0xff] }
  0xbf   :  { %4451 = vmatpush.bf16.msrb.mxu3 %v7174_v26  ;;  %v7196_v26 = vld [vmem:[#allocation2 + $0x698] sm:$0xff] }
  0xc0   :  { %4413 = vmatpush.bf16.msrb.mxu0 %v7149_v28  ;;  %v4187_v54 = vpop.f32.mrf.mxu2 }
  0xc1   :  { %4426 = vmatpush.bf16.msrb.mxu1 %v7157_v29  ;;  %v4200_v55 = vpop.f32.mrf.mxu3  ;;  %v146_v54 = vld.sshfl [vmem:[#allocation1 + $0x18] sm:$0xff pattern:$0x73625140] }
  0xc2   :  { %4439 = vmatpush.bf16.msrb.mxu2 %v7165_v32  ;;  %v7179_v32 = vld [vmem:[#allocation2 + $0x610] sm:$0xff]  ;;  %v7232_v55 = vld [vmem:[#allocation2 + $0x7b8] sm:$0xff] }
  0xc3   :  { %4452 = vmatpush.bf16.msrb.mxu3 %v7173_v33  ;;  %v7187_v33 = vld [vmem:[#allocation2 + $0x650] sm:$0xff]  ;;  %v147_v40 = vld.sshfl [vmem:[#allocation1 + $0x20] sm:$0xff pattern:$0x73625140] }
  0xc4   :  { %4414 = vmatpush.bf16.msrb.mxu0 %v7148_v35 }
  0xc5   :  { %4427 = vmatpush.bf16.msrb.mxu1 %v7156_v36  ;;  %v7195_v36 = vld [vmem:[#allocation2 + $0x690] sm:$0xff] }
  0xc6   :  { %4440 = vmatpush.bf16.msrb.mxu2 %v7164_v37  ;;  %v7203_v37 = vld [vmem:[#allocation2 + $0x6d0] sm:$0xff] }
  0xc7   :  { %4453 = vmatpush.bf16.msrb.mxu3 %v7172_v38  ;;  %v7178_v38 = vld [vmem:[#allocation2 + $0x608] sm:$0xff] }
  0xc8   :  { %4415 = vmatpush.bf16.msrb.mxu0 %v7147_v43 }
  0xc9   :  { %4428 = vmatpush.bf16.msrb.mxu1 %v7155_v44 }
  0xca   :  { %4441 = vmatpush.bf16.msrb.mxu2 %v7163_v47  ;;  %v7193_v47 = vld [vmem:[#allocation2 + $0x680] sm:$0xff] }
  0xcb   :  { %4454 = vmatpush.bf16.msrb.mxu3 %v7171_v48  ;;  %v7201_v48 = vld [vmem:[#allocation2 + $0x6c0] sm:$0xff] }
  0xcc   :  { %4416 = vmatpush.bf16.msrb.mxu0 %v7146_v49  ;;  %v7216_v49 = vld [vmem:[#allocation2 + $0x738] sm:$0xff] }
  0xcd   :  { %4429 = vmatpush.bf16.msrb.mxu1 %v7154_v50  ;;  %v7224_v50 = vld [vmem:[#allocation2 + $0x778] sm:$0xff] }
  0xce   :  { %4442 = vmatpush.bf16.msrb.mxu2 %v7162_v52  ;;  %v145_v52 = vld.sshfl [vmem:[#allocation1 + $0x10] sm:$0xff pattern:$0x73625140] }
  0xcf   :  { %4455 = vmatpush.bf16.msrb.mxu3 %v7170_v53  ;;  %v144_v53 = vld.sshfl [vmem:[#allocation1 + $0x8] sm:$0xff pattern:$0x73625140] }
  0xd0   :  { %4417 = vmatpush.bf16.msrb.mxu0 %v7145_v56  ;;  %v4211_v16 = vpop.f32.mrf.mxu0  ;;  %v7240_v56 = vld [vmem:[#allocation2 + $0x7f8] sm:$0xff] }
  0xd1   :  { %4430 = vmatpush.bf16.msrb.mxu1 %v7153_v57  ;;  %v4212_v19 = vadd.f32 %v4211_v16, %v7685_v45  ;;  %v4224_v20 = vpop.f32.mrf.mxu1  ;;  %v7177_v45 = vld [vmem:[#allocation2 + $0x600] sm:$0xff]  ;;  %v270_v57 = vpack.c.bf16 %v143_v51, %v143_v51  ;;  %v7236_v16 = vld [vmem:[#allocation2 + $0x7d8] sm:$0xff]  ;;  %v7255_v51 = vld [vmem:[#allocation2 + $0x870] sm:$0xff] }
  0xd2   :  { %4443 = vmatpush.bf16.msrb.mxu2 %v7161_v58  ;;  %v272_v58 = vpack.c.bf16 %v145_v52, %v145_v52  ;;  %v7263_v52 = vld [vmem:[#allocation2 + $0x8b0] sm:$0xff] }
  0xd3   :  { %4456 = vmatpush.bf16.msrb.mxu3 %v7169_v59  ;;  %4418 = vmatmul.bf16.vlgmr.msrb.gmra.mxu0 %v266_v4  ;;  %v4225_v23 = vadd.f32 %v4224_v20, %v4212_v19  ;;  %v271_v59 = vpack.c.bf16 %v144_v53, %v144_v53  ;;  %v7238_v4 = vld [vmem:[#allocation2 + $0x7e8] sm:$0xff]  ;;  %v7271_v53 = vld [vmem:[#allocation2 + $0x8f0] sm:$0xff] }
  0xd4   :  { %4462 = vmatpush.bf16.msra.mxu0 %v7184_v60  ;;  %4431 = vmatmul.bf16.vlgmr.msrb.gmra.mxu1 %v267_v6  ;;  %v273_v60 = vpack.c.bf16 %v146_v54, %v146_v54  ;;  %v7246_v54 = vld [vmem:[#allocation2 + $0x828] sm:$0xff] }
  0xd5   :  { %4475 = vmatpush.bf16.msra.mxu1 %v7192_v61  ;;  %4444 = vmatmul.bf16.vlgmr.msrb.gmra.mxu2 %v268_v5  ;;  %v7215_v61 = vld [vmem:[#allocation2 + $0x730] sm:$0xff] }
  0xd6   :  { %4488 = vmatpush.bf16.msra.mxu2 %v7200_v2  ;;  %4457 = vmatmul.bf16.vlgmr.msrb.gmra.mxu3 %v269_v7  ;;  %v7222_v2 = vld [vmem:[#allocation2 + $0x768] sm:$0xff]  ;;  %v7213_v7 = vld [vmem:[#allocation2 + $0x720] sm:$0xff] }
  0xd7   :  { %4501 = vmatpush.bf16.msra.mxu3 %v7208_v3  ;;  %v7230_v3 = vld [vmem:[#allocation2 + $0x7a8] sm:$0xff] }
  0xd8   :  { %4463 = vmatpush.bf16.msra.mxu0 %v7183_v8  ;;  %v4237_v28 = vpop.f32.mrf.mxu2  ;;  %v4213_v31 = vpop.f32.mrf.mxu0  ;;  %v7221_v8 = vld [vmem:[#allocation2 + $0x760] sm:$0xff] }
  0xd9   :  { %4476 = vmatpush.bf16.msra.mxu1 %v7191_v9  ;;  %v4238_v29 = vadd.f32 %v4237_v28, %v4225_v23  ;;  %v4250_v30 = vpop.f32.mrf.mxu3  ;;  %v4226_v35 = vpop.f32.mrf.mxu1  ;;  %v7219_v23 = vld [vmem:[#allocation2 + $0x750] sm:$0xff]  ;;  %v7218_v28 = vld [vmem:[#allocation2 + $0x748] sm:$0xff] }
  0xda   :  { %4489 = vmatpush.bf16.msra.mxu2 %v7199_v10  ;;  %v7229_v10 = vld [vmem:[#allocation2 + $0x7a0] sm:$0xff]  ;;  %v7234_v31 = vld [vmem:[#allocation2 + $0x7c8] sm:$0xff] }
  0xdb   :  { %4502 = vmatpush.bf16.msra.mxu3 %v7207_v11  ;;  %v7691_v34 = vadd.f32 %v4250_v30, %v4238_v29  ;;  %v7237_v11 = vld [vmem:[#allocation2 + $0x7e0] sm:$0xff]  ;;  %v88_v29 = vld [vmem:[%s7742_s0 + $0x40] sm:$0xff]  ;;  %v7226_v30 = vld [vmem:[#allocation2 + $0x788] sm:$0xff] }
  0xdc   :  { %4464 = vmatpush.bf16.msra.mxu0 %v7182_v12  ;;  %151 = vst [vmem:[#allocation1] ss:$4 sm:$0xff] %v88_v29  ;;  %v7217_v35 = vld [vmem:[#allocation2 + $0x740] sm:$0xff] }
  0xdd   :  { %4477 = vmatpush.bf16.msra.mxu1 %v7190_v13  ;;  %v7212_v13 = vld [vmem:[#allocation2 + $0x718] sm:$0xff] }
  0xde   :  { %4490 = vmatpush.bf16.msra.mxu2 %v7198_v14  ;;  %v7220_v14 = vld [vmem:[#allocation2 + $0x758] sm:$0xff] }
  0xdf   :  { %4503 = vmatpush.bf16.msra.mxu3 %v7206_v15  ;;  %v7228_v15 = vld [vmem:[#allocation2 + $0x798] sm:$0xff] }
  0xe0   :  { %4465 = vmatpush.bf16.msra.mxu0 %v7181_v17  ;;  %v4239_v43 = vpop.f32.mrf.mxu2 }
  0xe1   :  { %4478 = vmatpush.bf16.msra.mxu1 %v7189_v18  ;;  %v4252_v44 = vpop.f32.mrf.mxu3  ;;  %v150_v43 = vld.sshfl [vmem:[#allocation1 + $0x38] sm:$0xff pattern:$0x73625140] }
  0xe2   :  { %4491 = vmatpush.bf16.msra.mxu2 %v7197_v21  ;;  %v7264_v44 = vld [vmem:[#allocation2 + $0x8b8] sm:$0xff] }
  0xe3   :  { %4504 = vmatpush.bf16.msra.mxu3 %v7205_v22  ;;  %v7211_v22 = vld [vmem:[#allocation2 + $0x710] sm:$0xff]  ;;  %v153_v29 = vld.sshfl [vmem:[#allocation1] sm:$0xff pattern:$0x73625140] }
  0xe4   :  { %4466 = vmatpush.bf16.msra.mxu0 %v7180_v24 }
  0xe5   :  { %4479 = vmatpush.bf16.msra.mxu1 %v7188_v25  ;;  %v7227_v25 = vld [vmem:[#allocation2 + $0x790] sm:$0xff] }
  0xe6   :  { %4492 = vmatpush.bf16.msra.mxu2 %v7196_v26  ;;  %v7235_v26 = vld [vmem:[#allocation2 + $0x7d0] sm:$0xff] }
  0xe7   :  { %4505 = vmatpush.bf16.msra.mxu3 %v7204_v27  ;;  %v7210_v27 = vld [vmem:[#allocation2 + $0x708] sm:$0xff] }
  0xe8   :  { %4467 = vmatpush.bf16.msra.mxu0 %v7179_v32 }
  0xe9   :  { %4480 = vmatpush.bf16.msra.mxu1 %v7187_v33 }
  0xea   :  { %4493 = vmatpush.bf16.msra.mxu2 %v7195_v36  ;;  %v7225_v36 = vld [vmem:[#allocation2 + $0x780] sm:$0xff] }
  0xeb   :  { %4506 = vmatpush.bf16.msra.mxu3 %v7203_v37  ;;  %v7233_v37 = vld [vmem:[#allocation2 + $0x7c0] sm:$0xff] }
  0xec   :  { %4468 = vmatpush.bf16.msra.mxu0 %v7178_v38  ;;  %v7248_v38 = vld [vmem:[#allocation2 + $0x838] sm:$0xff] }
  0xed   :  { %4481 = vmatpush.bf16.msra.mxu1 %v7186_v39  ;;  %v7256_v39 = vld [vmem:[#allocation2 + $0x878] sm:$0xff] }
  0xee   :  { %4494 = vmatpush.bf16.msra.mxu2 %v7194_v41  ;;  %v149_v41 = vld.sshfl [vmem:[#allocation1 + $0x30] sm:$0xff pattern:$0x73625140] }
  0xef   :  { %4507 = vmatpush.bf16.msra.mxu3 %v7202_v42  ;;  %v148_v42 = vld.sshfl [vmem:[#allocation1 + $0x28] sm:$0xff pattern:$0x73625140] }
  0xf0   :  { %4469 = vmatpush.bf16.msra.mxu0 %v7177_v45  ;;  %v4263_v5 = vpop.f32.mrf.mxu0  ;;  %v7272_v45 = vld [vmem:[#allocation2 + $0x8f8] sm:$0xff] }
  0xf1   :  { %4482 = vmatpush.bf16.msra.mxu1 %v7185_v46  ;;  %v4264_v6 = vadd.f32 %v4263_v5, %v7691_v34  ;;  %v4276_v9 = vpop.f32.mrf.mxu1  ;;  %v7209_v34 = vld [vmem:[#allocation2 + $0x700] sm:$0xff]  ;;  %v274_v46 = vpack.c.bf16 %v147_v40, %v147_v40  ;;  %v7268_v5 = vld [vmem:[#allocation2 + $0x8d8] sm:$0xff]  ;;  %v7287_v40 = vld [vmem:[#allocation2 + $0x970] sm:$0xff] }
  0xf2   :  { %4495 = vmatpush.bf16.msra.mxu2 %v7193_v47  ;;  %v276_v47 = vpack.c.bf16 %v149_v41, %v149_v41  ;;  %v7295_v41 = vld [vmem:[#allocation2 + $0x9b0] sm:$0xff] }
  0xf3   :  { %4508 = vmatpush.bf16.msra.mxu3 %v7201_v48  ;;  %4470 = vmatmul.bf16.vlgmr.msra.gmra.mxu0 %v270_v57  ;;  %v4277_v12 = vadd.f32 %v4276_v9, %v4264_v6  ;;  %v275_v48 = vpack.c.bf16 %v148_v42, %v148_v42  ;;  %v7270_v57 = vld [vmem:[#allocation2 + $0x8e8] sm:$0xff]  ;;  %v7303_v42 = vld [vmem:[#allocation2 + $0x9f0] sm:$0xff] }
  0xf4   :  { %4514 = vmatpush.bf16.msrb.mxu0 %v7216_v49  ;;  %4483 = vmatmul.bf16.vlgmr.msra.gmra.mxu1 %v271_v59  ;;  %v277_v49 = vpack.c.bf16 %v150_v43, %v150_v43  ;;  %v7278_v43 = vld [vmem:[#allocation2 + $0x928] sm:$0xff] }
  0xf5   :  { %4527 = vmatpush.bf16.msrb.mxu1 %v7224_v50  ;;  %4496 = vmatmul.bf16.vlgmr.msra.gmra.mxu2 %v272_v58  ;;  %v7247_v50 = vld [vmem:[#allocation2 + $0x830] sm:$0xff] }
  0xf6   :  { %4540 = vmatpush.bf16.msrb.mxu2 %v7232_v55  ;;  %4509 = vmatmul.bf16.vlgmr.msra.gmra.mxu3 %v273_v60  ;;  %v7254_v55 = vld [vmem:[#allocation2 + $0x868] sm:$0xff]  ;;  %v7245_v60 = vld [vmem:[#allocation2 + $0x820] sm:$0xff] }
  0xf7   :  { %4553 = vmatpush.bf16.msrb.mxu3 %v7240_v56  ;;  %v7262_v56 = vld [vmem:[#allocation2 + $0x8a8] sm:$0xff] }
  0xf8   :  { %4515 = vmatpush.bf16.msrb.mxu0 %v7215_v61  ;;  %v4289_v17 = vpop.f32.mrf.mxu2  ;;  %v4265_v20 = vpop.f32.mrf.mxu0  ;;  %v7253_v61 = vld [vmem:[#allocation2 + $0x860] sm:$0xff] }
  0xf9   :  { %4528 = vmatpush.bf16.msrb.mxu1 %v7223_v62  ;;  %v4290_v18 = vadd.f32 %v4289_v17, %v4277_v12  ;;  %v4302_v19 = vpop.f32.mrf.mxu3  ;;  %v4278_v24 = vpop.f32.mrf.mxu1  ;;  %v7251_v12 = vld [vmem:[#allocation2 + $0x850] sm:$0xff]  ;;  %v7250_v17 = vld [vmem:[#allocation2 + $0x848] sm:$0xff] }
  0xfa   :  { %4541 = vmatpush.bf16.msrb.mxu2 %v7231_v63  ;;  %v7261_v63 = vld [vmem:[#allocation2 + $0x8a0] sm:$0xff]  ;;  %v7266_v20 = vld [vmem:[#allocation2 + $0x8c8] sm:$0xff] }
  0xfb   :  { %4554 = vmatpush.bf16.msrb.mxu3 %v7239_v0  ;;  %v7697_v21 = vadd.f32 %v4302_v19, %v4290_v18  ;;  %v7269_v0 = vld [vmem:[#allocation2 + $0x8e0] sm:$0xff]  ;;  %v7258_v19 = vld [vmem:[#allocation2 + $0x888] sm:$0xff] }
  0xfc   :  { %4516 = vmatpush.bf16.msrb.mxu0 %v7214_v1  ;;  %v89_v18 = vld [vmem:[%s7742_s0 + $0x48] sm:$0xff] }
  0xfd   :  { %4529 = vmatpush.bf16.msrb.mxu1 %v7222_v2  ;;  %v7244_v2 = vld [vmem:[#allocation2 + $0x818] sm:$0xff]  ;;  %152 = vst [vmem:[#allocation1 + $0x20] ss:$4 sm:$0xff] %v89_v18  ;;  %v7249_v24 = vld [vmem:[#allocation2 + $0x840] sm:$0xff] }
  0xfe   :  { %4542 = vmatpush.bf16.msrb.mxu2 %v7230_v3  ;;  %v7252_v3 = vld [vmem:[#allocation2 + $0x858] sm:$0xff] }
  0xff   :  { %4555 = vmatpush.bf16.msrb.mxu3 %v7238_v4  ;;  %v7260_v4 = vld [vmem:[#allocation2 + $0x898] sm:$0xff] }
 0x100   :  { %4517 = vmatpush.bf16.msrb.mxu0 %v7213_v7  ;;  %v4291_v32 = vpop.f32.mrf.mxu2 }
 0x101   :  { %4530 = vmatpush.bf16.msrb.mxu1 %v7221_v8  ;;  %v4304_v33 = vpop.f32.mrf.mxu3  ;;  %v156_v32 = vld.sshfl [vmem:[#allocation1 + $0x18] sm:$0xff pattern:$0x73625140] }
 0x102   :  { %4543 = vmatpush.bf16.msrb.mxu2 %v7229_v10  ;;  %v7296_v33 = vld [vmem:[#allocation2 + $0x9b8] sm:$0xff] }
 0x103   :  { %4556 = vmatpush.bf16.msrb.mxu3 %v7237_v11  ;;  %v7243_v11 = vld [vmem:[#allocation2 + $0x810] sm:$0xff] }
 0x104   :  { %4518 = vmatpush.bf16.msrb.mxu0 %v7212_v13  ;;  %v157_v18 = vld.sshfl [vmem:[#allocation1 + $0x20] sm:$0xff pattern:$0x73625140] }
 0x105   :  { %4531 = vmatpush.bf16.msrb.mxu1 %v7220_v14  ;;  %v7259_v14 = vld [vmem:[#allocation2 + $0x890] sm:$0xff] }
 0x106   :  { %4544 = vmatpush.bf16.msrb.mxu2 %v7228_v15  ;;  %v7267_v15 = vld [vmem:[#allocation2 + $0x8d0] sm:$0xff] }
 0x107   :  { %4557 = vmatpush.bf16.msrb.mxu3 %v7236_v16  ;;  %v7242_v16 = vld [vmem:[#allocation2 + $0x808] sm:$0xff] }
 0x108   :  { %4519 = vmatpush.bf16.msrb.mxu0 %v7211_v22 }
 0x109   :  { %4532 = vmatpush.bf16.msrb.mxu1 %v7219_v23  ;;  %v7241_v23 = vld [vmem:[#allocation2 + $0x800] sm:$0xff] }
 0x10a   :  { %4545 = vmatpush.bf16.msrb.mxu2 %v7227_v25  ;;  %v7257_v25 = vld [vmem:[#allocation2 + $0x880] sm:$0xff] }
 0x10b   :  { %4558 = vmatpush.bf16.msrb.mxu3 %v7235_v26  ;;  %v7265_v26 = vld [vmem:[#allocation2 + $0x8c0] sm:$0xff] }
 0x10c   :  { %4520 = vmatpush.bf16.msrb.mxu0 %v7210_v27  ;;  %v7280_v27 = vld [vmem:[#allocation2 + $0x938] sm:$0xff] }
 0x10d   :  { %4533 = vmatpush.bf16.msrb.mxu1 %v7218_v28  ;;  %v7288_v28 = vld [vmem:[#allocation2 + $0x978] sm:$0xff] }
 0x10e   :  { %4546 = vmatpush.bf16.msrb.mxu2 %v7226_v30  ;;  %v155_v30 = vld.sshfl [vmem:[#allocation1 + $0x10] sm:$0xff pattern:$0x73625140] }
 0x10f   :  { %4559 = vmatpush.bf16.msrb.mxu3 %v7234_v31  ;;  %v154_v31 = vld.sshfl [vmem:[#allocation1 + $0x8] sm:$0xff pattern:$0x73625140] }
 0x110   :  { %4521 = vmatpush.bf16.msrb.mxu0 %v7209_v34  ;;  %v4315_v58 = vpop.f32.mrf.mxu0  ;;  %v7304_v34 = vld [vmem:[#allocation2 + $0x9f8] sm:$0xff] }
 0x111   :  { %4534 = vmatpush.bf16.msrb.mxu1 %v7217_v35  ;;  %v4316_v59 = vadd.f32 %v4315_v58, %v7697_v21  ;;  %v4328_v62 = vpop.f32.mrf.mxu1  ;;  %v278_v35 = vpack.c.bf16 %v153_v29, %v153_v29  ;;  %v7300_v58 = vld [vmem:[#allocation2 + $0x9d8] sm:$0xff]  ;;  %v7319_v29 = vld [vmem:[#allocation2 + $0xa70] sm:$0xff] }
 0x112   :  { %4547 = vmatpush.bf16.msrb.mxu2 %v7225_v36  ;;  %v280_v36 = vpack.c.bf16 %v155_v30, %v155_v30  ;;  %v7327_v30 = vld [vmem:[#allocation2 + $0xab0] sm:$0xff] }
 0x113   :  { %4560 = vmatpush.bf16.msrb.mxu3 %v7233_v37  ;;  %4522 = vmatmul.bf16.vlgmr.msrb.gmra.mxu0 %v274_v46  ;;  %v4329_v1 = vadd.f32 %v4328_v62, %v4316_v59  ;;  %v279_v37 = vpack.c.bf16 %v154_v31, %v154_v31  ;;  %v7302_v46 = vld [vmem:[#allocation2 + $0x9e8] sm:$0xff]  ;;  %v7335_v31 = vld [vmem:[#allocation2 + $0xaf0] sm:$0xff] }
 0x114   :  { %4566 = vmatpush.bf16.msra.mxu0 %v7248_v38  ;;  %4535 = vmatmul.bf16.vlgmr.msrb.gmra.mxu1 %v275_v48  ;;  %v281_v38 = vpack.c.bf16 %v156_v32, %v156_v32  ;;  %v7310_v32 = vld [vmem:[#allocation2 + $0xa28] sm:$0xff] }
 0x115   :  { %4579 = vmatpush.bf16.msra.mxu1 %v7256_v39  ;;  %4548 = vmatmul.bf16.vlgmr.msrb.gmra.mxu2 %v276_v47  ;;  %v7279_v39 = vld [vmem:[#allocation2 + $0x930] sm:$0xff] }
 0x116   :  { %4592 = vmatpush.bf16.msra.mxu2 %v7264_v44  ;;  %4561 = vmatmul.bf16.vlgmr.msrb.gmra.mxu3 %v277_v49  ;;  %v7286_v44 = vld [vmem:[#allocation2 + $0x968] sm:$0xff]  ;;  %v7277_v49 = vld [vmem:[#allocation2 + $0x920] sm:$0xff] }
 0x117   :  { %4605 = vmatpush.bf16.msra.mxu3 %v7272_v45  ;;  %v7294_v45 = vld [vmem:[#allocation2 + $0x9a8] sm:$0xff] }
 0x118   :  { %4567 = vmatpush.bf16.msra.mxu0 %v7247_v50  ;;  %v4341_v6 = vpop.f32.mrf.mxu2  ;;  %v4317_v9 = vpop.f32.mrf.mxu0  ;;  %v7285_v50 = vld [vmem:[#allocation2 + $0x960] sm:$0xff] }
 0x119   :  { %4580 = vmatpush.bf16.msra.mxu1 %v7255_v51  ;;  %v4342_v7 = vadd.f32 %v4341_v6, %v4329_v1  ;;  %v4354_v8 = vpop.f32.mrf.mxu3  ;;  %v4330_v13 = vpop.f32.mrf.mxu1  ;;  %v7283_v1 = vld [vmem:[#allocation2 + $0x950] sm:$0xff]  ;;  %v7282_v6 = vld [vmem:[#allocation2 + $0x948] sm:$0xff] }
 0x11a   :  { %4593 = vmatpush.bf16.msra.mxu2 %v7263_v52  ;;  %v7293_v52 = vld [vmem:[#allocation2 + $0x9a0] sm:$0xff]  ;;  %v7298_v9 = vld [vmem:[#allocation2 + $0x9c8] sm:$0xff] }
 0x11b   :  { %4606 = vmatpush.bf16.msra.mxu3 %v7271_v53  ;;  %v7703_v10 = vadd.f32 %v4354_v8, %v4342_v7  ;;  %v7301_v53 = vld [vmem:[#allocation2 + $0x9e0] sm:$0xff]  ;;  %v90_v7 = vld [vmem:[%s7742_s0 + $0x50] sm:$0xff] }
 0x11c   :  { %4568 = vmatpush.bf16.msra.mxu0 %v7246_v54  ;;  %v7290_v8 = vld [vmem:[#allocation2 + $0x988] sm:$0xff]  ;;  %161 = vst [vmem:[#allocation1] ss:$4 sm:$0xff] %v90_v7  ;;  %v7281_v13 = vld [vmem:[#allocation2 + $0x940] sm:$0xff] }
 0x11d   :  { %4581 = vmatpush.bf16.msra.mxu1 %v7254_v55  ;;  %v7276_v55 = vld [vmem:[#allocation2 + $0x918] sm:$0xff] }
 0x11e   :  { %4594 = vmatpush.bf16.msra.mxu2 %v7262_v56  ;;  %v7284_v56 = vld [vmem:[#allocation2 + $0x958] sm:$0xff] }
 0x11f   :  { %4607 = vmatpush.bf16.msra.mxu3 %v7270_v57  ;;  %v7292_v57 = vld [vmem:[#allocation2 + $0x998] sm:$0xff] }
 0x120   :  { %4569 = vmatpush.bf16.msra.mxu0 %v7245_v60  ;;  %v4343_v21 = vpop.f32.mrf.mxu2 }
 0x121   :  { %4582 = vmatpush.bf16.msra.mxu1 %v7253_v61  ;;  %v4356_v22 = vpop.f32.mrf.mxu3  ;;  %v160_v21 = vld.sshfl [vmem:[#allocation1 + $0x38] sm:$0xff pattern:$0x73625140] }
 0x122   :  { %4595 = vmatpush.bf16.msra.mxu2 %v7261_v63  ;;  %v7328_v22 = vld [vmem:[#allocation2 + $0xab8] sm:$0xff] }
 0x123   :  { %4608 = vmatpush.bf16.msra.mxu3 %v7269_v0  ;;  %v7275_v0 = vld [vmem:[#allocation2 + $0x910] sm:$0xff]  ;;  %v163_v7 = vld.sshfl [vmem:[#allocation1] sm:$0xff pattern:$0x73625140] }
 0x124   :  { %4570 = vmatpush.bf16.msra.mxu0 %v7244_v2 }
 0x125   :  { %4583 = vmatpush.bf16.msra.mxu1 %v7252_v3  ;;  %v7291_v3 = vld [vmem:[#allocation2 + $0x990] sm:$0xff] }
 0x126   :  { %4596 = vmatpush.bf16.msra.mxu2 %v7260_v4  ;;  %v7299_v4 = vld [vmem:[#allocation2 + $0x9d0] sm:$0xff] }
 0x127   :  { %4609 = vmatpush.bf16.msra.mxu3 %v7268_v5  ;;  %v7274_v5 = vld [vmem:[#allocation2 + $0x908] sm:$0xff] }
 0x128   :  { %4571 = vmatpush.bf16.msra.mxu0 %v7243_v11 }
 0x129   :  { %4584 = vmatpush.bf16.msra.mxu1 %v7251_v12  ;;  %v7273_v12 = vld [vmem:[#allocation2 + $0x900] sm:$0xff] }
 0x12a   :  { %4597 = vmatpush.bf16.msra.mxu2 %v7259_v14  ;;  %v7289_v14 = vld [vmem:[#allocation2 + $0x980] sm:$0xff] }
 0x12b   :  { %4610 = vmatpush.bf16.msra.mxu3 %v7267_v15  ;;  %v7297_v15 = vld [vmem:[#allocation2 + $0x9c0] sm:$0xff] }
 0x12c   :  { %4572 = vmatpush.bf16.msra.mxu0 %v7242_v16  ;;  %v7312_v16 = vld [vmem:[#allocation2 + $0xa38] sm:$0xff] }
 0x12d   :  { %4585 = vmatpush.bf16.msra.mxu1 %v7250_v17  ;;  %v7320_v17 = vld [vmem:[#allocation2 + $0xa78] sm:$0xff] }
 0x12e   :  { %4598 = vmatpush.bf16.msra.mxu2 %v7258_v19  ;;  %v159_v19 = vld.sshfl [vmem:[#allocation1 + $0x30] sm:$0xff pattern:$0x73625140] }
 0x12f   :  { %4611 = vmatpush.bf16.msra.mxu3 %v7266_v20  ;;  %v158_v20 = vld.sshfl [vmem:[#allocation1 + $0x28] sm:$0xff pattern:$0x73625140] }
 0x130   :  { %4573 = vmatpush.bf16.msra.mxu0 %v7241_v23  ;;  %v4367_v47 = vpop.f32.mrf.mxu0  ;;  %v7336_v23 = vld [vmem:[#allocation2 + $0xaf8] sm:$0xff] }
 0x131   :  { %4586 = vmatpush.bf16.msra.mxu1 %v7249_v24  ;;  %v4368_v48 = vadd.f32 %v4367_v47, %v7703_v10  ;;  %v4380_v51 = vpop.f32.mrf.mxu1  ;;  %v282_v24 = vpack.c.bf16 %v157_v18, %v157_v18  ;;  %v7332_v47 = vld [vmem:[#allocation2 + $0xad8] sm:$0xff]  ;;  %v7351_v18 = vld [vmem:[#allocation2 + $0xb70] sm:$0xff] }
 0x132   :  { %4599 = vmatpush.bf16.msra.mxu2 %v7257_v25  ;;  %v284_v25 = vpack.c.bf16 %v159_v19, %v159_v19  ;;  %v7359_v19 = vld [vmem:[#allocation2 + $0xbb0] sm:$0xff] }
 0x133   :  { %4612 = vmatpush.bf16.msra.mxu3 %v7265_v26  ;;  %4574 = vmatmul.bf16.vlgmr.msra.gmra.mxu0 %v278_v35  ;;  %v4381_v54 = vadd.f32 %v4380_v51, %v4368_v48  ;;  %v283_v26 = vpack.c.bf16 %v158_v20, %v158_v20  ;;  %v7334_v35 = vld [vmem:[#allocation2 + $0xae8] sm:$0xff]  ;;  %v7367_v20 = vld [vmem:[#allocation2 + $0xbf0] sm:$0xff] }
 0x134   :  { %4618 = vmatpush.bf16.msrb.mxu0 %v7280_v27  ;;  %4587 = vmatmul.bf16.vlgmr.msra.gmra.mxu1 %v279_v37  ;;  %v285_v27 = vpack.c.bf16 %v160_v21, %v160_v21  ;;  %v7342_v21 = vld [vmem:[#allocation2 + $0xb28] sm:$0xff] }
 0x135   :  { %4631 = vmatpush.bf16.msrb.mxu1 %v7288_v28  ;;  %4600 = vmatmul.bf16.vlgmr.msra.gmra.mxu2 %v280_v36  ;;  %v7311_v28 = vld [vmem:[#allocation2 + $0xa30] sm:$0xff] }
 0x136   :  { %4644 = vmatpush.bf16.msrb.mxu2 %v7296_v33  ;;  %4613 = vmatmul.bf16.vlgmr.msra.gmra.mxu3 %v281_v38  ;;  %v7318_v33 = vld [vmem:[#allocation2 + $0xa68] sm:$0xff]  ;;  %v7309_v38 = vld [vmem:[#allocation2 + $0xa20] sm:$0xff] }
 0x137   :  { %4657 = vmatpush.bf16.msrb.mxu3 %v7304_v34  ;;  %v7326_v34 = vld [vmem:[#allocation2 + $0xaa8] sm:$0xff] }
 0x138   :  { %4619 = vmatpush.bf16.msrb.mxu0 %v7279_v39  ;;  %v4393_v59 = vpop.f32.mrf.mxu2  ;;  %v4369_v62 = vpop.f32.mrf.mxu0  ;;  %v7317_v39 = vld [vmem:[#allocation2 + $0xa60] sm:$0xff] }
 0x139   :  { %4632 = vmatpush.bf16.msrb.mxu1 %v7287_v40  ;;  %v4394_v60 = vadd.f32 %v4393_v59, %v4381_v54  ;;  %v4406_v61 = vpop.f32.mrf.mxu3  ;;  %v4382_v2 = vpop.f32.mrf.mxu1  ;;  %v7315_v54 = vld [vmem:[#allocation2 + $0xa50] sm:$0xff]  ;;  %v7314_v59 = vld [vmem:[#allocation2 + $0xa48] sm:$0xff] }
 0x13a   :  { %4645 = vmatpush.bf16.msrb.mxu2 %v7295_v41  ;;  %v7325_v41 = vld [vmem:[#allocation2 + $0xaa0] sm:$0xff]  ;;  %v7330_v62 = vld [vmem:[#allocation2 + $0xac8] sm:$0xff] }
 0x13b   :  { %4658 = vmatpush.bf16.msrb.mxu3 %v7303_v42  ;;  %v7709_v63 = vadd.f32 %v4406_v61, %v4394_v60  ;;  %v7333_v42 = vld [vmem:[#allocation2 + $0xae0] sm:$0xff]  ;;  %v91_v60 = vld [vmem:[%s7742_s0 + $0x58] sm:$0xff]  ;;  %v7322_v61 = vld [vmem:[#allocation2 + $0xa88] sm:$0xff] }
 0x13c   :  { %4620 = vmatpush.bf16.msrb.mxu0 %v7278_v43  ;;  %162 = vst [vmem:[#allocation1 + $0x20] ss:$4 sm:$0xff] %v91_v60  ;;  %v7313_v2 = vld [vmem:[#allocation2 + $0xa40] sm:$0xff] }
 0x13d   :  { %4633 = vmatpush.bf16.msrb.mxu1 %v7286_v44  ;;  %v7308_v44 = vld [vmem:[#allocation2 + $0xa18] sm:$0xff] }
 0x13e   :  { %4646 = vmatpush.bf16.msrb.mxu2 %v7294_v45  ;;  %v7316_v45 = vld [vmem:[#allocation2 + $0xa58] sm:$0xff] }
 0x13f   :  { %4659 = vmatpush.bf16.msrb.mxu3 %v7302_v46  ;;  %v7324_v46 = vld [vmem:[#allocation2 + $0xa98] sm:$0xff] }
 0x140   :  { %4621 = vmatpush.bf16.msrb.mxu0 %v7277_v49  ;;  %v4395_v10 = vpop.f32.mrf.mxu2 }
 0x141   :  { %4634 = vmatpush.bf16.msrb.mxu1 %v7285_v50  ;;  %v4408_v11 = vpop.f32.mrf.mxu3  ;;  %v166_v10 = vld.sshfl [vmem:[#allocation1 + $0x18] sm:$0xff pattern:$0x73625140] }
 0x142   :  { %4647 = vmatpush.bf16.msrb.mxu2 %v7293_v52  ;;  %v7360_v11 = vld [vmem:[#allocation2 + $0xbb8] sm:$0xff] }
 0x143   :  { %4660 = vmatpush.bf16.msrb.mxu3 %v7301_v53  ;;  %v7307_v53 = vld [vmem:[#allocation2 + $0xa10] sm:$0xff]  ;;  %v167_v60 = vld.sshfl [vmem:[#allocation1 + $0x20] sm:$0xff pattern:$0x73625140] }
 0x144   :  { %4622 = vmatpush.bf16.msrb.mxu0 %v7276_v55 }
 0x145   :  { %4635 = vmatpush.bf16.msrb.mxu1 %v7284_v56  ;;  %v7323_v56 = vld [vmem:[#allocation2 + $0xa90] sm:$0xff] }
 0x146   :  { %4648 = vmatpush.bf16.msrb.mxu2 %v7292_v57  ;;  %v7331_v57 = vld [vmem:[#allocation2 + $0xad0] sm:$0xff] }
 0x147   :  { %4661 = vmatpush.bf16.msrb.mxu3 %v7300_v58  ;;  %v7306_v58 = vld [vmem:[#allocation2 + $0xa08] sm:$0xff] }
 0x148   :  { %4623 = vmatpush.bf16.msrb.mxu0 %v7275_v0 }
 0x149   :  { %4636 = vmatpush.bf16.msrb.mxu1 %v7283_v1  ;;  %v7305_v1 = vld [vmem:[#allocation2 + $0xa00] sm:$0xff] }
 0x14a   :  { %4649 = vmatpush.bf16.msrb.mxu2 %v7291_v3  ;;  %v7321_v3 = vld [vmem:[#allocation2 + $0xa80] sm:$0xff] }
 0x14b   :  { %4662 = vmatpush.bf16.msrb.mxu3 %v7299_v4  ;;  %v7329_v4 = vld [vmem:[#allocation2 + $0xac0] sm:$0xff] }
 0x14c   :  { %4624 = vmatpush.bf16.msrb.mxu0 %v7274_v5  ;;  %v7344_v5 = vld [vmem:[#allocation2 + $0xb38] sm:$0xff] }
 0x14d   :  { %4637 = vmatpush.bf16.msrb.mxu1 %v7282_v6  ;;  %v7352_v6 = vld [vmem:[#allocation2 + $0xb78] sm:$0xff] }
 0x14e   :  { %4650 = vmatpush.bf16.msrb.mxu2 %v7290_v8  ;;  %v165_v8 = vld.sshfl [vmem:[#allocation1 + $0x10] sm:$0xff pattern:$0x73625140] }
 0x14f   :  { %4663 = vmatpush.bf16.msrb.mxu3 %v7298_v9  ;;  %v164_v9 = vld.sshfl [vmem:[#allocation1 + $0x8] sm:$0xff pattern:$0x73625140] }
 0x150   :  { %4625 = vmatpush.bf16.msrb.mxu0 %v7273_v12  ;;  %v4419_v36 = vpop.f32.mrf.mxu0  ;;  %v7368_v12 = vld [vmem:[#allocation2 + $0xbf8] sm:$0xff] }
 0x151   :  { %4638 = vmatpush.bf16.msrb.mxu1 %v7281_v13  ;;  %v4420_v37 = vadd.f32 %v4419_v36, %v7709_v63  ;;  %v4432_v40 = vpop.f32.mrf.mxu1  ;;  %v286_v13 = vpack.c.bf16 %v163_v7, %v163_v7  ;;  %v7364_v36 = vld [vmem:[#allocation2 + $0xbd8] sm:$0xff]  ;;  %v7383_v7 = vld [vmem:[#allocation2 + $0xc70] sm:$0xff] }
 0x152   :  { %4651 = vmatpush.bf16.msrb.mxu2 %v7289_v14  ;;  %v288_v14 = vpack.c.bf16 %v165_v8, %v165_v8  ;;  %v7391_v8 = vld [vmem:[#allocation2 + $0xcb0] sm:$0xff] }
 0x153   :  { %4664 = vmatpush.bf16.msrb.mxu3 %v7297_v15  ;;  %4626 = vmatmul.bf16.vlgmr.msrb.gmra.mxu0 %v282_v24  ;;  %v4433_v43 = vadd.f32 %v4432_v40, %v4420_v37  ;;  %v287_v15 = vpack.c.bf16 %v164_v9, %v164_v9  ;;  %v7366_v24 = vld [vmem:[#allocation2 + $0xbe8] sm:$0xff]  ;;  %v7399_v9 = vld [vmem:[#allocation2 + $0xcf0] sm:$0xff] }
 0x154   :  { %4670 = vmatpush.bf16.msra.mxu0 %v7312_v16  ;;  %4639 = vmatmul.bf16.vlgmr.msrb.gmra.mxu1 %v283_v26  ;;  %v289_v16 = vpack.c.bf16 %v166_v10, %v166_v10  ;;  %v7374_v10 = vld [vmem:[#allocation2 + $0xc28] sm:$0xff] }
 0x155   :  { %4683 = vmatpush.bf16.msra.mxu1 %v7320_v17  ;;  %4652 = vmatmul.bf16.vlgmr.msrb.gmra.mxu2 %v284_v25  ;;  %v7343_v17 = vld [vmem:[#allocation2 + $0xb30] sm:$0xff] }
 0x156   :  { %4696 = vmatpush.bf16.msra.mxu2 %v7328_v22  ;;  %4665 = vmatmul.bf16.vlgmr.msrb.gmra.mxu3 %v285_v27  ;;  %v7350_v22 = vld [vmem:[#allocation2 + $0xb68] sm:$0xff]  ;;  %v7341_v27 = vld [vmem:[#allocation2 + $0xb20] sm:$0xff] }
 0x157   :  { %4709 = vmatpush.bf16.msra.mxu3 %v7336_v23  ;;  %v7358_v23 = vld [vmem:[#allocation2 + $0xba8] sm:$0xff] }
 0x158   :  { %4671 = vmatpush.bf16.msra.mxu0 %v7311_v28  ;;  %v4445_v48 = vpop.f32.mrf.mxu2  ;;  %v4421_v51 = vpop.f32.mrf.mxu0  ;;  %v7349_v28 = vld [vmem:[#allocation2 + $0xb60] sm:$0xff] }
 0x159   :  { %4684 = vmatpush.bf16.msra.mxu1 %v7319_v29  ;;  %v4446_v49 = vadd.f32 %v4445_v48, %v4433_v43  ;;  %v4458_v50 = vpop.f32.mrf.mxu3  ;;  %v4434_v55 = vpop.f32.mrf.mxu1  ;;  %v7347_v43 = vld [vmem:[#allocation2 + $0xb50] sm:$0xff]  ;;  %v7346_v48 = vld [vmem:[#allocation2 + $0xb48] sm:$0xff] }
 0x15a   :  { %4697 = vmatpush.bf16.msra.mxu2 %v7327_v30  ;;  %v7357_v30 = vld [vmem:[#allocation2 + $0xba0] sm:$0xff]  ;;  %v7362_v51 = vld [vmem:[#allocation2 + $0xbc8] sm:$0xff] }
 0x15b   :  { %4710 = vmatpush.bf16.msra.mxu3 %v7335_v31  ;;  %v7715_v52 = vadd.f32 %v4458_v50, %v4446_v49  ;;  %v7365_v31 = vld [vmem:[#allocation2 + $0xbe0] sm:$0xff]  ;;  %v92_v49 = vld [vmem:[%s7742_s0 + $0x60] sm:$0xff]  ;;  %v7354_v50 = vld [vmem:[#allocation2 + $0xb88] sm:$0xff] }
 0x15c   :  { %4672 = vmatpush.bf16.msra.mxu0 %v7310_v32  ;;  %171 = vst [vmem:[#allocation1] ss:$4 sm:$0xff] %v92_v49  ;;  %v7345_v55 = vld [vmem:[#allocation2 + $0xb40] sm:$0xff] }
 0x15d   :  { %4685 = vmatpush.bf16.msra.mxu1 %v7318_v33  ;;  %v7340_v33 = vld [vmem:[#allocation2 + $0xb18] sm:$0xff] }
 0x15e   :  { %4698 = vmatpush.bf16.msra.mxu2 %v7326_v34  ;;  %v7348_v34 = vld [vmem:[#allocation2 + $0xb58] sm:$0xff] }
 0x15f   :  { %4711 = vmatpush.bf16.msra.mxu3 %v7334_v35  ;;  %v7356_v35 = vld [vmem:[#allocation2 + $0xb98] sm:$0xff] }
 0x160   :  { %4673 = vmatpush.bf16.msra.mxu0 %v7309_v38  ;;  %v4447_v63 = vpop.f32.mrf.mxu2 }
 0x161   :  { %4686 = vmatpush.bf16.msra.mxu1 %v7317_v39  ;;  %v4460_v0 = vpop.f32.mrf.mxu3  ;;  %v170_v63 = vld.sshfl [vmem:[#allocation1 + $0x38] sm:$0xff pattern:$0x73625140] }
 0x162   :  { %4699 = vmatpush.bf16.msra.mxu2 %v7325_v41  ;;  %v7392_v0 = vld [vmem:[#allocation2 + $0xcb8] sm:$0xff] }
 0x163   :  { %4712 = vmatpush.bf16.msra.mxu3 %v7333_v42  ;;  %v7339_v42 = vld [vmem:[#allocation2 + $0xb10] sm:$0xff]  ;;  %v173_v49 = vld.sshfl [vmem:[#allocation1] sm:$0xff pattern:$0x73625140] }
 0x164   :  { %4674 = vmatpush.bf16.msra.mxu0 %v7308_v44 }
 0x165   :  { %4687 = vmatpush.bf16.msra.mxu1 %v7316_v45  ;;  %v7355_v45 = vld [vmem:[#allocation2 + $0xb90] sm:$0xff] }
 0x166   :  { %4700 = vmatpush.bf16.msra.mxu2 %v7324_v46  ;;  %v7363_v46 = vld [vmem:[#allocation2 + $0xbd0] sm:$0xff] }
 0x167   :  { %4713 = vmatpush.bf16.msra.mxu3 %v7332_v47  ;;  %v7338_v47 = vld [vmem:[#allocation2 + $0xb08] sm:$0xff] }
 0x168   :  { %4675 = vmatpush.bf16.msra.mxu0 %v7307_v53 }
 0x169   :  { %4688 = vmatpush.bf16.msra.mxu1 %v7315_v54  ;;  %v7337_v54 = vld [vmem:[#allocation2 + $0xb00] sm:$0xff] }
 0x16a   :  { %4701 = vmatpush.bf16.msra.mxu2 %v7323_v56  ;;  %v7353_v56 = vld [vmem:[#allocation2 + $0xb80] sm:$0xff] }
 0x16b   :  { %4714 = vmatpush.bf16.msra.mxu3 %v7331_v57  ;;  %v7361_v57 = vld [vmem:[#allocation2 + $0xbc0] sm:$0xff] }
 0x16c   :  { %4676 = vmatpush.bf16.msra.mxu0 %v7306_v58  ;;  %v7376_v58 = vld [vmem:[#allocation2 + $0xc38] sm:$0xff] }
 0x16d   :  { %4689 = vmatpush.bf16.msra.mxu1 %v7314_v59  ;;  %v7384_v59 = vld [vmem:[#allocation2 + $0xc78] sm:$0xff] }
 0x16e   :  { %4702 = vmatpush.bf16.msra.mxu2 %v7322_v61  ;;  %v169_v61 = vld.sshfl [vmem:[#allocation1 + $0x30] sm:$0xff pattern:$0x73625140] }
 0x16f   :  { %4715 = vmatpush.bf16.msra.mxu3 %v7330_v62  ;;  %v168_v62 = vld.sshfl [vmem:[#allocation1 + $0x28] sm:$0xff pattern:$0x73625140] }
 0x170   :  { %4677 = vmatpush.bf16.msra.mxu0 %v7305_v1  ;;  %v4471_v25 = vpop.f32.mrf.mxu0  ;;  %v7400_v1 = vld [vmem:[#allocation2 + $0xcf8] sm:$0xff] }
 0x171   :  { %4690 = vmatpush.bf16.msra.mxu1 %v7313_v2  ;;  %v4472_v26 = vadd.f32 %v4471_v25, %v7715_v52  ;;  %v4484_v29 = vpop.f32.mrf.mxu1  ;;  %v290_v2 = vpack.c.bf16 %v167_v60, %v167_v60  ;;  %v7396_v25 = vld [vmem:[#allocation2 + $0xcd8] sm:$0xff]  ;;  %v7415_v60 = vld [vmem:[#allocation2 + $0xd70] sm:$0xff] }
 0x172   :  { %4703 = vmatpush.bf16.msra.mxu2 %v7321_v3  ;;  %v292_v3 = vpack.c.bf16 %v169_v61, %v169_v61  ;;  %v7423_v61 = vld [vmem:[#allocation2 + $0xdb0] sm:$0xff] }
 0x173   :  { %4716 = vmatpush.bf16.msra.mxu3 %v7329_v4  ;;  %4678 = vmatmul.bf16.vlgmr.msra.gmra.mxu0 %v286_v13  ;;  %v4485_v32 = vadd.f32 %v4484_v29, %v4472_v26  ;;  %v291_v4 = vpack.c.bf16 %v168_v62, %v168_v62  ;;  %v7398_v13 = vld [vmem:[#allocation2 + $0xce8] sm:$0xff]  ;;  %v7431_v62 = vld [vmem:[#allocation2 + $0xdf0] sm:$0xff] }
 0x174   :  { %4722 = vmatpush.bf16.msrb.mxu0 %v7344_v5  ;;  %4691 = vmatmul.bf16.vlgmr.msra.gmra.mxu1 %v287_v15  ;;  %v293_v5 = vpack.c.bf16 %v170_v63, %v170_v63  ;;  %v7406_v63 = vld [vmem:[#allocation2 + $0xd28] sm:$0xff] }
 0x175   :  { %4735 = vmatpush.bf16.msrb.mxu1 %v7352_v6  ;;  %4704 = vmatmul.bf16.vlgmr.msra.gmra.mxu2 %v288_v14  ;;  %v7375_v6 = vld [vmem:[#allocation2 + $0xc30] sm:$0xff] }
 0x176   :  { %4748 = vmatpush.bf16.msrb.mxu2 %v7360_v11  ;;  %4717 = vmatmul.bf16.vlgmr.msra.gmra.mxu3 %v289_v16  ;;  %v7382_v11 = vld [vmem:[#allocation2 + $0xc68] sm:$0xff]  ;;  %v7373_v16 = vld [vmem:[#allocation2 + $0xc20] sm:$0xff] }
 0x177   :  { %4761 = vmatpush.bf16.msrb.mxu3 %v7368_v12  ;;  %v7390_v12 = vld [vmem:[#allocation2 + $0xca8] sm:$0xff] }
 0x178   :  { %4723 = vmatpush.bf16.msrb.mxu0 %v7343_v17  ;;  %v4497_v37 = vpop.f32.mrf.mxu2  ;;  %v4473_v40 = vpop.f32.mrf.mxu0  ;;  %v7381_v17 = vld [vmem:[#allocation2 + $0xc60] sm:$0xff] }
 0x179   :  { %4736 = vmatpush.bf16.msrb.mxu1 %v7351_v18  ;;  %v4498_v38 = vadd.f32 %v4497_v37, %v4485_v32  ;;  %v4510_v39 = vpop.f32.mrf.mxu3  ;;  %v4486_v44 = vpop.f32.mrf.mxu1  ;;  %v7379_v32 = vld [vmem:[#allocation2 + $0xc50] sm:$0xff]  ;;  %v7378_v37 = vld [vmem:[#allocation2 + $0xc48] sm:$0xff] }
 0x17a   :  { %4749 = vmatpush.bf16.msrb.mxu2 %v7359_v19  ;;  %v7389_v19 = vld [vmem:[#allocation2 + $0xca0] sm:$0xff]  ;;  %v7394_v40 = vld [vmem:[#allocation2 + $0xcc8] sm:$0xff] }
 0x17b   :  { %4762 = vmatpush.bf16.msrb.mxu3 %v7367_v20  ;;  %v7721_v41 = vadd.f32 %v4510_v39, %v4498_v38  ;;  %v7397_v20 = vld [vmem:[#allocation2 + $0xce0] sm:$0xff]  ;;  %v7386_v39 = vld [vmem:[#allocation2 + $0xc88] sm:$0xff] }
 0x17c   :  { %4724 = vmatpush.bf16.msrb.mxu0 %v7342_v21  ;;  %v93_v38 = vld [vmem:[%s7742_s0 + $0x68] sm:$0xff] }
 0x17d   :  { %4737 = vmatpush.bf16.msrb.mxu1 %v7350_v22  ;;  %v7372_v22 = vld [vmem:[#allocation2 + $0xc18] sm:$0xff]  ;;  %172 = vst [vmem:[#allocation1 + $0x20] ss:$4 sm:$0xff] %v93_v38  ;;  %v7377_v44 = vld [vmem:[#allocation2 + $0xc40] sm:$0xff] }
 0x17e   :  { %4750 = vmatpush.bf16.msrb.mxu2 %v7358_v23  ;;  %v7380_v23 = vld [vmem:[#allocation2 + $0xc58] sm:$0xff] }
 0x17f   :  { %4763 = vmatpush.bf16.msrb.mxu3 %v7366_v24  ;;  %v7388_v24 = vld [vmem:[#allocation2 + $0xc98] sm:$0xff] }
 0x180   :  { %4725 = vmatpush.bf16.msrb.mxu0 %v7341_v27  ;;  %v4499_v52 = vpop.f32.mrf.mxu2 }
 0x181   :  { %4738 = vmatpush.bf16.msrb.mxu1 %v7349_v28  ;;  %v4512_v53 = vpop.f32.mrf.mxu3  ;;  %v176_v52 = vld.sshfl [vmem:[#allocation1 + $0x18] sm:$0xff pattern:$0x73625140] }
 0x182   :  { %4751 = vmatpush.bf16.msrb.mxu2 %v7357_v30  ;;  %v7424_v53 = vld [vmem:[#allocation2 + $0xdb8] sm:$0xff] }
 0x183   :  { %4764 = vmatpush.bf16.msrb.mxu3 %v7365_v31  ;;  %v7371_v31 = vld [vmem:[#allocation2 + $0xc10] sm:$0xff] }
 0x184   :  { %4726 = vmatpush.bf16.msrb.mxu0 %v7340_v33  ;;  %v177_v38 = vld.sshfl [vmem:[#allocation1 + $0x20] sm:$0xff pattern:$0x73625140] }
 0x185   :  { %4739 = vmatpush.bf16.msrb.mxu1 %v7348_v34  ;;  %v7387_v34 = vld [vmem:[#allocation2 + $0xc90] sm:$0xff] }
 0x186   :  { %4752 = vmatpush.bf16.msrb.mxu2 %v7356_v35  ;;  %v7395_v35 = vld [vmem:[#allocation2 + $0xcd0] sm:$0xff] }
 0x187   :  { %4765 = vmatpush.bf16.msrb.mxu3 %v7364_v36  ;;  %v7370_v36 = vld [vmem:[#allocation2 + $0xc08] sm:$0xff] }
 0x188   :  { %4727 = vmatpush.bf16.msrb.mxu0 %v7339_v42 }
 0x189   :  { %4740 = vmatpush.bf16.msrb.mxu1 %v7347_v43  ;;  %v7369_v43 = vld [vmem:[#allocation2 + $0xc00] sm:$0xff] }
 0x18a   :  { %4753 = vmatpush.bf16.msrb.mxu2 %v7355_v45  ;;  %v7385_v45 = vld [vmem:[#allocation2 + $0xc80] sm:$0xff] }
 0x18b   :  { %4766 = vmatpush.bf16.msrb.mxu3 %v7363_v46  ;;  %v7393_v46 = vld [vmem:[#allocation2 + $0xcc0] sm:$0xff] }
 0x18c   :  { %4728 = vmatpush.bf16.msrb.mxu0 %v7338_v47  ;;  %v7408_v47 = vld [vmem:[#allocation2 + $0xd38] sm:$0xff] }
 0x18d   :  { %4741 = vmatpush.bf16.msrb.mxu1 %v7346_v48  ;;  %v7416_v48 = vld [vmem:[#allocation2 + $0xd78] sm:$0xff] }
 0x18e   :  { %4754 = vmatpush.bf16.msrb.mxu2 %v7354_v50  ;;  %v175_v50 = vld.sshfl [vmem:[#allocation1 + $0x10] sm:$0xff pattern:$0x73625140] }
 0x18f   :  { %4767 = vmatpush.bf16.msrb.mxu3 %v7362_v51  ;;  %v174_v51 = vld.sshfl [vmem:[#allocation1 + $0x8] sm:$0xff pattern:$0x73625140] }
 0x190   :  { %4729 = vmatpush.bf16.msrb.mxu0 %v7337_v54  ;;  %v4523_v14 = vpop.f32.mrf.mxu0  ;;  %v7432_v54 = vld [vmem:[#allocation2 + $0xdf8] sm:$0xff] }
 0x191   :  { %4742 = vmatpush.bf16.msrb.mxu1 %v7345_v55  ;;  %v4524_v15 = vadd.f32 %v4523_v14, %v7721_v41  ;;  %v4536_v18 = vpop.f32.mrf.mxu1  ;;  %v294_v55 = vpack.c.bf16 %v173_v49, %v173_v49  ;;  %v7428_v14 = vld [vmem:[#allocation2 + $0xdd8] sm:$0xff]  ;;  %v7447_v49 = vld [vmem:[#allocation2 + $0xe70] sm:$0xff] }
 0x192   :  { %4755 = vmatpush.bf16.msrb.mxu2 %v7353_v56  ;;  %v296_v56 = vpack.c.bf16 %v175_v50, %v175_v50  ;;  %v7455_v50 = vld [vmem:[#allocation2 + $0xeb0] sm:$0xff] }
 0x193   :  { %4768 = vmatpush.bf16.msrb.mxu3 %v7361_v57  ;;  %4730 = vmatmul.bf16.vlgmr.msrb.gmra.mxu0 %v290_v2  ;;  %v4537_v21 = vadd.f32 %v4536_v18, %v4524_v15  ;;  %v295_v57 = vpack.c.bf16 %v174_v51, %v174_v51  ;;  %v7430_v2 = vld [vmem:[#allocation2 + $0xde8] sm:$0xff]  ;;  %v7463_v51 = vld [vmem:[#allocation2 + $0xef0] sm:$0xff] }
 0x194   :  { %4774 = vmatpush.bf16.msra.mxu0 %v7376_v58  ;;  %4743 = vmatmul.bf16.vlgmr.msrb.gmra.mxu1 %v291_v4  ;;  %v297_v58 = vpack.c.bf16 %v176_v52, %v176_v52  ;;  %v7438_v52 = vld [vmem:[#allocation2 + $0xe28] sm:$0xff] }
 0x195   :  { %4787 = vmatpush.bf16.msra.mxu1 %v7384_v59  ;;  %4756 = vmatmul.bf16.vlgmr.msrb.gmra.mxu2 %v292_v3  ;;  %v7407_v59 = vld [vmem:[#allocation2 + $0xd30] sm:$0xff] }
 0x196   :  { %4800 = vmatpush.bf16.msra.mxu2 %v7392_v0  ;;  %4769 = vmatmul.bf16.vlgmr.msrb.gmra.mxu3 %v293_v5  ;;  %v7414_v0 = vld [vmem:[#allocation2 + $0xd68] sm:$0xff]  ;;  %v7405_v5 = vld [vmem:[#allocation2 + $0xd20] sm:$0xff] }
 0x197   :  { %4813 = vmatpush.bf16.msra.mxu3 %v7400_v1  ;;  %v7422_v1 = vld [vmem:[#allocation2 + $0xda8] sm:$0xff] }
 0x198   :  { %4775 = vmatpush.bf16.msra.mxu0 %v7375_v6  ;;  %v4549_v26 = vpop.f32.mrf.mxu2  ;;  %v4525_v29 = vpop.f32.mrf.mxu0  ;;  %v7413_v6 = vld [vmem:[#allocation2 + $0xd60] sm:$0xff] }
 0x199   :  { %4788 = vmatpush.bf16.msra.mxu1 %v7383_v7  ;;  %v4550_v27 = vadd.f32 %v4549_v26, %v4537_v21  ;;  %v4562_v28 = vpop.f32.mrf.mxu3  ;;  %v4538_v33 = vpop.f32.mrf.mxu1  ;;  %v7411_v21 = vld [vmem:[#allocation2 + $0xd50] sm:$0xff]  ;;  %v7402_v26 = vld [vmem:[#allocation2 + $0xd08] sm:$0xff] }
 0x19a   :  { %4801 = vmatpush.bf16.msra.mxu2 %v7391_v8  ;;  %v7421_v8 = vld [vmem:[#allocation2 + $0xda0] sm:$0xff]  ;;  %v7426_v29 = vld [vmem:[#allocation2 + $0xdc8] sm:$0xff] }
 0x19b   :  { %4814 = vmatpush.bf16.msra.mxu3 %v7399_v9  ;;  %v7727_v30 = vadd.f32 %v4562_v28, %v4550_v27  ;;  %v7429_v9 = vld [vmem:[#allocation2 + $0xde0] sm:$0xff]  ;;  %v7410_v27 = vld [vmem:[#allocation2 + $0xd48] sm:$0xff] }
 0x19c   :  { %4776 = vmatpush.bf16.msra.mxu0 %v7374_v10  ;;  %v7418_v28 = vld [vmem:[#allocation2 + $0xd88] sm:$0xff]  ;;  %v7409_v33 = vld [vmem:[#allocation2 + $0xd40] sm:$0xff] }
 0x19d   :  { %4789 = vmatpush.bf16.msra.mxu1 %v7382_v11  ;;  %v7404_v11 = vld [vmem:[#allocation2 + $0xd18] sm:$0xff] }
 0x19e   :  { %4802 = vmatpush.bf16.msra.mxu2 %v7390_v12  ;;  %v7412_v12 = vld [vmem:[#allocation2 + $0xd58] sm:$0xff] }
 0x19f   :  { %4815 = vmatpush.bf16.msra.mxu3 %v7398_v13  ;;  %v7420_v13 = vld [vmem:[#allocation2 + $0xd98] sm:$0xff] }
 0x1a0   :  { %4777 = vmatpush.bf16.msra.mxu0 %v7373_v16  ;;  %v4551_v41 = vpop.f32.mrf.mxu2 }
 0x1a1   :  { %4790 = vmatpush.bf16.msra.mxu1 %v7381_v17  ;;  %v4564_v42 = vpop.f32.mrf.mxu3  ;;  %v180_v41 = vld.sshfl [vmem:[#allocation1 + $0x38] sm:$0xff pattern:$0x73625140] }
 0x1a2   :  { %4803 = vmatpush.bf16.msra.mxu2 %v7389_v19  ;;  %v7456_v42 = vld [vmem:[#allocation2 + $0xeb8] sm:$0xff] }
 0x1a3   :  { %4816 = vmatpush.bf16.msra.mxu3 %v7397_v20  ;;  %v7403_v20 = vld [vmem:[#allocation2 + $0xd10] sm:$0xff] }
 0x1a4   :  { %4778 = vmatpush.bf16.msra.mxu0 %v7372_v22 }
 0x1a5   :  { %4791 = vmatpush.bf16.msra.mxu1 %v7380_v23  ;;  %v7419_v23 = vld [vmem:[#allocation2 + $0xd90] sm:$0xff] }
 0x1a6   :  { %4804 = vmatpush.bf16.msra.mxu2 %v7388_v24  ;;  %v7427_v24 = vld [vmem:[#allocation2 + $0xdd0] sm:$0xff] }
 0x1a7   :  { %4817 = vmatpush.bf16.msra.mxu3 %v7396_v25  ;;  %v94_v25 = vld [vmem:[%s7742_s0 + $0x70] sm:$0xff]  ;;  %s7616_s0 = smov [#allocation10]  }
 0x1a8   :  { %4779 = vmatpush.bf16.msra.mxu0 %v7371_v31  ;;  %181 = vst [vmem:[#allocation1] ss:$4 sm:$0xff] %v94_v25  ;;  %s5019_s4 = sshll.u32 %s7616_s0, 4  ;;  %s5020_s4 = int_to_ptr.vmem [resolvable:$true] %s5019_s4 }
 0x1a9   :  { %4792 = vmatpush.bf16.msra.mxu1 %v7379_v32  ;;  %v7401_v32 = vld [vmem:[#allocation2 + $0xd00] sm:$0xff] }
 0x1aa   :  { %4805 = vmatpush.bf16.msra.mxu2 %v7387_v34  ;;  %v7417_v34 = vld [vmem:[#allocation2 + $0xd80] sm:$0xff] }
 0x1ab   :  { %4818 = vmatpush.bf16.msra.mxu3 %v7395_v35  ;;  %v7425_v35 = vld [vmem:[#allocation2 + $0xdc0] sm:$0xff] }
 0x1ac   :  { %4780 = vmatpush.bf16.msra.mxu0 %v7370_v36  ;;  %v7440_v36 = vld [vmem:[#allocation2 + $0xe38] sm:$0xff] }
 0x1ad   :  { %4793 = vmatpush.bf16.msra.mxu1 %v7378_v37  ;;  %v7448_v37 = vld [vmem:[#allocation2 + $0xe78] sm:$0xff] }
 0x1ae   :  { %4806 = vmatpush.bf16.msra.mxu2 %v7386_v39  ;;  %v179_v39 = vld.sshfl [vmem:[#allocation1 + $0x30] sm:$0xff pattern:$0x73625140] }
 0x1af   :  { %4819 = vmatpush.bf16.msra.mxu3 %v7394_v40  ;;  %v178_v40 = vld.sshfl [vmem:[#allocation1 + $0x28] sm:$0xff pattern:$0x73625140] }
 0x1b0   :  { %4781 = vmatpush.bf16.msra.mxu0 %v7369_v43  ;;  %v4575_v3 = vpop.f32.mrf.mxu0  ;;  %v7464_v43 = vld [vmem:[#allocation2 + $0xef8] sm:$0xff]  ;;  %v183_v25 = vld.sshfl [vmem:[#allocation1 + $0x8] sm:$0xff pattern:$0x73625140] }
 0x1b1   :  { %4794 = vmatpush.bf16.msra.mxu1 %v7377_v44  ;;  %v4576_v4 = vadd.f32 %v4575_v3, %v7727_v30  ;;  %v4588_v7 = vpop.f32.mrf.mxu1  ;;  %v298_v44 = vpack.c.bf16 %v177_v38, %v177_v38  ;;  %v7460_v3 = vld [vmem:[#allocation2 + $0xed8] sm:$0xff] }
 0x1b2   :  { %4807 = vmatpush.bf16.msra.mxu2 %v7385_v45  ;;  %v300_v45 = vpack.c.bf16 %v179_v39, %v179_v39 }
 0x1b3   :  { %4820 = vmatpush.bf16.msra.mxu3 %v7393_v46  ;;  %4782 = vmatmul.bf16.vlgmr.msra.gmra.mxu0 %v294_v55  ;;  %v4589_v10 = vadd.f32 %v4588_v7, %v4576_v4  ;;  %v299_v46 = vpack.c.bf16 %v178_v40, %v178_v40  ;;  %v7462_v55 = vld [vmem:[#allocation2 + $0xee8] sm:$0xff] }
 0x1b4   :  { %4826 = vmatpush.bf16.msrb.mxu0 %v7408_v47  ;;  %4795 = vmatmul.bf16.vlgmr.msra.gmra.mxu1 %v295_v57  ;;  %v301_v47 = vpack.c.bf16 %v180_v41, %v180_v41 }
 0x1b5   :  { %4839 = vmatpush.bf16.msrb.mxu1 %v7416_v48  ;;  %4808 = vmatmul.bf16.vlgmr.msra.gmra.mxu2 %v296_v56  ;;  %v7439_v48 = vld [vmem:[#allocation2 + $0xe30] sm:$0xff] }
 0x1b6   :  { %4852 = vmatpush.bf16.msrb.mxu2 %v7424_v53  ;;  %4821 = vmatmul.bf16.vlgmr.msra.gmra.mxu3 %v297_v58  ;;  %v7446_v53 = vld [vmem:[#allocation2 + $0xe68] sm:$0xff]  ;;  %v7437_v58 = vld [vmem:[#allocation2 + $0xe20] sm:$0xff] }
 0x1b7   :  { %4865 = vmatpush.bf16.msrb.mxu3 %v7432_v54  ;;  %v7454_v54 = vld [vmem:[#allocation2 + $0xea8] sm:$0xff] }
 0x1b8   :  { %4827 = vmatpush.bf16.msrb.mxu0 %v7407_v59  ;;  %v4601_v15 = vpop.f32.mrf.mxu2  ;;  %v4577_v18 = vpop.f32.mrf.mxu0  ;;  %v7445_v59 = vld [vmem:[#allocation2 + $0xe60] sm:$0xff] }
 0x1b9   :  { %4840 = vmatpush.bf16.msrb.mxu1 %v7415_v60  ;;  %v4602_v16 = vadd.f32 %v4601_v15, %v4589_v10  ;;  %v4614_v17 = vpop.f32.mrf.mxu3  ;;  %v4590_v22 = vpop.f32.mrf.mxu1  ;;  %v7443_v10 = vld [vmem:[#allocation2 + $0xe50] sm:$0xff]  ;;  %v7442_v15 = vld [vmem:[#allocation2 + $0xe48] sm:$0xff] }
 0x1ba   :  { %4853 = vmatpush.bf16.msrb.mxu2 %v7423_v61  ;;  %v7453_v61 = vld [vmem:[#allocation2 + $0xea0] sm:$0xff] }
 0x1bb   :  { %4866 = vmatpush.bf16.msrb.mxu3 %v7431_v62  ;;  %v7733_v19 = vadd.f32 %v4614_v17, %v4602_v16  ;;  %v7461_v62 = vld [vmem:[#allocation2 + $0xee0] sm:$0xff]  ;;  %v7450_v16 = vld [vmem:[#allocation2 + $0xe88] sm:$0xff] }
 0x1bc   :  { %4828 = vmatpush.bf16.msrb.mxu0 %v7406_v63  ;;  %v7458_v17 = vld [vmem:[#allocation2 + $0xec8] sm:$0xff]  ;;  %v7449_v22 = vld [vmem:[#allocation2 + $0xe80] sm:$0xff] }
 0x1bd   :  { %4841 = vmatpush.bf16.msrb.mxu1 %v7414_v0  ;;  %v7436_v0 = vld [vmem:[#allocation2 + $0xe18] sm:$0xff] }
 0x1be   :  { %4854 = vmatpush.bf16.msrb.mxu2 %v7422_v1  ;;  %v7444_v1 = vld [vmem:[#allocation2 + $0xe58] sm:$0xff] }
 0x1bf   :  { %4867 = vmatpush.bf16.msrb.mxu3 %v7430_v2  ;;  %v7452_v2 = vld [vmem:[#allocation2 + $0xe98] sm:$0xff] }
 0x1c0   :  { %4829 = vmatpush.bf16.msrb.mxu0 %v7405_v5  ;;  %v4603_v30 = vpop.f32.mrf.mxu2 }
 0x1c1   :  { %4842 = vmatpush.bf16.msrb.mxu1 %v7413_v6  ;;  %v4616_v31 = vpop.f32.mrf.mxu3 }
 0x1c2   :  { %4855 = vmatpush.bf16.msrb.mxu2 %v7421_v8 }
 0x1c3   :  { %4868 = vmatpush.bf16.msrb.mxu3 %v7429_v9  ;;  %v7435_v9 = vld [vmem:[#allocation2 + $0xe10] sm:$0xff] }
 0x1c4   :  { %4830 = vmatpush.bf16.msrb.mxu0 %v7404_v11 }
 0x1c5   :  { %4843 = vmatpush.bf16.msrb.mxu1 %v7412_v12  ;;  %v7451_v12 = vld [vmem:[#allocation2 + $0xe90] sm:$0xff] }
 0x1c6   :  { %4856 = vmatpush.bf16.msrb.mxu2 %v7420_v13  ;;  %v7459_v13 = vld [vmem:[#allocation2 + $0xed0] sm:$0xff] }
 0x1c7   :  { %4869 = vmatpush.bf16.msrb.mxu3 %v7428_v14  ;;  %v7434_v14 = vld [vmem:[#allocation2 + $0xe08] sm:$0xff] }
 0x1c8   :  { %4831 = vmatpush.bf16.msrb.mxu0 %v7403_v20 }
 0x1c9   :  { %4844 = vmatpush.bf16.msrb.mxu1 %v7411_v21  ;;  %v7441_v21 = vld [vmem:[#allocation2 + $0xe40] sm:$0xff] }
 0x1ca   :  { %4857 = vmatpush.bf16.msrb.mxu2 %v7419_v23  ;;  %v7457_v23 = vld [vmem:[#allocation2 + $0xec0] sm:$0xff] }
 0x1cb   :  { %4870 = vmatpush.bf16.msrb.mxu3 %v7427_v24  ;;  %v182_v24 = vld.sshfl [vmem:[#allocation1] sm:$0xff pattern:$0x73625140] }
 0x1cc   :  { %4832 = vmatpush.bf16.msrb.mxu0 %v7402_v26  ;;  %v184_v26 = vld.sshfl [vmem:[#allocation1 + $0x10] sm:$0xff pattern:$0x73625140] }
 0x1cd   :  { %4845 = vmatpush.bf16.msrb.mxu1 %v7410_v27  ;;  %v185_v27 = vld.sshfl [vmem:[#allocation1 + $0x18] sm:$0xff pattern:$0x73625140]  ;;  %v304_v30 = vpack.c.bf16 %v184_v26, %v184_v26 }
 0x1ce   :  { %4858 = vmatpush.bf16.msrb.mxu2 %v7418_v28  ;;  %v302_v28 = vpack.c.bf16 %v182_v24, %v182_v24  ;;  %v305_v31 = vpack.c.bf16 %v185_v27, %v185_v27 }
 0x1cf   :  { %4871 = vmatpush.bf16.msrb.mxu3 %v7426_v29  ;;  %v303_v29 = vpack.c.bf16 %v183_v25, %v183_v25 }
 0x1d0   :  { %4833 = vmatpush.bf16.msrb.mxu0 %v7401_v32  ;;  %v4627_v56 = vpop.f32.mrf.mxu0 }
 0x1d1   :  { %4846 = vmatpush.bf16.msrb.mxu1 %v7409_v33  ;;  %v4628_v57 = vadd.f32 %v4627_v56, %v7733_v19  ;;  %v4640_v60 = vpop.f32.mrf.mxu1  ;;  %v7433_v19 = vld [vmem:[#allocation2 + $0xe00] sm:$0xff] }
 0x1d2   :  { %4859 = vmatpush.bf16.msrb.mxu2 %v7417_v34 }
 0x1d3   :  { %4872 = vmatpush.bf16.msrb.mxu3 %v7425_v35  ;;  %4834 = vmatmul.bf16.vlgmr.msrb.gmra.mxu0 %v298_v44  ;;  %v4641_v63 = vadd.f32 %v4640_v60, %v4628_v57  ;;  %v7472_v60 = vld [vmem:[#allocation7 + $0x38] sm:$0xff] }
 0x1d4   :  { %4878 = vmatpush.bf16.msra.mxu0 %v7440_v36  ;;  %4847 = vmatmul.bf16.vlgmr.msrb.gmra.mxu1 %v299_v46 }
 0x1d5   :  { %4891 = vmatpush.bf16.msra.mxu1 %v7448_v37  ;;  %4860 = vmatmul.bf16.vlgmr.msrb.gmra.mxu2 %v300_v45 }
 0x1d6   :  { %4904 = vmatpush.bf16.msra.mxu2 %v7456_v42  ;;  %4873 = vmatmul.bf16.vlgmr.msrb.gmra.mxu3 %v301_v47 }
 0x1d7   :  { %4917 = vmatpush.bf16.msra.mxu3 %v7464_v43 }
 0x1d8   :  { %4879 = vmatpush.bf16.msra.mxu0 %v7439_v48  ;;  %v4653_v4 = vpop.f32.mrf.mxu2  ;;  %v4629_v7 = vpop.f32.mrf.mxu0 }
 0x1d9   :  { %4892 = vmatpush.bf16.msra.mxu1 %v7447_v49  ;;  %v4654_v5 = vadd.f32 %v4653_v4, %v4641_v63  ;;  %v4666_v6 = vpop.f32.mrf.mxu3  ;;  %v4642_v11 = vpop.f32.mrf.mxu1  ;;  %v7471_v63 = vld [vmem:[#allocation7 + $0x30] sm:$0xff]  ;;  %v7468_v4 = vld [vmem:[#allocation7 + $0x18] sm:$0xff] }
 0x1da   :  { %4905 = vmatpush.bf16.msra.mxu2 %v7455_v50 }
 0x1db   :  { %4918 = vmatpush.bf16.msra.mxu3 %v7463_v51  ;;  %v4667_v8 = vadd.f32 %v4666_v6, %v4654_v5  ;;  %v7467_v6 = vld [vmem:[#allocation7 + $0x10] sm:$0xff] }
 0x1dc   :  { %4880 = vmatpush.bf16.msra.mxu0 %v7438_v52 }
 0x1dd   :  { %4893 = vmatpush.bf16.msra.mxu1 %v7446_v53 }
 0x1de   :  { %4906 = vmatpush.bf16.msra.mxu2 %v7454_v54 }
 0x1df   :  { %4919 = vmatpush.bf16.msra.mxu3 %v7462_v55 }
 0x1e0   :  { %4881 = vmatpush.bf16.msra.mxu0 %v7437_v58  ;;  %v4655_v18 = vpop.f32.mrf.mxu2 }
 0x1e1   :  { %4894 = vmatpush.bf16.msra.mxu1 %v7445_v59  ;;  %v4668_v20 = vpop.f32.mrf.mxu3 }
 0x1e2   :  { %4907 = vmatpush.bf16.msra.mxu2 %v7453_v61 }
 0x1e3   :  { %4920 = vmatpush.bf16.msra.mxu3 %v7461_v62 }
 0x1e4   :  { %4882 = vmatpush.bf16.msra.mxu0 %v7436_v0  ;;  %v7470_v0 = vld [vmem:[#allocation7 + $0x28] sm:$0xff] }
 0x1e5   :  { %4895 = vmatpush.bf16.msra.mxu1 %v7444_v1 }
 0x1e6   :  { %4908 = vmatpush.bf16.msra.mxu2 %v7452_v2 }
 0x1e7   :  { %4921 = vmatpush.bf16.msra.mxu3 %v7460_v3  ;;  %v7469_v3 = vld [vmem:[#allocation7 + $0x20] sm:$0xff] }
 0x1e8   :  { %4883 = vmatpush.bf16.msra.mxu0 %v7435_v9 }
 0x1e9   :  { %4896 = vmatpush.bf16.msra.mxu1 %v7443_v10 }
 0x1ea   :  { %4909 = vmatpush.bf16.msra.mxu2 %v7451_v12 }
 0x1eb   :  { %4922 = vmatpush.bf16.msra.mxu3 %v7459_v13  ;;  %v7465_v13 = vld [vmem:[#allocation7] sm:$0xff] }
 0x1ec   :  { %4884 = vmatpush.bf16.msra.mxu0 %v7434_v14 }
 0x1ed   :  { %4897 = vmatpush.bf16.msra.mxu1 %v7442_v15 }
 0x1ee   :  { %4910 = vmatpush.bf16.msra.mxu2 %v7450_v16 }
 0x1ef   :  { %4923 = vmatpush.bf16.msra.mxu3 %v7458_v17 }
 0x1f0   :  { %4885 = vmatpush.bf16.msra.mxu0 %v7433_v19  ;;  %v4679_v32 = vpop.f32.mrf.mxu0 }
 0x1f1   :  { %4898 = vmatpush.bf16.msra.mxu1 %v7441_v21  ;;  %v4680_v33 = vadd.f32 %v4679_v32, %v4667_v8  ;;  %v4692_v34 = vpop.f32.mrf.mxu1  ;;  %v7466_v8 = vld [vmem:[#allocation7 + $0x8] sm:$0xff] }
 0x1f2   :  { %4911 = vmatpush.bf16.msra.mxu2 %v7449_v22 }
 0x1f3   :  { %4924 = vmatpush.bf16.msra.mxu3 %v7457_v23  ;;  %4886 = vmatmul.bf16.vlgmr.msra.gmra.mxu0 %v302_v28  ;;  %v4693_v35 = vadd.f32 %v4692_v34, %v4680_v33 }
 0x1f4   :  { %4899 = vmatmul.bf16.vlgmr.msra.gmra.mxu1 %v303_v29  ;;  %5000 = vmatpush.bf16.msrb.mxu0 %v7472_v60 }
 0x1f5   :  { %4912 = vmatmul.bf16.vlgmr.msra.gmra.mxu2 %v304_v30 }
 0x1f6   :  { %4925 = vmatmul.bf16.vlgmr.msra.gmra.mxu3 %v305_v31 }
 0x1f8   :  { %v4705_v36 = vpop.f32.mrf.mxu2  ;;  %v4681_v39 = vpop.f32.mrf.mxu0  ;;  %5001 = vmatpush.bf16.msrb.mxu0 %v7471_v63 }
 0x1f9   :  { %v4706_v37 = vadd.f32 %v4705_v36, %v4693_v35  ;;  %v4718_v38 = vpop.f32.mrf.mxu3  ;;  %v4694_v41 = vpop.f32.mrf.mxu1 }
 0x1fb   :  { %v4719_v40 = vadd.f32 %v4718_v38, %v4706_v37  ;;  %v7481_v38 = vld [vmem:[#allocation8] ss:$0 sm:$0xff] }
 0x1fc   :  { %5002 = vmatpush.bf16.msrb.mxu0 %v7470_v0 }
 0x200   :  { %v4707_v42 = vpop.f32.mrf.mxu2  ;;  %5003 = vmatpush.bf16.msrb.mxu0 %v7469_v3 }
 0x201   :  { %v4720_v43 = vpop.f32.mrf.mxu3 }
 0x204   :  { %5004 = vmatpush.bf16.msrb.mxu0 %v7468_v4 }
 0x208   :  { %5005 = vmatpush.bf16.msrb.mxu0 %v7467_v6 }
 0x20c   :  { %5006 = vmatpush.bf16.msrb.mxu0 %v7466_v8 }
 0x210   :  { %v4731_v44 = vpop.f32.mrf.mxu0  ;;  %5007 = vmatpush.bf16.msrb.mxu0 %v7465_v13 }
 0x211   :  { %v4732_v45 = vadd.f32 %v4731_v44, %v4719_v40  ;;  %v4744_v46 = vpop.f32.mrf.mxu1 }
 0x213   :  { %v4745_v47 = vadd.f32 %v4744_v46, %v4732_v45 }
 0x218   :  { %v4757_v48 = vpop.f32.mrf.mxu2  ;;  %v4733_v51 = vpop.f32.mrf.mxu0 }
 0x219   :  { %v4758_v49 = vadd.f32 %v4757_v48, %v4745_v47  ;;  %v4770_v50 = vpop.f32.mrf.mxu3  ;;  %v4746_v53 = vpop.f32.mrf.mxu1 }
 0x21b   :  { %v4771_v52 = vadd.f32 %v4770_v50, %v4758_v49 }
 0x220   :  { %v4759_v54 = vpop.f32.mrf.mxu2 }
 0x221   :  { %v4772_v55 = vpop.f32.mrf.mxu3 }
 0x230   :  { %v4783_v56 = vpop.f32.mrf.mxu0 }
 0x231   :  { %v4796_v57 = vpop.f32.mrf.mxu1  ;;  %v4784_v10 = vadd.f32 %v4783_v56, %v4771_v52 }
 0x233   :  { %v4797_v15 = vadd.f32 %v4796_v57, %v4784_v10 }
 0x238   :  { %v4809_v58 = vpop.f32.mrf.mxu2  ;;  %v4785_v61 = vpop.f32.mrf.mxu0 }
 0x239   :  { %v4822_v59 = vpop.f32.mrf.mxu3  ;;  %v4798_v62 = vpop.f32.mrf.mxu1  ;;  %v4810_v16 = vadd.f32 %v4809_v58, %v4797_v15 }
 0x23b   :  { %v4823_v19 = vadd.f32 %v4822_v59, %v4810_v16 }
 0x240   :  { %v4811_v1 = vpop.f32.mrf.mxu2 }
 0x241   :  { %v4824_v2 = vpop.f32.mrf.mxu3 }
 0x250   :  { %v4835_v5 = vpop.f32.mrf.mxu0 }
 0x251   :  { %v4848_v7 = vpop.f32.mrf.mxu1  ;;  %v4836_v20 = vadd.f32 %v4835_v5, %v4823_v19 }
 0x253   :  { %v4849_v21 = vadd.f32 %v4848_v7, %v4836_v20 }
 0x258   :  { %v4861_v9 = vpop.f32.mrf.mxu2  ;;  %v4837_v12 = vpop.f32.mrf.mxu0 }
 0x259   :  { %v4874_v11 = vpop.f32.mrf.mxu3  ;;  %v4850_v14 = vpop.f32.mrf.mxu1  ;;  %v4862_v22 = vadd.f32 %v4861_v9, %v4849_v21 }
 0x25b   :  { %v4875_v23 = vadd.f32 %v4874_v11, %v4862_v22 }
 0x260   :  { %v4863_v17 = vpop.f32.mrf.mxu2 }
 0x261   :  { %v4876_v18 = vpop.f32.mrf.mxu3 }
 0x270   :  { %v4887_v24 = vpop.f32.mrf.mxu0 }
 0x271   :  { %v4900_v25 = vpop.f32.mrf.mxu1  ;;  %v4888_v26 = vadd.f32 %v4887_v24, %v4875_v23 }
 0x273   :  { %v4901_v27 = vadd.f32 %v4900_v25, %v4888_v26 }
 0x278   :  { %v4913_v28 = vpop.f32.mrf.mxu2  ;;  %v4889_v31 = vpop.f32.mrf.mxu0 }
 0x279   :  { %v4926_v29 = vpop.f32.mrf.mxu3  ;;  %v4914_v30 = vadd.f32 %v4913_v28, %v4901_v27  ;;  %v4902_v32 = vpop.f32.mrf.mxu1 }
 0x27b   :  { %v4927_v33 = vadd.f32 %v4926_v29, %v4914_v30 }
 0x27d   :  { %v4930_v34 = vmax.f32 %v4927_v33, 0.0 }
 0x27f   :  { %v4931_v35 = vpack.c.bf16 %v4930_v34, %v4930_v34 }
 0x280   :  { %v4915_v36 = vpop.f32.mrf.mxu2 }
 0x281   :  { %v4928_v37 = vpop.f32.mrf.mxu3  ;;  %5008 = vmatmul.bf16.vlgmr.msrb.gmra.mxu0 %v4931_v35 }
 0x2fe   :  { %v5009_v39 = vpop.f32.mrf.mxu0 }
 0x2ff   :  { %v5010_v40 = vadd.f32 %v7481_v38, %v5009_v39 }
 0x301   :  { %5013 = vst [vmem:[#allocation10] sm:$0x3] %v5010_v40 }
 0x302   :  { %5024 = dma.vmem_to_hbm [thread:$0]  %s5020_s4, 32, %s5022_s15, [#allocation4]  }
 0x306   :  { %v5011_v41 = vpop.f32.mrf.mxu0 }
 0x307   :  { %7608 = dma.done.wait [#allocation4], 32  }
 0x308   :  { %7609 = vsyncadd [#allocation4], 4294967264 }
 0x309   :  { %5029 = vsyncpa [#allocation3], 1 }
 0x30a   :  { %5030 = vsyncpa [#allocation6], 1 }
 0x30b   :  { %5031 = vsyncpa [#allocation9], 1 }
 0x30c   :  { %5032 = vsyncpa [#allocation4], 1 }

// kernel: forward.2
= control target key start
LH: loop header
LB: loop body
LE: loop exit
PB: predicated region body
PF: predicated region fallthrough
CT: control target
= control target key end

     0   :  { %10 = vsyncpa [#allocation3], 0  ;;  %s11887_s0 = inlined_call_operand.vmem [shape: f32[128,128], index: 0, kind: input, shape index: {}]   ;;  %s11888_s1 = inlined_call_operand.hbm [shape: bf16[6,640,128], index: 1, kind: input, shape index: {}]   ;;  %s11889_s2 = inlined_call_operand.hbm [shape: f32[6,1,128], index: 2, kind: input, shape index: {}]   ;;  %s11890_s3 = inlined_call_operand.hbm [shape: bf16[3,128,128], index: 3, kind: input, shape index: {}]   ;;  %s11891_s4 = inlined_call_operand.hbm [shape: f32[3,1,128], index: 4, kind: input, shape index: {}]   ;;  %s11892_s5 = inlined_call_operand.vmem [shape: f32[128,128], index: 5, kind: output, shape index: {}]  }
   0x1   :  { %11 = vsyncpa [#allocation5], 0  ;;  %s32_s20 = sshll.u32 %s11889_s2, 4  ;;  %s33_s20 = int_to_ptr.hbm [resolvable:$true] %s32_s20 }
   0x2   :  { %12 = vsyncpa [#allocation8], 0  ;;  %s9067_s21 = smov [#allocation4]   ;;  %s19_s25 = sshll.u32 %s11888_s1, 4  ;;  %s20_s25 = int_to_ptr.hbm [resolvable:$true] %s19_s25 }
   0x3   :  { %s34_s22 = sshll.u32 %s9067_s21, 4  ;;  %s9068_s26 = smov 16   ;;  %s35_s22 = int_to_ptr.vmem [resolvable:$true] %s34_s22 }
   0x4   :  { %s9069_s27 = smov 1   ;;  %s9070_s28 = smov [#allocation2]  }
   0x5   :  { %40 = dma.hbm_to_vmem [thread:$0]  %s33_s20, 96, %s35_s22, [#allocation5], %s9068_s26, %s9068_s26, %s9069_s27  }
   0x6   :  { %s21_s29 = sshll.u32 %s9070_s28, 4  ;;  %s9071_s30 = smov 64   ;;  %s22_s29 = int_to_ptr.vmem [resolvable:$true] %s21_s29 }
   0x7   :  { %s9072_s6 = smov 4   ;;  %s45_s8 = sshll.u32 %s11890_s3, 4  ;;  %s46_s8 = int_to_ptr.hbm [resolvable:$true] %s45_s8 }
   0x8   :  { %27 = dma.hbm_to_vmem [thread:$0]  %s20_s25, 30720, %s22_s29, [#allocation3], %s9071_s30, %s9071_s30, %s9072_s6  }
   0x9   :  { %s9073_s9 = smov [#allocation6]   ;;  %s58_s12 = sshll.u32 %s11891_s4, 4  ;;  %s59_s12 = int_to_ptr.hbm [resolvable:$true] %s58_s12 }
   0xa   :  { %s47_s10 = sshll.u32 %s9073_s9, 4  ;;  %s9074_s13 = smov [#allocation7]   ;;  %s48_s10 = int_to_ptr.vmem [resolvable:$true] %s47_s10 }
   0xb   :  { %53 = dma.hbm_to_vmem [thread:$0]  %s46_s8, 3072, %s48_s10, [#allocation5], %s9071_s30, %s9071_s30, %s9072_s6  }
   0xc   :  { %s60_s14 = sshll.u32 %s9074_s13, 4  ;;  %s61_s14 = int_to_ptr.vmem [resolvable:$true] %s60_s14 }
   0xd   :  { %66 = dma.hbm_to_vmem [thread:$0]  %s59_s12, 48, %s61_s14, [#allocation8], %s9068_s26, %s9068_s26, %s9069_s27  }
   0xe   :  { %9061 = dma.done.wait [#allocation3], 30720  }
   0xf   :  { %9062 = vsyncadd [#allocation3], 4294936576 }
  0x10   :  { %9063 = dma.done.wait [#allocation5], 3168  }
  0x11   :  { %9064 = vsyncadd [#allocation5], 4294964128 }
  0x12   :  { %9065 = dma.done.wait [#allocation8], 48  }
  0x13   :  { %9066 = vsyncadd [#allocation8], 4294967248  ;;  %v83_v0 = vlaneseq  ;;  %v8666_v2 = vld [vmem:[#allocation2 + $0x38] sm:$0xff]  ;;  %v8665_v3 = vld [vmem:[#allocation2 + $0x30] sm:$0xff] }
  0x14   :  { %8923 = vmatpush.bf16.msra.mxu1 %v8666_v2  ;;  %8924 = vmatpush.bf16.msra.mxu2 %v8666_v2  ;;  %v8664_v5 = vld [vmem:[#allocation2 + $0x28] sm:$0xff]  ;;  %v9126_v7 = vld [vmem:[%s11887_s0 + $0x18] sm:$0xff]  ;;  %v9131_v8 = vld [vmem:[%s11887_s0 + $0x20] sm:$0xff] }
  0x15   :  { %v9118_v1 = vshrl.u32 %v83_v0, 7  ;;  %8925 = vmatpush.bf16.msra.mxu3 %v8666_v2  ;;  %1356 = vmatpush.bf16.msra.mxu0 %v8666_v2  ;;  %v9136_v9 = vld [vmem:[%s11887_s0 + $0x28] sm:$0xff]  ;;  %v9141_v10 = vld [vmem:[%s11887_s0 + $0x38] sm:$0xff]  ;;  %v9146_v11 = vld [vmem:[%s11887_s0 + $0x40] sm:$0xff]  ;;  %v408_v17 = vrot.slane %v9126_v7, 4  ;;  %v409_v18 = vrot.slane %v9131_v8, 4 }
  0x16   :  { %v9151_v12 = vld [vmem:[%s11887_s0 + $0x48] sm:$0xff]  ;;  %v9156_v13 = vld [vmem:[%s11887_s0] sm:$0xff]  ;;  %v9161_v14 = vld [vmem:[%s11887_s0 + $0x78] sm:$0xff]  ;;  %v412_v19 = vrot.slane %v9141_v10, 4  ;;  %v413_v20 = vrot.slane %v9146_v11, 4  ;;  %v410_v24 = vrot.slane %v9136_v9, 4 }
  0x17   :  { %v92_v4 = vadd.s32 64, %v9118_v1  ;;  %v8663_v15 = vld [vmem:[#allocation2 + $0x20] sm:$0xff]  ;;  %vm421_vm0 = vcmp.lt.s32.totalorder %v9118_v1, 4  ;;  %v9166_v16 = vand.u32 63, %v9118_v1  ;;  %v9175_v21 = vld [vmem:[%s11887_s0 + $0x58] sm:$0xff]  ;;  %v414_v25 = vrot.slane %v9151_v12, 4 }
  0x18   :  { %8926 = vmatpush.bf16.msra.mxu1 %v8665_v3  ;;  %8927 = vmatpush.bf16.msra.mxu2 %v8665_v3  ;;  %v9180_v22 = vld [vmem:[%s11887_s0 + $0x60] sm:$0xff]  ;;  %v8662_v23 = vld [vmem:[#allocation2 + $0x18] sm:$0xff]  ;;  %v9187_v26 = vld [vmem:[%s11887_s0 + $0x68] sm:$0xff]  ;;  %v405_v28 = vrot.slane %v9156_v13, 4  ;;  %v420_v29 = vrot.slane %v9161_v14, 4  ;;  %v416_v30 = vrot.slane %v9175_v21, 4  ;;  %v429_v32 = vsel %vm421_vm0, %v412_v19, %v413_v20 }
  0x19   :  { %v9121_v6 = vand.u32 63, %v92_v4  ;;  %8928 = vmatpush.bf16.msra.mxu3 %v8665_v3  ;;  %1357 = vmatpush.bf16.msra.mxu0 %v8665_v3  ;;  %11980 = vst [vmem:[#allocation13_spill] sm:$0xff] %v9166_v16  ;;  %v9192_v27 = vld [vmem:[%s11887_s0 + $0x8] sm:$0xff]  ;;  %v417_v31 = vrot.slane %v9180_v22, 4  ;;  %v418_v33 = vrot.slane %v9187_v26, 4  ;;  %vm438_vm2 = vcmp.ge.s32.totalorder %v9166_v16, 4 }
  0x1a   :  { %v406_v34 = vrot.slane %v9192_v27, 4  ;;  %v437_v35 = vsel %vm421_vm0, %v420_v29, %v405_v28  ;;  %v433_v36 = vsel %vm421_vm0, %v408_v17, %v409_v18  ;;  %v8661_v37 = vld [vmem:[#allocation2 + $0x10] sm:$0xff]  ;;  %v432_v38 = vsel %vm421_vm0, %v409_v18, %v410_v24  ;;  %v8660_v50 = vld [vmem:[#allocation2 + $0x8] sm:$0xff]  ;;  %v8659_v61 = vld [vmem:[#allocation2] sm:$0xff] }
  0x1b   :  { %11979 = vst [vmem:[#allocation12_spill] sm:$0xff] %v9121_v6  ;;  %vm446_vm1 = vcmp.ge.s32.totalorder %v9121_v6, 4  ;;  %v428_v39 = vsel %vm421_vm0, %v413_v20, %v414_v25  ;;  %v425_v41 = vsel %vm421_vm0, %v416_v30, %v417_v31  ;;  %v424_v42 = vsel %vm421_vm0, %v417_v31, %v418_v33  ;;  %v9240_v54 = vld [vmem:[%s11887_s0 + $0x30] sm:$0xff] }
  0x1c   :  { %8929 = vmatpush.bf16.msra.mxu1 %v8664_v5  ;;  %8930 = vmatpush.bf16.msra.mxu2 %v8664_v5  ;;  %v494_v40 = vsel %vm446_vm1, %v429_v32, 0.0  ;;  %v436_v43 = vsel %vm421_vm0, %v405_v28, %v406_v34  ;;  %v486_v44 = vsel %vm438_vm2, %v437_v35, 0.0  ;;  %v506_v45 = vpack.c.bf16 %v433_v36, %v433_v36  ;;  %v9246_v60 = vld [vmem:[%s11887_s0 + $0x50] sm:$0xff] }
  0x1d   :  { %8931 = vmatpush.bf16.msra.mxu3 %v8664_v5  ;;  %1358 = vmatpush.bf16.msra.mxu0 %v8664_v5  ;;  %v507_v46 = vpack.c.bf16 %v432_v38, %v432_v38  ;;  %v510_v47 = vpack.c.bf16 %v494_v40, %v494_v40  ;;  %v511_v48 = vpack.c.bf16 %v428_v39, %v428_v39  ;;  %v411_v59 = vrot.slane %v9240_v54, 4  ;;  %v9251_v3 = vld [vmem:[%s11887_s0 + $0x70] sm:$0xff]  ;;  %v8682_v5 = vld [vmem:[#allocation2 + $0xb8] sm:$0xff] }
  0x1e   :  { %v514_v49 = vpack.c.bf16 %v425_v41, %v425_v41  ;;  %v515_v51 = vpack.c.bf16 %v424_v42, %v424_v42  ;;  %v502_v52 = vpack.c.bf16 %v486_v44, %v486_v44  ;;  %v503_v53 = vpack.c.bf16 %v436_v43, %v436_v43  ;;  %v9256_v4 = vld [vmem:[%s11887_s0 + $0x10] sm:$0xff]  ;;  %v8698_v38 = vld [vmem:[#allocation2 + $0x138] sm:$0xff] }
  0x1f   :  { %v893_v55 = vunpack.c.l.b16 %v506_v45  ;;  %v894_v56 = vunpack.c.l.b16 %v507_v46  ;;  %v897_v57 = vunpack.c.l.b16 %v510_v47  ;;  %v898_v58 = vunpack.c.l.b16 %v511_v48  ;;  %v8673_v40 = vld [vmem:[#allocation2 + $0x70] sm:$0xff]  ;;  %v8672_v48 = vld [vmem:[#allocation2 + $0x68] sm:$0xff] }
  0x20   :  { %8932 = vmatpush.bf16.msra.mxu1 %v8663_v15  ;;  %8933 = vmatpush.bf16.msra.mxu2 %v8663_v15  ;;  %v901_v62 = vunpack.c.l.b16 %v514_v49  ;;  %v902_v63 = vunpack.c.l.b16 %v515_v51  ;;  %v889_v0 = vunpack.c.l.b16 %v502_v52  ;;  %v890_v2 = vunpack.c.l.b16 %v503_v53  ;;  %v8697_v46 = vld [vmem:[#allocation2 + $0x130] sm:$0xff] }
  0x21   :  { %8934 = vmatpush.bf16.msra.mxu3 %v8663_v15  ;;  %1359 = vmatpush.bf16.msra.mxu0 %v8663_v15  ;;  %v8674_v15 = vld [vmem:[#allocation2 + $0x78] sm:$0xff]  ;;  %v415_v18 = vrot.slane %v9246_v60, 4  ;;  %v907_v20 = vpack.c.b16 %v894_v56, %v893_v55  ;;  %v431_v28 = vsel %vm421_vm0, %v410_v24, %v411_v59  ;;  %v419_v31 = vrot.slane %v9251_v3, 4  ;;  %v8681_v24 = vld [vmem:[#allocation2 + $0xb0] sm:$0xff] }
  0x22   :  { %v911_v32 = vpack.c.b16 %v902_v63, %v901_v62  ;;  %v905_v35 = vpack.c.b16 %v890_v2, %v889_v0  ;;  %v407_v36 = vrot.slane %v9256_v4, 4  ;;  %v430_v39 = vsel %vm421_vm0, %v411_v59, %v412_v19  ;;  %v8679_v63 = vld [vmem:[#allocation2 + $0xa0] sm:$0xff] }
  0x23   :  { %v508_v41 = vpack.c.bf16 %v431_v28, %v431_v28  ;;  %v426_v42 = vsel %vm421_vm0, %v415_v18, %v416_v30  ;;  %v427_v43 = vsel %vm421_vm0, %v414_v25, %v415_v18  ;;  %v422_v19 = vsel %vm421_vm0, %v419_v31, %v420_v29  ;;  %v8689_v29 = vld [vmem:[#allocation2 + $0xf0] sm:$0xff]  ;;  %v8671_v0 = vld [vmem:[#allocation2 + $0x60] sm:$0xff] }
  0x24   :  { %8935 = vmatpush.bf16.msra.mxu1 %v8662_v23  ;;  %8936 = vmatpush.bf16.msra.mxu2 %v8662_v23  ;;  %v423_v44 = vsel %vm421_vm0, %v418_v33, %v419_v31  ;;  %v509_v30 = vpack.c.bf16 %v430_v39, %v430_v39  ;;  %v434_v45 = vsel %vm421_vm0, %v407_v36, %v408_v17  ;;  %v8680_v33 = vld [vmem:[#allocation2 + $0xa8] sm:$0xff]  ;;  %v518_v56 = vrot.slane %v9156_v13, 5 }
  0x25   :  { %8937 = vmatpush.bf16.msra.mxu3 %v8662_v23  ;;  %1360 = vmatpush.bf16.msra.mxu0 %v8662_v23  ;;  %v909_v23 = vpack.c.b16 %v898_v58, %v897_v57  ;;  %v435_v25 = vsel %vm421_vm0, %v406_v34, %v407_v36  ;;  %v513_v47 = vpack.c.bf16 %v426_v42, %v426_v42  ;;  %v895_v17 = vunpack.c.l.b16 %v508_v41  ;;  %v8688_v57 = vld [vmem:[#allocation2 + $0xe8] sm:$0xff]  ;;  %v8687_v36 = vld [vmem:[#allocation2 + $0xe0] sm:$0xff]  ;;  %v8670_v41 = vld [vmem:[#allocation2 + $0x58] sm:$0xff] }
  0x26   :  { %v512_v49 = vpack.c.bf16 %v427_v43, %v427_v43  ;;  %v517_v51 = vpack.c.bf16 %v422_v19, %v422_v19  ;;  %v504_v52 = vpack.c.bf16 %v435_v25, %v435_v25  ;;  %v505_v53 = vpack.c.bf16 %v434_v45, %v434_v45  ;;  %v8696_v58 = vld [vmem:[#allocation2 + $0x128] sm:$0xff] }
  0x27   :  { %v896_v55 = vunpack.c.l.b16 %v509_v30  ;;  %v533_v34 = vrot.slane %v9161_v14, 5  ;;  %v900_v59 = vunpack.c.l.b16 %v513_v47  ;;  %vm534_vm3 = vcmp.lt.s32.totalorder %v9118_v1, 3  ;;  %v8694_v47 = vld [vmem:[#allocation2 + $0x118] sm:$0xff] }
  0x28   :  { %8938 = vmatpush.bf16.msra.mxu1 %v8661_v37  ;;  %8939 = vmatpush.bf16.msra.mxu2 %v8661_v37  ;;  %v646_v62 = vrot.slane %v9161_v14, 6  ;;  %v899_v2 = vunpack.c.l.b16 %v512_v49  ;;  %vm647_vm4 = vcmp.lt.s32.totalorder %v9118_v1, 2  ;;  %v891_v18 = vunpack.c.l.b16 %v504_v52 }
  0x29   :  { %8940 = vmatpush.bf16.msra.mxu3 %v8661_v37  ;;  %1361 = vmatpush.bf16.msra.mxu0 %v8661_v37  ;;  %v8690_v37 = vld [vmem:[#allocation2 + $0xf8] sm:$0xff]  ;;  %v632_v28 = vrot.slane %v9192_v27, 6  ;;  %v550_v31 = vsel %vm534_vm3, %v533_v34, %v518_v56  ;;  %vm551_vm5 = vcmp.ge.s32.totalorder %v9166_v16, 3  ;;  %vm664_vm6 = vcmp.ge.s32.totalorder %v9166_v16, 2 }
  0x2a   :  { %vm760_vm7 = vcmp.lt.s32.totalorder %v9118_v1, 1  ;;  %v908_v39 = vpack.c.b16 %v896_v55, %v895_v17  ;;  %v745_v42 = vrot.slane %v9192_v27, 7  ;;  %v599_v30 = vsel %vm551_vm5, %v550_v31, 0.0 }
  0x2b   :  { %vm777_vm8 = vcmp.ge.s32.totalorder %v9166_v16, 1  ;;  %v615_v49 = vpack.c.bf16 %v599_v30, %v599_v30  ;;  %v857_v55 = vpack.c.bf16 %v9156_v13, %v9156_v13  ;;  %v8667_v30 = vld [vmem:[#allocation2 + $0x40] sm:$0xff]  ;;  %vm559_vm9 = vcmp.ge.s32.totalorder %v9121_v6, 3 }
  0x2c   :  { %8941 = vmatpush.bf16.msra.mxu1 %v8660_v50  ;;  %8942 = vmatpush.bf16.msra.mxu2 %v8660_v50  ;;  %vm672_vm10 = vcmp.ge.s32.totalorder %v9121_v6, 2  ;;  %vm785_vm11 = vcmp.ge.s32.totalorder %v9121_v6, 1  ;;  %v8727_v6 = vld [vmem:[#allocation2 + $0x220] sm:$0xff]  ;;  %vm3092_vm12 = vcmp.lt.s32.totalorder %v9118_v1, 6 }
  0x2d   :  { %8943 = vmatpush.bf16.msra.mxu3 %v8660_v50  ;;  %1362 = vmatpush.bf16.msra.mxu0 %v8660_v50  ;;  %v516_v50 = vpack.c.bf16 %v423_v44, %v423_v44 }
  0x30   :  { %8944 = vmatpush.bf16.msra.mxu1 %v8659_v61  ;;  %8945 = vmatpush.bf16.msra.mxu2 %v8659_v61 }
  0x31   :  { %8946 = vmatpush.bf16.msra.mxu3 %v8659_v61  ;;  %1363 = vmatpush.bf16.msra.mxu0 %v8659_v61  ;;  %v631_v61 = vrot.slane %v9156_v13, 6 }
  0x33   :  { %1374 = vmatmul.bf16.vlgmr.msra.gmra.mxu1 %v907_v20  ;;  %1384 = vmatmul.bf16.vlgmr.msra.gmra.mxu2 %v909_v23  ;;  %v892_v20 = vunpack.c.l.b16 %v505_v53  ;;  %v519_v23 = vrot.slane %v9192_v27, 5  ;;  %v662_v45 = vsel %vm647_vm4, %v631_v61, %v632_v28 }
  0x34   :  { %1454 = vmatpush.bf16.msrb.mxu2 %v8682_v5  ;;  %1405 = vmatpush.bf16.msrb.mxu1 %v8674_v15  ;;  %v903_v5 = vunpack.c.l.b16 %v516_v50  ;;  %v904_v15 = vunpack.c.l.b16 %v517_v51  ;;  %v729_v53 = vpack.c.bf16 %v662_v45, %v662_v45 }
  0x35   :  { %1394 = vmatmul.bf16.vlgmr.msra.gmra.mxu3 %v911_v32  ;;  %1364 = vmatmul.bf16.vlgmr.msra.gmra.mxu0 %v905_v35  ;;  %v744_v32 = vrot.slane %v9156_v13, 7  ;;  %v759_v35 = vrot.slane %v9161_v14, 7  ;;  %v906_v19 = vpack.c.b16 %v892_v20, %v891_v18  ;;  %v549_v44 = vsel %vm534_vm3, %v518_v56, %v519_v23  ;;  %v8668_v13 = vld [vmem:[#allocation2 + $0x48] sm:$0xff] }
  0x36   :  { %1503 = vmatpush.bf16.msrb.mxu3 %v8690_v37  ;;  %1552 = vmatpush.bf16.msrb.mxu0 %v8698_v38  ;;  %v8695_v37 = vld [vmem:[#allocation2 + $0x120] sm:$0xff]  ;;  %v663_v38 = vsel %vm647_vm4, %v646_v62, %v631_v61  ;;  %v912_v43 = vpack.c.b16 %v904_v15, %v903_v5  ;;  %v616_v50 = vpack.c.bf16 %v549_v44, %v549_v44  ;;  %v8685_v61 = vld [vmem:[#allocation2 + $0xd0] sm:$0xff]  ;;  %v937_v20 = vunpack.c.l.b16 %v615_v49 }
  0x37   :  { %v712_v25 = vsel %vm664_vm6, %v663_v38, 0.0  ;;  %v775_v51 = vsel %vm760_vm7, %v744_v32, %v745_v42  ;;  %v858_v56 = vpack.c.bf16 %v9192_v27, %v9192_v27  ;;  %v986_v38 = vunpack.c.l.b16 %v729_v53  ;;  %v8675_v44 = vld [vmem:[#allocation2 + $0x80] sm:$0xff] }
  0x38   :  { %1455 = vmatpush.bf16.msrb.mxu2 %v8681_v24  ;;  %1406 = vmatpush.bf16.msrb.mxu1 %v8673_v40  ;;  %v910_v24 = vpack.c.b16 %v900_v59, %v899_v2  ;;  %v8678_v40 = vld [vmem:[#allocation2 + $0x98] sm:$0xff]  ;;  %v728_v52 = vpack.c.bf16 %v712_v25, %v712_v25  ;;  %v523_v59 = vrot.slane %v9136_v9, 5  ;;  %v8676_v2 = vld [vmem:[#allocation2 + $0x88] sm:$0xff]  ;;  %v938_v31 = vunpack.c.l.b16 %v616_v50 }
  0x39   :  { %v748_v49 = vrot.slane %v9131_v8, 7  ;;  %v749_v53 = vrot.slane %v9136_v9, 7 }
  0x3a   :  { %1504 = vmatpush.bf16.msrb.mxu3 %v8689_v29  ;;  %1553 = vmatpush.bf16.msrb.mxu0 %v8697_v46  ;;  %v776_v29 = vsel %vm760_vm7, %v759_v35, %v744_v32  ;;  %v8686_v46 = vld [vmem:[#allocation2 + $0xd8] sm:$0xff]  ;;  %v953_v50 = vpack.c.b16 %v938_v31, %v937_v20 }
  0x3b   :  { %v825_v17 = vsel %vm777_vm8, %v776_v29, 0.0  ;;  %v634_v29 = vrot.slane %v9126_v7, 6 }
  0x3c   :  { %1456 = vmatpush.bf16.msrb.mxu2 %v8680_v33  ;;  %1407 = vmatpush.bf16.msrb.mxu1 %v8672_v48  ;;  %v8677_v33 = vld [vmem:[#allocation2 + $0x90] sm:$0xff]  ;;  %v841_v5 = vpack.c.bf16 %v825_v17, %v825_v17  ;;  %v8683_v17 = vld [vmem:[#allocation2 + $0xc0] sm:$0xff] }
  0x3d   :  { %v8669_v48 = vld [vmem:[#allocation2 + $0x50] sm:$0xff] }
  0x3e   :  { %1505 = vmatpush.bf16.msrb.mxu3 %v8688_v57  ;;  %1554 = vmatpush.bf16.msrb.mxu0 %v8696_v58  ;;  %v521_v57 = vrot.slane %v9126_v7, 5  ;;  %v522_v58 = vrot.slane %v9131_v8, 5  ;;  %v1033_v45 = vunpack.c.l.b16 %v841_v5 }
  0x40   :  { %1457 = vmatpush.bf16.msrb.mxu2 %v8679_v63  ;;  %1408 = vmatpush.bf16.msrb.mxu1 %v8671_v0  ;;  %v8693_v63 = vld [vmem:[#allocation2 + $0x110] sm:$0xff]  ;;  %v842_v0 = vpack.c.bf16 %v775_v51, %v775_v51  ;;  %v545_v15 = vsel %vm534_vm3, %v522_v58, %v523_v59  ;;  %v546_v18 = vsel %vm534_vm3, %v521_v57, %v522_v58 }
  0x41   :  { %v619_v32 = vpack.c.bf16 %v546_v18, %v546_v18 }
  0x42   :  { %1506 = vmatpush.bf16.msrb.mxu3 %v8687_v36  ;;  %1555 = vmatpush.bf16.msrb.mxu0 %v8695_v37  ;;  %v620_v36 = vpack.c.bf16 %v545_v15, %v545_v15  ;;  %v985_v37 = vunpack.c.l.b16 %v728_v52  ;;  %v1034_v25 = vunpack.c.l.b16 %v842_v0  ;;  %v633_v15 = vrot.slane %v9256_v4, 6 }
  0x43   :  { %1379 = vmatmul.bf16.gmra.mxu1 %v908_v39  ;;  %1389 = vmatmul.bf16.gmra.mxu2 %v910_v24  ;;  %v1081_v39 = vunpack.c.l.b16 %v857_v55  ;;  %v1082_v24 = vunpack.c.l.b16 %v858_v56  ;;  %v8691_v55 = vld [vmem:[#allocation2 + $0x100] sm:$0xff] }
  0x44   :  { %1458 = vmatpush.bf16.msrb.mxu2 %v8678_v40  ;;  %1409 = vmatpush.bf16.msrb.mxu1 %v8670_v41  ;;  %v8684_v40 = vld [vmem:[#allocation2 + $0xc8] sm:$0xff]  ;;  %v1001_v51 = vpack.c.b16 %v986_v38, %v985_v37  ;;  %v1049_v5 = vpack.c.b16 %v1034_v25, %v1033_v45  ;;  %v862_v37 = vpack.c.bf16 %v9136_v9, %v9136_v9  ;;  %v746_v38 = vrot.slane %v9256_v4, 7 }
  0x45   :  { %1399 = vmatmul.bf16.gmra.mxu3 %v912_v43  ;;  %1369 = vmatmul.bf16.gmra.mxu0 %v906_v19  ;;  %v8692_v41 = vld [vmem:[#allocation2 + $0x108] sm:$0xff]  ;;  %v9353_v43 = vunpack.c.l.b16 %v619_v32  ;;  %v9355_v19 = vunpack.c.l.b16 %v620_v36  ;;  %v9364_v52 = vpack.c.b16 %v1082_v24, %v1081_v39  ;;  %v861_v36 = vpack.c.bf16 %v9131_v8, %v9131_v8 }
  0x46   :  { %1507 = vmatpush.bf16.msrb.mxu3 %v8686_v46  ;;  %1556 = vmatpush.bf16.msrb.mxu0 %v8694_v47  ;;  %v747_v46 = vrot.slane %v9126_v7, 7  ;;  %v660_v25 = vsel %vm647_vm4, %v633_v15, %v634_v29 }
  0x47   :  { %v955_v47 = vpack.c.b16 %v9355_v19, %v9353_v43  ;;  %11981 = vst [vmem:[#allocation14_spill] sm:$0xff] %v9364_v52 }
  0x48   :  { %1459 = vmatpush.bf16.msrb.mxu2 %v8677_v33  ;;  %1410 = vmatpush.bf16.msrb.mxu1 %v8669_v48  ;;  %v635_v33 = vrot.slane %v9131_v8, 6  ;;  %v636_v48 = vrot.slane %v9136_v9, 6 }
  0x4a   :  { %1508 = vmatpush.bf16.msrb.mxu3 %v8685_v61  ;;  %1557 = vmatpush.bf16.msrb.mxu0 %v8693_v63  ;;  %v658_v56 = vsel %vm647_vm4, %v635_v33, %v636_v48  ;;  %v659_v58 = vsel %vm647_vm4, %v634_v29, %v635_v33  ;;  %v772_v61 = vsel %vm760_vm7, %v747_v46, %v748_v49  ;;  %v520_v63 = vrot.slane %v9256_v4, 5 }
  0x4b   :  { %v732_v0 = vpack.c.bf16 %v659_v58, %v659_v58  ;;  %v845_v18 = vpack.c.bf16 %v772_v61, %v772_v61  ;;  %v661_v33 = vsel %vm647_vm4, %v632_v28, %v633_v15  ;;  %v859_v58 = vpack.c.bf16 %v9256_v4, %v9256_v4 }
  0x4c   :  { %1460 = vmatpush.bf16.msrb.mxu2 %v8676_v2  ;;  %1411 = vmatpush.bf16.msrb.mxu1 %v8668_v13  ;;  %v733_v2 = vpack.c.bf16 %v658_v56, %v658_v56  ;;  %v771_v13 = vsel %vm760_vm7, %v748_v49, %v749_v53  ;;  %v548_v8 = vsel %vm534_vm3, %v519_v23, %v520_v63  ;;  %v525_v4 = vrot.slane %v9141_v10, 5 }
  0x4d   :  { %v846_v20 = vpack.c.bf16 %v771_v13, %v771_v13  ;;  %v989_v31 = vunpack.c.l.b16 %v732_v0  ;;  %v1037_v39 = vunpack.c.l.b16 %v845_v18  ;;  %v774_v23 = vsel %vm760_vm7, %v745_v42, %v746_v38 }
  0x4e   :  { %1509 = vmatpush.bf16.msrb.mxu3 %v8684_v40  ;;  %1558 = vmatpush.bf16.msrb.mxu0 %v8692_v41  ;;  %v990_v32 = vunpack.c.l.b16 %v733_v2  ;;  %v1085_v41 = vunpack.c.l.b16 %v861_v36  ;;  %v843_v29 = vpack.c.bf16 %v774_v23, %v774_v23  ;;  %v860_v28 = vpack.c.bf16 %v9126_v7, %v9126_v7 }
  0x4f   :  { %v1038_v24 = vunpack.c.l.b16 %v846_v20  ;;  %v1083_v13 = vunpack.c.l.b16 %v859_v58  ;;  %v524_v7 = vrot.slane %v9240_v54, 5  ;;  %v750_v36 = vrot.slane %v9240_v54, 7 }
  0x50   :  { %1461 = vmatpush.bf16.msrb.mxu2 %v8675_v44  ;;  %1412 = vmatpush.bf16.msrb.mxu1 %v8667_v30  ;;  %v1003_v40 = vpack.c.b16 %v990_v32, %v989_v31  ;;  %v1086_v44 = vunpack.c.l.b16 %v862_v37  ;;  %v547_v30 = vsel %vm534_vm3, %v520_v63, %v521_v57  ;;  %v773_v57 = vsel %vm760_vm7, %v746_v38, %v747_v46 }
  0x51   :  { %v1051_v45 = vpack.c.b16 %v1038_v24, %v1037_v39  ;;  %v844_v56 = vpack.c.bf16 %v773_v57, %v773_v57  ;;  %v1035_v27 = vunpack.c.l.b16 %v843_v29  ;;  %v1084_v42 = vunpack.c.l.b16 %v860_v28 }
  0x52   :  { %1510 = vmatpush.bf16.msrb.mxu3 %v8683_v17  ;;  %1559 = vmatpush.bf16.msrb.mxu0 %v8691_v55  ;;  %v9401_v49 = vpack.c.b16 %v1086_v44, %v1085_v41  ;;  %v730_v17 = vpack.c.bf16 %v661_v33, %v661_v33  ;;  %v731_v55 = vpack.c.bf16 %v660_v25, %v660_v25  ;;  %v637_v31 = vrot.slane %v9240_v54, 6 }
  0x53   :  { %1413 = vmatmul.bf16.vlgmr.msrb.gmra.mxu1 %v953_v50  ;;  %1462 = vmatmul.bf16.vlgmr.msrb.gmra.mxu2 %v1001_v51  ;;  %v617_v50 = vpack.c.bf16 %v548_v8, %v548_v8  ;;  %v618_v51 = vpack.c.bf16 %v547_v30, %v547_v30  ;;  %v1036_v2 = vunpack.c.l.b16 %v844_v56  ;;  %v9413_v20 = vpack.c.b16 %v1084_v42, %v1083_v13 }
  0x54   :  { %11982 = vst [vmem:[#allocation15_spill] sm:$0xff] %v9401_v49  ;;  %v987_v46 = vunpack.c.l.b16 %v730_v17  ;;  %v988_v0 = vunpack.c.l.b16 %v731_v55  ;;  %v638_v32 = vrot.slane %v9141_v10, 6  ;;  %v751_v37 = vrot.slane %v9141_v10, 7 }
  0x55   :  { %1511 = vmatmul.bf16.vlgmr.msrb.gmra.mxu3 %v1049_v5  ;;  %1560 = vmatmul.bf16.vlgmr.msrb.gmra.mxu0 %v9364_v52  ;;  %v939_v61 = vunpack.c.l.b16 %v617_v50  ;;  %v940_v63 = vunpack.c.l.b16 %v618_v51  ;;  %v1050_v18 = vpack.c.b16 %v1036_v2, %v1035_v27  ;;  %11983 = vst [vmem:[#allocation16_spill] sm:$0xff] %v9413_v20  ;;  %v543_v38 = vsel %vm534_vm3, %v524_v7, %v525_v4 }
  0x56   :  { %v1002_v15 = vpack.c.b16 %v988_v0, %v987_v46  ;;  %v544_v39 = vsel %vm534_vm3, %v523_v59, %v524_v7  ;;  %v656_v24 = vsel %vm647_vm4, %v637_v31, %v638_v32  ;;  %v657_v43 = vsel %vm647_vm4, %v636_v48, %v637_v31 }
  0x57   :  { %v954_v5 = vpack.c.b16 %v940_v63, %v939_v61  ;;  %v769_v19 = vsel %vm760_vm7, %v750_v36, %v751_v37  ;;  %v621_v59 = vpack.c.bf16 %v544_v39, %v544_v39  ;;  %v734_v41 = vpack.c.bf16 %v657_v43, %v657_v43 }
  0x58   :  { %v735_v44 = vpack.c.bf16 %v656_v24, %v656_v24  ;;  %v848_v8 = vpack.c.bf16 %v769_v19, %v769_v19  ;;  %v864_v48 = vpack.c.bf16 %v9141_v10, %v9141_v10  ;;  %v526_v17 = vrot.slane %v9146_v11, 5 }
  0x59   :  { %v943_v25 = vunpack.c.l.b16 %v621_v59  ;;  %v991_v57 = vunpack.c.l.b16 %v734_v41  ;;  %v639_v55 = vrot.slane %v9146_v11, 6  ;;  %v752_v29 = vrot.slane %v9146_v11, 7 }
  0x5a   :  { %v992_v23 = vunpack.c.l.b16 %v735_v44  ;;  %v1040_v50 = vunpack.c.l.b16 %v848_v8  ;;  %v527_v10 = vrot.slane %v9151_v12, 5  ;;  %v640_v61 = vrot.slane %v9151_v12, 6 }
  0x5b   :  { %v542_v63 = vsel %vm534_vm3, %v525_v4, %v526_v17  ;;  %v655_v46 = vsel %vm647_vm4, %v638_v32, %v639_v55  ;;  %v753_v0 = vrot.slane %v9151_v12, 7  ;;  %v768_v27 = vsel %vm760_vm7, %v751_v37, %v752_v29 }
  0x5c   :  { %v1004_v58 = vpack.c.b16 %v992_v23, %v991_v57  ;;  %v541_v2 = vsel %vm534_vm3, %v526_v17, %v527_v10  ;;  %v607_v13 = vsel %vm559_vm9, %v542_v63, 0.0  ;;  %v654_v42 = vsel %vm647_vm4, %v639_v55, %v640_v61 }
  0x5d   :  { %v623_v7 = vpack.c.bf16 %v607_v13, %v607_v13  ;;  %v624_v4 = vpack.c.bf16 %v541_v2, %v541_v2  ;;  %v737_v32 = vpack.c.bf16 %v654_v42, %v654_v42  ;;  %v866_v39 = vpack.c.bf16 %v9151_v12, %v9151_v12 }
  0x5e   :  { %v642_v12 = vrot.slane %v9175_v21, 6  ;;  %v754_v57 = vrot.slane %v9246_v60, 7  ;;  %v755_v23 = vrot.slane %v9175_v21, 7 }
  0x5f   :  { %v945_v24 = vunpack.c.l.b16 %v623_v7  ;;  %v946_v43 = vunpack.c.l.b16 %v624_v4  ;;  %v1090_v44 = vunpack.c.l.b16 %v866_v39  ;;  %v757_v39 = vrot.slane %v9187_v26, 7 }
  0x60   :  { %v765_v17 = vsel %vm760_vm7, %v754_v57, %v755_v23  ;;  %v766_v55 = vsel %vm760_vm7, %v753_v0, %v754_v57 }
  0x61   :  { %v851_v63 = vpack.c.bf16 %v766_v55, %v766_v55 }
  0x63   :  { %1418 = vmatmul.bf16.gmra.mxu1 %v954_v5  ;;  %1467 = vmatmul.bf16.gmra.mxu2 %v1002_v15  ;;  %v720_v5 = vsel %vm672_vm10, %v655_v46, 0.0  ;;  %v767_v15 = vsel %vm760_vm7, %v752_v29, %v753_v0  ;;  %v852_v46 = vpack.c.bf16 %v765_v17, %v765_v17 }
  0x64   :  { %v736_v31 = vpack.c.bf16 %v720_v5, %v720_v5  ;;  %v850_v37 = vpack.c.bf16 %v767_v15, %v767_v15  ;;  %v1043_v5 = vunpack.c.l.b16 %v851_v63 }
  0x65   :  { %1516 = vmatmul.bf16.gmra.mxu3 %v1050_v18  ;;  %1565 = vmatmul.bf16.gmra.mxu0 %v9413_v20  ;;  %v833_v18 = vsel %vm785_vm11, %v768_v27, 0.0  ;;  %v868_v27 = vpack.c.bf16 %v9175_v21, %v9175_v21  ;;  %v1044_v15 = vunpack.c.l.b16 %v852_v46 }
  0x66   :  { %v993_v19 = vunpack.c.l.b16 %v736_v31  ;;  %v530_v31 = vrot.slane %v9180_v22, 5 }
  0x67   :  { %v1092_v0 = vunpack.c.l.b16 %v868_v27 }
  0x73   :  { %1423 = vmatmul.bf16.gmra.mxu1 %v955_v47  ;;  %1472 = vmatmul.bf16.gmra.mxu2 %v1003_v40  ;;  %v770_v47 = vsel %vm760_vm7, %v749_v53, %v750_v36  ;;  %v622_v40 = vpack.c.bf16 %v543_v38, %v543_v38  ;;  %v1088_v53 = vunpack.c.l.b16 %v864_v48  ;;  %v849_v36 = vpack.c.bf16 %v833_v18, %v833_v18 }
  0x74   :  { %v847_v30 = vpack.c.bf16 %v770_v47, %v770_v47  ;;  %v865_v38 = vpack.c.bf16 %v9146_v11, %v9146_v11  ;;  %v994_v47 = vunpack.c.l.b16 %v737_v32  ;;  %v529_v48 = vrot.slane %v9175_v21, 5 }
  0x75   :  { %1521 = vmatmul.bf16.gmra.mxu3 %v1051_v45  ;;  %1570 = vmatmul.bf16.gmra.mxu0 %v9401_v49  ;;  %v863_v45 = vpack.c.bf16 %v9240_v54, %v9240_v54  ;;  %v944_v33 = vunpack.c.l.b16 %v622_v40  ;;  %v1041_v59 = vunpack.c.l.b16 %v849_v36  ;;  %v1042_v40 = vunpack.c.l.b16 %v850_v37 }
  0x76   :  { %v1039_v9 = vunpack.c.l.b16 %v847_v30  ;;  %v1089_v41 = vunpack.c.l.b16 %v865_v38  ;;  %v957_v30 = vpack.c.b16 %v946_v43, %v945_v24  ;;  %v1005_v8 = vpack.c.b16 %v994_v47, %v993_v19 }
  0x77   :  { %v1087_v51 = vunpack.c.l.b16 %v863_v45  ;;  %v956_v56 = vpack.c.b16 %v944_v33, %v943_v25  ;;  %v528_v45 = vrot.slane %v9246_v60, 5  ;;  %v1053_v25 = vpack.c.b16 %v1042_v40, %v1041_v59 }
  0x78   :  { %v1052_v54 = vpack.c.b16 %v1040_v50, %v1039_v9  ;;  %v9484_v33 = vpack.c.b16 %v1090_v44, %v1089_v41  ;;  %v641_v11 = vrot.slane %v9246_v60, 6  ;;  %v531_v32 = vrot.slane %v9187_v26, 5 }
  0x79   :  { %v9451_v28 = vpack.c.b16 %v1088_v53, %v1087_v51  ;;  %v539_v9 = vsel %vm534_vm3, %v528_v45, %v529_v48  ;;  %v540_v50 = vsel %vm534_vm3, %v527_v10, %v528_v45  ;;  %v867_v10 = vpack.c.bf16 %v9246_v60, %v9246_v60 }
  0x7a   :  { %11985 = vst [vmem:[#allocation18_spill] sm:$0xff] %v9484_v33  ;;  %v652_v51 = vsel %vm647_vm4, %v641_v11, %v642_v12  ;;  %v653_v53 = vsel %vm647_vm4, %v640_v61, %v641_v11  ;;  %v625_v29 = vpack.c.bf16 %v540_v50, %v540_v50  ;;  %v1054_v36 = vpack.c.b16 %v1044_v15, %v1043_v5 }
  0x7b   :  { %11984 = vst [vmem:[#allocation17_spill] sm:$0xff] %v9451_v28  ;;  %v1091_v18 = vunpack.c.l.b16 %v867_v10  ;;  %v643_v60 = vrot.slane %v9180_v22, 6  ;;  %v644_v21 = vrot.slane %v9187_v26, 6  ;;  %v756_v38 = vrot.slane %v9180_v22, 7 }
  0x7c   :  { %v947_v2 = vunpack.c.l.b16 %v625_v29  ;;  %v537_v24 = vsel %vm534_vm3, %v530_v31, %v531_v32  ;;  %v538_v43 = vsel %vm534_vm3, %v529_v48, %v530_v31  ;;  %v869_v48 = vpack.c.bf16 %v9180_v22, %v9180_v22 }
  0x7d   :  { %v9509_v37 = vpack.c.b16 %v1092_v0, %v1091_v18  ;;  %v650_v19 = vsel %vm647_vm4, %v643_v60, %v644_v21  ;;  %v651_v47 = vsel %vm647_vm4, %v642_v12, %v643_v60  ;;  %v763_v59 = vsel %vm760_vm7, %v756_v38, %v757_v39 }
  0x7e   :  { %v764_v40 = vsel %vm760_vm7, %v755_v23, %v756_v38  ;;  %v627_v41 = vpack.c.bf16 %v538_v43, %v538_v43  ;;  %v628_v44 = vpack.c.bf16 %v537_v24, %v537_v24  ;;  %v870_v11 = vpack.c.bf16 %v9187_v26, %v9187_v26 }
  0x7f   :  { %11986 = vst [vmem:[#allocation19_spill] sm:$0xff] %v9509_v37  ;;  %v853_v45 = vpack.c.bf16 %v764_v40, %v764_v40  ;;  %v1093_v17 = vunpack.c.l.b16 %v869_v48  ;;  %v645_v22 = vrot.slane %v9251_v3, 6  ;;  %v758_v26 = vrot.slane %v9251_v3, 7 }
  0x80   :  { %v949_v57 = vunpack.c.l.b16 %v627_v41  ;;  %v950_v12 = vunpack.c.l.b16 %v628_v44  ;;  %v1094_v23 = vunpack.c.l.b16 %v870_v11  ;;  %v8714_v11 = vld [vmem:[#allocation2 + $0x1b8] sm:$0xff] }
  0x81   :  { %2504 = vmatpush.bf16.msra.mxu2 %v8714_v11 }
  0x82   :  { %v959_v55 = vpack.c.b16 %v950_v12, %v949_v57  ;;  %v9535_v63 = vpack.c.b16 %v1094_v23, %v1093_v17  ;;  %v8706_v57 = vld [vmem:[#allocation2 + $0x178] sm:$0xff] }
  0x83   :  { %1428 = vmatmul.bf16.gmra.mxu1 %v956_v56  ;;  %1477 = vmatmul.bf16.gmra.mxu2 %v1004_v58  ;;  %v626_v56 = vpack.c.bf16 %v539_v9, %v539_v9  ;;  %v738_v58 = vpack.c.bf16 %v653_v53, %v653_v53 }
  0x84   :  { %11987 = vst [vmem:[#allocation20_spill] sm:$0xff] %v9535_v63  ;;  %2455 = vmatpush.bf16.msra.mxu1 %v8706_v57 }
  0x85   :  { %1526 = vmatmul.bf16.gmra.mxu3 %v1052_v54  ;;  %1575 = vmatmul.bf16.gmra.mxu0 %v9451_v28  ;;  %v739_v54 = vpack.c.bf16 %v652_v51, %v652_v51  ;;  %v948_v61 = vunpack.c.l.b16 %v626_v56  ;;  %v995_v13 = vunpack.c.l.b16 %v738_v58  ;;  %v1045_v51 = vunpack.c.l.b16 %v853_v45 }
  0x86   :  { %v532_v56 = vrot.slane %v9251_v3, 5 }
  0x87   :  { %v996_v42 = vunpack.c.l.b16 %v739_v54  ;;  %v958_v7 = vpack.c.b16 %v948_v61, %v947_v2  ;;  %v648_v2 = vsel %vm647_vm4, %v645_v22, %v646_v62  ;;  %v649_v61 = vsel %vm647_vm4, %v644_v21, %v645_v22 }
  0x88   :  { %v535_v10 = vsel %vm534_vm3, %v532_v56, %v533_v34  ;;  %v536_v27 = vsel %vm534_vm3, %v531_v32, %v532_v56  ;;  %v761_v34 = vsel %vm760_vm7, %v758_v26, %v759_v35  ;;  %v871_v21 = vpack.c.bf16 %v9251_v3, %v9251_v3 }
  0x89   :  { %v1006_v4 = vpack.c.b16 %v996_v42, %v995_v13  ;;  %v762_v13 = vsel %vm760_vm7, %v757_v39, %v758_v26  ;;  %v9554_v42 = vld [vmem:[#allocation4] ss:$0 sm:$0xff]  ;;  %v629_v15 = vpack.c.bf16 %v536_v27, %v536_v27  ;;  %v630_v18 = vpack.c.bf16 %v535_v10, %v535_v10  ;;  %v8713_v26 = vld [vmem:[#allocation2 + $0x1b0] sm:$0xff] }
  0x8a   :  { %v855_v31 = vpack.c.bf16 %v762_v13, %v762_v13  ;;  %v856_v60 = vpack.c.bf16 %v761_v34, %v761_v34  ;;  %v872_v35 = vpack.c.bf16 %v9161_v14, %v9161_v14  ;;  %v1095_v40 = vunpack.c.l.b16 %v871_v21  ;;  %v8705_v10 = vld [vmem:[#allocation2 + $0x170] sm:$0xff]  ;;  %2505 = vmatpush.bf16.msra.mxu2 %v8713_v26 }
  0x8b   :  { %v951_v39 = vunpack.c.l.b16 %v629_v15  ;;  %v952_v24 = vunpack.c.l.b16 %v630_v18  ;;  %2456 = vmatpush.bf16.msra.mxu1 %v8705_v10 }
  0x8c   :  { %v1096_v41 = vunpack.c.l.b16 %v872_v35 }
  0x8e   :  { %v9578_v48 = vpack.c.b16 %v1096_v41, %v1095_v40 }
  0x90   :  { %11988 = vst [vmem:[#allocation21_spill] sm:$0xff] %v9578_v48 }
  0x93   :  { %1433 = vmatmul.bf16.gmra.mxu1 %v957_v30  ;;  %1482 = vmatmul.bf16.gmra.mxu2 %v1005_v8  ;;  %v740_v30 = vpack.c.bf16 %v651_v47, %v651_v47  ;;  %v741_v8 = vpack.c.bf16 %v650_v19, %v650_v19  ;;  %v1047_v47 = vunpack.c.l.b16 %v855_v31 }
  0x95   :  { %1531 = vmatmul.bf16.gmra.mxu3 %v1053_v25  ;;  %1580 = vmatmul.bf16.gmra.mxu0 %v9484_v33  ;;  %v854_v25 = vpack.c.bf16 %v763_v59, %v763_v59  ;;  %v997_v9 = vunpack.c.l.b16 %v740_v30  ;;  %v998_v50 = vunpack.c.l.b16 %v741_v8  ;;  %v1048_v59 = vunpack.c.l.b16 %v856_v60 }
  0x96   :  { %v960_v8 = vpack.c.b16 %v952_v24, %v951_v39 }
  0x97   :  { %v1046_v53 = vunpack.c.l.b16 %v854_v25  ;;  %v1007_v29 = vpack.c.b16 %v998_v50, %v997_v9  ;;  %v1056_v3 = vpack.c.b16 %v1048_v59, %v1047_v47  ;;  %v8712_v47 = vld [vmem:[#allocation2 + $0x1a8] sm:$0xff] }
  0x98   :  { %v8704_v59 = vld [vmem:[#allocation2 + $0x168] sm:$0xff]  ;;  %2506 = vmatpush.bf16.msra.mxu2 %v8712_v47 }
  0x99   :  { %v1055_v54 = vpack.c.b16 %v1046_v53, %v1045_v51  ;;  %2457 = vmatpush.bf16.msra.mxu1 %v8704_v59 }
  0xa3   :  { %1438 = vmatmul.bf16.gmra.mxu1 %v958_v7  ;;  %1487 = vmatmul.bf16.gmra.mxu2 %v1006_v4  ;;  %v742_v7 = vpack.c.bf16 %v649_v61, %v649_v61  ;;  %v743_v4 = vpack.c.bf16 %v648_v2, %v648_v2 }
  0xa5   :  { %1536 = vmatmul.bf16.gmra.mxu3 %v1054_v36  ;;  %1585 = vmatmul.bf16.gmra.mxu0 %v9509_v37  ;;  %v999_v43 = vunpack.c.l.b16 %v742_v7  ;;  %v1000_v19 = vunpack.c.l.b16 %v743_v4  ;;  %v8725_v37 = vld [vmem:[#allocation2 + $0x210] sm:$0xff] }
  0xa7   :  { %v1008_v45 = vpack.c.b16 %v1000_v19, %v999_v43 }
  0xb0   :  { %v9533_v58 = vpop.f32.mrf.mxu1 }
  0xb1   :  { %v1376_v26 = vadd.f32 %v9554_v42, %v9533_v58 }
  0xb2   :  { %v1365_v46 = vpop.f32.mrf.mxu0 }
  0xb3   :  { %1443 = vmatmul.bf16.gmra.mxu1 %v959_v55  ;;  %1492 = vmatmul.bf16.gmra.mxu2 %v1007_v29  ;;  %v1366_v55 = vadd.f32 %v9554_v42, %v1365_v46 }
  0xb5   :  { %1541 = vmatmul.bf16.gmra.mxu3 %v1055_v54  ;;  %1590 = vmatmul.bf16.gmra.mxu0 %v9535_v63 }
  0xb6   :  { %v1385_v5 = vpop.f32.mrf.mxu2 }
  0xb7   :  { %v9561_v0 = vadd.f32 %v9554_v42, %v1385_v5 }
  0xb8   :  { %v1395_v62 = vpop.f32.mrf.mxu3  ;;  %v9566_v36 = vpop.f32.mrf.mxu1 }
  0xb9   :  { %v9564_v32 = vadd.f32 %v9554_v42, %v1395_v62 }
  0xba   :  { %v1367_v38 = vpop.f32.mrf.mxu0 }
  0xbb   :  { %v1368_v15 = vadd.f32 %v9554_v42, %v1367_v38 }
  0xbe   :  { %v9572_v44 = vpop.f32.mrf.mxu2 }
  0xc0   :  { %v9574_v30 = vpop.f32.mrf.mxu3  ;;  %v9576_v25 = vpop.f32.mrf.mxu1 }
  0xc2   :  { %v1370_v14 = vpop.f32.mrf.mxu0 }
  0xc3   :  { %1448 = vmatmul.bf16.gmra.mxu1 %v960_v8  ;;  %1497 = vmatmul.bf16.gmra.mxu2 %v1008_v45  ;;  %v1371_v7 = vadd.f32 %v9554_v42, %v1370_v14 }
  0xc5   :  { %1546 = vmatmul.bf16.gmra.mxu3 %v1056_v3  ;;  %1595 = vmatmul.bf16.gmra.mxu0 %v9578_v48 }
  0xc6   :  { %v1390_v12 = vpop.f32.mrf.mxu2 }
  0xc7   :  { %v9582_v9 = vadd.f32 %v9554_v42, %v1390_v12 }
  0xc8   :  { %v1400_v50 = vpop.f32.mrf.mxu3  ;;  %v9587_v53 = vpop.f32.mrf.mxu1 }
  0xc9   :  { %v9585_v51 = vadd.f32 %v9554_v42, %v1400_v50 }
  0xca   :  { %v1372_v17 = vpop.f32.mrf.mxu0 }
  0xcb   :  { %v1373_v57 = vadd.f32 %v9554_v42, %v1372_v17 }
  0xce   :  { %v9589_v23 = vpop.f32.mrf.mxu2 }
  0xd0   :  { %v9592_v29 = vpop.f32.mrf.mxu3  ;;  %v1414_v56 = vpop.f32.mrf.mxu1 }
  0xd1   :  { %v1415_v54 = vadd.f32 %v1414_v56, %v1366_v55 }
  0xd2   :  { %v1561_v22 = vpop.f32.mrf.mxu0 }
  0xd6   :  { %v1463_v27 = vpop.f32.mrf.mxu2 }
  0xd7   :  { %v1464_v2 = vadd.f32 %v1463_v27, %v1415_v54 }
  0xd8   :  { %v1512_v61 = vpop.f32.mrf.mxu3  ;;  %v1416_v13 = vpop.f32.mrf.mxu1 }
  0xd9   :  { %v1513_v34 = vadd.f32 %v1512_v61, %v1464_v2  ;;  %v1417_v62 = vadd.f32 %v1416_v13, %v1368_v15 }
  0xda   :  { %v1563_v5 = vpop.f32.mrf.mxu0 }
  0xdb   :  { %v1562_v18 = vadd.f32 %v1561_v22, %v1513_v34 }
  0xdd   :  { %v9596_v24 = vmax.f32 %v1562_v18, 0.0  ;;  %v8711_v18 = vld [vmem:[#allocation2 + $0x1a0] sm:$0xff] }
  0xde   :  { %v1465_v46 = vpop.f32.mrf.mxu2  ;;  %2507 = vmatpush.bf16.msra.mxu2 %v8711_v18 }
  0xdf   :  { %v1466_v4 = vadd.f32 %v1465_v46, %v1417_v62  ;;  %v1956_v8 = vpack.c.bf16 %v9596_v24, %v9596_v24  ;;  %v8703_v62 = vld [vmem:[#allocation2 + $0x160] sm:$0xff] }
  0xe0   :  { %v1514_v31 = vpop.f32.mrf.mxu3  ;;  %v1419_v60 = vpop.f32.mrf.mxu1  ;;  %2458 = vmatpush.bf16.msra.mxu1 %v8703_v62  ;;  %v1383_v62 = vadd.f32 %v9554_v42, %v9587_v53 }
  0xe1   :  { %v1515_v21 = vadd.f32 %v1514_v31, %v1466_v4  ;;  %v1420_v35 = vadd.f32 %v1419_v60, %v1371_v7  ;;  %v9605_v50 = vunpack.c.l.b16 %v1956_v8  ;;  %v1381_v8 = vadd.f32 %v9554_v42, %v9576_v25 }
  0xe2   :  { %v1566_v39 = vpop.f32.mrf.mxu0 }
  0xe3   :  { %v1564_v43 = vadd.f32 %v1563_v5, %v1515_v21  ;;  %11989 = vst [vmem:[#allocation22_spill] sm:$0xff] %v9605_v50 }
  0xe5   :  { %v9598_v19 = vmax.f32 %v1564_v43, 0.0 }
  0xe6   :  { %v1468_v40 = vpop.f32.mrf.mxu2 }
  0xe7   :  { %v1469_v38 = vadd.f32 %v1468_v40, %v1420_v35  ;;  %v1957_v3 = vpack.c.bf16 %v9598_v19, %v9598_v19 }
  0xe8   :  { %v1517_v41 = vpop.f32.mrf.mxu3  ;;  %v1421_v45 = vpop.f32.mrf.mxu1 }
  0xe9   :  { %v1518_v14 = vadd.f32 %v1517_v41, %v1469_v38  ;;  %v9607_v55 = vunpack.c.l.b16 %v1957_v3  ;;  %v1422_v56 = vadd.f32 %v1421_v45, %v1373_v57 }
  0xea   :  { %v1568_v11 = vpop.f32.mrf.mxu0 }
  0xeb   :  { %v1567_v12 = vadd.f32 %v1566_v39, %v1518_v14  ;;  %11990 = vst [vmem:[#allocation23_spill] sm:$0xff] %v9607_v55  ;;  %v1378_v39 = vadd.f32 %v9554_v42, %v9566_v36 }
  0xed   :  { %v9613_v17 = vmax.f32 %v1567_v12, 0.0 }
  0xee   :  { %v1470_v22 = vpop.f32.mrf.mxu2 }
  0xef   :  { %v1471_v10 = vadd.f32 %v1470_v22, %v1422_v56  ;;  %v1958_v58 = vpack.c.bf16 %v9613_v17, %v9613_v17 }
  0xf0   :  { %v1519_v27 = vpop.f32.mrf.mxu3  ;;  %v1424_v2 = vpop.f32.mrf.mxu1 }
  0xf1   :  { %v1520_v61 = vadd.f32 %v1519_v27, %v1471_v10  ;;  %v1425_v13 = vadd.f32 %v1424_v2, %v1376_v26  ;;  %v9623_v47 = vunpack.c.l.b16 %v1958_v58  ;;  %v8710_v26 = vld [vmem:[#allocation2 + $0x198] sm:$0xff] }
  0xf2   :  { %v1571_v34 = vpop.f32.mrf.mxu0  ;;  %v8702_v10 = vld [vmem:[#allocation2 + $0x158] sm:$0xff]  ;;  %2508 = vmatpush.bf16.msra.mxu2 %v8710_v26 }
  0xf3   :  { %v1569_v5 = vadd.f32 %v1568_v11, %v1520_v61  ;;  %11991 = vst [vmem:[#allocation24_spill] sm:$0xff] %v9623_v47  ;;  %2459 = vmatpush.bf16.msra.mxu1 %v8702_v10 }
  0xf5   :  { %v9615_v15 = vmax.f32 %v1569_v5, 0.0 }
  0xf6   :  { %v1473_v46 = vpop.f32.mrf.mxu2 }
  0xf7   :  { %v1474_v7 = vadd.f32 %v1473_v46, %v1425_v13  ;;  %v1959_v60 = vpack.c.bf16 %v9615_v15, %v9615_v15 }
  0xf8   :  { %v1522_v4 = vpop.f32.mrf.mxu3  ;;  %v1426_v31 = vpop.f32.mrf.mxu1 }
  0xf9   :  { %v1523_v21 = vadd.f32 %v1522_v4, %v1474_v7  ;;  %v9625_v59 = vunpack.c.l.b16 %v1959_v60  ;;  %v1427_v40 = vadd.f32 %v1426_v31, %v1378_v39 }
  0xfa   :  { %v1573_v35 = vpop.f32.mrf.mxu0 }
  0xfb   :  { %v1572_v43 = vadd.f32 %v1571_v34, %v1523_v21  ;;  %11992 = vst [vmem:[#allocation25_spill] sm:$0xff] %v9625_v59 }
  0xfd   :  { %v9631_v36 = vmax.f32 %v1572_v43, 0.0 }
  0xfe   :  { %v1475_v41 = vpop.f32.mrf.mxu2 }
  0xff   :  { %v1476_v45 = vadd.f32 %v1475_v41, %v1427_v40  ;;  %v1960_v25 = vpack.c.bf16 %v9631_v36, %v9631_v36 }
 0x100   :  { %v1524_v3 = vpop.f32.mrf.mxu3  ;;  %v1429_v14 = vpop.f32.mrf.mxu1 }
 0x101   :  { %v1525_v11 = vadd.f32 %v1524_v3, %v1476_v45  ;;  %v1430_v57 = vadd.f32 %v1429_v14, %v1381_v8  ;;  %v9641_v7 = vunpack.c.l.b16 %v1960_v25  ;;  %v8709_v3 = vld [vmem:[#allocation2 + $0x190] sm:$0xff] }
 0x102   :  { %v1576_v12 = vpop.f32.mrf.mxu0  ;;  %v8701_v14 = vld [vmem:[#allocation2 + $0x150] sm:$0xff]  ;;  %2509 = vmatpush.bf16.msra.mxu2 %v8709_v3 }
 0x103   :  { %v1574_v56 = vadd.f32 %v1573_v35, %v1525_v11  ;;  %11993 = vst [vmem:[#allocation26_spill] sm:$0xff] %v9641_v7  ;;  %2460 = vmatpush.bf16.msra.mxu1 %v8701_v14 }
 0x105   :  { %v9633_v22 = vmax.f32 %v1574_v56, 0.0 }
 0x106   :  { %v1478_v27 = vpop.f32.mrf.mxu2 }
 0x107   :  { %v1479_v2 = vadd.f32 %v1478_v27, %v1430_v57  ;;  %v1961_v34 = vpack.c.bf16 %v9633_v22, %v9633_v22 }
 0x108   :  { %v1527_v61 = vpop.f32.mrf.mxu3  ;;  %v1431_v13 = vpop.f32.mrf.mxu1 }
 0x109   :  { %v1528_v5 = vadd.f32 %v1527_v61, %v1479_v2  ;;  %v9643_v4 = vunpack.c.l.b16 %v1961_v34  ;;  %v1432_v58 = vadd.f32 %v1431_v13, %v1383_v62  ;;  %v1388_v2 = vadd.f32 %v9554_v42, %v9572_v44 }
 0x10a   :  { %v1578_v18 = vpop.f32.mrf.mxu0 }
 0x10b   :  { %v1577_v46 = vadd.f32 %v1576_v12, %v1528_v5  ;;  %11994 = vst [vmem:[#allocation27_spill] sm:$0xff] %v9643_v4 }
 0x10d   :  { %v9648_v8 = vmax.f32 %v1577_v46, 0.0 }
 0x10e   :  { %v1480_v60 = vpop.f32.mrf.mxu2 }
 0x10f   :  { %v1481_v21 = vadd.f32 %v1480_v60, %v1432_v58  ;;  %v1962_v56 = vpack.c.bf16 %v9648_v8, %v9648_v8 }
 0x110   :  { %v1529_v35 = vpop.f32.mrf.mxu3  ;;  %v1434_v39 = vpop.f32.mrf.mxu1 }
 0x111   :  { %v1530_v43 = vadd.f32 %v1529_v35, %v1481_v21  ;;  %v1435_v40 = vadd.f32 %v1434_v39, %v9561_v0  ;;  %v9658_v25 = vunpack.c.l.b16 %v1962_v56 }
 0x112   :  { %v1581_v41 = vpop.f32.mrf.mxu0 }
 0x113   :  { %v1579_v53 = vadd.f32 %v1578_v18, %v1530_v43  ;;  %11995 = vst [vmem:[#allocation28_spill] sm:$0xff] %v9658_v25  ;;  %v8721_v18 = vld [vmem:[#allocation2 + $0x1f0] sm:$0xff] }
 0x115   :  { %v9650_v45 = vmax.f32 %v1579_v53, 0.0 }
 0x116   :  { %v1483_v11 = vpop.f32.mrf.mxu2 }
 0x117   :  { %v1484_v57 = vadd.f32 %v1483_v11, %v1435_v40  ;;  %v1963_v0 = vpack.c.bf16 %v9650_v45, %v9650_v45  ;;  %v11896_v46 = vrot.slane %v9650_v45, 4  ;;  %v11895_v21 = vrot.slane %v9650_v45, 5 }
 0x118   :  { %v1532_v12 = vpop.f32.mrf.mxu3  ;;  %v1436_v26 = vpop.f32.mrf.mxu1  ;;  %v11894_v44 = vrot.slane %v9650_v45, 6  ;;  %v11893_v43 = vrot.slane %v9650_v45, 7 }
 0x119   :  { %v1533_v10 = vadd.f32 %v1532_v12, %v1484_v57  ;;  %v9660_v13 = vunpack.c.l.b16 %v1963_v0  ;;  %v1437_v5 = vadd.f32 %v1436_v26, %v1388_v2  ;;  %v8722_v57 = vld [vmem:[#allocation2 + $0x1f8] sm:$0xff] }
 0x11a   :  { %v1583_v27 = vpop.f32.mrf.mxu0  ;;  %v8730_v12 = vld [vmem:[#allocation2 + $0x238] sm:$0xff]  ;;  %2553 = vmatpush.bf16.msra.mxu3 %v8722_v57  ;;  %v8729_v57 = vld [vmem:[#allocation2 + $0x230] sm:$0xff] }
 0x11b   :  { %v1582_v61 = vadd.f32 %v1581_v41, %v1533_v10  ;;  %11996 = vst [vmem:[#allocation29_spill] sm:$0xff] %v9660_v13  ;;  %2602 = vmatpush.bf16.msra.mxu0 %v8730_v12 }
 0x11d   :  { %v9662_v34 = vmax.f32 %v1582_v61, 0.0 }
 0x11e   :  { %v1485_v62 = vpop.f32.mrf.mxu2  ;;  %2554 = vmatpush.bf16.msra.mxu3 %v8721_v18 }
 0x11f   :  { %v1486_v58 = vadd.f32 %v1485_v62, %v1437_v5  ;;  %v1708_v35 = vrot.slane %v9662_v34, 4  ;;  %v1772_v40 = vrot.slane %v9662_v34, 5  ;;  %v1836_v41 = vrot.slane %v9662_v34, 6  ;;  %2603 = vmatpush.bf16.msra.mxu0 %v8729_v57 }
 0x120   :  { %v1534_v60 = vpop.f32.mrf.mxu3  ;;  %v1439_v39 = vpop.f32.mrf.mxu1  ;;  %v1900_v53 = vrot.slane %v9662_v34, 7  ;;  %v1964_v26 = vpack.c.bf16 %v9662_v34, %v9662_v34 }
 0x121   :  { %v1535_v3 = vadd.f32 %v1534_v60, %v1486_v58  ;;  %v1440_v14 = vadd.f32 %v1439_v39, %v9582_v9  ;;  %v1723_v56 = vsel %vm421_vm0, %v11896_v46, %v1708_v35  ;;  %v1787_v10 = vsel %vm534_vm3, %v11895_v21, %v1772_v40  ;;  %v8708_v39 = vld [vmem:[#allocation2 + $0x188] sm:$0xff] }
 0x122   :  { %v1586_v11 = vpop.f32.mrf.mxu0  ;;  %v1740_v0 = vsel %vm446_vm1, %v1723_v56, 0.0  ;;  %v1851_v9 = vsel %vm647_vm4, %v11894_v44, %v1836_v41  ;;  %v1915_v2 = vsel %vm760_vm7, %v11893_v43, %v1900_v53  ;;  %v1804_v5 = vsel %vm559_vm9, %v1787_v10, 0.0  ;;  %v8700_v56 = vld [vmem:[#allocation2 + $0x148] sm:$0xff]  ;;  %2510 = vmatpush.bf16.msra.mxu2 %v8708_v39 }
 0x123   :  { %v1584_v61 = vadd.f32 %v1583_v27, %v1535_v3  ;;  %v1756_v34 = vpack.c.bf16 %v1740_v0, %v1740_v0  ;;  %v1868_v62 = vsel %vm672_vm10, %v1851_v9, 0.0  ;;  %v1820_v58 = vpack.c.bf16 %v1804_v5, %v1804_v5  ;;  %2461 = vmatpush.bf16.msra.mxu1 %v8700_v56  ;;  %v8720_v39 = vld [vmem:[#allocation2 + $0x1e8] sm:$0xff] }
 0x124   :  { %v1884_v31 = vpack.c.bf16 %v1868_v62, %v1868_v62  ;;  %v1932_v38 = vsel %vm785_vm11, %v1915_v2, 0.0  ;;  %v1393_v27 = vadd.f32 %v9554_v42, %v9589_v23  ;;  %v9707_v0 = vunpack.c.l.b16 %v1964_v26  ;;  %v8728_v56 = vld [vmem:[#allocation2 + $0x228] sm:$0xff]  ;;  %2555 = vmatpush.bf16.msra.mxu3 %v8720_v39 }
 0x125   :  { %v9699_v60 = vmax.f32 %v1584_v61, 0.0  ;;  %v9705_v12 = vunpack.c.l.b16 %v1756_v34  ;;  %v9712_v23 = vunpack.c.l.b16 %v1820_v58  ;;  %v1948_v54 = vpack.c.bf16 %v1932_v38, %v1932_v38  ;;  %2604 = vmatpush.bf16.msra.mxu0 %v8728_v56 }
 0x126   :  { %v1488_v3 = vpop.f32.mrf.mxu2  ;;  %11997 = vst [vmem:[#allocation30_spill] sm:$0xff] %v9707_v0  ;;  %v9721_v44 = vunpack.c.l.b16 %v1884_v31 }
 0x127   :  { %v1489_v10 = vadd.f32 %v1488_v3, %v1440_v14  ;;  %v1709_v61 = vrot.slane %v9699_v60, 4  ;;  %v1773_v5 = vrot.slane %v9699_v60, 5  ;;  %v1837_v62 = vrot.slane %v9699_v60, 6 }
 0x128   :  { %v1537_v9 = vpop.f32.mrf.mxu3  ;;  %v1441_v2 = vpop.f32.mrf.mxu1  ;;  %v1901_v34 = vrot.slane %v9699_v60, 7  ;;  %v1965_v14 = vpack.c.bf16 %v9699_v60, %v9699_v60 }
 0x129   :  { %v1538_v26 = vadd.f32 %v1537_v9, %v1489_v10  ;;  %v1722_v3 = vsel %vm421_vm0, %v1708_v35, %v1709_v61  ;;  %v1786_v43 = vsel %vm534_vm3, %v1772_v40, %v1773_v5  ;;  %v1850_v38 = vsel %vm647_vm4, %v1836_v41, %v1837_v62  ;;  %v8719_v41 = vld [vmem:[#allocation2 + $0x1e0] sm:$0xff]  ;;  %2605 = vmatpush.bf16.msra.mxu0 %v8727_v6 }
 0x12a   :  { %v1588_v18 = vpop.f32.mrf.mxu0  ;;  %v1757_v58 = vpack.c.bf16 %v1722_v3, %v1722_v3  ;;  %v1821_v57 = vpack.c.bf16 %v1786_v43, %v1786_v43  ;;  %v1914_v60 = vsel %vm760_vm7, %v1900_v53, %v1901_v34  ;;  %v1885_v9 = vpack.c.bf16 %v1850_v38, %v1850_v38  ;;  %2556 = vmatpush.bf16.msra.mxu3 %v8719_v41 }
 0x12b   :  { %v1587_v10 = vadd.f32 %v1586_v11, %v1538_v26  ;;  %v1949_v21 = vpack.c.bf16 %v1914_v60, %v1914_v60  ;;  %v9727_v46 = vunpack.c.l.b16 %v1965_v14  ;;  %v1442_v35 = vadd.f32 %v1441_v2, %v1393_v27 }
 0x12c   :  { %v9729_v40 = vunpack.c.l.b16 %v1757_v58  ;;  %v9731_v31 = vunpack.c.l.b16 %v1821_v57  ;;  %v9733_v3 = vunpack.c.l.b16 %v1948_v54  ;;  %v9737_v48 = vunpack.c.l.b16 %v1885_v9 }
 0x12d   :  { %11998 = vst [vmem:[#allocation31_spill] sm:$0xff] %v9727_v46  ;;  %v9735_v43 = vmax.f32 %v1587_v10, 0.0  ;;  %v9739_v53 = vunpack.c.l.b16 %v1949_v21 }
 0x12e   :  { %v1490_v27 = vpop.f32.mrf.mxu2 }
 0x12f   :  { %v1491_v54 = vadd.f32 %v1490_v27, %v1442_v35  ;;  %v1710_v21 = vrot.slane %v9735_v43, 4  ;;  %v1774_v57 = vrot.slane %v9735_v43, 5  ;;  %v1838_v38 = vrot.slane %v9735_v43, 6  ;;  %v8718_v35 = vld [vmem:[#allocation2 + $0x1d8] sm:$0xff] }
 0x130   :  { %v1539_v26 = vpop.f32.mrf.mxu3  ;;  %v1444_v58 = vpop.f32.mrf.mxu1  ;;  %v1902_v60 = vrot.slane %v9735_v43, 7  ;;  %v8726_v27 = vld [vmem:[#allocation2 + $0x218] sm:$0xff]  ;;  %2557 = vmatpush.bf16.msra.mxu3 %v8718_v35 }
 0x131   :  { %v1540_v10 = vadd.f32 %v1539_v26, %v1491_v54  ;;  %v1445_v9 = vadd.f32 %v1444_v58, %v9564_v32  ;;  %v1721_v11 = vsel %vm421_vm0, %v1709_v61, %v1710_v21  ;;  %v1785_v39 = vsel %vm534_vm3, %v1773_v5, %v1774_v57  ;;  %2606 = vmatpush.bf16.msra.mxu0 %v8726_v27  ;;  %v8707_v61 = vld [vmem:[#allocation2 + $0x180] sm:$0xff]  ;;  %v8717_v58 = vld [vmem:[#allocation2 + $0x1d0] sm:$0xff] }
 0x132   :  { %v1758_v56 = vpack.c.bf16 %v1721_v11, %v1721_v11  ;;  %v1849_v6 = vsel %vm647_vm4, %v1837_v62, %v1838_v38  ;;  %v1913_v41 = vsel %vm760_vm7, %v1901_v34, %v1902_v60  ;;  %v1591_v2 = vpop.f32.mrf.mxu0  ;;  %v1822_v32 = vpack.c.bf16 %v1785_v39, %v1785_v39  ;;  %v8699_v11 = vld [vmem:[#allocation2 + $0x140] sm:$0xff]  ;;  %2511 = vmatpush.bf16.msra.mxu2 %v8707_v61 }
 0x133   :  { %v1589_v14 = vadd.f32 %v1588_v18, %v1540_v10  ;;  %v1966_v54 = vpack.c.bf16 %v9735_v43, %v9735_v43  ;;  %v1886_v5 = vpack.c.bf16 %v1849_v6, %v1849_v6  ;;  %v1398_v62 = vadd.f32 %v9554_v42, %v9574_v30  ;;  %2462 = vmatpush.bf16.msra.mxu1 %v8699_v11  ;;  %v8716_v6 = vld [vmem:[#allocation2 + $0x1c8] sm:$0xff] }
 0x134   :  { %v9770_v34 = vunpack.c.l.b16 %v1758_v56  ;;  %v1950_v18 = vpack.c.bf16 %v1913_v41, %v1913_v41  ;;  %2558 = vmatpush.bf16.msra.mxu3 %v8717_v58  ;;  %v8724_v30 = vld [vmem:[#allocation2 + $0x208] sm:$0xff]  ;;  %v9775_v33 = vunpack.c.l.b16 %v1822_v32 }
 0x135   :  { %v9766_v26 = vmax.f32 %v1589_v14, 0.0  ;;  %2607 = vmatpush.bf16.msra.mxu0 %v8725_v37  ;;  %v9786_v58 = vunpack.c.l.b16 %v1886_v5 }
 0x136   :  { %v1493_v63 = vpop.f32.mrf.mxu2 }
 0x137   :  { %v1494_v10 = vadd.f32 %v1493_v63, %v1445_v9  ;;  %v1711_v43 = vrot.slane %v9766_v26, 4  ;;  %v1775_v14 = vrot.slane %v9766_v26, 5  ;;  %v1839_v39 = vrot.slane %v9766_v26, 6 }
 0x138   :  { %v1542_v35 = vpop.f32.mrf.mxu3  ;;  %v1446_v27 = vpop.f32.mrf.mxu1  ;;  %v1903_v56 = vrot.slane %v9766_v26, 7  ;;  %v1967_v63 = vpack.c.bf16 %v9766_v26, %v9766_v26  ;;  %v9780_v9 = vunpack.c.l.b16 %v1966_v54  ;;  %2559 = vmatpush.bf16.msra.mxu3 %v8716_v6 }
 0x139   :  { %v1543_v41 = vadd.f32 %v1542_v35, %v1494_v10  ;;  %v1720_v61 = vsel %vm421_vm0, %v1710_v21, %v1711_v43  ;;  %v1784_v11 = vsel %vm534_vm3, %v1774_v57, %v1775_v14  ;;  %v1848_v32 = vsel %vm647_vm4, %v1838_v38, %v1839_v39  ;;  %2608 = vmatpush.bf16.msra.mxu0 %v8724_v30  ;;  %v8715_v21 = vld [vmem:[#allocation2 + $0x1c0] sm:$0xff] }
 0x13a   :  { %11999 = vst [vmem:[#allocation32_spill] sm:$0xff] %v9780_v9  ;;  %v1759_v37 = vpack.c.bf16 %v1720_v61, %v1720_v61  ;;  %v1823_v0 = vpack.c.bf16 %v1784_v11, %v1784_v11  ;;  %v1912_v46 = vsel %vm760_vm7, %v1902_v60, %v1903_v56  ;;  %v1887_v54 = vpack.c.bf16 %v1848_v32, %v1848_v32  ;;  %v8723_v57 = vld [vmem:[#allocation2 + $0x200] sm:$0xff]  ;;  %v1593_v60 = vpop.f32.mrf.mxu0 }
 0x13b   :  { %v1592_v26 = vadd.f32 %v1591_v2, %v1543_v41  ;;  %v1951_v28 = vpack.c.bf16 %v1912_v46, %v1912_v46  ;;  %v9792_v10 = vunpack.c.l.b16 %v1967_v63  ;;  %v1447_v35 = vadd.f32 %v1446_v27, %v1398_v62  ;;  %v8738_v27 = vld [vmem:[#allocation2 + $0x278] sm:$0xff] }
 0x13c   :  { %v9794_v5 = vunpack.c.l.b16 %v1759_v37  ;;  %v9796_v61 = vunpack.c.l.b16 %v1823_v0  ;;  %v9798_v11 = vunpack.c.l.b16 %v1950_v18  ;;  %v9802_v25 = vunpack.c.l.b16 %v1887_v54  ;;  %2560 = vmatpush.bf16.msra.mxu3 %v8715_v21  ;;  %v8746_v0 = vld [vmem:[#allocation6 + $0x38] sm:$0xff]  ;;  %2651 = vmatpush.bf16.msrb.mxu1 %v8738_v27 }
 0x13d   :  { %12000 = vst [vmem:[#allocation33_spill] sm:$0xff] %v9792_v10  ;;  %v9800_v38 = vmax.f32 %v1592_v26, 0.0  ;;  %v9804_v2 = vunpack.c.l.b16 %v1951_v28  ;;  %2609 = vmatpush.bf16.msra.mxu0 %v8723_v57  ;;  %v11911_v28 = vrot.slane %v9598_v19, 6  ;;  %2784 = vmatpush.bf16.msrb.mxu2 %v8746_v0 }
 0x13e   :  { %v1495_v62 = vpop.f32.mrf.mxu2 }
 0x13f   :  { %v1496_v30 = vadd.f32 %v1495_v62, %v1447_v35  ;;  %v1712_v37 = vrot.slane %v9800_v38, 4  ;;  %v1776_v54 = vrot.slane %v9800_v38, 5  ;;  %v1840_v46 = vrot.slane %v9800_v38, 6 }
 0x140   :  { %v1544_v63 = vpop.f32.mrf.mxu3  ;;  %v1449_v32 = vpop.f32.mrf.mxu1  ;;  %v1904_v35 = vrot.slane %v9800_v38, 7 }
 0x141   :  { %v1545_v62 = vadd.f32 %v1544_v63, %v1496_v30  ;;  %v1450_v18 = vadd.f32 %v1449_v32, %v9585_v51  ;;  %v1719_v41 = vsel %vm421_vm0, %v1711_v43, %v1712_v37  ;;  %v1783_v57 = vsel %vm534_vm3, %v1775_v14, %v1776_v54 }
 0x142   :  { %v1760_v21 = vpack.c.bf16 %v1719_v41, %v1719_v41  ;;  %v1847_v26 = vsel %vm647_vm4, %v1839_v39, %v1840_v46  ;;  %v1911_v6 = vsel %vm760_vm7, %v1903_v56, %v1904_v35  ;;  %v1403_v51 = vadd.f32 %v9554_v42, %v9592_v29  ;;  %v1596_v9 = vpop.f32.mrf.mxu0 }
 0x143   :  { %v1594_v30 = vadd.f32 %v1593_v60, %v1545_v62  ;;  %v12001_v63 = vrot.slane %v9598_v19, 4  ;;  %v12002_v43 = vrot.slane %v9596_v24, 4  ;;  %v11907_v14 = vrot.slane %v9596_v24, 5 }
 0x144   :  { %v11912_v32 = vrot.slane %v9596_v24, 6  ;;  %v1824_v56 = vpack.c.bf16 %v1783_v57, %v1783_v57  ;;  %v1968_v42 = vpack.c.bf16 %v9800_v38, %v9800_v38  ;;  %v12003_v60 = vrot.slane %v9598_v19, 5 }
 0x145   :  { %v9841_v41 = vsel %vm421_vm0, %v12002_v43, %v12001_v63  ;;  %v9848_v29 = vmax.f32 %v1594_v30, 0.0  ;;  %v1888_v43 = vpack.c.bf16 %v1847_v26, %v1847_v26  ;;  %v9867_v0 = vunpack.c.l.b16 %v1760_v21 }
 0x146   :  { %v9856_v62 = vsel %vm534_vm3, %v11907_v14, %v12003_v60  ;;  %v1498_v39 = vpop.f32.mrf.mxu2  ;;  %v1749_v27 = vpack.c.bf16 %v9841_v41, %v9841_v41  ;;  %v1858_v38 = vsel %vm647_vm4, %v11912_v32, %v11911_v28  ;;  %v1952_v57 = vpack.c.bf16 %v1911_v6, %v1911_v6 }
 0x147   :  { %v1499_v30 = vadd.f32 %v1498_v39, %v1450_v18  ;;  %v1713_v14 = vrot.slane %v9848_v29, 4  ;;  %v1777_v26 = vrot.slane %v9848_v29, 5  ;;  %v1841_v63 = vrot.slane %v9848_v29, 6 }
 0x148   :  { %v1547_v60 = vpop.f32.mrf.mxu3  ;;  %v9872_v41 = vunpack.c.l.b16 %v1824_v56  ;;  %v1905_v10 = vrot.slane %v9848_v29, 7  ;;  %v1969_v13 = vpack.c.bf16 %v9848_v29, %v9848_v29  ;;  %v9877_v28 = vunpack.c.l.b16 %v1968_v42  ;;  %v1451_v6 = vpop.f32.mrf.mxu1 }
 0x149   :  { %v1548_v21 = vadd.f32 %v1547_v60, %v1499_v30  ;;  %v1718_v18 = vsel %vm421_vm0, %v1712_v37, %v1713_v14  ;;  %v1782_v39 = vsel %vm534_vm3, %v1776_v54, %v1777_v26  ;;  %v9883_v32 = vunpack.c.l.b16 %v1888_v43 }
 0x14a   :  { %12004 = vst [vmem:[#allocation34_spill] sm:$0xff] %v9872_v41  ;;  %v1761_v49 = vpack.c.bf16 %v1718_v18, %v1718_v18  ;;  %v1825_v56 = vpack.c.bf16 %v1782_v39, %v1782_v39  ;;  %v1846_v7 = vsel %vm647_vm4, %v1840_v46, %v1841_v63  ;;  %v1910_v29 = vsel %vm760_vm7, %v1904_v35, %v1905_v10 }
 0x14b   :  { %12005 = vst [vmem:[#allocation35_spill] sm:$0xff] %v9877_v28  ;;  %v1597_v42 = vadd.f32 %v1596_v9, %v1548_v21  ;;  %v1889_v4 = vpack.c.bf16 %v1846_v7, %v1846_v7  ;;  %v1953_v30 = vpack.c.bf16 %v1910_v29, %v1910_v29  ;;  %v9889_v60 = vunpack.c.l.b16 %v1969_v13 }
 0x14c   :  { %12006 = vst [vmem:[#allocation36_spill] sm:$0xff] %v9883_v32  ;;  %v1452_v20 = vadd.f32 %v1451_v6, %v1403_v51  ;;  %v9891_v37 = vunpack.c.l.b16 %v1761_v49  ;;  %v9893_v47 = vunpack.c.l.b16 %v1825_v56  ;;  %v9895_v54 = vunpack.c.l.b16 %v1952_v57  ;;  %v8745_v6 = vld [vmem:[#allocation6 + $0x30] sm:$0xff] }
 0x14d   :  { %12007 = vst [vmem:[#allocation37_spill] sm:$0xff] %v9889_v60  ;;  %v9897_v43 = vmax.f32 %v1597_v42, 0.0  ;;  %v9899_v18 = vunpack.c.l.b16 %v1889_v4  ;;  %v9901_v46 = vunpack.c.l.b16 %v1953_v30  ;;  %v1813_v13 = vpack.c.bf16 %v9856_v62, %v9856_v62  ;;  %v8737_v57 = vld [vmem:[#allocation2 + $0x270] sm:$0xff]  ;;  %2785 = vmatpush.bf16.msrb.mxu2 %v8745_v6 }
 0x14e   :  { %12008 = vst [vmem:[#allocation38_spill] sm:$0xff] %v9895_v54  ;;  %v1500_v7 = vpop.f32.mrf.mxu2  ;;  %v12011_v49 = vrot.slane %v9598_v19, 7  ;;  %v12012_v35 = vrot.slane %v9596_v24, 7  ;;  %v1877_v29 = vpack.c.bf16 %v1858_v38, %v1858_v38  ;;  %v1989_v60 = vunpack.c.l.b16 %v1749_v27  ;;  %2652 = vmatpush.bf16.msrb.mxu1 %v8737_v57 }
 0x14f   :  { %12009 = vst [vmem:[#allocation39_spill] sm:$0xff] %v9899_v18  ;;  %v1501_v21 = vadd.f32 %v1500_v7, %v1452_v20  ;;  %v1714_v39 = vrot.slane %v9897_v43, 4  ;;  %v1778_v42 = vrot.slane %v9897_v43, 5  ;;  %v1842_v30 = vrot.slane %v9897_v43, 6  ;;  %v1598_v7 = vpop.f32.mrf.mxu0 }
 0x150   :  { %12010 = vst [vmem:[#allocation40_spill] sm:$0xff] %v9901_v46  ;;  %v1922_v51 = vsel %vm760_vm7, %v12012_v35, %v12011_v49  ;;  %v1549_v56 = vpop.f32.mrf.mxu3  ;;  %v1906_v49 = vrot.slane %v9897_v43, 7  ;;  %v2037_v59 = vunpack.c.l.b16 %v1813_v13  ;;  %v1970_v27 = vpack.c.bf16 %v9897_v43, %v9897_v43 }
 0x151   :  { %v1550_v35 = vadd.f32 %v1549_v56, %v1501_v21  ;;  %v1941_v9 = vpack.c.bf16 %v1922_v51, %v1922_v51  ;;  %v1717_v20 = vsel %vm421_vm0, %v1713_v14, %v1714_v39  ;;  %v1781_v62 = vsel %vm534_vm3, %v1777_v26, %v1778_v42 }
 0x152   :  { %v1845_v38 = vsel %vm647_vm4, %v1841_v63, %v1842_v30  ;;  %v1909_v4 = vsel %vm760_vm7, %v1905_v10, %v1906_v49  ;;  %v2085_v21 = vunpack.c.l.b16 %v1877_v29  ;;  %v1762_v51 = vpack.c.bf16 %v1717_v20, %v1717_v20 }
 0x153   :  { %v1599_v28 = vadd.f32 %v1598_v7, %v1550_v35  ;;  %v1826_v14 = vpack.c.bf16 %v1781_v62, %v1781_v62  ;;  %v1890_v56 = vpack.c.bf16 %v1845_v38, %v1845_v38  ;;  %v2133_v50 = vunpack.c.l.b16 %v1941_v9 }
 0x154   :  { %v1954_v10 = vpack.c.bf16 %v1909_v4, %v1909_v4  ;;  %v9939_v62 = vunpack.c.l.b16 %v1762_v51  ;;  %v12013_v20 = vrot.slane %v9596_v24, 4  ;;  %v12014_v4 = vrot.slane %v9596_v24, 5 }
 0x155   :  { %v1616_v52 = vmax.f32 %v1599_v28, 0.0  ;;  %v9941_v28 = vunpack.c.l.b16 %v1826_v14  ;;  %v9943_v9 = vunpack.c.l.b16 %v1890_v56  ;;  %v12015_v38 = vrot.slane %v9596_v24, 6 }
 0x156   :  { %v12016_v14 = vrot.slane %v9596_v24, 7 }
 0x157   :  { %v1715_v13 = vrot.slane %v1616_v52, 4  ;;  %v1779_v6 = vrot.slane %v1616_v52, 5  ;;  %v1843_v57 = vrot.slane %v1616_v52, 6  ;;  %v1907_v29 = vrot.slane %v1616_v52, 7 }
 0x158   :  { %v1971_v35 = vpack.c.bf16 %v1616_v52, %v1616_v52 }
 0x159   :  { %v1731_v7 = vsel %vm421_vm0, %v1715_v13, %v12013_v20  ;;  %v1795_v43 = vsel %vm534_vm3, %v1779_v6, %v12014_v4  ;;  %v1859_v51 = vsel %vm647_vm4, %v1843_v57, %v12015_v38  ;;  %v1923_v52 = vsel %vm760_vm7, %v1907_v29, %v12016_v14 }
 0x15a   :  { %v1732_v56 = vsel %vm438_vm2, %v1731_v7, 0.0  ;;  %v1796_v20 = vsel %vm551_vm5, %v1795_v43, 0.0  ;;  %v1860_v54 = vsel %vm664_vm6, %v1859_v51, 0.0  ;;  %v1924_v4 = vsel %vm777_vm8, %v1923_v52, 0.0 }
 0x15b   :  { %v1748_v63 = vpack.c.bf16 %v1732_v56, %v1732_v56  ;;  %v1812_v55 = vpack.c.bf16 %v1796_v20, %v1796_v20  ;;  %v1876_v38 = vpack.c.bf16 %v1860_v54, %v1860_v54  ;;  %v1940_v26 = vpack.c.bf16 %v1924_v4, %v1924_v4 }
 0x15c   :  { %v1716_v24 = vsel %vm421_vm0, %v1714_v39, %v1715_v13  ;;  %v1780_v14 = vsel %vm534_vm3, %v1778_v42, %v1779_v6  ;;  %v1844_v7 = vsel %vm647_vm4, %v1842_v30, %v1843_v57  ;;  %v1908_v43 = vsel %vm760_vm7, %v1906_v49, %v1907_v29 }
 0x15d   :  { %v1988_v51 = vunpack.c.l.b16 %v1748_v63  ;;  %v2036_v46 = vunpack.c.l.b16 %v1812_v55  ;;  %v2084_v16 = vunpack.c.l.b16 %v1876_v38  ;;  %v2132_v52 = vunpack.c.l.b16 %v1940_v26 }
 0x15e   :  { %v1763_v56 = vpack.c.bf16 %v1716_v24, %v1716_v24  ;;  %v1827_v20 = vpack.c.bf16 %v1780_v14, %v1780_v14  ;;  %v1891_v54 = vpack.c.bf16 %v1844_v7, %v1844_v7  ;;  %v1955_v4 = vpack.c.bf16 %v1908_v43, %v1908_v43 }
 0x15f   :  { %v2004_v32 = vpack.c.b16 %v1989_v60, %v1988_v51  ;;  %v2052_v18 = vpack.c.b16 %v2037_v59, %v2036_v46  ;;  %v2100_v39 = vpack.c.b16 %v2085_v21, %v2084_v16  ;;  %v2148_v13 = vpack.c.b16 %v2133_v50, %v2132_v52  ;;  %v8744_v50 = vld [vmem:[#allocation6 + $0x28] sm:$0xff] }
 0x160   :  { %v9977_v41 = vunpack.c.l.b16 %v1763_v56  ;;  %v9979_v42 = vunpack.c.l.b16 %v1827_v20  ;;  %v9981_v30 = vunpack.c.l.b16 %v1891_v54  ;;  %v9983_v6 = vunpack.c.l.b16 %v1955_v4  ;;  %v8736_v59 = vld [vmem:[#allocation2 + $0x268] sm:$0xff]  ;;  %2786 = vmatpush.bf16.msrb.mxu2 %v8744_v50 }
 0x161   :  { %2463 = vmatmul.bf16.vlgmr.msra.gmra.mxu1 %v2004_v32  ;;  %2512 = vmatmul.bf16.vlgmr.msra.gmra.mxu2 %v2052_v18  ;;  %v1895_v55 = vrot.slane %v9615_v15, 7  ;;  %v9986_v49 = vunpack.c.l.b16 %v1954_v10  ;;  %v9988_v26 = vunpack.c.l.b16 %v1970_v27  ;;  %v9990_v60 = vunpack.c.l.b16 %v1971_v35 }
 0x162   :  { %2561 = vmatmul.bf16.vlgmr.msra.gmra.mxu3 %v2100_v39  ;;  %2610 = vmatmul.bf16.vlgmr.msra.gmra.mxu0 %v2148_v13  ;;  %v1766_v16 = vrot.slane %v9613_v17, 5  ;;  %v1830_v21 = vrot.slane %v9613_v17, 6  ;;  %v1894_v63 = vrot.slane %v9613_v17, 7  ;;  %v12017_v57 = vrot.slane %v9615_v15, 4 }
 0x163   :  { %v12018_v29 = vrot.slane %v9613_v17, 4  ;;  %v12019_v38 = vrot.slane %v9615_v15, 5  ;;  %2653 = vmatpush.bf16.msrb.mxu1 %v8736_v59  ;;  %v12020_v14 = vrot.slane %v9615_v15, 6  ;;  %v12022_v52 = vrot.slane %v9598_v19, 4 }
 0x164   :  { %v1920_v43 = vsel %vm760_vm7, %v1894_v63, %v1895_v55  ;;  %v12023_v20 = vrot.slane %v9598_v19, 5  ;;  %v12024_v13 = vrot.slane %v9598_v19, 6  ;;  %v12025_v59 = vrot.slane %v9598_v19, 7 }
 0x165   :  { %v1728_v35 = vsel %vm421_vm0, %v12018_v29, %v12017_v57  ;;  %v1792_v24 = vsel %vm534_vm3, %v1766_v16, %v12019_v38  ;;  %v1856_v7 = vsel %vm647_vm4, %v1830_v21, %v12020_v14  ;;  %v12021_v51 = vmov %v12018_v29 }
 0x166   :  { %v1729_v56 = vsel %vm421_vm0, %v12022_v52, %v12021_v51  ;;  %v1793_v54 = vsel %vm534_vm3, %v12023_v20, %v1766_v16  ;;  %v1751_v4 = vpack.c.bf16 %v1728_v35, %v1728_v35  ;;  %v1815_v39 = vpack.c.bf16 %v1792_v24, %v1792_v24 }
 0x167   :  { %v1857_v50 = vsel %vm647_vm4, %v12024_v13, %v1830_v21  ;;  %v1921_v17 = vsel %vm760_vm7, %v12025_v59, %v1894_v63  ;;  %v1879_v57 = vpack.c.bf16 %v1856_v7, %v1856_v7  ;;  %v1943_v29 = vpack.c.bf16 %v1920_v43, %v1920_v43 }
 0x168   :  { %v1750_v38 = vpack.c.bf16 %v1729_v56, %v1729_v56  ;;  %v1814_v14 = vpack.c.bf16 %v1793_v54, %v1793_v54  ;;  %v1878_v51 = vpack.c.bf16 %v1857_v50, %v1857_v50  ;;  %v1942_v52 = vpack.c.bf16 %v1921_v17, %v1921_v17 }
 0x169   :  { %v1991_v27 = vunpack.c.l.b16 %v1751_v4  ;;  %v2039_v16 = vunpack.c.l.b16 %v1815_v39  ;;  %v2087_v35 = vunpack.c.l.b16 %v1879_v57  ;;  %v2135_v24 = vunpack.c.l.b16 %v1943_v29 }
 0x16a   :  { %v1990_v20 = vunpack.c.l.b16 %v1750_v38  ;;  %v2038_v10 = vunpack.c.l.b16 %v1814_v14  ;;  %v2086_v18 = vunpack.c.l.b16 %v1878_v51  ;;  %v2134_v32 = vunpack.c.l.b16 %v1942_v52 }
 0x16b   :  { %v1705_v63 = vrot.slane %v9633_v22, 4  ;;  %v1769_v7 = vrot.slane %v9633_v22, 5  ;;  %v1833_v43 = vrot.slane %v9633_v22, 6  ;;  %v1897_v56 = vrot.slane %v9633_v22, 7 }
 0x16c   :  { %v2005_v21 = vpack.c.b16 %v1991_v27, %v1990_v20  ;;  %v2053_v13 = vpack.c.b16 %v2039_v16, %v2038_v10  ;;  %v2101_v19 = vpack.c.b16 %v2087_v35, %v2086_v18  ;;  %v2149_v46 = vpack.c.b16 %v2135_v24, %v2134_v32  ;;  %v8743_v27 = vld [vmem:[#allocation6 + $0x20] sm:$0xff] }
 0x16d   :  { %v1704_v54 = vrot.slane %v9631_v36, 4  ;;  %v1768_v4 = vrot.slane %v9631_v36, 5  ;;  %v8735_v10 = vld [vmem:[#allocation2 + $0x260] sm:$0xff]  ;;  %v1832_v32 = vrot.slane %v9631_v36, 6  ;;  %v1896_v18 = vrot.slane %v9631_v36, 7  ;;  %2787 = vmatpush.bf16.msrb.mxu2 %v8743_v27 }
 0x16e   :  { %2654 = vmatpush.bf16.msrb.mxu1 %v8735_v10  ;;  %v12026_v59 = vrot.slane %v9615_v15, 4  ;;  %v12027_v36 = vrot.slane %v9615_v15, 5  ;;  %v12028_v14 = vrot.slane %v9615_v15, 6 }
 0x16f   :  { %v1726_v39 = vsel %vm421_vm0, %v1704_v54, %v1705_v63  ;;  %v1790_v50 = vsel %vm534_vm3, %v1768_v4, %v1769_v7  ;;  %v1854_v22 = vsel %vm647_vm4, %v1832_v32, %v1833_v43  ;;  %v1919_v52 = vsel %vm760_vm7, %v1895_v55, %v1896_v18 }
 0x170   :  { %v1727_v17 = vsel %vm421_vm0, %v12026_v59, %v1704_v54  ;;  %v1791_v57 = vsel %vm534_vm3, %v12027_v36, %v1768_v4  ;;  %v1753_v29 = vpack.c.bf16 %v1726_v39, %v1726_v39  ;;  %v1817_v38 = vpack.c.bf16 %v1790_v50, %v1790_v50 }
 0x171   :  { %2468 = vmatmul.bf16.gmra.mxu1 %v2005_v21  ;;  %2517 = vmatmul.bf16.gmra.mxu2 %v2053_v13  ;;  %v1855_v51 = vsel %vm647_vm4, %v12028_v14, %v1832_v32  ;;  %v1881_v16 = vpack.c.bf16 %v1854_v22, %v1854_v22  ;;  %v1752_v24 = vpack.c.bf16 %v1727_v17, %v1727_v17  ;;  %v1706_v55 = vrot.slane %v9648_v8, 4  ;;  %v8742_v22 = vld [vmem:[#allocation6 + $0x18] sm:$0xff] }
 0x172   :  { %2566 = vmatmul.bf16.gmra.mxu3 %v2101_v19  ;;  %2615 = vmatmul.bf16.gmra.mxu0 %v2149_v46  ;;  %v1918_v46 = vsel %vm760_vm7, %v1896_v18, %v1897_v56  ;;  %v1816_v20 = vpack.c.bf16 %v1791_v57, %v1791_v57  ;;  %v1880_v21 = vpack.c.bf16 %v1855_v51, %v1855_v51  ;;  %v1993_v19 = vunpack.c.l.b16 %v1753_v29 }
 0x173   :  { %v1945_v35 = vpack.c.bf16 %v1918_v46, %v1918_v46  ;;  %v1944_v13 = vpack.c.bf16 %v1919_v52, %v1919_v52  ;;  %v2041_v54 = vunpack.c.l.b16 %v1817_v38  ;;  %v2089_v4 = vunpack.c.l.b16 %v1881_v16  ;;  %v8734_v46 = vld [vmem:[#allocation2 + $0x258] sm:$0xff]  ;;  %2788 = vmatpush.bf16.msrb.mxu2 %v8742_v22 }
 0x174   :  { %v1992_v10 = vunpack.c.l.b16 %v1752_v24  ;;  %v2040_v39 = vunpack.c.l.b16 %v1816_v20  ;;  %v2088_v50 = vunpack.c.l.b16 %v1880_v21  ;;  %v1770_v18 = vrot.slane %v9648_v8, 5  ;;  %2655 = vmatpush.bf16.msrb.mxu1 %v8734_v46 }
 0x175   :  { %v2137_v27 = vunpack.c.l.b16 %v1945_v35  ;;  %v2136_v59 = vunpack.c.l.b16 %v1944_v13  ;;  %v1834_v17 = vrot.slane %v9648_v8, 6  ;;  %v1898_v57 = vrot.slane %v9648_v8, 7 }
 0x176   :  { %v2006_v32 = vpack.c.b16 %v1993_v19, %v1992_v10  ;;  %v2054_v36 = vpack.c.b16 %v2041_v54, %v2040_v39  ;;  %v2102_v15 = vpack.c.b16 %v2089_v4, %v2088_v50  ;;  %v12029_v29 = vrot.slane %v9650_v45, 4 }
 0x177   :  { %v2150_v14 = vpack.c.b16 %v2137_v27, %v2136_v59  ;;  %v12030_v51 = vrot.slane %v9650_v45, 5  ;;  %v12031_v16 = vrot.slane %v9650_v45, 6  ;;  %v12032_v24 = vrot.slane %v9650_v45, 7 }
 0x178   :  { %v1724_v38 = vsel %vm421_vm0, %v1706_v55, %v12029_v29  ;;  %v1725_v20 = vsel %vm421_vm0, %v1705_v63, %v1706_v55  ;;  %v1789_v21 = vsel %vm534_vm3, %v1769_v7, %v1770_v18  ;;  %v1853_v54 = vsel %vm647_vm4, %v1833_v43, %v1834_v17 }
 0x179   :  { %v1788_v52 = vsel %vm534_vm3, %v1770_v18, %v12030_v51  ;;  %v1852_v35 = vsel %vm647_vm4, %v1834_v17, %v12031_v16  ;;  %v1916_v8 = vsel %vm760_vm7, %v1898_v57, %v12032_v24  ;;  %v1755_v13 = vpack.c.bf16 %v1724_v38, %v1724_v38  ;;  %v8740_v16 = vld [vmem:[#allocation6 + $0x8] sm:$0xff] }
 0x17a   :  { %v1819_v19 = vpack.c.bf16 %v1788_v52, %v1788_v52  ;;  %v1917_v4 = vsel %vm760_vm7, %v1897_v56, %v1898_v57  ;;  %v1883_v27 = vpack.c.bf16 %v1852_v35, %v1852_v35  ;;  %v1947_v10 = vpack.c.bf16 %v1916_v8, %v1916_v8  ;;  %v8741_v56 = vld [vmem:[#allocation6 + $0x10] sm:$0xff]  ;;  %v8732_v35 = vld [vmem:[#allocation2 + $0x248] sm:$0xff] }
 0x17b   :  { %v1754_v45 = vpack.c.bf16 %v1725_v20, %v1725_v20  ;;  %v1818_v39 = vpack.c.bf16 %v1789_v21, %v1789_v21  ;;  %v1882_v50 = vpack.c.bf16 %v1853_v54, %v1853_v54  ;;  %v1946_v59 = vpack.c.bf16 %v1917_v4, %v1917_v4  ;;  %v8733_v57 = vld [vmem:[#allocation2 + $0x250] sm:$0xff]  ;;  %2789 = vmatpush.bf16.msrb.mxu2 %v8741_v56  ;;  %v10149_v20 = vld [vmem:[#allocation4 + $0x1] ss:$0 sm:$0xff]  ;;  %v12054_v21 = vld [vmem:[#allocation23_spill] sm:$0xff] }
 0x17c   :  { %v2091_v63 = vunpack.c.l.b16 %v1883_v27  ;;  %2656 = vmatpush.bf16.msrb.mxu1 %v8733_v57  ;;  %v12033_v29 = vpack.c.b16 %v9729_v40, %v9705_v12  ;;  %v12034_v38 = vpack.c.b16 %v9731_v31, %v9712_v23  ;;  %v12035_v51 = vpack.c.b16 %v9737_v48, %v9721_v44  ;;  %v8739_v40 = vld [vmem:[#allocation6] sm:$0xff]  ;;  %v12058_v27 = vld [vmem:[#allocation25_spill] sm:$0xff] }
 0x17d   :  { %v2042_v7 = vunpack.c.l.b16 %v1818_v39  ;;  %v2090_v55 = vunpack.c.l.b16 %v1882_v50  ;;  %v2138_v18 = vunpack.c.l.b16 %v1946_v59  ;;  %v12036_v52 = vpack.c.b16 %v9739_v53, %v9733_v3  ;;  %v8731_v31 = vld [vmem:[#allocation2 + $0x240] sm:$0xff]  ;;  %v12061_v39 = vld [vmem:[#allocation16_spill] sm:$0xff] }
 0x17e   :  { %v12037_v12 = vpack.c.b16 %v9794_v5, %v9770_v34  ;;  %v12038_v23 = vpack.c.b16 %v9796_v61, %v9775_v33  ;;  %v12039_v48 = vpack.c.b16 %v9802_v25, %v9786_v58  ;;  %v12040_v44 = vpack.c.b16 %v9804_v2, %v9798_v11  ;;  %v12042_v53 = vld [vmem:[#allocation34_spill] sm:$0xff]  ;;  %v12044_v34 = vld [vmem:[#allocation39_spill] sm:$0xff]  ;;  %v12045_v5 = vld [vmem:[#allocation36_spill] sm:$0xff] }
 0x17f   :  { %v2103_v43 = vpack.c.b16 %v2091_v63, %v2090_v55  ;;  %2790 = vmatpush.bf16.msrb.mxu2 %v8740_v16  ;;  %v12041_v3 = vpack.c.b16 %v9891_v37, %v9867_v0  ;;  %v12043_v33 = vpack.c.b16 %v9893_v47, %v12042_v53  ;;  %v12046_v25 = vpack.c.b16 %v12044_v34, %v12045_v5  ;;  %v12047_v58 = vld [vmem:[#allocation40_spill] sm:$0xff]  ;;  %v12048_v61 = vld [vmem:[#allocation38_spill] sm:$0xff] }
 0x180   :  { %2657 = vmatpush.bf16.msrb.mxu1 %v8732_v35  ;;  %v12049_v11 = vpack.c.b16 %v12047_v58, %v12048_v61  ;;  %v12050_v2 = vpack.c.b16 %v9977_v41, %v9939_v62  ;;  %v12051_v0 = vpack.c.b16 %v9979_v42, %v9941_v28  ;;  %v8754_v37 = vld [vmem:[#allocation2 + $0x2b8] sm:$0xff]  ;;  %v12052_v47 = vpack.c.b16 %v9981_v30, %v9943_v9  ;;  %v8753_v28 = vld [vmem:[#allocation2 + $0x2b0] sm:$0xff]  ;;  %v8752_v50 = vld [vmem:[#allocation2 + $0x2a8] sm:$0xff] }
 0x181   :  { %2473 = vmatmul.bf16.gmra.mxu1 %v2006_v32  ;;  %2522 = vmatmul.bf16.gmra.mxu2 %v2054_v36  ;;  %v1995_v32 = vunpack.c.l.b16 %v1755_v13  ;;  %v2043_v36 = vunpack.c.l.b16 %v1819_v19  ;;  %v12053_v24 = vpack.c.b16 %v9983_v6, %v9986_v49  ;;  %v12055_v41 = vld [vmem:[#allocation22_spill] sm:$0xff]  ;;  %v12070_v61 = vld [vmem:[#allocation31_spill] sm:$0xff] }
 0x182   :  { %2571 = vmatmul.bf16.gmra.mxu3 %v2102_v15  ;;  %2620 = vmatmul.bf16.gmra.mxu0 %v2150_v14  ;;  %v2139_v15 = vunpack.c.l.b16 %v1947_v10  ;;  %v1994_v14 = vunpack.c.l.b16 %v1754_v45  ;;  %v12056_v62 = vpack.c.b16 %v12054_v21, %v12055_v41  ;;  %v12057_v13 = vld [vmem:[#allocation14_spill] sm:$0xff]  ;;  %v12059_v10 = vld [vmem:[#allocation24_spill] sm:$0xff] }
 0x183   :  { %v2055_v46 = vpack.c.b16 %v2043_v36, %v2042_v7  ;;  %2791 = vmatpush.bf16.msrb.mxu2 %v8739_v40  ;;  %3816 = vmatpush.bf16.msrb.mxu3 %v8754_v37  ;;  %v12060_v45 = vpack.c.b16 %v12058_v27, %v12059_v10  ;;  %v8750_v40 = vld [vmem:[#allocation2 + $0x298] sm:$0xff]  ;;  %v8749_v37 = vld [vmem:[#allocation2 + $0x290] sm:$0xff] }
 0x184   :  { %v2007_v22 = vpack.c.b16 %v1995_v32, %v1994_v14  ;;  %v2151_v17 = vpack.c.b16 %v2139_v15, %v2138_v18  ;;  %2658 = vmatpush.bf16.msrb.mxu1 %v8731_v31  ;;  %v12062_v18 = vld [vmem:[#allocation27_spill] sm:$0xff] }
 0x187   :  { %3817 = vmatpush.bf16.msrb.mxu3 %v8753_v28  ;;  %v12075_v28 = vld [vmem:[#allocation32_spill] sm:$0xff] }
 0x18b   :  { %3818 = vmatpush.bf16.msrb.mxu3 %v8752_v50 }
 0x191   :  { %2478 = vmatmul.bf16.gmra.mxu1 %v2007_v22  ;;  %2527 = vmatmul.bf16.gmra.mxu2 %v2055_v46  ;;  %v12063_v22 = vld [vmem:[#allocation26_spill] sm:$0xff] }
 0x192   :  { %2576 = vmatmul.bf16.gmra.mxu3 %v2103_v43  ;;  %2625 = vmatmul.bf16.gmra.mxu0 %v2151_v17  ;;  %v12064_v46 = vpack.c.b16 %v12062_v18, %v12063_v22  ;;  %v12065_v43 = vld [vmem:[#allocation15_spill] sm:$0xff] }
 0x193   :  { %v8751_v17 = vld [vmem:[#allocation2 + $0x2a0] sm:$0xff] }
 0x194   :  { %3819 = vmatpush.bf16.msrb.mxu3 %v8751_v17 }
 0x198   :  { %3820 = vmatpush.bf16.msrb.mxu3 %v8750_v40 }
 0x19c   :  { %3821 = vmatpush.bf16.msrb.mxu3 %v8749_v37  ;;  %v8777_v37 = vld [vmem:[#allocation2 + $0x370] sm:$0xff] }
 0x1a1   :  { %2483 = vmatmul.bf16.gmra.mxu1 %v12033_v29  ;;  %2532 = vmatmul.bf16.gmra.mxu2 %v12034_v38 }
 0x1a2   :  { %2581 = vmatmul.bf16.gmra.mxu3 %v12035_v51  ;;  %2630 = vmatmul.bf16.gmra.mxu0 %v12036_v52 }
 0x1b1   :  { %2488 = vmatmul.bf16.gmra.mxu1 %v12037_v12  ;;  %2537 = vmatmul.bf16.gmra.mxu2 %v12038_v23  ;;  %v12066_v12 = vld [vmem:[#allocation29_spill] sm:$0xff]  ;;  %v12067_v23 = vld [vmem:[#allocation28_spill] sm:$0xff] }
 0x1b2   :  { %2586 = vmatmul.bf16.gmra.mxu3 %v12039_v48  ;;  %2635 = vmatmul.bf16.gmra.mxu0 %v12040_v44  ;;  %v12068_v48 = vpack.c.b16 %v12066_v12, %v12067_v23  ;;  %v12069_v44 = vld [vmem:[#allocation17_spill] sm:$0xff] }
 0x1b3   :  { %v8778_v23 = vld [vmem:[#allocation2 + $0x378] sm:$0xff] }
 0x1b4   :  { %3963 = vmatpush.bf16.msra.mxu2 %v8778_v23  ;;  %v8760_v23 = vld [vmem:[#allocation2 + $0x2e8] sm:$0xff] }
 0x1b8   :  { %3964 = vmatpush.bf16.msra.mxu2 %v8777_v37 }
 0x1c1   :  { %2493 = vmatmul.bf16.gmra.mxu1 %v12041_v3  ;;  %2542 = vmatmul.bf16.gmra.mxu2 %v12043_v33 }
 0x1c2   :  { %2591 = vmatmul.bf16.gmra.mxu3 %v12046_v25  ;;  %2640 = vmatmul.bf16.gmra.mxu0 %v12049_v11  ;;  %v12071_v11 = vld [vmem:[#allocation30_spill] sm:$0xff] }
 0x1d1   :  { %2498 = vmatmul.bf16.gmra.mxu1 %v12050_v2  ;;  %2547 = vmatmul.bf16.gmra.mxu2 %v12051_v0  ;;  %v12072_v2 = vpack.c.b16 %v12070_v61, %v12071_v11  ;;  %v12073_v0 = vld [vmem:[#allocation18_spill] sm:$0xff]  ;;  %v10238_v11 = vld [vmem:[#allocation7] ss:$0 sm:$0xff] }
 0x1d2   :  { %2596 = vmatmul.bf16.gmra.mxu3 %v12052_v47  ;;  %2645 = vmatmul.bf16.gmra.mxu0 %v12053_v24 }
 0x1de   :  { %v2464_v8 = vpop.f32.mrf.mxu1 }
 0x1df   :  { %v2465_v42 = vadd.f32 %v10149_v20, %v2464_v8 }
 0x1e1   :  { %2659 = vmatmul.bf16.vlgmr.msrb.gmra.mxu1 %v12056_v62  ;;  %2792 = vmatmul.bf16.vlgmr.msrb.gmra.mxu2 %v12057_v13  ;;  %v12074_v13 = vld [vmem:[#allocation33_spill] sm:$0xff] }
 0x1e4   :  { %v2513_v9 = vpop.f32.mrf.mxu2 }
 0x1e5   :  { %v10156_v30 = vadd.f32 %v2513_v9, %v2465_v42  ;;  %v12076_v42 = vpack.c.b16 %v12074_v13, %v12075_v28  ;;  %v12077_v9 = vld [vmem:[#allocation19_spill] sm:$0xff]  ;;  %v2562_v10 = vpop.f32.mrf.mxu3 }
 0x1e6   :  { %v2466_v19 = vpop.f32.mrf.mxu1 }
 0x1e7   :  { %v2467_v6 = vadd.f32 %v10149_v20, %v2466_v19  ;;  %v8748_v19 = vld [vmem:[#allocation2 + $0x288] sm:$0xff] }
 0x1e8   :  { %3822 = vmatpush.bf16.msrb.mxu3 %v8748_v19 }
 0x1ec   :  { %v2515_v49 = vpop.f32.mrf.mxu2 }
 0x1ed   :  { %v10159_v54 = vadd.f32 %v2515_v49, %v2467_v6 }
 0x1ee   :  { %v2469_v4 = vpop.f32.mrf.mxu1 }
 0x1ef   :  { %v2470_v59 = vadd.f32 %v10149_v20, %v2469_v4 }
 0x1f1   :  { %2664 = vmatmul.bf16.gmra.mxu1 %v12060_v45  ;;  %2797 = vmatmul.bf16.gmra.mxu2 %v12061_v39  ;;  %v2611_v39 = vpop.f32.mrf.mxu0 }
 0x1f4   :  { %v2518_v32 = vpop.f32.mrf.mxu2 }
 0x1f5   :  { %v10166_v36 = vadd.f32 %v2518_v32, %v2470_v59  ;;  %v12078_v59 = vld [vmem:[#allocation37_spill] sm:$0xff]  ;;  %v12079_v32 = vld [vmem:[#allocation35_spill] sm:$0xff] }
 0x1f6   :  { %v2471_v63 = vpop.f32.mrf.mxu1 }
 0x1f7   :  { %v2472_v15 = vadd.f32 %v10149_v20, %v2471_v63  ;;  %v12080_v63 = vpack.c.b16 %v12078_v59, %v12079_v32  ;;  %v9075_v32 = vmov 0.0|0.0  }
 0x1f9   :  { %v2613_v17 = vpop.f32.mrf.mxu0 }
 0x1fc   :  { %v2520_v14 = vpop.f32.mrf.mxu2 }
 0x1fd   :  { %v10169_v7 = vadd.f32 %v2520_v14, %v2472_v15  ;;  %v12081_v15 = vld [vmem:[#allocation20_spill] sm:$0xff]  ;;  %v8747_v14 = vld [vmem:[#allocation2 + $0x280] sm:$0xff] }
 0x1fe   :  { %v2474_v55 = vpop.f32.mrf.mxu1  ;;  %3823 = vmatpush.bf16.msrb.mxu3 %v8747_v14 }
 0x1ff   :  { %v2475_v56 = vadd.f32 %v10149_v20, %v2474_v55  ;;  %v2564_v55 = vpop.f32.mrf.mxu3 }
 0x200   :  { %v2565_v13 = vadd.f32 %v2564_v55, %v10159_v54 }
 0x201   :  { %2669 = vmatmul.bf16.gmra.mxu1 %v12064_v46  ;;  %2802 = vmatmul.bf16.gmra.mxu2 %v12065_v43 }
 0x204   :  { %v2523_v57 = vpop.f32.mrf.mxu2 }
 0x205   :  { %v10176_v29 = vadd.f32 %v2523_v57, %v2475_v56 }
 0x206   :  { %v2476_v38 = vpop.f32.mrf.mxu1 }
 0x207   :  { %v2477_v51 = vadd.f32 %v10149_v20, %v2476_v38  ;;  %v2567_v57 = vpop.f32.mrf.mxu3 }
 0x20c   :  { %v2525_v52 = vpop.f32.mrf.mxu2 }
 0x20d   :  { %v10179_v16 = vadd.f32 %v2525_v52, %v2477_v51  ;;  %v2616_v51 = vpop.f32.mrf.mxu0  ;;  %v12082_v52 = vpack.c.b16 %v9990_v60, %v9988_v26  ;;  %v2563_v26 = vadd.f32 %v2562_v10, %v10156_v30 }
 0x20e   :  { %v2479_v35 = vpop.f32.mrf.mxu1 }
 0x20f   :  { %v2480_v31 = vadd.f32 %v10149_v20, %v2479_v35  ;;  %v12083_v35 = vld [vmem:[#allocation21_spill] sm:$0xff]  ;;  %v2612_v61 = vadd.f32 %v2611_v39, %v2563_v26  ;;  %v8768_v26 = vld [vmem:[#allocation2 + $0x328] sm:$0xff] }
 0x211   :  { %2674 = vmatmul.bf16.gmra.mxu1 %v12068_v48  ;;  %2807 = vmatmul.bf16.gmra.mxu2 %v12069_v44  ;;  %v8762_v48 = vld [vmem:[#allocation2 + $0x2f8] sm:$0xff] }
 0x212   :  { %v8786_v44 = vld [vmem:[#allocation2 + $0x3b8] sm:$0xff]  ;;  %3865 = vmatpush.bf16.msrb.mxu0 %v8762_v48  ;;  %v8784_v48 = vld [vmem:[#allocation2 + $0x3a8] sm:$0xff] }
 0x213   :  { %4012 = vmatpush.bf16.msra.mxu3 %v8786_v44 }
 0x214   :  { %v2528_v3 = vpop.f32.mrf.mxu2 }
 0x215   :  { %v10186_v53 = vadd.f32 %v2528_v3, %v2480_v31  ;;  %v8770_v31 = vld [vmem:[#allocation2 + $0x338] sm:$0xff]  ;;  %v10234_v60 = vpop.f32.mrf.mxu0 }
 0x216   :  { %v2481_v33 = vpop.f32.mrf.mxu1  ;;  %3914 = vmatpush.bf16.msra.mxu1 %v8770_v31 }
 0x217   :  { %v2482_v34 = vadd.f32 %v10149_v20, %v2481_v33 }
 0x21c   :  { %v2530_v5 = vpop.f32.mrf.mxu2 }
 0x21d   :  { %v10189_v25 = vadd.f32 %v2530_v5, %v2482_v34  ;;  %v2569_v34 = vpop.f32.mrf.mxu3  ;;  %v10243_v28 = vpop.f32.mrf.mxu0 }
 0x21e   :  { %v2484_v58 = vpop.f32.mrf.mxu1  ;;  %v2570_v44 = vadd.f32 %v2569_v34, %v10169_v7 }
 0x21f   :  { %v2485_v47 = vadd.f32 %v10149_v20, %v2484_v58 }
 0x221   :  { %2679 = vmatmul.bf16.gmra.mxu1 %v12072_v2  ;;  %2812 = vmatmul.bf16.gmra.mxu2 %v12073_v0 }
 0x224   :  { %v2533_v24 = vpop.f32.mrf.mxu2 }
 0x225   :  { %v10196_v8 = vadd.f32 %v2533_v24, %v2485_v47  ;;  %v10240_v2 = vpop.f32.mrf.mxu3  ;;  %v8761_v47 = vld [vmem:[#allocation2 + $0x2f0] sm:$0xff] }
 0x226   :  { %v10198_v21 = vpop.f32.mrf.mxu1  ;;  %v8785_v24 = vld [vmem:[#allocation2 + $0x3b0] sm:$0xff]  ;;  %3866 = vmatpush.bf16.msrb.mxu0 %v8761_v47 }
 0x227   :  { %4013 = vmatpush.bf16.msra.mxu3 %v8785_v24 }
 0x22a   :  { %3867 = vmatpush.bf16.msrb.mxu0 %v8760_v23 }
 0x22b   :  { %4014 = vmatpush.bf16.msra.mxu3 %v8784_v48 }
 0x22c   :  { %v10200_v41 = vpop.f32.mrf.mxu2 }
 0x22d   :  { %v10249_v59 = vpop.f32.mrf.mxu3 }
 0x22e   :  { %v2489_v62 = vpop.f32.mrf.mxu1 }
 0x22f   :  { %v2490_v6 = vadd.f32 %v10149_v20, %v2489_v62  ;;  %v8769_v62 = vld [vmem:[#allocation2 + $0x330] sm:$0xff] }
 0x230   :  { %3915 = vmatpush.bf16.msra.mxu1 %v8769_v62 }
 0x231   :  { %2684 = vmatmul.bf16.gmra.mxu1 %v12076_v42  ;;  %2817 = vmatmul.bf16.gmra.mxu2 %v12077_v9 }
 0x234   :  { %v2538_v49 = vpop.f32.mrf.mxu2  ;;  %3916 = vmatpush.bf16.msra.mxu1 %v8768_v26 }
 0x235   :  { %v10207_v4 = vadd.f32 %v2538_v49, %v2490_v6  ;;  %v2614_v49 = vadd.f32 %v2613_v17, %v2565_v13  ;;  %v10264_v7 = vpop.f32.mrf.mxu3 }
 0x236   :  { %v10209_v27 = vpop.f32.mrf.mxu1 }
 0x23c   :  { %v10211_v45 = vpop.f32.mrf.mxu2 }
 0x23e   :  { %v2494_v50 = vpop.f32.mrf.mxu1 }
 0x23f   :  { %v2495_v18 = vadd.f32 %v10149_v20, %v2494_v50  ;;  %v2568_v50 = vadd.f32 %v2567_v57, %v10166_v36 }
 0x241   :  { %2689 = vmatmul.bf16.gmra.mxu1 %v12080_v63  ;;  %2822 = vmatmul.bf16.gmra.mxu2 %v12081_v15  ;;  %v10253_v63 = vunpack.c.l.b16 %v9075_v32  ;;  %v2573_v32 = vadd.f32 %v10240_v2, %v10176_v29  ;;  %v2579_v2 = vpop.f32.mrf.mxu3 }
 0x243   :  { %12084 = vst [vmem:[#allocation34_spill] sm:$0xff] %v10253_v63 }
 0x244   :  { %v2543_v22 = vpop.f32.mrf.mxu2 }
 0x245   :  { %v10218_v46 = vadd.f32 %v2543_v22, %v2495_v18  ;;  %v2617_v22 = vadd.f32 %v2616_v51, %v2568_v50 }
 0x246   :  { %v10220_v43 = vpop.f32.mrf.mxu1 }
 0x24c   :  { %v10222_v56 = vpop.f32.mrf.mxu2 }
 0x24e   :  { %v2499_v38 = vpop.f32.mrf.mxu1 }
 0x24f   :  { %v2500_v12 = vadd.f32 %v10149_v20, %v2499_v38  ;;  %v10256_v38 = vpop.f32.mrf.mxu0 }
 0x251   :  { %2694 = vmatmul.bf16.gmra.mxu1 %v12082_v52  ;;  %2827 = vmatmul.bf16.gmra.mxu2 %v12083_v35 }
 0x254   :  { %v2548_v40 = vpop.f32.mrf.mxu2 }
 0x255   :  { %v10229_v3 = vadd.f32 %v2548_v40, %v2500_v12  ;;  %v8776_v12 = vld [vmem:[#allocation2 + $0x368] sm:$0xff] }
 0x256   :  { %v10231_v33 = vpop.f32.mrf.mxu1  ;;  %3965 = vmatpush.bf16.msra.mxu2 %v8776_v12 }
 0x257   :  { %v10288_v50 = vpop.f32.mrf.mxu0 }
 0x25c   :  { %v10236_v5 = vpop.f32.mrf.mxu2 }
 0x25e   :  { %v2660_v58 = vpop.f32.mrf.mxu1 }
 0x25f   :  { %v2661_v0 = vadd.f32 %v2660_v58, %v2612_v61 }
 0x261   :  { %v2700_v42 = vmax.f32 %v2661_v0, 0.0 }
 0x264   :  { %v2793_v30 = vpop.f32.mrf.mxu2 }
 0x265   :  { %v2794_v9 = vadd.f32 %v10238_v11, %v2793_v30 }
 0x266   :  { %v2662_v19 = vpop.f32.mrf.mxu1 }
 0x267   :  { %v2833_v6 = vadd.f32 %v2794_v9, %v2700_v42  ;;  %v2663_v39 = vadd.f32 %v2662_v19, %v2614_v49  ;;  %v2619_v42 = vadd.f32 %v10234_v60, %v2570_v44  ;;  %v2575_v44 = vadd.f32 %v10249_v59, %v10179_v16 }
 0x269   :  { %v10246_v10 = vmax.f32 %v2833_v6, 0.0  ;;  %v2701_v55 = vmax.f32 %v2663_v39, 0.0 }
 0x26b   :  { %v3061_v54 = vpack.c.bf16 %v10246_v10, %v10246_v10  ;;  %v11933_v40 = vrot.slane %v10246_v10, 2  ;;  %v11932_v31 = vrot.slane %v10246_v10, 4  ;;  %v11931_v37 = vrot.slane %v10246_v10, 6 }
 0x26c   :  { %v2795_v15 = vpop.f32.mrf.mxu2 }
 0x26d   :  { %v3350_v14 = vunpack.c.l.b16 %v3061_v54  ;;  %v2796_v18 = vadd.f32 %v10238_v11, %v2795_v15 }
 0x26e   :  { %v2665_v17 = vpop.f32.mrf.mxu1 }
 0x26f   :  { %v2834_v52 = vadd.f32 %v2796_v18, %v2701_v55  ;;  %v3365_v36 = vpack.c.b16 %v3350_v14, %v10253_v63  ;;  %v2666_v57 = vadd.f32 %v2665_v17, %v2617_v22 }
 0x271   :  { %v2850_v35 = vmax.f32 %v2834_v52, 0.0  ;;  %3824 = vmatmul.bf16.vlgmr.msrb.gmra.mxu3 %v3365_v36  ;;  %v2702_v47 = vmax.f32 %v2666_v57, 0.0 }
 0x273   :  { %v3077_v51 = vrot.slane %v2850_v35, 2  ;;  %v3190_v58 = vrot.slane %v2850_v35, 4  ;;  %v3254_v61 = vrot.slane %v2850_v35, 6  ;;  %v3062_v0 = vpack.c.bf16 %v2850_v35, %v2850_v35 }
 0x274   :  { %v2798_v24 = vpop.f32.mrf.mxu2  ;;  %v2622_v35 = vadd.f32 %v10243_v28, %v2573_v32 }
 0x275   :  { %v2799_v34 = vadd.f32 %v10238_v11, %v2798_v24  ;;  %v3351_v62 = vunpack.c.l.b16 %v3062_v0  ;;  %v10271_v13 = vsel %vm3092_vm12, %v11933_v40, %v3077_v51  ;;  %v10277_v30 = vsel %vm421_vm0, %v11932_v31, %v3190_v58  ;;  %v10302_v24 = vpop.f32.mrf.mxu0  ;;  %v8765_v31 = vld [vmem:[#allocation2 + $0x310] sm:$0xff] }
 0x276   :  { %v2667_v9 = vpop.f32.mrf.mxu1  ;;  %v10284_v19 = vsel %vm647_vm4, %v11931_v37, %v3254_v61  ;;  %v8757_v37 = vld [vmem:[#allocation2 + $0x2d0] sm:$0xff] }
 0x277   :  { %v2835_v6 = vadd.f32 %v2799_v34, %v2702_v47  ;;  %v10286_v49 = vpack.c.b16 %v3351_v62, %v3350_v14  ;;  %v2668_v39 = vadd.f32 %v2667_v9, %v2619_v42 }
 0x279   :  { %12085 = vst [vmem:[#allocation39_spill] sm:$0xff] %v10286_v49  ;;  %v2851_v54 = vmax.f32 %v2835_v6, 0.0  ;;  %v2703_v22 = vmax.f32 %v2668_v39, 0.0  ;;  %v8775_v39 = vld [vmem:[#allocation2 + $0x360] sm:$0xff] }
 0x27a   :  { %3966 = vmatpush.bf16.msra.mxu2 %v8775_v39 }
 0x27b   :  { %v3078_v15 = vrot.slane %v2851_v54, 2  ;;  %v3191_v55 = vrot.slane %v2851_v54, 4  ;;  %v3255_v60 = vrot.slane %v2851_v54, 6  ;;  %v3063_v18 = vpack.c.bf16 %v2851_v54, %v2851_v54  ;;  %v8783_v54 = vld [vmem:[#allocation2 + $0x3a0] sm:$0xff] }
 0x27c   :  { %v2800_v17 = vpop.f32.mrf.mxu2  ;;  %4015 = vmatpush.bf16.msra.mxu3 %v8783_v54 }
 0x27d   :  { %v2801_v52 = vadd.f32 %v10238_v11, %v2800_v17  ;;  %v3352_v36 = vunpack.c.l.b16 %v3063_v18  ;;  %v3106_v14 = vsel %vm3092_vm12, %v3077_v51, %v3078_v15  ;;  %v3218_v57 = vsel %vm421_vm0, %v3190_v58, %v3191_v55  ;;  %v8767_v18 = vld [vmem:[#allocation2 + $0x320] sm:$0xff] }
 0x27e   :  { %v2670_v12 = vpop.f32.mrf.mxu1  ;;  %v3282_v29 = vsel %vm647_vm4, %v3254_v61, %v3255_v60  ;;  %v3175_v47 = vpack.c.bf16 %v3106_v14, %v3106_v14  ;;  %v3239_v51 = vpack.c.bf16 %v3218_v57, %v3218_v57  ;;  %v2624_v61 = vadd.f32 %v10256_v38, %v2575_v44  ;;  %3917 = vmatpush.bf16.msra.mxu1 %v8767_v18  ;;  %v10336_v18 = vpop.f32.mrf.mxu0 }
 0x27f   :  { %v2836_v23 = vadd.f32 %v2801_v52, %v2703_v22  ;;  %v3366_v48 = vpack.c.b16 %v3352_v36, %v3351_v62  ;;  %v2671_v26 = vadd.f32 %v2670_v12, %v2622_v35  ;;  %v8759_v62 = vld [vmem:[#allocation2 + $0x2e0] sm:$0xff]  ;;  %v3303_v32 = vpack.c.bf16 %v3282_v29, %v3282_v29 }
 0x280   :  { %3868 = vmatpush.bf16.msrb.mxu0 %v8759_v62  ;;  %v10312_v12 = vunpack.c.l.b16 %v3175_v47  ;;  %v10314_v29 = vunpack.c.l.b16 %v3239_v51 }
 0x281   :  { %v2852_v0 = vmax.f32 %v2836_v23, 0.0  ;;  %3829 = vmatmul.bf16.gmra.mxu3 %v3366_v48  ;;  %v2704_v9 = vmax.f32 %v2671_v26, 0.0  ;;  %v10322_v26 = vpop.f32.mrf.mxu3 }
 0x283   :  { %v3064_v58 = vpack.c.bf16 %v2852_v0, %v2852_v0  ;;  %v3079_v34 = vrot.slane %v2852_v0, 2  ;;  %v3192_v28 = vrot.slane %v2852_v0, 4  ;;  %v3256_v42 = vrot.slane %v2852_v0, 6 }
 0x284   :  { %v2803_v6 = vpop.f32.mrf.mxu2 }
 0x285   :  { %v2804_v16 = vadd.f32 %v10238_v11, %v2803_v6  ;;  %v3353_v59 = vunpack.c.l.b16 %v3064_v58  ;;  %v3105_v22 = vsel %vm3092_vm12, %v3078_v15, %v3079_v34  ;;  %v3217_v17 = vsel %vm421_vm0, %v3191_v55, %v3192_v28 }
 0x286   :  { %v2672_v52 = vpop.f32.mrf.mxu1  ;;  %v3176_v14 = vpack.c.bf16 %v3105_v22, %v3105_v22  ;;  %v3240_v57 = vpack.c.bf16 %v3217_v17, %v3217_v17  ;;  %v3281_v38 = vsel %vm647_vm4, %v3255_v60, %v3256_v42  ;;  %v2578_v60 = vadd.f32 %v10264_v7, %v10186_v53 }
 0x287   :  { %v2837_v35 = vadd.f32 %v2804_v16, %v2704_v9  ;;  %v3304_v23 = vpack.c.bf16 %v3281_v38, %v3281_v38  ;;  %v2673_v15 = vadd.f32 %v2672_v52, %v2624_v61  ;;  %v10320_v44 = vpack.c.b16 %v3353_v59, %v3352_v36 }
 0x288   :  { %v10316_v48 = vunpack.c.l.b16 %v3176_v14  ;;  %v10318_v55 = vunpack.c.l.b16 %v3240_v57  ;;  %v10332_v9 = vunpack.c.l.b16 %v3303_v32  ;;  %v2580_v17 = vadd.f32 %v2579_v2, %v10189_v25 }
 0x289   :  { %12086 = vst [vmem:[#allocation36_spill] sm:$0xff] %v10320_v44  ;;  %v2853_v0 = vmax.f32 %v2837_v35, 0.0  ;;  %v10324_v58 = vunpack.c.l.b16 %v3304_v23  ;;  %v2705_v62 = vmax.f32 %v2673_v15, 0.0  ;;  %v2627_v52 = vadd.f32 %v10288_v50, %v2578_v60  ;;  %v2584_v25 = vpop.f32.mrf.mxu3 }
 0x28a   :  { %v2487_v60 = vadd.f32 %v10149_v20, %v10198_v21 }
 0x28b   :  { %v3080_v6 = vrot.slane %v2853_v0, 2  ;;  %v3193_v61 = vrot.slane %v2853_v0, 4  ;;  %v3257_v36 = vrot.slane %v2853_v0, 6  ;;  %v3065_v39 = vpack.c.bf16 %v2853_v0, %v2853_v0  ;;  %v8774_v0 = vld [vmem:[#allocation2 + $0x358] sm:$0xff] }
 0x28c   :  { %v2805_v54 = vpop.f32.mrf.mxu2  ;;  %3967 = vmatpush.bf16.msra.mxu2 %v8774_v0 }
 0x28d   :  { %v2806_v53 = vadd.f32 %v10238_v11, %v2805_v54  ;;  %v3354_v7 = vunpack.c.l.b16 %v3065_v39  ;;  %v3104_v22 = vsel %vm3092_vm12, %v3079_v34, %v3080_v6  ;;  %v3216_v32 = vsel %vm421_vm0, %v3192_v28, %v3193_v61  ;;  %v8758_v39 = vld [vmem:[#allocation2 + $0x2d8] sm:$0xff] }
 0x28e   :  { %v2675_v14 = vpop.f32.mrf.mxu1  ;;  %v3280_v57 = vsel %vm647_vm4, %v3256_v42, %v3257_v36  ;;  %v8782_v34 = vld [vmem:[#allocation2 + $0x398] sm:$0xff]  ;;  %v2629_v54 = vadd.f32 %v10302_v24, %v2580_v17  ;;  %v3177_v16 = vpack.c.bf16 %v3104_v22, %v3104_v22  ;;  %3869 = vmatpush.bf16.msrb.mxu0 %v8758_v39  ;;  %v91_v24 = vadd.s32 56, %v9118_v1  ;;  %v2633_v39 = vpop.f32.mrf.mxu0 }
 0x28f   :  { %v2838_v38 = vadd.f32 %v2806_v53, %v2705_v62  ;;  %v3367_v35 = vpack.c.b16 %v3354_v7, %v3353_v59  ;;  %v2676_v23 = vadd.f32 %v2675_v14, %v2627_v52  ;;  %v8766_v28 = vld [vmem:[#allocation2 + $0x318] sm:$0xff]  ;;  %4016 = vmatpush.bf16.msra.mxu3 %v8782_v34  ;;  %v3241_v22 = vpack.c.bf16 %v3216_v32, %v3216_v32 }
 0x290   :  { %3918 = vmatpush.bf16.msra.mxu1 %v8766_v28  ;;  %v10365_v28 = vunpack.c.l.b16 %v3177_v16 }
 0x291   :  { %v10347_v15 = vmax.f32 %v2838_v38, 0.0  ;;  %3834 = vmatmul.bf16.gmra.mxu3 %v3367_v35  ;;  %v2706_v62 = vmax.f32 %v2676_v23, 0.0  ;;  %v3305_v23 = vpack.c.bf16 %v3280_v57, %v3280_v57  ;;  %v2536_v57 = vadd.f32 %v10200_v41, %v2487_v60 }
 0x292   :  { %3870 = vmatpush.bf16.msrb.mxu0 %v8757_v37 }
 0x293   :  { %v3066_v50 = vpack.c.bf16 %v10347_v15, %v10347_v15  ;;  %v3081_v2 = vrot.slane %v10347_v15, 2  ;;  %v3194_v42 = vrot.slane %v10347_v15, 4  ;;  %v3258_v59 = vrot.slane %v10347_v15, 6 }
 0x294   :  { %v2808_v53 = vpop.f32.mrf.mxu2  ;;  %3919 = vmatpush.bf16.msra.mxu1 %v8765_v31 }
 0x295   :  { %v2809_v17 = vadd.f32 %v10238_v11, %v2808_v53  ;;  %v3355_v52 = vunpack.c.l.b16 %v3066_v50  ;;  %v3103_v14 = vsel %vm3092_vm12, %v3080_v6, %v3081_v2  ;;  %v3215_v38 = vsel %vm421_vm0, %v3193_v61, %v3194_v42 }
 0x296   :  { %v2677_v35 = vpop.f32.mrf.mxu1  ;;  %v3178_v15 = vpack.c.bf16 %v3103_v14, %v3103_v14  ;;  %v3242_v0 = vpack.c.bf16 %v3215_v38, %v3215_v38  ;;  %v3279_v21 = vsel %vm647_vm4, %v3257_v36, %v3258_v59  ;;  %v10371_v6 = vunpack.c.l.b16 %v3241_v22 }
 0x297   :  { %v2839_v34 = vadd.f32 %v2809_v17, %v2706_v62  ;;  %v3306_v32 = vpack.c.bf16 %v3279_v21, %v3279_v21  ;;  %v10367_v53 = vpack.c.b16 %v3355_v52, %v3354_v7  ;;  %v2678_v50 = vadd.f32 %v2677_v35, %v2629_v54  ;;  %v2587_v21 = vpop.f32.mrf.mxu3 }
 0x298   :  { %v10369_v51 = vunpack.c.l.b16 %v3178_v15  ;;  %v10373_v61 = vunpack.c.l.b16 %v3242_v0  ;;  %v2583_v14 = vadd.f32 %v10322_v26, %v10196_v8  ;;  %v10384_v54 = vunpack.c.l.b16 %v3305_v23 }
 0x299   :  { %12087 = vst [vmem:[#allocation40_spill] sm:$0xff] %v10367_v53  ;;  %v2855_v38 = vmax.f32 %v2839_v34, 0.0  ;;  %v10377_v36 = vunpack.c.l.b16 %v3306_v32  ;;  %v2707_v15 = vmax.f32 %v2678_v50, 0.0  ;;  %v153_v0 = vand.u32 63, %v91_v24 }
 0x29a   :  { %v2585_v50 = vadd.f32 %v2584_v25, %v2536_v57  ;;  %v2632_v7 = vadd.f32 %v10336_v18, %v2583_v14  ;;  %v12088_v26 = vmov 0 }
 0x29b   :  { %v3082_v62 = vrot.slane %v2855_v38, 2  ;;  %v3195_v22 = vrot.slane %v2855_v38, 4  ;;  %v3259_v17 = vrot.slane %v2855_v38, 6  ;;  %v3067_v35 = vpack.c.bf16 %v2855_v38, %v2855_v38 }
 0x29c   :  { %v2810_v8 = vpop.f32.mrf.mxu2  ;;  %vm10396_vm13 = vcmp.lt.s32.totalorder %v153_v0, 60  ;;  %v2634_v18 = vadd.f32 %v2633_v39, %v2585_v50  ;;  %v2588_v50 = vadd.f32 %v2587_v21, %v10207_v4 }
 0x29d   :  { %v2811_v41 = vadd.f32 %v10238_v11, %v2810_v8  ;;  %v3356_v60 = vunpack.c.l.b16 %v3067_v35  ;;  %v3102_v34 = vsel %vm3092_vm12, %v3081_v2, %v3082_v62  ;;  %v3214_v23 = vsel %vm421_vm0, %v3194_v42, %v3195_v22  ;;  %v2636_v35 = vpop.f32.mrf.mxu0  ;;  %v8773_v2 = vld [vmem:[#allocation2 + $0x350] sm:$0xff] }
 0x29e   :  { %v2680_v32 = vpop.f32.mrf.mxu1  ;;  %v3278_v38 = vsel %vm647_vm4, %v3258_v59, %v3259_v17  ;;  %v12089_v26 = vsel %vm10396_vm13, 4294967295, %v12088_v26  ;;  %v8781_v42 = vld [vmem:[#allocation2 + $0x390] sm:$0xff]  ;;  %v2492_v59 = vadd.f32 %v10149_v20, %v10209_v27  ;;  %3968 = vmatpush.bf16.msra.mxu2 %v8773_v2 }
 0x29f   :  { %v2840_v24 = vadd.f32 %v2811_v41, %v2707_v15  ;;  %v3368_v16 = vpack.c.b16 %v3356_v60, %v3355_v52  ;;  %12090 = vst [vmem:[#allocation38_spill] sm:$0xff] %v12089_v26  ;;  %v2681_v47 = vadd.f32 %v2680_v32, %v2632_v7  ;;  %v3179_v52 = vpack.c.bf16 %v3102_v34, %v3102_v34  ;;  %v2589_v31 = vpop.f32.mrf.mxu3  ;;  %v12092_v26 = vld [vmem:[#allocation12_spill] sm:$0xff] }
 0x2a0   :  { %4017 = vmatpush.bf16.msra.mxu3 %v8781_v42  ;;  %v3243_v32 = vpack.c.bf16 %v3214_v23, %v3214_v23  ;;  %v2541_v23 = vadd.f32 %v10211_v45, %v2492_v59  ;;  %vm3117_vm14 = vcmp.ge.s32.totalorder %v12092_v26, 6 }
 0x2a1   :  { %v2856_v8 = vmax.f32 %v2840_v24, 0.0  ;;  %3839 = vmatmul.bf16.gmra.mxu3 %v3368_v16  ;;  %v2708_v7 = vmax.f32 %v2681_v47, 0.0  ;;  %v3307_v24 = vpack.c.bf16 %v3278_v38, %v3278_v38 }
 0x2a2   :  { %v10422_v4 = vunpack.c.l.b16 %v3243_v32  ;;  %v2590_v32 = vadd.f32 %v2589_v31, %v2541_v23 }
 0x2a3   :  { %v2904_v25 = vsel %vm10396_vm13, %v2856_v8, 0.0  ;;  %v10424_v21 = vunpack.c.l.b16 %v3307_v24 }
 0x2a4   :  { %v3083_v14 = vrot.slane %v2904_v25, 2  ;;  %v3196_v57 = vrot.slane %v2904_v25, 4  ;;  %v3260_v15 = vrot.slane %v2904_v25, 6  ;;  %v2813_v0 = vpop.f32.mrf.mxu2  ;;  %v3324_v16 = vpack.c.bf16 %v2904_v25, %v2904_v25 }
 0x2a5   :  { %v2814_v41 = vadd.f32 %v10238_v11, %v2813_v0  ;;  %v2638_v45 = vpop.f32.mrf.mxu0 }
 0x2a6   :  { %v2682_v27 = vpop.f32.mrf.mxu1  ;;  %v3101_v8 = vsel %vm3092_vm12, %v3082_v62, %v3083_v14  ;;  %v3213_v37 = vsel %vm421_vm0, %v3195_v22, %v3196_v57  ;;  %v3277_v39 = vsel %vm647_vm4, %v3259_v17, %v3260_v15  ;;  %v3548_v34 = vunpack.c.l.b16 %v3324_v16 }
 0x2a7   :  { %v2841_v2 = vadd.f32 %v2814_v41, %v2708_v7  ;;  %v3180_v47 = vpack.c.bf16 %v3101_v8, %v3101_v8  ;;  %v3244_v42 = vpack.c.bf16 %v3213_v37, %v3213_v37  ;;  %v2683_v38 = vadd.f32 %v2682_v27, %v2634_v18  ;;  %v8756_v8 = vld [vmem:[#allocation2 + $0x2c8] sm:$0xff] }
 0x2a8   :  { %v3308_v25 = vpack.c.bf16 %v3277_v39, %v3277_v39  ;;  %v10413_v0 = vpack.c.b16 %v3548_v34, %v3356_v60  ;;  %v10420_v17 = vunpack.c.l.b16 %v3179_v52  ;;  %3871 = vmatpush.bf16.msrb.mxu0 %v8756_v8 }
 0x2a9   :  { %v2857_v62 = vmax.f32 %v2841_v2, 0.0  ;;  %v10415_v40 = vunpack.c.l.b16 %v3180_v47  ;;  %v10417_v22 = vunpack.c.l.b16 %v3244_v42  ;;  %v2709_v41 = vmax.f32 %v2683_v38, 0.0 }
 0x2aa   :  { %12091 = vst [vmem:[#allocation23_spill] sm:$0xff] %v10413_v0  ;;  %v10426_v16 = vunpack.c.l.b16 %v3308_v25  ;;  %v2637_v2 = vadd.f32 %v2636_v35, %v2588_v50  ;;  %v8764_v50 = vld [vmem:[#allocation2 + $0x308] sm:$0xff] }
 0x2ab   :  { %v3084_v59 = vrot.slane %v2857_v62, 2  ;;  %v3197_v18 = vrot.slane %v2857_v62, 4  ;;  %v3261_v60 = vrot.slane %v2857_v62, 6  ;;  %v3069_v7 = vpack.c.bf16 %v2857_v62, %v2857_v62  ;;  %3920 = vmatpush.bf16.msra.mxu1 %v8764_v50 }
 0x2ac   :  { %v2815_v27 = vpop.f32.mrf.mxu2 }
 0x2ad   :  { %v2816_v24 = vadd.f32 %v10238_v11, %v2815_v27  ;;  %v3358_v37 = vunpack.c.l.b16 %v3069_v7  ;;  %v3100_v39 = vsel %vm3092_vm12, %v3083_v14, %v3084_v59  ;;  %v3212_v34 = vsel %vm421_vm0, %v3196_v57, %v3197_v18  ;;  %v2592_v7 = vpop.f32.mrf.mxu3  ;;  %v8772_v14 = vld [vmem:[#allocation2 + $0x348] sm:$0xff] }
 0x2ae   :  { %v2685_v47 = vpop.f32.mrf.mxu1  ;;  %v3276_v42 = vsel %vm647_vm4, %v3260_v15, %v3261_v60  ;;  %v3165_v62 = vsel %vm3117_vm14, %v3100_v39, 0.0  ;;  %v8780_v57 = vld [vmem:[#allocation2 + $0x388] sm:$0xff]  ;;  %v3229_v35 = vsel %vm446_vm1, %v3212_v34, 0.0  ;;  %3969 = vmatpush.bf16.msra.mxu2 %v8772_v14 }
 0x2af   :  { %v2842_v38 = vadd.f32 %v2816_v24, %v2709_v41  ;;  %v3369_v25 = vpack.c.b16 %v3358_v37, %v10253_v63  ;;  %v2686_v27 = vadd.f32 %v2685_v47, %v2637_v2  ;;  %v3181_v15 = vpack.c.bf16 %v3165_v62, %v3165_v62  ;;  %4018 = vmatpush.bf16.msra.mxu3 %v8780_v57 }
 0x2b0   :  { %v3293_v41 = vsel %vm672_vm10, %v3276_v42, 0.0  ;;  %v3245_v34 = vpack.c.bf16 %v3229_v35, %v3229_v35 }
 0x2b1   :  { %v10444_v52 = vmax.f32 %v2842_v38, 0.0  ;;  %3844 = vmatmul.bf16.gmra.mxu3 %v3369_v25  ;;  %v2710_v2 = vmax.f32 %v2686_v27, 0.0  ;;  %v2639_v38 = vadd.f32 %v2638_v45, %v2590_v32  ;;  %v2641_v25 = vpop.f32.mrf.mxu0  ;;  %v3309_v45 = vpack.c.bf16 %v3293_v41, %v3293_v41 }
 0x2b2   :  { %v10462_v27 = vunpack.c.l.b16 %v3181_v15 }
 0x2b3   :  { %v3070_v24 = vpack.c.bf16 %v10444_v52, %v10444_v52  ;;  %v3085_v31 = vrot.slane %v10444_v52, 2  ;;  %v3198_v23 = vrot.slane %v10444_v52, 4  ;;  %v3262_v39 = vrot.slane %v10444_v52, 6 }
 0x2b4   :  { %v2818_v47 = vpop.f32.mrf.mxu2  ;;  %12093 = vst [vmem:[#allocation22_spill] sm:$0xff] %v10462_v27 }
 0x2b5   :  { %v2819_v42 = vadd.f32 %v10238_v11, %v2818_v47  ;;  %v3359_v62 = vunpack.c.l.b16 %v3070_v24  ;;  %v3099_v14 = vsel %vm3092_vm12, %v3084_v59, %v3085_v31  ;;  %v3211_v8 = vsel %vm421_vm0, %v3197_v18, %v3198_v23 }
 0x2b6   :  { %v2687_v26 = vpop.f32.mrf.mxu1  ;;  %v3182_v63 = vpack.c.bf16 %v3099_v14, %v3099_v14  ;;  %v3246_v0 = vpack.c.bf16 %v3211_v8, %v3211_v8  ;;  %v3275_v52 = vsel %vm647_vm4, %v3261_v60, %v3262_v39  ;;  %v10468_v59 = vunpack.c.l.b16 %v3245_v34 }
 0x2b7   :  { %v2843_v32 = vadd.f32 %v2819_v42, %v2710_v2  ;;  %v3310_v57 = vpack.c.bf16 %v3275_v52, %v3275_v52  ;;  %v10464_v35 = vpack.c.b16 %v3359_v62, %v3358_v37  ;;  %v2688_v50 = vadd.f32 %v2687_v26, %v2639_v38  ;;  %v2594_v37 = vpop.f32.mrf.mxu3 }
 0x2b8   :  { %v10466_v24 = vunpack.c.l.b16 %v3182_v63  ;;  %12095 = vst [vmem:[#allocation25_spill] sm:$0xff] %v10468_v59  ;;  %v10470_v47 = vunpack.c.l.b16 %v3246_v0  ;;  %v2593_v18 = vadd.f32 %v2592_v7, %v10218_v46  ;;  %v2497_v60 = vadd.f32 %v10149_v20, %v10220_v43 }
 0x2b9   :  { %12094 = vst [vmem:[#allocation14_spill] sm:$0xff] %v10464_v35  ;;  %v2859_v14 = vmax.f32 %v2843_v32, 0.0  ;;  %v10473_v8 = vunpack.c.l.b16 %v3310_v57  ;;  %v10481_v63 = vunpack.c.l.b16 %v3309_v45  ;;  %v2711_v7 = vmax.f32 %v2688_v50, 0.0 }
 0x2ba   :  { %12096 = vst [vmem:[#allocation24_spill] sm:$0xff] %v10470_v47  ;;  %v2546_v46 = vadd.f32 %v10222_v56, %v2497_v60  ;;  %v2642_v57 = vadd.f32 %v2641_v25, %v2593_v18  ;;  %v2643_v56 = vpop.f32.mrf.mxu0 }
 0x2bb   :  { %12097 = vst [vmem:[#allocation16_spill] sm:$0xff] %v10473_v8  ;;  %v3086_v41 = vrot.slane %v2859_v14, 2  ;;  %v3199_v0 = vrot.slane %v2859_v14, 4  ;;  %v3263_v2 = vrot.slane %v2859_v14, 6  ;;  %v3071_v38 = vpack.c.bf16 %v2859_v14, %v2859_v14 }
 0x2bc   :  { %12098 = vst [vmem:[#allocation27_spill] sm:$0xff] %v10481_v63  ;;  %v2820_v34 = vpop.f32.mrf.mxu2  ;;  %v2595_v15 = vadd.f32 %v2594_v37, %v2546_v46  ;;  %v8771_v46 = vld [vmem:[#allocation2 + $0x340] sm:$0xff] }
 0x2bd   :  { %v2821_v42 = vadd.f32 %v10238_v11, %v2820_v34  ;;  %v3360_v52 = vunpack.c.l.b16 %v3071_v38  ;;  %v3098_v32 = vsel %vm3092_vm12, %v3085_v31, %v3086_v41  ;;  %v3210_v45 = vsel %vm421_vm0, %v3198_v23, %v3199_v0  ;;  %3970 = vmatpush.bf16.msra.mxu2 %v8771_v46 }
 0x2be   :  { %v2690_v26 = vpop.f32.mrf.mxu1  ;;  %v3274_v14 = vsel %vm647_vm4, %v3262_v39, %v3263_v2  ;;  %v3183_v34 = vpack.c.bf16 %v3098_v32, %v3098_v32  ;;  %v2644_v23 = vadd.f32 %v2643_v56, %v2595_v15  ;;  %v3247_v25 = vpack.c.bf16 %v3210_v45, %v3210_v45 }
 0x2bf   :  { %v2844_v50 = vadd.f32 %v2821_v42, %v2711_v7  ;;  %v3370_v60 = vpack.c.b16 %v3360_v52, %v3359_v62  ;;  %v2691_v35 = vadd.f32 %v2690_v26, %v2642_v57  ;;  %v2597_v18 = vpop.f32.mrf.mxu3  ;;  %v8755_v7 = vld [vmem:[#allocation2 + $0x2c0] sm:$0xff]  ;;  %v3311_v15 = vpack.c.bf16 %v3274_v14, %v3274_v14 }
 0x2c0   :  { %v8779_v42 = vld [vmem:[#allocation2 + $0x380] sm:$0xff]  ;;  %3872 = vmatpush.bf16.msrb.mxu0 %v8755_v7 }
 0x2c1   :  { %v2860_v43 = vmax.f32 %v2844_v50, 0.0  ;;  %3849 = vmatmul.bf16.gmra.mxu3 %v3370_v60  ;;  %v2712_v59 = vmax.f32 %v2691_v35, 0.0  ;;  %v8763_v57 = vld [vmem:[#allocation2 + $0x300] sm:$0xff]  ;;  %v10506_v60 = vunpack.c.l.b16 %v3247_v25 }
 0x2c2   :  { %4019 = vmatpush.bf16.msra.mxu3 %v8779_v42  ;;  %3921 = vmatpush.bf16.msra.mxu1 %v8763_v57 }
 0x2c3   :  { %v3072_v38 = vpack.c.bf16 %v2860_v43, %v2860_v43  ;;  %v3087_v63 = vrot.slane %v2860_v43, 2  ;;  %v3200_v8 = vrot.slane %v2860_v43, 4  ;;  %v3264_v31 = vrot.slane %v2860_v43, 6 }
 0x2c4   :  { %v2823_v47 = vpop.f32.mrf.mxu2 }
 0x2c5   :  { %v2824_v27 = vadd.f32 %v10238_v11, %v2823_v47  ;;  %v3361_v39 = vunpack.c.l.b16 %v3072_v38  ;;  %v3097_v62 = vsel %vm3092_vm12, %v3086_v41, %v3087_v63  ;;  %v3209_v26 = vsel %vm421_vm0, %v3199_v0, %v3200_v8 }
 0x2c6   :  { %v2692_v37 = vpop.f32.mrf.mxu1  ;;  %v3184_v32 = vpack.c.bf16 %v3097_v62, %v3097_v62  ;;  %v3248_v43 = vpack.c.bf16 %v3209_v26, %v3209_v26  ;;  %v3273_v35 = vsel %vm647_vm4, %v3263_v2, %v3264_v31  ;;  %v10500_v47 = vunpack.c.l.b16 %v3183_v34  ;;  %v2646_v62 = vpop.f32.mrf.mxu0 }
 0x2c7   :  { %v2845_v45 = vadd.f32 %v2824_v27, %v2712_v59  ;;  %v3312_v56 = vpack.c.bf16 %v3273_v35, %v3273_v35  ;;  %v10502_v50 = vpack.c.b16 %v3361_v39, %v3360_v52  ;;  %v2693_v41 = vadd.f32 %v2692_v37, %v2644_v23 }
 0x2c8   :  { %v10504_v0 = vunpack.c.l.b16 %v3184_v32  ;;  %v10508_v38 = vunpack.c.l.b16 %v3248_v43  ;;  %v2598_v2 = vadd.f32 %v2597_v18, %v10229_v3  ;;  %v2502_v59 = vadd.f32 %v10149_v20, %v10231_v33 }
 0x2c9   :  { %12099 = vst [vmem:[#allocation26_spill] sm:$0xff] %v10502_v50  ;;  %v2861_v14 = vmax.f32 %v2845_v45, 0.0  ;;  %v10511_v27 = vunpack.c.l.b16 %v3312_v56  ;;  %v10519_v23 = vunpack.c.l.b16 %v3311_v15  ;;  %v2713_v46 = vmax.f32 %v2693_v41, 0.0 }
 0x2ca   :  { %v2551_v18 = vadd.f32 %v10236_v5, %v2502_v59  ;;  %v2647_v35 = vadd.f32 %v2646_v62, %v2598_v2  ;;  %v2599_v5 = vpop.f32.mrf.mxu3  ;;  %v99_v2 = vadd.s32 120, %v9118_v1 }
 0x2cb   :  { %12100 = vst [vmem:[#allocation15_spill] sm:$0xff] %v10519_v23  ;;  %v3088_v25 = vrot.slane %v2861_v14, 2  ;;  %v3201_v26 = vrot.slane %v2861_v14, 4  ;;  %v3265_v37 = vrot.slane %v2861_v14, 6  ;;  %v3073_v3 = vpack.c.bf16 %v2861_v14, %v2861_v14 }
 0x2cc   :  { %v2825_v7 = vpop.f32.mrf.mxu2  ;;  %v2600_v41 = vadd.f32 %v2599_v5, %v2551_v18 }
 0x2cd   :  { %v2826_v20 = vadd.f32 %v10238_v11, %v2825_v7  ;;  %v3362_v33 = vunpack.c.l.b16 %v3073_v3  ;;  %v3096_v32 = vsel %vm3092_vm12, %v3087_v63, %v3088_v25  ;;  %v3208_v43 = vsel %vm421_vm0, %v3200_v8, %v3201_v26 }
 0x2ce   :  { %v2695_v15 = vpop.f32.mrf.mxu1  ;;  %v3272_v45 = vsel %vm647_vm4, %v3264_v31, %v3265_v37  ;;  %v3185_v7 = vpack.c.bf16 %v3096_v32, %v3096_v32  ;;  %v2648_v3 = vpop.f32.mrf.mxu0  ;;  %v3249_v23 = vpack.c.bf16 %v3208_v43, %v3208_v43 }
 0x2cf   :  { %v2846_v57 = vadd.f32 %v2826_v20, %v2713_v46  ;;  %v3371_v56 = vpack.c.b16 %v3362_v33, %v3361_v39  ;;  %v2696_v14 = vadd.f32 %v2695_v15, %v2647_v35  ;;  %v2649_v62 = vadd.f32 %v2648_v3, %v2600_v41 }
 0x2d0   :  { %v3313_v5 = vpack.c.bf16 %v3272_v45, %v3272_v45 }
 0x2d1   :  { %v2862_v59 = vmax.f32 %v2846_v57, 0.0  ;;  %3854 = vmatmul.bf16.gmra.mxu3 %v3371_v56  ;;  %v2714_v50 = vmax.f32 %v2696_v14, 0.0  ;;  %v10539_v56 = vunpack.c.l.b16 %v3185_v7 }
 0x2d2   :  { %v10555_v45 = vunpack.c.l.b16 %v3313_v5  ;;  %v3174_v5 = vpack.c.bf16 %v10271_v13, %v10271_v13 }
 0x2d3   :  { %v3074_v42 = vpack.c.bf16 %v2862_v59, %v2862_v59  ;;  %v3089_v34 = vrot.slane %v2862_v59, 2  ;;  %v3202_v63 = vrot.slane %v2862_v59, 4  ;;  %v3266_v52 = vrot.slane %v2862_v59, 6 }
 0x2d4   :  { %v2828_v8 = vpop.f32.mrf.mxu2  ;;  %12102 = vst [vmem:[#allocation28_spill] sm:$0xff] %v10555_v45 }
 0x2d5   :  { %v2829_v31 = vadd.f32 %v10238_v11, %v2828_v8  ;;  %v3363_v46 = vunpack.c.l.b16 %v3074_v42  ;;  %v3095_v39 = vsel %vm3092_vm12, %v3088_v25, %v3089_v34  ;;  %v3207_v18 = vsel %vm421_vm0, %v3201_v26, %v3202_v63 }
 0x2d6   :  { %v2697_v20 = vpop.f32.mrf.mxu1  ;;  %v3186_v32 = vpack.c.bf16 %v3095_v39, %v3095_v39  ;;  %v3250_v35 = vpack.c.bf16 %v3207_v18, %v3207_v18  ;;  %v3271_v15 = vsel %vm647_vm4, %v3265_v37, %v3266_v52  ;;  %v10545_v25 = vunpack.c.l.b16 %v3249_v23  ;;  %v12106_v18 = vld [vmem:[#allocation13_spill] sm:$0xff] }
 0x2d7   :  { %v2847_v57 = vadd.f32 %v2829_v31, %v2714_v50  ;;  %v3314_v43 = vpack.c.bf16 %v3271_v15, %v3271_v15  ;;  %v10541_v41 = vpack.c.b16 %v3363_v46, %v3362_v33  ;;  %v2698_v42 = vadd.f32 %v2697_v20, %v2649_v62 }
 0x2d8   :  { %v10543_v14 = vunpack.c.l.b16 %v3186_v32  ;;  %v10547_v59 = vunpack.c.l.b16 %v3250_v35  ;;  %v209_v23 = vand.u32 63, %v99_v2  ;;  %vm3109_vm3 = vcmp.ge.s32.totalorder %v12106_v18, 6 }
 0x2d9   :  { %12101 = vst [vmem:[#allocation29_spill] sm:$0xff] %v10541_v41  ;;  %v2863_v26 = vmax.f32 %v2847_v57, 0.0  ;;  %v10549_v3 = vunpack.c.l.b16 %v3314_v43  ;;  %v2715_v31 = vmax.f32 %v2698_v42, 0.0  ;;  %v3238_v42 = vpack.c.bf16 %v10277_v30, %v10277_v30 }
 0x2da   :  { %vm10572_vm15 = vcmp.lt.s32.totalorder %v209_v23, 60 }
 0x2db   :  { %v3090_v33 = vrot.slane %v2863_v26, 2  ;;  %v3203_v7 = vrot.slane %v2863_v26, 4  ;;  %v3267_v8 = vrot.slane %v2863_v26, 6  ;;  %v3075_v62 = vpack.c.bf16 %v2863_v26, %v2863_v26 }
 0x2dc   :  { %v2830_v39 = vpop.f32.mrf.mxu2  ;;  %v12103_v26 = vmov 0 }
 0x2dd   :  { %v2831_v20 = vadd.f32 %v10238_v11, %v2830_v39  ;;  %v3364_v32 = vunpack.c.l.b16 %v3075_v62  ;;  %v3094_v35 = vsel %vm3092_vm12, %v3089_v34, %v3090_v33  ;;  %v3206_v15 = vsel %vm421_vm0, %v3202_v63, %v3203_v7 }
 0x2de   :  { %v3270_v57 = vsel %vm647_vm4, %v3266_v52, %v3267_v8  ;;  %v3302_v11 = vpack.c.bf16 %v10284_v19, %v10284_v19  ;;  %v12104_v26 = vsel %vm10572_vm15, 4294967295, %v12103_v26  ;;  %v3187_v63 = vpack.c.bf16 %v3094_v35, %v3094_v35 }
 0x2df   :  { %v2848_v2 = vadd.f32 %v2831_v20, %v2715_v31  ;;  %v3372_v43 = vpack.c.b16 %v3364_v32, %v3363_v46  ;;  %12105 = vst [vmem:[#allocation17_spill] sm:$0xff] %v12104_v26  ;;  %v3251_v62 = vpack.c.bf16 %v3206_v15, %v3206_v15  ;;  %v3398_v52 = vunpack.c.l.b16 %v3174_v5 }
 0x2e0   :  { %v3446_v31 = vunpack.c.l.b16 %v3238_v42  ;;  %v3494_v46 = vunpack.c.l.b16 %v3302_v11  ;;  %v10579_v19 = vunpack.c.l.b16 %v3187_v63  ;;  %v3315_v50 = vpack.c.bf16 %v3270_v57, %v3270_v57 }
 0x2e1   :  { %v2864_v34 = vmax.f32 %v2848_v2, 0.0  ;;  %3859 = vmatmul.bf16.gmra.mxu3 %v3372_v43  ;;  %v10581_v23 = vunpack.c.l.b16 %v3251_v62  ;;  %v12107_v35 = vrot.slane %v10246_v10, 2  ;;  %v12108_v5 = vrot.slane %v10246_v10, 4 }
 0x2e2   :  { %v12109_v42 = vrot.slane %v10246_v10, 6 }
 0x2e3   :  { %v2912_v13 = vsel %vm10572_vm15, %v2864_v34, 0.0 }
 0x2e4   :  { %v3091_v39 = vrot.slane %v2912_v13, 2  ;;  %v3204_v20 = vrot.slane %v2912_v13, 4  ;;  %v3268_v30 = vrot.slane %v2912_v13, 6  ;;  %v3332_v2 = vpack.c.bf16 %v2912_v13, %v2912_v13 }
 0x2e6   :  { %v3108_v15 = vsel %vm3092_vm12, %v3091_v39, %v12107_v35  ;;  %v3220_v43 = vsel %vm421_vm0, %v3204_v20, %v12108_v5  ;;  %v3284_v11 = vsel %vm647_vm4, %v3268_v30, %v12109_v42  ;;  %v3093_v34 = vsel %vm3092_vm12, %v3090_v33, %v3091_v39 }
 0x2e7   :  { %v3157_v57 = vsel %vm3109_vm3, %v3108_v15, 0.0  ;;  %v3221_v63 = vsel %vm438_vm2, %v3220_v43, 0.0  ;;  %v3285_v62 = vsel %vm664_vm6, %v3284_v11, 0.0  ;;  %v3188_v13 = vpack.c.bf16 %v3093_v34, %v3093_v34 }
 0x2e8   :  { %v3173_v35 = vpack.c.bf16 %v3157_v57, %v3157_v57  ;;  %v3237_v5 = vpack.c.bf16 %v3221_v63, %v3221_v63  ;;  %v3301_v37 = vpack.c.bf16 %v3285_v62, %v3285_v62  ;;  %v3205_v10 = vsel %vm421_vm0, %v3203_v7, %v3204_v20 }
 0x2e9   :  { %v10605_v42 = vunpack.c.l.b16 %v3188_v13  ;;  %v3252_v26 = vpack.c.bf16 %v3205_v10, %v3205_v10  ;;  %v3269_v33 = vsel %vm647_vm4, %v3267_v8, %v3268_v30  ;;  %v3556_v39 = vunpack.c.l.b16 %v3332_v2 }
 0x2ea   :  { %v3397_v15 = vunpack.c.l.b16 %v3173_v35  ;;  %v3445_v41 = vunpack.c.l.b16 %v3237_v5  ;;  %v3493_v43 = vunpack.c.l.b16 %v3301_v37  ;;  %v3316_v45 = vpack.c.bf16 %v3269_v33, %v3269_v33  ;;  %v12132_v5 = vld [vmem:[#allocation15_spill] sm:$0xff]  ;;  %v8794_v33 = vld [vmem:[#allocation2 + $0x3f8] sm:$0xff] }
 0x2eb   :  { %v3420_v11 = vpack.c.b16 %v10605_v42, %v10579_v19  ;;  %v10611_v34 = vunpack.c.l.b16 %v3252_v26  ;;  %v10613_v57 = vunpack.c.l.b16 %v3315_v50  ;;  %v10615_v63 = vpack.c.b16 %v3556_v39, %v3364_v32  ;;  %v12134_v39 = vld [vmem:[#allocation26_spill] sm:$0xff]  ;;  %4883 = vmatpush.bf16.msra.mxu0 %v8794_v33  ;;  %v8801_v42 = vld [vmem:[#allocation2 + $0x430] sm:$0xff] }
 0x2ec   :  { %v3413_v7 = vpack.c.b16 %v3398_v52, %v3397_v15  ;;  %v3461_v20 = vpack.c.b16 %v3446_v31, %v3445_v41  ;;  %v3509_v62 = vpack.c.b16 %v3494_v46, %v3493_v43  ;;  %v3508_v13 = vunpack.c.l.b16 %v3316_v45  ;;  %v8793_v43 = vld [vmem:[#allocation2 + $0x3f0] sm:$0xff] }
 0x2ed   :  { %12110 = vst [vmem:[#allocation31_spill] sm:$0xff] %v10615_v63  ;;  %v3468_v8 = vpack.c.b16 %v10611_v34, %v10581_v23  ;;  %v12111_v50 = vpack.c.b16 %v10316_v48, %v10312_v12  ;;  %v12112_v41 = vpack.c.b16 %v10318_v55, %v10314_v29  ;;  %v12113_v45 = vpack.c.b16 %v10324_v58, %v10332_v9  ;;  %v8792_v34 = vld [vmem:[#allocation2 + $0x3e8] sm:$0xff] }
 0x2ee   :  { %3873 = vmatmul.bf16.vlgmr.msrb.gmra.mxu0 %v3413_v7  ;;  %3922 = vmatmul.bf16.vlgmr.msra.gmra.mxu1 %v3461_v20  ;;  %v3516_v37 = vpack.c.b16 %v3508_v13, %v10613_v57  ;;  %v12114_v31 = vpack.c.b16 %v10369_v51, %v10365_v28  ;;  %v12115_v12 = vpack.c.b16 %v10373_v61, %v10371_v6  ;;  %v12120_v28 = vld [vmem:[#allocation23_spill] sm:$0xff]  ;;  %v8790_v7 = vld [vmem:[#allocation2 + $0x3d8] sm:$0xff]  ;;  %v8789_v13 = vld [vmem:[#allocation2 + $0x3d0] sm:$0xff] }
 0x2ef   :  { %3971 = vmatmul.bf16.vlgmr.msra.gmra.mxu2 %v3509_v62  ;;  %v12116_v29 = vpack.c.b16 %v10377_v36, %v10384_v54  ;;  %v12117_v58 = vpack.c.b16 %v10415_v40, %v10420_v17  ;;  %v12118_v51 = vpack.c.b16 %v10417_v22, %v10422_v4  ;;  %v12119_v9 = vpack.c.b16 %v10426_v16, %v10424_v21  ;;  %v12121_v36 = vld [vmem:[#allocation22_spill] sm:$0xff]  ;;  %v12123_v40 = vld [vmem:[#allocation24_spill] sm:$0xff]  ;;  %v12124_v17 = vld [vmem:[#allocation25_spill] sm:$0xff] }
 0x2f0   :  { %v12122_v54 = vpack.c.b16 %v10466_v24, %v12121_v36  ;;  %v12125_v46 = vpack.c.b16 %v12123_v40, %v12124_v17  ;;  %v12126_v22 = vld [vmem:[#allocation16_spill] sm:$0xff]  ;;  %v12127_v4 = vld [vmem:[#allocation27_spill] sm:$0xff]  ;;  %v12129_v21 = vld [vmem:[#allocation14_spill] sm:$0xff]  ;;  %v12130_v35 = vpack.c.b16 %v10504_v0, %v10500_v47  ;;  %v12131_v24 = vpack.c.b16 %v10508_v38, %v10506_v60  ;;  %4884 = vmatpush.bf16.msra.mxu0 %v8793_v43 }
 0x2f1   :  { %4020 = vmatmul.bf16.vlgmr.msra.gmra.mxu3 %v10286_v49  ;;  %v12128_v23 = vpack.c.b16 %v12126_v22, %v12127_v4  ;;  %v12133_v10 = vpack.c.b16 %v10511_v27, %v12132_v5  ;;  %v12135_v0 = vpack.c.b16 %v10543_v14, %v10539_v56  ;;  %v12136_v60 = vpack.c.b16 %v10547_v59, %v10545_v25  ;;  %v8791_v38 = vld [vmem:[#allocation2 + $0x3e0] sm:$0xff]  ;;  %v12137_v27 = vld [vmem:[#allocation28_spill] sm:$0xff]  ;;  %v12139_v20 = vld [vmem:[#allocation29_spill] sm:$0xff] }
 0x2f2   :  { %v12138_v57 = vpack.c.b16 %v10549_v3, %v12137_v27  ;;  %v8788_v56 = vld [vmem:[#allocation2 + $0x3c8] sm:$0xff]  ;;  %v8802_v14 = vld [vmem:[#allocation2 + $0x438] sm:$0xff]  ;;  %v8787_v25 = vld [vmem:[#allocation2 + $0x3c0] sm:$0xff] }
 0x2f3   :  { %4932 = vmatpush.bf16.msrb.mxu1 %v8802_v14  ;;  %v10713_v3 = vld [vmem:[#allocation4 + $0x2] ss:$0 sm:$0xff]  ;;  %v8817_v49 = vld [vmem:[#allocation2 + $0x4b0] sm:$0xff] }
 0x2f4   :  { %v3825_v26 = vpop.f32.mrf.mxu3  ;;  %4885 = vmatpush.bf16.msra.mxu0 %v8792_v34  ;;  %v8800_v34 = vld [vmem:[#allocation2 + $0x428] sm:$0xff] }
 0x2f7   :  { %4933 = vmatpush.bf16.msrb.mxu1 %v8801_v42 }
 0x2f8   :  { %4886 = vmatpush.bf16.msra.mxu0 %v8791_v38 }
 0x2fb   :  { %4934 = vmatpush.bf16.msrb.mxu1 %v8800_v34 }
 0x2fc   :  { %v10621_v30 = vpop.f32.mrf.mxu3  ;;  %4887 = vmatpush.bf16.msra.mxu0 %v8790_v7 }
 0x2fe   :  { %3878 = vmatmul.bf16.gmra.mxu0 %v12111_v50  ;;  %3927 = vmatmul.bf16.gmra.mxu1 %v12112_v41  ;;  %v3826_v41 = vadd.f32 %v10713_v3, %v3825_v26 }
 0x2ff   :  { %3976 = vmatmul.bf16.gmra.mxu2 %v12113_v45 }
 0x300   :  { %4888 = vmatpush.bf16.msra.mxu0 %v8789_v13 }
 0x301   :  { %4025 = vmatmul.bf16.gmra.mxu3 %v10320_v44 }
 0x304   :  { %v10633_v32 = vpop.f32.mrf.mxu3  ;;  %4889 = vmatpush.bf16.msra.mxu0 %v8788_v56 }
 0x308   :  { %4890 = vmatpush.bf16.msra.mxu0 %v8787_v25 }
 0x30c   :  { %v10635_v52 = vpop.f32.mrf.mxu3 }
 0x30d   :  { %v3833_v56 = vadd.f32 %v10713_v3, %v10635_v52 }
 0x30e   :  { %3883 = vmatmul.bf16.gmra.mxu0 %v12114_v31  ;;  %3932 = vmatmul.bf16.gmra.mxu1 %v12115_v12 }
 0x30f   :  { %3981 = vmatmul.bf16.gmra.mxu2 %v12116_v29 }
 0x311   :  { %4030 = vmatmul.bf16.gmra.mxu3 %v10367_v53 }
 0x314   :  { %v10647_v48 = vpop.f32.mrf.mxu3 }
 0x31c   :  { %v10649_v55 = vpop.f32.mrf.mxu3 }
 0x31e   :  { %3888 = vmatmul.bf16.gmra.mxu0 %v12117_v58  ;;  %3937 = vmatmul.bf16.gmra.mxu1 %v12118_v51 }
 0x31f   :  { %3986 = vmatmul.bf16.gmra.mxu2 %v12119_v9 }
 0x321   :  { %4035 = vmatmul.bf16.gmra.mxu3 %v12120_v28 }
 0x324   :  { %v10661_v6 = vpop.f32.mrf.mxu3 }
 0x32c   :  { %v10663_v61 = vpop.f32.mrf.mxu3 }
 0x32e   :  { %3893 = vmatmul.bf16.gmra.mxu0 %v12122_v54  ;;  %3942 = vmatmul.bf16.gmra.mxu1 %v12125_v46  ;;  %v3831_v46 = vadd.f32 %v10713_v3, %v10633_v32 }
 0x32f   :  { %3991 = vmatmul.bf16.gmra.mxu2 %v12128_v23 }
 0x331   :  { %4040 = vmatmul.bf16.gmra.mxu3 %v12129_v21 }
 0x334   :  { %v10675_v16 = vpop.f32.mrf.mxu3 }
 0x33c   :  { %v10677_v2 = vpop.f32.mrf.mxu3 }
 0x33e   :  { %3898 = vmatmul.bf16.gmra.mxu0 %v12130_v35  ;;  %3947 = vmatmul.bf16.gmra.mxu1 %v12131_v24 }
 0x33f   :  { %3996 = vmatmul.bf16.gmra.mxu2 %v12133_v10  ;;  %v12140_v10 = vld [vmem:[#allocation34_spill] sm:$0xff] }
 0x341   :  { %4045 = vmatmul.bf16.gmra.mxu3 %v12134_v39 }
 0x344   :  { %v10689_v15 = vpop.f32.mrf.mxu3 }
 0x34c   :  { %v10691_v47 = vpop.f32.mrf.mxu3 }
 0x34e   :  { %3903 = vmatmul.bf16.gmra.mxu0 %v12135_v0  ;;  %3952 = vmatmul.bf16.gmra.mxu1 %v12136_v60 }
 0x34f   :  { %4001 = vmatmul.bf16.gmra.mxu2 %v12138_v57 }
 0x351   :  { %4050 = vmatmul.bf16.gmra.mxu3 %v12139_v20 }
 0x354   :  { %v10703_v62 = vpop.f32.mrf.mxu3 }
 0x35c   :  { %v10705_v50 = vpop.f32.mrf.mxu3 }
 0x35e   :  { %3908 = vmatmul.bf16.gmra.mxu0 %v3420_v11  ;;  %3957 = vmatmul.bf16.gmra.mxu1 %v3468_v8 }
 0x35f   :  { %4006 = vmatmul.bf16.gmra.mxu2 %v3516_v37  ;;  %v3828_v37 = vadd.f32 %v10713_v3, %v10621_v30 }
 0x361   :  { %4055 = vmatmul.bf16.gmra.mxu3 %v10615_v63 }
 0x364   :  { %v10711_v59 = vpop.f32.mrf.mxu3 }
 0x36b   :  { %v3874_v45 = vpop.f32.mrf.mxu0  ;;  %v3923_v31 = vpop.f32.mrf.mxu1 }
 0x36c   :  { %v10716_v12 = vpop.f32.mrf.mxu3  ;;  %v3875_v19 = vadd.f32 %v3874_v45, %v3826_v41 }
 0x36e   :  { %v3924_v11 = vadd.f32 %v3923_v31, %v3875_v19 }
 0x372   :  { %v3972_v8 = vpop.f32.mrf.mxu2 }
 0x373   :  { %v3973_v29 = vadd.f32 %v3972_v8, %v3924_v11  ;;  %v3876_v58 = vpop.f32.mrf.mxu0  ;;  %v3925_v51 = vpop.f32.mrf.mxu1 }
 0x374   :  { %v4021_v9 = vpop.f32.mrf.mxu3  ;;  %v3877_v36 = vadd.f32 %v3876_v58, %v3828_v37 }
 0x375   :  { %v4022_v54 = vadd.f32 %v4021_v9, %v3973_v29 }
 0x376   :  { %v3926_v26 = vadd.f32 %v3925_v51, %v3877_v36 }
 0x377   :  { %v10720_v40 = vmax.f32 %v4022_v54, 0.0 }
 0x379   :  { %v4177_v17 = vpack.c.bf16 %v10720_v40, %v10720_v40  ;;  %v11954_v60 = vrot.slane %v10720_v40, 2  ;;  %v11953_v38 = vrot.slane %v10720_v40, 4  ;;  %v11952_v14 = vrot.slane %v10720_v40, 6 }
 0x37a   :  { %v3974_v22 = vpop.f32.mrf.mxu2 }
 0x37b   :  { %v10726_v4 = vunpack.c.l.b16 %v4177_v17  ;;  %v3975_v23 = vadd.f32 %v3974_v22, %v3926_v26  ;;  %v3879_v30 = vpop.f32.mrf.mxu0  ;;  %v3928_v35 = vpop.f32.mrf.mxu1 }
 0x37c   :  { %v3880_v24 = vadd.f32 %v3879_v30, %v3831_v46  ;;  %v4023_v5 = vpop.f32.mrf.mxu3  ;;  %v3836_v46 = vadd.f32 %v10713_v3, %v10647_v48 }
 0x37d   :  { %v4432_v33 = vpack.c.b16 %v10726_v4, %v12140_v10  ;;  %v4024_v43 = vadd.f32 %v4023_v5, %v3975_v23 }
 0x37e   :  { %v3929_v32 = vadd.f32 %v3928_v35, %v3880_v24 }
 0x37f   :  { %v4062_v0 = vmax.f32 %v4024_v43, 0.0  ;;  %4891 = vmatmul.bf16.vlgmr.msra.gmra.mxu0 %v4432_v33 }
 0x381   :  { %v4193_v27 = vrot.slane %v4062_v0, 2  ;;  %v4257_v57 = vrot.slane %v4062_v0, 4  ;;  %v4321_v7 = vrot.slane %v4062_v0, 6  ;;  %v4178_v13 = vpack.c.bf16 %v4062_v0, %v4062_v0 }
 0x382   :  { %v3977_v25 = vpop.f32.mrf.mxu2 }
 0x383   :  { %v3978_v41 = vadd.f32 %v3977_v25, %v3929_v32  ;;  %v3881_v45 = vpop.f32.mrf.mxu0  ;;  %v3930_v31 = vpop.f32.mrf.mxu1  ;;  %v10735_v19 = vunpack.c.l.b16 %v4178_v13  ;;  %v10741_v42 = vsel %vm3092_vm12, %v11954_v60, %v4193_v27  ;;  %v10747_v11 = vsel %vm421_vm0, %v11953_v38, %v4257_v57  ;;  %v8799_v13 = vld [vmem:[#allocation2 + $0x420] sm:$0xff] }
 0x384   :  { %v3882_v52 = vadd.f32 %v3881_v45, %v3833_v56  ;;  %v4026_v8 = vpop.f32.mrf.mxu3  ;;  %v10753_v37 = vsel %vm647_vm4, %v11952_v14, %v4321_v7  ;;  %4935 = vmatpush.bf16.msrb.mxu1 %v8799_v13 }
 0x385   :  { %v4027_v29 = vadd.f32 %v4026_v8, %v3978_v41 }
 0x386   :  { %v3931_v9 = vadd.f32 %v3930_v31, %v3882_v52 }
 0x387   :  { %v4063_v51 = vmax.f32 %v4027_v29, 0.0 }
 0x389   :  { %v4194_v36 = vrot.slane %v4063_v51, 2  ;;  %v4258_v54 = vrot.slane %v4063_v51, 4  ;;  %v4322_v26 = vrot.slane %v4063_v51, 6  ;;  %v4179_v17 = vpack.c.bf16 %v4063_v51, %v4063_v51 }
 0x38a   :  { %v3979_v22 = vpop.f32.mrf.mxu2 }
 0x38b   :  { %v3980_v23 = vadd.f32 %v3979_v22, %v3931_v9  ;;  %v3884_v30 = vpop.f32.mrf.mxu0  ;;  %v3933_v35 = vpop.f32.mrf.mxu1  ;;  %v10759_v24 = vunpack.c.l.b16 %v4179_v17  ;;  %v4221_v5 = vsel %vm3092_vm12, %v4193_v27, %v4194_v36  ;;  %v4285_v33 = vsel %vm421_vm0, %v4257_v57, %v4258_v54 }
 0x38c   :  { %v3885_v43 = vadd.f32 %v3884_v30, %v3836_v46  ;;  %v4028_v34 = vpop.f32.mrf.mxu3  ;;  %v4349_v0 = vsel %vm647_vm4, %v4321_v7, %v4322_v26  ;;  %v3838_v57 = vadd.f32 %v10713_v3, %v10649_v55  ;;  %v4242_v8 = vpack.c.bf16 %v4221_v5, %v4221_v5 }
 0x38d   :  { %v4029_v32 = vadd.f32 %v4028_v34, %v3980_v23  ;;  %v4433_v48 = vpack.c.b16 %v10759_v24, %v10735_v19  ;;  %v4306_v29 = vpack.c.bf16 %v4285_v33, %v4285_v33  ;;  %v4370_v7 = vpack.c.bf16 %v4349_v0, %v4349_v0 }
 0x38e   :  { %v3934_v25 = vadd.f32 %v3933_v35, %v3885_v43 }
 0x38f   :  { %v4064_v56 = vmax.f32 %v4029_v32, 0.0  ;;  %4896 = vmatmul.bf16.gmra.mxu0 %v4433_v48  ;;  %v10781_v32 = vunpack.c.l.b16 %v4242_v8 }
 0x391   :  { %v4195_v41 = vrot.slane %v4064_v56, 2  ;;  %v4259_v45 = vrot.slane %v4064_v56, 4  ;;  %v4323_v27 = vrot.slane %v4064_v56, 6  ;;  %v4180_v31 = vpack.c.bf16 %v4064_v56, %v4064_v56 }
 0x392   :  { %v3982_v52 = vpop.f32.mrf.mxu2 }
 0x393   :  { %v3983_v51 = vadd.f32 %v3982_v52, %v3934_v25  ;;  %v3886_v9 = vpop.f32.mrf.mxu0  ;;  %v3935_v17 = vpop.f32.mrf.mxu1  ;;  %v10771_v46 = vunpack.c.l.b16 %v4180_v31  ;;  %v4220_v22 = vsel %vm3092_vm12, %v4194_v36, %v4195_v41  ;;  %v4284_v23 = vsel %vm421_vm0, %v4258_v54, %v4259_v45 }
 0x394   :  { %v3887_v30 = vadd.f32 %v3886_v9, %v3838_v57  ;;  %v4031_v35 = vpop.f32.mrf.mxu3  ;;  %v4243_v43 = vpack.c.bf16 %v4220_v22, %v4220_v22  ;;  %v4307_v34 = vpack.c.bf16 %v4284_v23, %v4284_v23  ;;  %v4348_v55 = vsel %vm647_vm4, %v4322_v26, %v4323_v27 }
 0x395   :  { %v4032_v5 = vadd.f32 %v4031_v35, %v3983_v51  ;;  %v4371_v33 = vpack.c.bf16 %v4348_v55, %v4348_v55  ;;  %v10785_v36 = vunpack.c.l.b16 %v4306_v29  ;;  %v10795_v57 = vunpack.c.l.b16 %v4370_v7 }
 0x396   :  { %v10783_v48 = vunpack.c.l.b16 %v4243_v43  ;;  %v10787_v13 = vunpack.c.l.b16 %v4307_v34  ;;  %v3936_v25 = vadd.f32 %v3935_v17, %v3887_v30  ;;  %v3841_v29 = vadd.f32 %v10713_v3, %v10661_v6 }
 0x397   :  { %v4065_v54 = vmax.f32 %v4032_v5, 0.0  ;;  %v10789_v56 = vunpack.c.l.b16 %v4371_v33 }
 0x399   :  { %v4196_v52 = vrot.slane %v4065_v54, 2  ;;  %v4260_v8 = vrot.slane %v4065_v54, 4  ;;  %v4324_v51 = vrot.slane %v4065_v54, 6  ;;  %v4181_v9 = vpack.c.bf16 %v4065_v54, %v4065_v54 }
 0x39a   :  { %v3984_v22 = vpop.f32.mrf.mxu2 }
 0x39b   :  { %v3985_v17 = vadd.f32 %v3984_v22, %v3936_v25  ;;  %v3889_v30 = vpop.f32.mrf.mxu0  ;;  %v3938_v35 = vpop.f32.mrf.mxu1  ;;  %v10801_v43 = vunpack.c.l.b16 %v4181_v9  ;;  %v4219_v7 = vsel %vm3092_vm12, %v4195_v41, %v4196_v52  ;;  %v4283_v34 = vsel %vm421_vm0, %v4259_v45, %v4260_v8  ;;  %v8798_v25 = vld [vmem:[#allocation2 + $0x418] sm:$0xff] }
 0x39c   :  { %v3890_v55 = vadd.f32 %v3889_v30, %v3841_v29  ;;  %v4033_v5 = vpop.f32.mrf.mxu3  ;;  %v4347_v6 = vsel %vm647_vm4, %v4323_v27, %v4324_v51  ;;  %4936 = vmatpush.bf16.msrb.mxu1 %v8798_v25  ;;  %v3843_v45 = vadd.f32 %v10713_v3, %v10663_v61  ;;  %v4244_v30 = vpack.c.bf16 %v4219_v7, %v4219_v7 }
 0x39d   :  { %v4034_v33 = vadd.f32 %v4033_v5, %v3985_v17  ;;  %v4434_v54 = vpack.c.b16 %v10801_v43, %v10771_v46  ;;  %v4308_v26 = vpack.c.bf16 %v4283_v34, %v4283_v34  ;;  %v4372_v27 = vpack.c.bf16 %v4347_v6, %v4347_v6 }
 0x39e   :  { %v3939_v9 = vadd.f32 %v3938_v35, %v3890_v55 }
 0x39f   :  { %v4066_v22 = vmax.f32 %v4034_v33, 0.0  ;;  %4901 = vmatmul.bf16.gmra.mxu0 %v4434_v54 }
 0x3a1   :  { %v4197_v0 = vrot.slane %v4066_v22, 2  ;;  %v4261_v23 = vrot.slane %v4066_v22, 4  ;;  %v4325_v41 = vrot.slane %v4066_v22, 6  ;;  %v4182_v31 = vpack.c.bf16 %v4066_v22, %v4066_v22 }
 0x3a2   :  { %v3987_v29 = vpop.f32.mrf.mxu2 }
 0x3a3   :  { %v3988_v17 = vadd.f32 %v3987_v29, %v3939_v9  ;;  %v3891_v5 = vpop.f32.mrf.mxu0  ;;  %v3940_v58 = vpop.f32.mrf.mxu1  ;;  %v10813_v14 = vunpack.c.l.b16 %v4182_v31  ;;  %v4218_v35 = vsel %vm3092_vm12, %v4196_v52, %v4197_v0  ;;  %v4282_v55 = vsel %vm421_vm0, %v4260_v8, %v4261_v23 }
 0x3a4   :  { %v3892_v33 = vadd.f32 %v3891_v5, %v3843_v45  ;;  %v4036_v54 = vpop.f32.mrf.mxu3  ;;  %v4245_v25 = vpack.c.bf16 %v4218_v35, %v4218_v35  ;;  %v4309_v22 = vpack.c.bf16 %v4282_v55, %v4282_v55  ;;  %v4346_v61 = vsel %vm647_vm4, %v4324_v51, %v4325_v41 }
 0x3a5   :  { %v4037_v7 = vadd.f32 %v4036_v54, %v3988_v17  ;;  %v4373_v34 = vpack.c.bf16 %v4346_v61, %v4346_v61  ;;  %v10823_v31 = vunpack.c.l.b16 %v4244_v30  ;;  %v10827_v52 = vunpack.c.l.b16 %v4308_v26 }
 0x3a6   :  { %v10825_v9 = vunpack.c.l.b16 %v4245_v25  ;;  %v10829_v29 = vunpack.c.l.b16 %v4309_v22  ;;  %v3941_v5 = vadd.f32 %v3940_v58, %v3892_v33  ;;  %v10837_v35 = vunpack.c.l.b16 %v4372_v27 }
 0x3a7   :  { %v4067_v8 = vmax.f32 %v4037_v7, 0.0  ;;  %v10831_v45 = vunpack.c.l.b16 %v4373_v34  ;;  %v3846_v26 = vadd.f32 %v10713_v3, %v10675_v16 }
 0x3a9   :  { %v4198_v30 = vrot.slane %v4067_v8, 2  ;;  %v4262_v55 = vrot.slane %v4067_v8, 4  ;;  %v4326_v54 = vrot.slane %v4067_v8, 6  ;;  %v4183_v25 = vpack.c.bf16 %v4067_v8, %v4067_v8 }
 0x3aa   :  { %v3989_v22 = vpop.f32.mrf.mxu2 }
 0x3ab   :  { %v3990_v58 = vadd.f32 %v3989_v22, %v3941_v5  ;;  %v3894_v33 = vpop.f32.mrf.mxu0  ;;  %v3943_v7 = vpop.f32.mrf.mxu1  ;;  %v10843_v34 = vunpack.c.l.b16 %v4183_v25  ;;  %v4217_v27 = vsel %vm3092_vm12, %v4197_v0, %v4198_v30  ;;  %v4281_v6 = vsel %vm421_vm0, %v4261_v23, %v4262_v55  ;;  %v8797_v5 = vld [vmem:[#allocation2 + $0x410] sm:$0xff] }
 0x3ac   :  { %v3895_v17 = vadd.f32 %v3894_v33, %v3846_v26  ;;  %v4038_v8 = vpop.f32.mrf.mxu3  ;;  %v4345_v16 = vsel %vm647_vm4, %v4325_v41, %v4326_v54  ;;  %4937 = vmatpush.bf16.msrb.mxu1 %v8797_v5  ;;  %v4246_v38 = vpack.c.bf16 %v4217_v27, %v4217_v27  ;;  %v4310_v60 = vpack.c.bf16 %v4281_v6, %v4281_v6 }
 0x3ad   :  { %12141 = vst [vmem:[#allocation30_spill] sm:$0xff] %v10843_v34  ;;  %v4039_v51 = vadd.f32 %v4038_v8, %v3990_v58  ;;  %v4435_v61 = vpack.c.b16 %v10843_v34, %v10813_v14  ;;  %v3848_v26 = vadd.f32 %v10713_v3, %v10677_v2  ;;  %v4374_v41 = vpack.c.bf16 %v4345_v16, %v4345_v16 }
 0x3ae   :  { %v3944_v25 = vadd.f32 %v3943_v7, %v3895_v17  ;;  %v10861_v21 = vunpack.c.l.b16 %v4246_v38  ;;  %v10863_v16 = vunpack.c.l.b16 %v4310_v60 }
 0x3af   :  { %v4068_v22 = vmax.f32 %v4039_v51, 0.0  ;;  %4906 = vmatmul.bf16.gmra.mxu0 %v4435_v61 }
 0x3b1   :  { %v4199_v0 = vrot.slane %v4068_v22, 2  ;;  %v4263_v63 = vrot.slane %v4068_v22, 4  ;;  %v4327_v20 = vrot.slane %v4068_v22, 6  ;;  %v4391_v23 = vpack.c.bf16 %v4068_v22, %v4068_v22 }
 0x3b2   :  { %v3992_v33 = vpop.f32.mrf.mxu2 }
 0x3b3   :  { %v3993_v58 = vadd.f32 %v3992_v33, %v3944_v25  ;;  %v3896_v8 = vpop.f32.mrf.mxu0  ;;  %v3945_v39 = vpop.f32.mrf.mxu1  ;;  %v4216_v51 = vsel %vm3092_vm12, %v4198_v30, %v4199_v0  ;;  %v4280_v17 = vsel %vm421_vm0, %v4262_v55, %v4263_v63  ;;  %v4344_v6 = vsel %vm647_vm4, %v4326_v54, %v4327_v20 }
 0x3b4   :  { %v3897_v61 = vadd.f32 %v3896_v8, %v3848_v26  ;;  %v4041_v7 = vpop.f32.mrf.mxu3  ;;  %v4247_v27 = vpack.c.bf16 %v4216_v51, %v4216_v51  ;;  %v4311_v5 = vpack.c.bf16 %v4280_v17, %v4280_v17  ;;  %v4375_v22 = vpack.c.bf16 %v4344_v6, %v4344_v6 }
 0x3b5   :  { %v4042_v2 = vadd.f32 %v4041_v7, %v3993_v58  ;;  %v10865_v25 = vunpack.c.l.b16 %v4391_v23  ;;  %v10871_v55 = vunpack.c.l.b16 %v4374_v41  ;;  %v3851_v6 = vadd.f32 %v10713_v3, %v10689_v15 }
 0x3b6   :  { %v10867_v33 = vunpack.c.l.b16 %v4247_v27  ;;  %v10869_v30 = vunpack.c.l.b16 %v4311_v5  ;;  %v10873_v28 = vunpack.c.l.b16 %v4375_v22  ;;  %v3946_v8 = vadd.f32 %v3945_v39, %v3897_v61 }
 0x3b7   :  { %12142 = vst [vmem:[#allocation18_spill] sm:$0xff] %v10865_v25  ;;  %v4069_v54 = vmax.f32 %v4042_v2, 0.0 }
 0x3b8   :  { %12143 = vst [vmem:[#allocation33_spill] sm:$0xff] %v10871_v55 }
 0x3b9   :  { %v4200_v58 = vrot.slane %v4069_v54, 2  ;;  %v4264_v51 = vrot.slane %v4069_v54, 4  ;;  %v4328_v41 = vrot.slane %v4069_v54, 6  ;;  %v4185_v17 = vpack.c.bf16 %v4069_v54, %v4069_v54 }
 0x3ba   :  { %v3994_v7 = vpop.f32.mrf.mxu2 }
 0x3bb   :  { %v3995_v27 = vadd.f32 %v3994_v7, %v3946_v8  ;;  %v3899_v5 = vpop.f32.mrf.mxu0  ;;  %v3948_v39 = vpop.f32.mrf.mxu1  ;;  %v10885_v61 = vunpack.c.l.b16 %v4185_v17  ;;  %v4215_v22 = vsel %vm3092_vm12, %v4199_v0, %v4200_v58  ;;  %v4279_v2 = vsel %vm421_vm0, %v4263_v63, %v4264_v51  ;;  %v8796_v8 = vld [vmem:[#allocation2 + $0x408] sm:$0xff] }
 0x3bc   :  { %v3900_v26 = vadd.f32 %v3899_v5, %v3851_v6  ;;  %v4043_v23 = vpop.f32.mrf.mxu3  ;;  %v4343_v54 = vsel %vm647_vm4, %v4327_v20, %v4328_v41  ;;  %v4232_v38 = vsel %vm3117_vm14, %v4215_v22, 0.0  ;;  %v4296_v0 = vsel %vm446_vm1, %v4279_v2, 0.0  ;;  %4938 = vmatpush.bf16.msrb.mxu1 %v8796_v8  ;;  %v8810_v5 = vld [vmem:[#allocation2 + $0x478] sm:$0xff] }
 0x3bd   :  { %12144 = vst [vmem:[#allocation32_spill] sm:$0xff] %v10885_v61  ;;  %v4044_v60 = vadd.f32 %v4043_v23, %v3995_v27  ;;  %v4436_v15 = vpack.c.b16 %v10885_v61, %v12140_v10  ;;  %v4360_v63 = vsel %vm672_vm10, %v4343_v54, 0.0  ;;  %v3853_v22 = vadd.f32 %v10713_v3, %v10691_v47  ;;  %v8826_v10 = vld [vmem:[#allocation2 + $0x4f8] sm:$0xff]  ;;  %4981 = vmatpush.bf16.msrb.mxu2 %v8810_v5  ;;  %v8809_v27 = vld [vmem:[#allocation2 + $0x470] sm:$0xff] }
 0x3be   :  { %v3949_v6 = vadd.f32 %v3948_v39, %v3900_v26  ;;  %v4248_v17 = vpack.c.bf16 %v4232_v38, %v4232_v38  ;;  %v4312_v54 = vpack.c.bf16 %v4296_v0, %v4296_v0  ;;  %v4376_v26 = vpack.c.bf16 %v4360_v63, %v4360_v63  ;;  %5079 = vmatpush.bf16.msrb.mxu0 %v8826_v10 }
 0x3bf   :  { %v10895_v7 = vmax.f32 %v4044_v60, 0.0  ;;  %4911 = vmatmul.bf16.gmra.mxu0 %v4436_v15  ;;  %v8818_v15 = vld [vmem:[#allocation2 + $0x4b8] sm:$0xff] }
 0x3c0   :  { %5030 = vmatpush.bf16.msrb.mxu3 %v8818_v15  ;;  %v8807_v15 = vld [vmem:[#allocation2 + $0x460] sm:$0xff] }
 0x3c1   :  { %v4201_v20 = vrot.slane %v10895_v7, 2  ;;  %v4265_v23 = vrot.slane %v10895_v7, 4  ;;  %v4186_v60 = vpack.c.bf16 %v10895_v7, %v10895_v7  ;;  %v12147_v63 = vrot.slane %v10895_v7, 6  ;;  %4982 = vmatpush.bf16.msrb.mxu2 %v8809_v27  ;;  %v8808_v27 = vld [vmem:[#allocation2 + $0x468] sm:$0xff] }
 0x3c2   :  { %v3997_v2 = vpop.f32.mrf.mxu2 }
 0x3c3   :  { %v3998_v39 = vadd.f32 %v3997_v2, %v3949_v6  ;;  %v3901_v8 = vpop.f32.mrf.mxu0  ;;  %v3950_v53 = vpop.f32.mrf.mxu1  ;;  %v10910_v44 = vunpack.c.l.b16 %v4186_v60  ;;  %v4214_v34 = vsel %vm3092_vm12, %v4200_v58, %v4201_v20  ;;  %v4278_v47 = vsel %vm421_vm0, %v4264_v51, %v4265_v23 }
 0x3c4   :  { %v3902_v25 = vadd.f32 %v3901_v8, %v3853_v22  ;;  %v4046_v55 = vpop.f32.mrf.mxu3  ;;  %v4249_v38 = vpack.c.bf16 %v4214_v34, %v4214_v34  ;;  %v4313_v0 = vpack.c.bf16 %v4278_v47, %v4278_v47  ;;  %v4342_v6 = vsel %vm647_vm4, %v4328_v41, %v12147_v63  ;;  %5031 = vmatpush.bf16.msrb.mxu3 %v8817_v49 }
 0x3c5   :  { %12146 = vst [vmem:[#allocation19_spill] sm:$0xff] %v10910_v44  ;;  %v4047_v60 = vadd.f32 %v4046_v55, %v3998_v39  ;;  %v4377_v5 = vpack.c.bf16 %v4342_v6, %v4342_v6  ;;  %v10922_v2 = vunpack.c.l.b16 %v4248_v17  ;;  %v10926_v51 = vunpack.c.l.b16 %v4312_v54  ;;  %4983 = vmatpush.bf16.msrb.mxu2 %v8808_v27  ;;  %v8795_v17 = vld [vmem:[#allocation2 + $0x400] sm:$0xff] }
 0x3c6   :  { %v10924_v58 = vunpack.c.l.b16 %v4249_v38  ;;  %v10928_v22 = vunpack.c.l.b16 %v4313_v0  ;;  %v3951_v41 = vadd.f32 %v3950_v53, %v3902_v25  ;;  %v10938_v39 = vunpack.c.l.b16 %v4376_v26  ;;  %v8816_v38 = vld [vmem:[#allocation2 + $0x4a8] sm:$0xff]  ;;  %v8825_v53 = vld [vmem:[#allocation2 + $0x4f0] sm:$0xff]  ;;  %4939 = vmatpush.bf16.msrb.mxu1 %v8795_v17 }
 0x3c7   :  { %12148 = vst [vmem:[#allocation37_spill] sm:$0xff] %v10926_v51  ;;  %v10930_v10 = vmax.f32 %v4047_v60, 0.0  ;;  %v10932_v34 = vunpack.c.l.b16 %v4377_v5  ;;  %v3856_v25 = vadd.f32 %v10713_v3, %v10703_v62  ;;  %5080 = vmatpush.bf16.msrb.mxu0 %v8825_v53  ;;  %v8815_v51 = vld [vmem:[#allocation2 + $0x4a0] sm:$0xff]  ;;  %v8824_v26 = vld [vmem:[#allocation2 + $0x4e8] sm:$0xff]  ;;  %v3858_v17 = vadd.f32 %v10713_v3, %v10705_v50  ;;  %v8805_v50 = vld [vmem:[#allocation2 + $0x450] sm:$0xff] }
 0x3c8   :  { %12149 = vst [vmem:[#allocation35_spill] sm:$0xff] %v10928_v22  ;;  %5032 = vmatpush.bf16.msrb.mxu3 %v8816_v38 }
 0x3c9   :  { %12150 = vst [vmem:[#allocation20_spill] sm:$0xff] %v10932_v34  ;;  %v4202_v54 = vrot.slane %v10930_v10, 2  ;;  %v4266_v8 = vrot.slane %v10930_v10, 4  ;;  %v4187_v49 = vpack.c.bf16 %v10930_v10, %v10930_v10  ;;  %4984 = vmatpush.bf16.msrb.mxu2 %v8807_v15  ;;  %v8823_v15 = vld [vmem:[#allocation2 + $0x4e0] sm:$0xff]  ;;  %v8813_v34 = vld [vmem:[#allocation2 + $0x490] sm:$0xff] }
 0x3ca   :  { %12151 = vst [vmem:[#allocation21_spill] sm:$0xff] %v10938_v39  ;;  %v3999_v0 = vpop.f32.mrf.mxu2 }
 0x3cb   :  { %v4000_v63 = vadd.f32 %v3999_v0, %v3951_v41  ;;  %v3904_v6 = vpop.f32.mrf.mxu0  ;;  %v3953_v60 = vpop.f32.mrf.mxu1  ;;  %v10949_v5 = vunpack.c.l.b16 %v4187_v49  ;;  %v4213_v55 = vsel %vm3092_vm12, %v4201_v20, %v4202_v54  ;;  %v4277_v47 = vsel %vm421_vm0, %v4265_v23, %v4266_v8  ;;  %5081 = vmatpush.bf16.msrb.mxu0 %v8824_v26 }
 0x3cc   :  { %v3905_v62 = vadd.f32 %v3904_v6, %v3856_v25  ;;  %v4048_v61 = vpop.f32.mrf.mxu3  ;;  %v12153_v41 = vrot.slane %v10930_v10, 6  ;;  %v12154_v49 = vrot.slane %v10895_v7, 6  ;;  %5033 = vmatpush.bf16.msrb.mxu3 %v8815_v51  ;;  %v4250_v53 = vpack.c.bf16 %v4213_v55, %v4213_v55 }
 0x3cd   :  { %12152 = vst [vmem:[#allocation22_spill] sm:$0xff] %v10949_v5  ;;  %v4049_v38 = vadd.f32 %v4048_v61, %v4000_v63  ;;  %v4437_v0 = vpack.c.b16 %v10949_v5, %v10910_v44  ;;  %v8834_v5 = vld [vmem:[#allocation6 + $0x78] sm:$0xff] }
 0x3ce   :  { %v4341_v27 = vsel %vm647_vm4, %v12154_v49, %v12153_v41  ;;  %v3954_v23 = vadd.f32 %v3953_v60, %v3905_v62  ;;  %v8806_v41 = vld [vmem:[#allocation2 + $0x458] sm:$0xff]  ;;  %v4314_v60 = vpack.c.bf16 %v4277_v47, %v4277_v47  ;;  %5214 = vmatpush.bf16.msra.mxu1 %v8834_v5 }
 0x3cf   :  { %v10963_v20 = vmax.f32 %v4049_v38, 0.0  ;;  %4916 = vmatmul.bf16.gmra.mxu0 %v4437_v0  ;;  %v8814_v49 = vld [vmem:[#allocation2 + $0x498] sm:$0xff]  ;;  %v4378_v51 = vpack.c.bf16 %v4341_v27, %v4341_v27  ;;  %4985 = vmatpush.bf16.msrb.mxu2 %v8806_v41 }
 0x3d0   :  { %5034 = vmatpush.bf16.msrb.mxu3 %v8814_v49  ;;  %5082 = vmatpush.bf16.msrb.mxu0 %v8823_v15  ;;  %v10990_v49 = vunpack.c.l.b16 %v4314_v60 }
 0x3d1   :  { %v4203_v25 = vrot.slane %v10963_v20, 2  ;;  %v4267_v7 = vrot.slane %v10963_v20, 4  ;;  %v4188_v61 = vpack.c.bf16 %v10963_v20, %v10963_v20 }
 0x3d2   :  { %v4002_v63 = vpop.f32.mrf.mxu2  ;;  %12158 = vst [vmem:[#allocation25_spill] sm:$0xff] %v10990_v49 }
 0x3d3   :  { %v4003_v26 = vadd.f32 %v4002_v63, %v3954_v23  ;;  %v3906_v55 = vpop.f32.mrf.mxu0  ;;  %v3955_v62 = vpop.f32.mrf.mxu1  ;;  %v10972_v38 = vunpack.c.l.b16 %v4188_v61  ;;  %v4212_v0 = vsel %vm3092_vm12, %v4202_v54, %v4203_v25  ;;  %v4276_v6 = vsel %vm421_vm0, %v4266_v8, %v4267_v7  ;;  %v8822_v23 = vld [vmem:[#allocation2 + $0x4d8] sm:$0xff]  ;;  %4986 = vmatpush.bf16.msrb.mxu2 %v8805_v50 }
 0x3d4   :  { %v3907_v44 = vadd.f32 %v3906_v55, %v3858_v17  ;;  %v4051_v39 = vpop.f32.mrf.mxu3  ;;  %v4251_v22 = vpack.c.bf16 %v4212_v0, %v4212_v0  ;;  %v4315_v47 = vpack.c.bf16 %v4276_v6, %v4276_v6  ;;  %v10978_v63 = vunpack.c.l.b16 %v4250_v53  ;;  %5035 = vmatpush.bf16.msrb.mxu3 %v8813_v34  ;;  %v8812_v55 = vld [vmem:[#allocation2 + $0x488] sm:$0xff]  ;;  %5083 = vmatpush.bf16.msrb.mxu0 %v8822_v23  ;;  %v8821_v34 = vld [vmem:[#allocation2 + $0x4d0] sm:$0xff]  ;;  %v8803_v0 = vld [vmem:[#allocation2 + $0x440] sm:$0xff] }
 0x3d5   :  { %12155 = vst [vmem:[#allocation24_spill] sm:$0xff] %v10972_v38  ;;  %v4052_v27 = vadd.f32 %v4051_v39, %v4003_v26  ;;  %v12156_v61 = vrot.slane %v10963_v20, 6  ;;  %v12157_v54 = vrot.slane %v10930_v10, 6  ;;  %v10996_v53 = vunpack.c.l.b16 %v4378_v51  ;;  %v8804_v10 = vld [vmem:[#allocation2 + $0x448] sm:$0xff] }
 0x3d6   :  { %v10988_v41 = vunpack.c.l.b16 %v4251_v22  ;;  %v10992_v6 = vunpack.c.l.b16 %v4315_v47  ;;  %v3956_v26 = vadd.f32 %v3955_v62, %v3907_v44  ;;  %v3861_v62 = vadd.f32 %v10713_v3, %v10711_v59  ;;  %v8811_v59 = vld [vmem:[#allocation2 + $0x480] sm:$0xff] }
 0x3d7   :  { %v4340_v8 = vsel %vm647_vm4, %v12157_v54, %v12156_v61  ;;  %v10994_v15 = vmax.f32 %v4052_v27, 0.0  ;;  %12160 = vst [vmem:[#allocation27_spill] sm:$0xff] %v10996_v53  ;;  %4987 = vmatpush.bf16.msrb.mxu2 %v8804_v10 }
 0x3d8   :  { %12159 = vst [vmem:[#allocation16_spill] sm:$0xff] %v10992_v6  ;;  %v4379_v39 = vpack.c.bf16 %v4340_v8, %v4340_v8  ;;  %5036 = vmatpush.bf16.msrb.mxu3 %v8812_v55  ;;  %5084 = vmatpush.bf16.msrb.mxu0 %v8821_v34  ;;  %v3863_v34 = vadd.f32 %v10713_v3, %v10716_v12 }
 0x3d9   :  { %v4204_v47 = vrot.slane %v10994_v15, 2  ;;  %v4268_v27 = vrot.slane %v10994_v15, 4  ;;  %v4332_v51 = vrot.slane %v10994_v15, 6  ;;  %v4189_v44 = vpack.c.bf16 %v10994_v15, %v10994_v15 }
 0x3da   :  { %v11002_v60 = vunpack.c.l.b16 %v4379_v39  ;;  %v4004_v50 = vpop.f32.mrf.mxu2 }
 0x3db   :  { %v4005_v54 = vadd.f32 %v4004_v50, %v3956_v26  ;;  %v3909_v8 = vpop.f32.mrf.mxu0  ;;  %v11013_v39 = vunpack.c.l.b16 %v4189_v44  ;;  %v4211_v17 = vsel %vm3092_vm12, %v4203_v25, %v4204_v47  ;;  %v4275_v22 = vsel %vm421_vm0, %v4267_v7, %v4268_v27  ;;  %v3958_v49 = vpop.f32.mrf.mxu1  ;;  %v8820_v44 = vld [vmem:[#allocation2 + $0x4c8] sm:$0xff]  ;;  %4988 = vmatpush.bf16.msrb.mxu2 %v8803_v0 }
 0x3dc   :  { %v3910_v15 = vadd.f32 %v3909_v8, %v3861_v62  ;;  %v4053_v23 = vpop.f32.mrf.mxu3  ;;  %v12162_v50 = vmov %v12156_v61  ;;  %5037 = vmatpush.bf16.msrb.mxu3 %v8811_v59  ;;  %5085 = vmatpush.bf16.msrb.mxu0 %v8820_v44  ;;  %v4252_v20 = vpack.c.bf16 %v4211_v17, %v4211_v17 }
 0x3dd   :  { %12161 = vst [vmem:[#allocation15_spill] sm:$0xff] %v11013_v39  ;;  %v4054_v6 = vadd.f32 %v4053_v23, %v4005_v54  ;;  %v4438_v26 = vpack.c.b16 %v11013_v39, %v10972_v38  ;;  %v4339_v25 = vsel %vm647_vm4, %v12162_v50, %v4332_v51  ;;  %v8819_v23 = vld [vmem:[#allocation2 + $0x4c0] sm:$0xff]  ;;  %v4316_v38 = vpack.c.bf16 %v4275_v22, %v4275_v22 }
 0x3de   :  { %v3959_v10 = vadd.f32 %v3958_v49, %v3910_v15  ;;  %v4380_v53 = vpack.c.bf16 %v4339_v25, %v4339_v25 }
 0x3df   :  { %v4074_v7 = vmax.f32 %v4054_v6, 0.0  ;;  %4921 = vmatmul.bf16.gmra.mxu0 %v4438_v26 }
 0x3e0   :  { %5086 = vmatpush.bf16.msrb.mxu0 %v8819_v23 }
 0x3e1   :  { %v4205_v55 = vrot.slane %v4074_v7, 2  ;;  %v4269_v62 = vrot.slane %v4074_v7, 4  ;;  %v4333_v8 = vrot.slane %v4074_v7, 6  ;;  %v4190_v54 = vpack.c.bf16 %v4074_v7, %v4074_v7 }
 0x3e2   :  { %v4007_v61 = vpop.f32.mrf.mxu2 }
 0x3e3   :  { %v4008_v50 = vadd.f32 %v4007_v61, %v3959_v10  ;;  %v3911_v5 = vpop.f32.mrf.mxu0  ;;  %v11027_v6 = vunpack.c.l.b16 %v4190_v54  ;;  %v4210_v49 = vsel %vm3092_vm12, %v4204_v47, %v4205_v55  ;;  %v4274_v0 = vsel %vm421_vm0, %v4268_v27, %v4269_v62  ;;  %v3960_v7 = vpop.f32.mrf.mxu1 }
 0x3e4   :  { %v3912_v15 = vadd.f32 %v3911_v5, %v3863_v34  ;;  %v4056_v59 = vpop.f32.mrf.mxu3  ;;  %v4253_v26 = vpack.c.bf16 %v4210_v49, %v4210_v49  ;;  %v4317_v44 = vpack.c.bf16 %v4274_v0, %v4274_v0  ;;  %v4338_v3 = vsel %vm647_vm4, %v4332_v51, %v4333_v8 }
 0x3e5   :  { %12163 = vst [vmem:[#allocation28_spill] sm:$0xff] %v11027_v6  ;;  %v4057_v12 = vadd.f32 %v4056_v59, %v4008_v50  ;;  %v4381_v17 = vpack.c.bf16 %v4338_v3, %v4338_v3  ;;  %v11037_v61 = vunpack.c.l.b16 %v4252_v20  ;;  %v11041_v47 = vunpack.c.l.b16 %v4316_v38 }
 0x3e6   :  { %v11039_v25 = vunpack.c.l.b16 %v4253_v26  ;;  %v11043_v27 = vunpack.c.l.b16 %v4317_v44  ;;  %v3961_v34 = vadd.f32 %v3960_v7, %v3912_v15  ;;  %v11051_v50 = vunpack.c.l.b16 %v4380_v53  ;;  %v8833_v7 = vld [vmem:[#allocation6 + $0x70] sm:$0xff] }
 0x3e7   :  { %v4075_v10 = vmax.f32 %v4057_v12, 0.0  ;;  %v11045_v54 = vunpack.c.l.b16 %v4381_v17  ;;  %v4241_v53 = vpack.c.bf16 %v10741_v42, %v10741_v42  ;;  %v4305_v17 = vpack.c.bf16 %v10747_v11, %v10747_v11  ;;  %5215 = vmatpush.bf16.msra.mxu1 %v8833_v7 }
 0x3e8   :  { %12164 = vst [vmem:[#allocation41_spill] sm:$0xff] %v11051_v50 }
 0x3e9   :  { %v4206_v20 = vrot.slane %v4075_v10, 2  ;;  %v4270_v5 = vrot.slane %v4075_v10, 4  ;;  %v4334_v49 = vrot.slane %v4075_v10, 6  ;;  %v4191_v38 = vpack.c.bf16 %v4075_v10, %v4075_v10 }
 0x3ea   :  { %v4009_v0 = vpop.f32.mrf.mxu2  ;;  %v4465_v42 = vunpack.c.l.b16 %v4241_v53  ;;  %v4513_v59 = vunpack.c.l.b16 %v4305_v17  ;;  %v12167_v53 = vrot.slane %v10720_v40, 6 }
 0x3eb   :  { %v4010_v26 = vadd.f32 %v4009_v0, %v3961_v34  ;;  %v11055_v44 = vunpack.c.l.b16 %v4191_v38  ;;  %v4209_v15 = vsel %vm3092_vm12, %v4205_v55, %v4206_v20  ;;  %v4273_v3 = vsel %vm421_vm0, %v4269_v62, %v4270_v5 }
 0x3ec   :  { %v4058_v12 = vpop.f32.mrf.mxu3  ;;  %v4337_v10 = vsel %vm647_vm4, %v4333_v8, %v4334_v49  ;;  %v4369_v55 = vpack.c.bf16 %v10753_v37, %v10753_v37  ;;  %v4254_v62 = vpack.c.bf16 %v4209_v15, %v4209_v15  ;;  %v4318_v0 = vpack.c.bf16 %v4273_v3, %v4273_v3 }
 0x3ed   :  { %v4059_v34 = vadd.f32 %v4058_v12, %v4010_v26  ;;  %v4439_v38 = vpack.c.b16 %v11055_v44, %v11027_v6  ;;  %v4382_v26 = vpack.c.bf16 %v4337_v10, %v4337_v10  ;;  %v12165_v6 = vrot.slane %v10720_v40, 2 }
 0x3ee   :  { %v4561_v39 = vunpack.c.l.b16 %v4369_v55  ;;  %v11071_v50 = vunpack.c.l.b16 %v4254_v62  ;;  %v11073_v8 = vunpack.c.l.b16 %v4318_v0  ;;  %v12166_v15 = vrot.slane %v10720_v40, 4 }
 0x3ef   :  { %v4076_v22 = vmax.f32 %v4059_v34, 0.0  ;;  %4926 = vmatmul.bf16.gmra.mxu0 %v4439_v38 }
 0x3f1   :  { %v4207_v23 = vrot.slane %v4076_v22, 2  ;;  %v4271_v11 = vrot.slane %v4076_v22, 4  ;;  %v4335_v51 = vrot.slane %v4076_v22, 6  ;;  %v4399_v12 = vpack.c.bf16 %v4076_v22, %v4076_v22 }
 0x3f3   :  { %v4223_v37 = vsel %vm3092_vm12, %v4207_v23, %v12165_v6  ;;  %v4287_v3 = vsel %vm421_vm0, %v4271_v11, %v12166_v15  ;;  %v4351_v17 = vsel %vm647_vm4, %v4335_v51, %v12167_v53  ;;  %v4208_v7 = vsel %vm3092_vm12, %v4206_v20, %v4207_v23 }
 0x3f4   :  { %v4224_v22 = vsel %vm3109_vm3, %v4223_v37, 0.0  ;;  %v4288_v10 = vsel %vm438_vm2, %v4287_v3, 0.0  ;;  %v4352_v6 = vsel %vm664_vm6, %v4351_v17, 0.0  ;;  %v4255_v34 = vpack.c.bf16 %v4208_v7, %v4208_v7 }
 0x3f5   :  { %v4240_v38 = vpack.c.bf16 %v4224_v22, %v4224_v22  ;;  %v4304_v55 = vpack.c.bf16 %v4288_v10, %v4288_v10  ;;  %v4368_v62 = vpack.c.bf16 %v4352_v6, %v4352_v6  ;;  %v4272_v40 = vsel %vm421_vm0, %v4270_v5, %v4271_v11 }
 0x3f6   :  { %v11097_v0 = vunpack.c.l.b16 %v4255_v34  ;;  %v4319_v15 = vpack.c.bf16 %v4272_v40, %v4272_v40  ;;  %v4336_v23 = vsel %vm647_vm4, %v4334_v49, %v4335_v51  ;;  %v11101_v20 = vunpack.c.l.b16 %v4399_v12  ;;  %v8832_v12 = vld [vmem:[#allocation6 + $0x68] sm:$0xff] }
 0x3f7   :  { %v4464_v37 = vunpack.c.l.b16 %v4240_v38  ;;  %v4512_v3 = vunpack.c.l.b16 %v4304_v55  ;;  %v4560_v53 = vunpack.c.l.b16 %v4368_v62  ;;  %v4383_v18 = vpack.c.bf16 %v4336_v23, %v4336_v23  ;;  %5216 = vmatpush.bf16.msra.mxu1 %v8832_v12  ;;  %v12192_v38 = vld [vmem:[#allocation32_spill] sm:$0xff]  ;;  %v12196_v40 = vld [vmem:[#allocation25_spill] sm:$0xff] }
 0x3f8   :  { %v4487_v17 = vpack.c.b16 %v11097_v0, %v11071_v50  ;;  %v4527_v7 = vunpack.c.l.b16 %v4319_v15  ;;  %v4574_v22 = vunpack.c.l.b16 %v4382_v26  ;;  %v4631_v5 = vpack.c.b16 %v11101_v20, %v11055_v44  ;;  %v12198_v15 = vld [vmem:[#allocation27_spill] sm:$0xff] }
 0x3f9   :  { %v4480_v11 = vpack.c.b16 %v4465_v42, %v4464_v37  ;;  %v4528_v10 = vpack.c.b16 %v4513_v59, %v4512_v3  ;;  %v4576_v6 = vpack.c.b16 %v4561_v39, %v4560_v53  ;;  %v4575_v34 = vunpack.c.l.b16 %v4383_v18  ;;  %v8831_v59 = vld [vmem:[#allocation6 + $0x60] sm:$0xff]  ;;  %v12201_v3 = vld [vmem:[#allocation22_spill] sm:$0xff] }
 0x3fa   :  { %v4535_v51 = vpack.c.b16 %v4527_v7, %v11073_v8  ;;  %v12168_v50 = vpack.c.b16 %v10735_v19, %v10726_v4  ;;  %v12169_v26 = vpack.c.b16 %v10783_v48, %v10781_v32  ;;  %v12170_v39 = vpack.c.b16 %v10787_v13, %v10785_v36  ;;  %v8830_v48 = vld [vmem:[#allocation6 + $0x58] sm:$0xff]  ;;  %v8827_v20 = vld [vmem:[#allocation6 + $0x40] sm:$0xff] }
 0x3fb   :  { %4940 = vmatmul.bf16.vlgmr.msrb.gmra.mxu1 %v4480_v11  ;;  %4989 = vmatmul.bf16.vlgmr.msrb.gmra.mxu2 %v4528_v10  ;;  %v4583_v49 = vpack.c.b16 %v4575_v34, %v4574_v22  ;;  %v12171_v18 = vpack.c.b16 %v10789_v56, %v10795_v57  ;;  %v12172_v44 = vpack.c.b16 %v10771_v46, %v10759_v24  ;;  %v12179_v56 = vld [vmem:[#allocation33_spill] sm:$0xff]  ;;  %v12191_v8 = vld [vmem:[#allocation19_spill] sm:$0xff]  ;;  %v12200_v37 = vld [vmem:[#allocation24_spill] sm:$0xff] }
 0x3fc   :  { %5038 = vmatmul.bf16.vlgmr.msrb.gmra.mxu3 %v4576_v6  ;;  %5217 = vmatpush.bf16.msra.mxu1 %v8831_v59  ;;  %v12173_v4 = vpack.c.b16 %v10825_v9, %v10823_v31  ;;  %v12174_v19 = vpack.c.b16 %v10829_v29, %v10827_v52  ;;  %v12175_v32 = vpack.c.b16 %v10831_v45, %v10837_v35  ;;  %v4892_v24 = vpop.f32.mrf.mxu0  ;;  %v8829_v31 = vld [vmem:[#allocation6 + $0x50] sm:$0xff]  ;;  %v12207_v10 = vld [vmem:[#allocation28_spill] sm:$0xff]  ;;  %v12208_v6 = vld [vmem:[#allocation15_spill] sm:$0xff] }
 0x3fd   :  { %v12176_v36 = vpack.c.b16 %v10813_v14, %v10801_v43  ;;  %v12177_v46 = vpack.c.b16 %v10867_v33, %v10861_v21  ;;  %v12178_v13 = vpack.c.b16 %v10869_v30, %v10863_v16  ;;  %v12180_v57 = vpack.c.b16 %v10873_v28, %v12179_v56  ;;  %v12181_v9 = vld [vmem:[#allocation18_spill] sm:$0xff]  ;;  %v12185_v21 = vld [vmem:[#allocation35_spill] sm:$0xff]  ;;  %v12186_v45 = vld [vmem:[#allocation37_spill] sm:$0xff] }
 0x3fe   :  { %v12182_v52 = vld [vmem:[#allocation30_spill] sm:$0xff]  ;;  %v12184_v43 = vpack.c.b16 %v10924_v58, %v10922_v2  ;;  %v12187_v35 = vpack.c.b16 %v12185_v21, %v12186_v45  ;;  %v12188_v16 = vld [vmem:[#allocation20_spill] sm:$0xff]  ;;  %v12189_v33 = vld [vmem:[#allocation21_spill] sm:$0xff]  ;;  %v12193_v55 = vpack.c.b16 %v12191_v8, %v12192_v38  ;;  %v12194_v2 = vpack.c.b16 %v10988_v41, %v10978_v63 }
 0x3ff   :  { %5087 = vmatmul.bf16.vlgmr.msrb.gmra.mxu0 %v12168_v50  ;;  %v12183_v29 = vpack.c.b16 %v12181_v9, %v12182_v52  ;;  %v12190_v30 = vpack.c.b16 %v12188_v16, %v12189_v33  ;;  %v8828_v28 = vld [vmem:[#allocation6 + $0x48] sm:$0xff]  ;;  %v12199_v23 = vpack.c.b16 %v11002_v60, %v12198_v15  ;;  %v12202_v53 = vpack.c.b16 %v12200_v37, %v12201_v3  ;;  %v8842_v50 = vld [vmem:[#allocation2 + $0x538] sm:$0xff]  ;;  %v8839_v9 = vld [vmem:[#allocation2 + $0x520] sm:$0xff] }
 0x400   :  { %5218 = vmatpush.bf16.msra.mxu1 %v8830_v48  ;;  %v12195_v58 = vld [vmem:[#allocation16_spill] sm:$0xff]  ;;  %v12203_v63 = vpack.c.b16 %v11039_v25, %v11037_v61  ;;  %v12204_v41 = vpack.c.b16 %v11043_v27, %v11041_v47  ;;  %v12205_v11 = vld [vmem:[#allocation41_spill] sm:$0xff]  ;;  %v12209_v34 = vpack.c.b16 %v12207_v10, %v12208_v6  ;;  %6149 = vmatpush.bf16.msra.mxu2 %v8842_v50  ;;  %v11183_v61 = vld [vmem:[#allocation4 + $0x3] ss:$0 sm:$0xff] }
 0x401   :  { %v12197_v0 = vpack.c.b16 %v12195_v58, %v12196_v40  ;;  %v12206_v60 = vpack.c.b16 %v11045_v54, %v12205_v11  ;;  %v4893_v25 = vadd.f32 %v11183_v61, %v4892_v24  ;;  %v12210_v54 = vld [vmem:[#allocation39_spill] sm:$0xff]  ;;  %v12214_v58 = vld [vmem:[#allocation14_spill] sm:$0xff]  ;;  %v8837_v40 = vld [vmem:[#allocation2 + $0x510] sm:$0xff] }
 0x402   :  { %v12213_v16 = vld [vmem:[#allocation23_spill] sm:$0xff] }
 0x403   :  { %v8856_v10 = vld [vmem:[#allocation2 + $0x5a8] sm:$0xff] }
 0x404   :  { %5219 = vmatpush.bf16.msra.mxu1 %v8829_v31  ;;  %v4894_v14 = vpop.f32.mrf.mxu0  ;;  %v12212_v31 = vld [vmem:[#allocation40_spill] sm:$0xff] }
 0x408   :  { %5220 = vmatpush.bf16.msra.mxu1 %v8828_v28 }
 0x40b   :  { %4945 = vmatmul.bf16.gmra.mxu1 %v12169_v26  ;;  %4994 = vmatmul.bf16.gmra.mxu2 %v12170_v39  ;;  %v8841_v39 = vld [vmem:[#allocation2 + $0x530] sm:$0xff] }
 0x40c   :  { %5043 = vmatmul.bf16.gmra.mxu3 %v12171_v18  ;;  %v4897_v42 = vpop.f32.mrf.mxu0  ;;  %5221 = vmatpush.bf16.msra.mxu1 %v8827_v20  ;;  %v4895_v18 = vadd.f32 %v11183_v61, %v4894_v14 }
 0x40d   :  { %6150 = vmatpush.bf16.msra.mxu2 %v8841_v39  ;;  %v8854_v39 = vld [vmem:[#allocation2 + $0x598] sm:$0xff] }
 0x40f   :  { %5092 = vmatmul.bf16.gmra.mxu0 %v12172_v44 }
 0x414   :  { %v4899_v62 = vpop.f32.mrf.mxu0 }
 0x41b   :  { %4950 = vmatmul.bf16.gmra.mxu1 %v12173_v4  ;;  %4999 = vmatmul.bf16.gmra.mxu2 %v12174_v19  ;;  %v12211_v4 = vld [vmem:[#allocation36_spill] sm:$0xff] }
 0x41c   :  { %5048 = vmatmul.bf16.gmra.mxu3 %v12175_v32  ;;  %v4902_v7 = vpop.f32.mrf.mxu0  ;;  %v8840_v19 = vld [vmem:[#allocation2 + $0x528] sm:$0xff]  ;;  %v4900_v32 = vadd.f32 %v11183_v61, %v4899_v62 }
 0x41d   :  { %6151 = vmatpush.bf16.msra.mxu2 %v8840_v19 }
 0x41f   :  { %5097 = vmatmul.bf16.gmra.mxu0 %v12176_v36 }
 0x421   :  { %6152 = vmatpush.bf16.msra.mxu2 %v8839_v9 }
 0x424   :  { %v4904_v22 = vpop.f32.mrf.mxu0 }
 0x425   :  { %v4905_v52 = vadd.f32 %v11183_v61, %v4904_v22  ;;  %v8858_v22 = vld [vmem:[#allocation2 + $0x5b8] sm:$0xff] }
 0x426   :  { %6247 = vmatpush.bf16.msra.mxu0 %v8858_v22 }
 0x42b   :  { %4955 = vmatmul.bf16.gmra.mxu1 %v12177_v46  ;;  %5004 = vmatmul.bf16.gmra.mxu2 %v12178_v13  ;;  %v4903_v46 = vadd.f32 %v11183_v61, %v4902_v7 }
 0x42c   :  { %5053 = vmatmul.bf16.gmra.mxu3 %v12180_v57  ;;  %v4907_v12 = vpop.f32.mrf.mxu0 }
 0x42d   :  { %v4908_v21 = vadd.f32 %v11183_v61, %v4907_v12  ;;  %v8855_v12 = vld [vmem:[#allocation2 + $0x5a0] sm:$0xff] }
 0x42f   :  { %5102 = vmatmul.bf16.gmra.mxu0 %v12183_v29 }
 0x434   :  { %v4909_v26 = vpop.f32.mrf.mxu0 }
 0x435   :  { %v4910_v28 = vadd.f32 %v11183_v61, %v4909_v26 }
 0x43b   :  { %4960 = vmatmul.bf16.gmra.mxu1 %v12184_v43  ;;  %5009 = vmatmul.bf16.gmra.mxu2 %v12187_v35 }
 0x43c   :  { %5058 = vmatmul.bf16.gmra.mxu3 %v12190_v30  ;;  %v8838_v30 = vld [vmem:[#allocation2 + $0x518] sm:$0xff] }
 0x43d   :  { %6153 = vmatpush.bf16.msra.mxu2 %v8838_v30 }
 0x43f   :  { %5107 = vmatmul.bf16.gmra.mxu0 %v12193_v55 }
 0x441   :  { %6154 = vmatpush.bf16.msra.mxu2 %v8837_v40 }
 0x44b   :  { %4965 = vmatmul.bf16.gmra.mxu1 %v12194_v2  ;;  %5014 = vmatmul.bf16.gmra.mxu2 %v12197_v0 }
 0x44c   :  { %5063 = vmatmul.bf16.gmra.mxu3 %v12199_v23 }
 0x44f   :  { %5112 = vmatmul.bf16.gmra.mxu0 %v12202_v53  ;;  %v12215_v53 = vld [vmem:[#allocation26_spill] sm:$0xff] }
 0x45b   :  { %4970 = vmatmul.bf16.gmra.mxu1 %v12203_v63  ;;  %5019 = vmatmul.bf16.gmra.mxu2 %v12204_v41  ;;  %v8836_v63 = vld [vmem:[#allocation2 + $0x508] sm:$0xff]  ;;  %v8857_v41 = vld [vmem:[#allocation2 + $0x5b0] sm:$0xff] }
 0x45c   :  { %5068 = vmatmul.bf16.gmra.mxu3 %v12206_v60  ;;  %6155 = vmatpush.bf16.msra.mxu2 %v8836_v63 }
 0x45d   :  { %6248 = vmatpush.bf16.msra.mxu0 %v8857_v41 }
 0x45f   :  { %5117 = vmatmul.bf16.gmra.mxu0 %v12209_v34 }
 0x461   :  { %6249 = vmatpush.bf16.msra.mxu0 %v8856_v10 }
 0x465   :  { %6250 = vmatpush.bf16.msra.mxu0 %v8855_v12 }
 0x469   :  { %6251 = vmatpush.bf16.msra.mxu0 %v8854_v39  ;;  %v8873_v39 = vld [vmem:[#allocation2 + $0x630] sm:$0xff] }
 0x46b   :  { %4975 = vmatmul.bf16.gmra.mxu1 %v4487_v17  ;;  %5024 = vmatmul.bf16.gmra.mxu2 %v4535_v51 }
 0x46c   :  { %5073 = vmatmul.bf16.gmra.mxu3 %v4583_v49  ;;  %v4912_v49 = vpop.f32.mrf.mxu0 }
 0x46d   :  { %v4913_v38 = vadd.f32 %v11183_v61, %v4912_v49 }
 0x46f   :  { %5122 = vmatmul.bf16.gmra.mxu0 %v4631_v5  ;;  %v4898_v5 = vadd.f32 %v11183_v61, %v4897_v42 }
 0x474   :  { %v11197_v48 = vpop.f32.mrf.mxu0 }
 0x478   :  { %v4941_v47 = vpop.f32.mrf.mxu1 }
 0x479   :  { %v11186_v27 = vadd.f32 %v4941_v47, %v4893_v25  ;;  %v12216_v47 = vld [vmem:[#allocation29_spill] sm:$0xff] }
 0x47b   :  { %5222 = vmatmul.bf16.vlgmr.msra.gmra.mxu1 %v12210_v54 }
 0x47c   :  { %v4917_v56 = vpop.f32.mrf.mxu0 }
 0x47d   :  { %v4918_v23 = vadd.f32 %v11183_v61, %v4917_v56  ;;  %v8851_v56 = vld [vmem:[#allocation2 + $0x580] sm:$0xff] }
 0x47e   :  { %v4990_v7 = vpop.f32.mrf.mxu2 }
 0x47f   :  { %v5039_v60 = vpop.f32.mrf.mxu3 }
 0x480   :  { %v4943_v17 = vpop.f32.mrf.mxu1 }
 0x481   :  { %v11190_v51 = vadd.f32 %v4943_v17, %v4895_v18 }
 0x484   :  { %v11208_v43 = vpop.f32.mrf.mxu0 }
 0x486   :  { %v4992_v34 = vpop.f32.mrf.mxu2 }
 0x487   :  { %v5041_v54 = vpop.f32.mrf.mxu3  ;;  %v4993_v40 = vadd.f32 %v4992_v34, %v11190_v51 }
 0x488   :  { %v4946_v59 = vpop.f32.mrf.mxu1 }
 0x489   :  { %v11193_v44 = vadd.f32 %v4946_v59, %v4898_v5  ;;  %v8835_v5 = vld [vmem:[#allocation2 + $0x500] sm:$0xff]  ;;  %v8853_v59 = vld [vmem:[#allocation2 + $0x590] sm:$0xff] }
 0x48a   :  { %6156 = vmatpush.bf16.msra.mxu2 %v8835_v5  ;;  %6252 = vmatpush.bf16.msra.mxu0 %v8853_v59  ;;  %v8865_v5 = vld [vmem:[#allocation2 + $0x5f0] sm:$0xff] }
 0x48b   :  { %5227 = vmatmul.bf16.gmra.mxu1 %v12211_v4  ;;  %v12217_v4 = vld [vmem:[#allocation34_spill] sm:$0xff] }
 0x48c   :  { %v4922_v33 = vpop.f32.mrf.mxu0  ;;  %v11241_v19 = vpack.c.b16 %v12217_v4, %v12217_v4 }
 0x48d   :  { %v4923_v50 = vadd.f32 %v11183_v61, %v4922_v33 }
 0x48e   :  { %v4995_v17 = vpop.f32.mrf.mxu2  ;;  %6157 = vmatmul.bf16.vlgmr.msra.gmra.mxu2 %v11241_v19 }
 0x490   :  { %v4948_v36 = vpop.f32.mrf.mxu1 }
 0x491   :  { %v11199_v24 = vadd.f32 %v4948_v36, %v4900_v32  ;;  %v8852_v32 = vld [vmem:[#allocation2 + $0x588] sm:$0xff]  ;;  %v5044_v36 = vpop.f32.mrf.mxu3 }
 0x492   :  { %6253 = vmatpush.bf16.msra.mxu0 %v8852_v32 }
 0x494   :  { %v11218_v55 = vpop.f32.mrf.mxu0 }
 0x496   :  { %6254 = vmatpush.bf16.msra.mxu0 %v8851_v56 }
 0x498   :  { %v4951_v13 = vpop.f32.mrf.mxu1 }
 0x499   :  { %v11202_v57 = vadd.f32 %v4951_v13, %v4903_v46 }
 0x49b   :  { %5232 = vmatmul.bf16.gmra.mxu1 %v12212_v31 }
 0x49c   :  { %v4927_v15 = vpop.f32.mrf.mxu0 }
 0x49d   :  { %v4928_v46 = vadd.f32 %v11183_v61, %v4927_v15  ;;  %v11252_v15 = vld [vmem:[#allocation7 + $0x1] ss:$0 sm:$0xff] }
 0x4a0   :  { %v4953_v29 = vpop.f32.mrf.mxu1 }
 0x4a1   :  { %v11206_v14 = vadd.f32 %v4953_v29, %v4905_v52  ;;  %v4997_v52 = vpop.f32.mrf.mxu2  ;;  %v12218_v29 = vld [vmem:[#allocation31_spill] sm:$0xff] }
 0x4a4   :  { %v11228_v3 = vpop.f32.mrf.mxu0 }
 0x4a8   :  { %v4956_v45 = vpop.f32.mrf.mxu1 }
 0x4a9   :  { %v11211_v35 = vadd.f32 %v4956_v45, %v4908_v21  ;;  %v8850_v21 = vld [vmem:[#allocation2 + $0x578] sm:$0xff]  ;;  %v4991_v45 = vadd.f32 %v4990_v7, %v11186_v27  ;;  %v5042_v27 = vadd.f32 %v5041_v54, %v4993_v40 }
 0x4aa   :  { %6198 = vmatpush.bf16.msra.mxu3 %v8850_v21  ;;  %v8848_v21 = vld [vmem:[#allocation2 + $0x568] sm:$0xff] }
 0x4ab   :  { %5237 = vmatmul.bf16.gmra.mxu1 %v12213_v16  ;;  %v5046_v16 = vpop.f32.mrf.mxu3  ;;  %v5040_v30 = vadd.f32 %v5039_v60, %v4991_v45  ;;  %v4996_v60 = vadd.f32 %v4995_v17, %v11193_v44  ;;  %v4998_v44 = vadd.f32 %v4997_v52, %v11199_v24 }
 0x4ac   :  { %v5088_v6 = vpop.f32.mrf.mxu0 }
 0x4ad   :  { %v5047_v45 = vadd.f32 %v5046_v16, %v4998_v44 }
 0x4b0   :  { %v4958_v42 = vpop.f32.mrf.mxu1 }
 0x4b1   :  { %v11215_v8 = vadd.f32 %v4958_v42, %v4910_v28  ;;  %v8874_v28 = vld [vmem:[#allocation2 + $0x638] sm:$0xff] }
 0x4b2   :  { %v8866_v42 = vld [vmem:[#allocation2 + $0x5f8] sm:$0xff]  ;;  %6345 = vmatpush.bf16.msrb.mxu2 %v8874_v28 }
 0x4b3   :  { %6296 = vmatpush.bf16.msrb.mxu1 %v8866_v42  ;;  %v5049_v22 = vpop.f32.mrf.mxu3 }
 0x4b4   :  { %v5090_v18 = vpop.f32.mrf.mxu0 }
 0x4b5   :  { %v5091_v41 = vadd.f32 %v5090_v18, %v5042_v27 }
 0x4b6   :  { %6346 = vmatpush.bf16.msrb.mxu2 %v8873_v39 }
 0x4b7   :  { %6297 = vmatpush.bf16.msrb.mxu1 %v8865_v5 }
 0x4b8   :  { %v4961_v62 = vpop.f32.mrf.mxu1 }
 0x4b9   :  { %v11220_v2 = vadd.f32 %v4961_v62, %v4913_v38  ;;  %v5000_v62 = vpop.f32.mrf.mxu2 }
 0x4bb   :  { %5242 = vmatmul.bf16.gmra.mxu1 %v12214_v58  ;;  %v5089_v58 = vadd.f32 %v5088_v6, %v5040_v30  ;;  %v5051_v17 = vpop.f32.mrf.mxu3 }
 0x4bc   :  { %v5093_v31 = vpop.f32.mrf.mxu0 }
 0x4c0   :  { %v11223_v0 = vpop.f32.mrf.mxu1 }
 0x4c1   :  { %v5002_v6 = vpop.f32.mrf.mxu2 }
 0x4c3   :  { %v5054_v16 = vpop.f32.mrf.mxu3 }
 0x4c4   :  { %v5095_v38 = vpop.f32.mrf.mxu0 }
 0x4c8   :  { %v4966_v20 = vpop.f32.mrf.mxu1 }
 0x4c9   :  { %v11226_v37 = vadd.f32 %v4966_v20, %v4918_v23  ;;  %v8849_v23 = vld [vmem:[#allocation2 + $0x570] sm:$0xff]  ;;  %v5005_v30 = vpop.f32.mrf.mxu2 }
 0x4ca   :  { %6199 = vmatpush.bf16.msra.mxu3 %v8849_v23  ;;  %v5096_v23 = vadd.f32 %v5095_v38, %v5047_v45 }
 0x4cb   :  { %5247 = vmatmul.bf16.gmra.mxu1 %v12215_v53  ;;  %v5128_v53 = vmax.f32 %v5089_v58, 0.0  ;;  %v5056_v45 = vpop.f32.mrf.mxu3 }
 0x4cc   :  { %v5098_v10 = vpop.f32.mrf.mxu0 }
 0x4ce   :  { %6200 = vmatpush.bf16.msra.mxu3 %v8848_v21 }
 0x4d0   :  { %v11231_v11 = vpop.f32.mrf.mxu1 }
 0x4d8   :  { %v4971_v26 = vpop.f32.mrf.mxu1 }
 0x4d9   :  { %v11234_v25 = vadd.f32 %v4971_v26, %v4923_v50  ;;  %v5129_v50 = vmax.f32 %v5091_v41, 0.0  ;;  %v5045_v26 = vadd.f32 %v5044_v36, %v4996_v60 }
 0x4db   :  { %5252 = vmatmul.bf16.gmra.mxu1 %v12216_v47  ;;  %v5094_v32 = vadd.f32 %v5093_v31, %v5045_v26 }
 0x4dd   :  { %v5130_v42 = vmax.f32 %v5094_v32, 0.0 }
 0x4e0   :  { %v11237_v49 = vpop.f32.mrf.mxu1 }
 0x4e8   :  { %v4976_v13 = vpop.f32.mrf.mxu1 }
 0x4e9   :  { %v11245_v9 = vadd.f32 %v4976_v13, %v4928_v46  ;;  %v5100_v13 = vpop.f32.mrf.mxu0 }
 0x4eb   :  { %5257 = vmatmul.bf16.gmra.mxu1 %v12218_v29 }
 0x4f0   :  { %v11249_v33 = vpop.f32.mrf.mxu1 }
 0x4f8   :  { %v5223_v20 = vpop.f32.mrf.mxu1 }
 0x4f9   :  { %v5224_v7 = vadd.f32 %v11252_v15, %v5223_v20  ;;  %v5001_v20 = vadd.f32 %v5000_v62, %v11202_v57  ;;  %v5007_v57 = vpop.f32.mrf.mxu2 }
 0x4fb   :  { %v5263_v63 = vadd.f32 %v5224_v7, %v5128_v53 }
 0x4fd   :  { %v11256_v12 = vmax.f32 %v5263_v63, 0.0  ;;  %v5131_v63 = vmax.f32 %v5096_v23, 0.0 }
 0x4ff   :  { %v5460_v51 = vpack.c.bf16 %v11256_v12, %v11256_v12  ;;  %v5474_v56 = vrot.slane %v11256_v12, 4 }
 0x500   :  { %v5225_v34 = vpop.f32.mrf.mxu1 }
 0x501   :  { %v5684_v47 = vunpack.c.l.b16 %v5460_v51  ;;  %v5226_v54 = vadd.f32 %v11252_v15, %v5225_v34  ;;  %v5050_v51 = vadd.f32 %v5049_v22, %v5001_v20  ;;  %v5103_v34 = vpop.f32.mrf.mxu0 }
 0x503   :  { %v5794_v59 = vpack.c.b16 %v5684_v47, %v12217_v4  ;;  %v5264_v18 = vadd.f32 %v5226_v54, %v5129_v50  ;;  %v8872_v54 = vld [vmem:[#allocation2 + $0x628] sm:$0xff]  ;;  %v5099_v44 = vadd.f32 %v5098_v10, %v5050_v51 }
 0x504   :  { %6347 = vmatpush.bf16.msrb.mxu2 %v8872_v54 }
 0x505   :  { %v5280_v46 = vmax.f32 %v5264_v18, 0.0  ;;  %6255 = vmatmul.bf16.vlgmr.msra.gmra.mxu0 %v5794_v59  ;;  %v5003_v59 = vadd.f32 %v5002_v6, %v11206_v14 }
 0x507   :  { %v5461_v36 = vpack.c.bf16 %v5280_v46, %v5280_v46  ;;  %v5475_v29 = vrot.slane %v5280_v46, 4  ;;  %v5052_v21 = vadd.f32 %v5051_v17, %v5003_v59  ;;  %v5006_v17 = vadd.f32 %v5005_v30, %v11211_v35  ;;  %v5059_v35 = vpop.f32.mrf.mxu3 }
 0x508   :  { %v5228_v28 = vpop.f32.mrf.mxu1  ;;  %v5008_v59 = vadd.f32 %v5007_v57, %v11215_v8 }
 0x509   :  { %v5504_v58 = vsel %vm421_vm0, %v5474_v56, %v5475_v29  ;;  %v5229_v24 = vadd.f32 %v11252_v15, %v5228_v28  ;;  %v5685_v31 = vunpack.c.l.b16 %v5461_v36  ;;  %v5101_v20 = vadd.f32 %v5100_v13, %v5052_v21  ;;  %v8871_v13 = vld [vmem:[#allocation2 + $0x620] sm:$0xff] }
 0x50a   :  { %v5572_v41 = vpack.c.bf16 %v5504_v58, %v5504_v58  ;;  %v5132_v58 = vmax.f32 %v5099_v44, 0.0  ;;  %v5055_v54 = vadd.f32 %v5054_v16, %v5006_v17  ;;  %6348 = vmatpush.bf16.msrb.mxu2 %v8871_v13 }
 0x50b   :  { %v5265_v52 = vadd.f32 %v5229_v24, %v5130_v42  ;;  %v11269_v40 = vpack.c.b16 %v5685_v31, %v5684_v47  ;;  %v8864_v47 = vld [vmem:[#allocation2 + $0x5e8] sm:$0xff]  ;;  %v8847_v42 = vld [vmem:[#allocation2 + $0x560] sm:$0xff]  ;;  %v5133_v51 = vmax.f32 %v5101_v20, 0.0 }
 0x50c   :  { %6298 = vmatpush.bf16.msrb.mxu1 %v8864_v47  ;;  %v11277_v18 = vunpack.c.l.b16 %v5572_v41  ;;  %6201 = vmatpush.bf16.msra.mxu3 %v8847_v42 }
 0x50d   :  { %v5281_v53 = vmax.f32 %v5265_v52, 0.0  ;;  %6162 = vmatmul.bf16.gmra.mxu2 %v11269_v40 }
 0x50f   :  { %v5462_v27 = vpack.c.bf16 %v5281_v53, %v5281_v53  ;;  %v5476_v7 = vrot.slane %v5281_v53, 4  ;;  %v5010_v53 = vpop.f32.mrf.mxu2 }
 0x510   :  { %v5230_v60 = vpop.f32.mrf.mxu1 }
 0x511   :  { %v5686_v50 = vunpack.c.l.b16 %v5462_v27  ;;  %v5231_v26 = vadd.f32 %v11252_v15, %v5230_v60  ;;  %v5503_v38 = vsel %vm421_vm0, %v5475_v29, %v5476_v7 }
 0x512   :  { %v5573_v62 = vpack.c.bf16 %v5503_v38, %v5503_v38  ;;  %v8863_v38 = vld [vmem:[#allocation2 + $0x5e0] sm:$0xff] }
 0x513   :  { %v5266_v39 = vadd.f32 %v5231_v26, %v5131_v63  ;;  %v5795_v5 = vpack.c.b16 %v5686_v50, %v5685_v31  ;;  %v5105_v31 = vpop.f32.mrf.mxu0  ;;  %6299 = vmatpush.bf16.msrb.mxu1 %v8863_v38 }
 0x514   :  { %v11279_v22 = vunpack.c.l.b16 %v5573_v62 }
 0x515   :  { %v5282_v32 = vmax.f32 %v5266_v39, 0.0  ;;  %6260 = vmatmul.bf16.gmra.mxu0 %v5795_v5 }
 0x516   :  { %v5747_v46 = vpack.c.b16 %v11279_v22, %v11277_v18 }
 0x517   :  { %v5463_v36 = vpack.c.bf16 %v5282_v32, %v5282_v32  ;;  %v5477_v29 = vrot.slane %v5282_v32, 4  ;;  %v5104_v32 = vadd.f32 %v5103_v34, %v5055_v54  ;;  %v5012_v21 = vpop.f32.mrf.mxu2 }
 0x518   :  { %v5233_v28 = vpop.f32.mrf.mxu1 }
 0x519   :  { %v5234_v24 = vadd.f32 %v11252_v15, %v5233_v28  ;;  %v5687_v14 = vunpack.c.l.b16 %v5463_v36  ;;  %v5502_v6 = vsel %vm421_vm0, %v5476_v7, %v5477_v29 }
 0x51a   :  { %v5574_v10 = vpack.c.bf16 %v5502_v6, %v5502_v6 }
 0x51b   :  { %v5267_v52 = vadd.f32 %v5234_v24, %v5132_v58  ;;  %v11286_v23 = vpack.c.b16 %v5687_v14, %v5686_v50  ;;  %v5108_v16 = vpop.f32.mrf.mxu0  ;;  %v8846_v58 = vld [vmem:[#allocation2 + $0x558] sm:$0xff]  ;;  %v5057_v24 = vadd.f32 %v5056_v45, %v5008_v59 }
 0x51c   :  { %v11288_v27 = vunpack.c.l.b16 %v5574_v10  ;;  %6202 = vmatpush.bf16.msra.mxu3 %v8846_v58 }
 0x51d   :  { %v5283_v63 = vmax.f32 %v5267_v52, 0.0  ;;  %6167 = vmatmul.bf16.gmra.mxu2 %v11286_v23  ;;  %v5106_v17 = vadd.f32 %v5105_v31, %v5057_v24 }
 0x51e   :  { %v5843_v41 = vpack.c.b16 %v11288_v27, %v11279_v22 }
 0x51f   :  { %v5464_v60 = vpack.c.bf16 %v5283_v63, %v5283_v63  ;;  %v5478_v7 = vrot.slane %v5283_v63, 4  ;;  %v5061_v63 = vpop.f32.mrf.mxu3  ;;  %v5015_v38 = vpop.f32.mrf.mxu2 }
 0x520   :  { %v5235_v26 = vpop.f32.mrf.mxu1 }
 0x521   :  { %v5688_v47 = vunpack.c.l.b16 %v5464_v60  ;;  %v5236_v50 = vadd.f32 %v11252_v15, %v5235_v26  ;;  %v5501_v62 = vsel %vm421_vm0, %v5477_v29, %v5478_v7 }
 0x522   :  { %v5575_v30 = vpack.c.bf16 %v5501_v62, %v5501_v62 }
 0x523   :  { %v5268_v39 = vadd.f32 %v5236_v50, %v5133_v51  ;;  %v5796_v5 = vpack.c.b16 %v5688_v47, %v5687_v14  ;;  %v5134_v14 = vmax.f32 %v5104_v32, 0.0  ;;  %v5011_v51 = vadd.f32 %v5010_v53, %v11220_v2  ;;  %v5110_v54 = vpop.f32.mrf.mxu0  ;;  %v8870_v2 = vld [vmem:[#allocation2 + $0x618] sm:$0xff] }
 0x524   :  { %v11298_v44 = vunpack.c.l.b16 %v5575_v30  ;;  %v8862_v53 = vld [vmem:[#allocation2 + $0x5d8] sm:$0xff]  ;;  %6349 = vmatpush.bf16.msrb.mxu2 %v8870_v2 }
 0x525   :  { %v5284_v36 = vmax.f32 %v5268_v39, 0.0  ;;  %6265 = vmatmul.bf16.gmra.mxu0 %v5796_v5  ;;  %v5060_v62 = vadd.f32 %v5059_v35, %v5011_v51  ;;  %6300 = vmatpush.bf16.msrb.mxu1 %v8862_v53 }
 0x526   :  { %v5748_v28 = vpack.c.b16 %v11298_v44, %v11288_v27 }
 0x527   :  { %v5465_v42 = vpack.c.bf16 %v5284_v36, %v5284_v36  ;;  %v5479_v29 = vrot.slane %v5284_v36, 4  ;;  %v5109_v58 = vadd.f32 %v5108_v16, %v5060_v62  ;;  %v5017_v16 = vpop.f32.mrf.mxu2 }
 0x528   :  { %v5238_v6 = vpop.f32.mrf.mxu1 }
 0x529   :  { %v5239_v10 = vadd.f32 %v11252_v15, %v5238_v6  ;;  %v5689_v52 = vunpack.c.l.b16 %v5465_v42  ;;  %v5500_v8 = vsel %vm421_vm0, %v5478_v7, %v5479_v29  ;;  %v4915_v7 = vadd.f32 %v11183_v61, %v11197_v48  ;;  %v5064_v6 = vpop.f32.mrf.mxu3 }
 0x52a   :  { %v5576_v34 = vpack.c.bf16 %v5500_v8, %v5500_v8  ;;  %v8845_v8 = vld [vmem:[#allocation2 + $0x550] sm:$0xff] }
 0x52b   :  { %v5269_v57 = vadd.f32 %v5239_v10, %v5134_v14  ;;  %v11305_v20 = vpack.c.b16 %v5689_v52, %v5688_v47  ;;  %v5135_v47 = vmax.f32 %v5106_v17, 0.0  ;;  %v4964_v32 = vadd.f32 %v11223_v0, %v4915_v7  ;;  %v5113_v51 = vpop.f32.mrf.mxu0  ;;  %6203 = vmatpush.bf16.msra.mxu3 %v8845_v8 }
 0x52c   :  { %v11307_v60 = vunpack.c.l.b16 %v5576_v34 }
 0x52d   :  { %v5285_v45 = vmax.f32 %v5269_v57, 0.0  ;;  %6172 = vmatmul.bf16.gmra.mxu2 %v11305_v20  ;;  %v5013_v24 = vadd.f32 %v5012_v21, %v4964_v32 }
 0x52e   :  { %v5844_v26 = vpack.c.b16 %v11307_v60, %v11298_v44 }
 0x52f   :  { %v5480_v50 = vrot.slane %v5285_v45, 4  ;;  %v5609_v13 = vpack.c.bf16 %v5285_v45, %v5285_v45  ;;  %v5062_v17 = vadd.f32 %v5061_v63, %v5013_v24 }
 0x530   :  { %v5240_v31 = vpop.f32.mrf.mxu1 }
 0x531   :  { %v5785_v30 = vunpack.c.l.b16 %v5609_v13  ;;  %v5241_v39 = vadd.f32 %v11252_v15, %v5240_v31  ;;  %v5499_v5 = vsel %vm421_vm0, %v5479_v29, %v5480_v50  ;;  %v5016_v31 = vadd.f32 %v5015_v38, %v11226_v37 }
 0x532   :  { %v5577_v59 = vpack.c.bf16 %v5499_v5, %v5499_v5 }
 0x533   :  { %v5270_v36 = vadd.f32 %v5241_v39, %v5135_v47  ;;  %v5797_v42 = vpack.c.b16 %v5785_v30, %v5689_v52  ;;  %v5136_v52 = vmax.f32 %v5109_v58, 0.0  ;;  %v5111_v39 = vadd.f32 %v5110_v54, %v5062_v17  ;;  %v8861_v58 = vld [vmem:[#allocation2 + $0x5d0] sm:$0xff] }
 0x534   :  { %v11319_v48 = vunpack.c.l.b16 %v5577_v59  ;;  %v5065_v32 = vadd.f32 %v5064_v6, %v5016_v31  ;;  %6301 = vmatpush.bf16.msrb.mxu1 %v8861_v58  ;;  %v5020_v6 = vpop.f32.mrf.mxu2 }
 0x535   :  { %v5286_v35 = vmax.f32 %v5270_v36, 0.0  ;;  %6270 = vmatmul.bf16.gmra.mxu0 %v5797_v42  ;;  %v5066_v36 = vpop.f32.mrf.mxu3  ;;  %v5137_v37 = vmax.f32 %v5111_v39, 0.0 }
 0x536   :  { %v5749_v14 = vpack.c.b16 %v11319_v48, %v11307_v60 }
 0x537   :  { %v5302_v29 = vsel %vm10396_vm13, %v5286_v35, 0.0 }
 0x538   :  { %v5481_v34 = vrot.slane %v5302_v29, 4  ;;  %v5243_v0 = vpop.f32.mrf.mxu1  ;;  %v5657_v57 = vpack.c.bf16 %v5302_v29, %v5302_v29  ;;  %v5115_v29 = vpop.f32.mrf.mxu0 }
 0x539   :  { %v5244_v45 = vadd.f32 %v11252_v15, %v5243_v0 }
 0x53a   :  { %v5881_v21 = vunpack.c.l.b16 %v5657_v57  ;;  %v5498_v13 = vsel %vm421_vm0, %v5480_v50, %v5481_v34  ;;  %v4920_v50 = vadd.f32 %v11183_v61, %v11208_v43  ;;  %v5114_v43 = vadd.f32 %v5113_v51, %v5065_v32 }
 0x53b   :  { %v5271_v7 = vadd.f32 %v5244_v45, %v5136_v52  ;;  %v5641_v47 = vpack.c.bf16 %v5498_v13, %v5498_v13  ;;  %v8844_v13 = vld [vmem:[#allocation2 + $0x548] sm:$0xff] }
 0x53c   :  { %v11329_v62 = vpack.c.b16 %v5881_v21, %v5785_v30  ;;  %v8869_v30 = vld [vmem:[#allocation2 + $0x610] sm:$0xff]  ;;  %v4969_v35 = vadd.f32 %v11231_v11, %v4920_v50  ;;  %6204 = vmatpush.bf16.msra.mxu3 %v8844_v13 }
 0x53d   :  { %v5287_v2 = vmax.f32 %v5271_v7, 0.0  ;;  %6177 = vmatmul.bf16.gmra.mxu2 %v11241_v19  ;;  %v11332_v63 = vunpack.c.l.b16 %v5641_v47  ;;  %v5138_v7 = vmax.f32 %v5114_v43, 0.0 }
 0x53e   :  { %6350 = vmatpush.bf16.msrb.mxu2 %v8869_v30  ;;  %v5018_v57 = vadd.f32 %v5017_v16, %v4969_v35  ;;  %v5069_v16 = vpop.f32.mrf.mxu3  ;;  %v5022_v35 = vpop.f32.mrf.mxu2 }
 0x53f   :  { %v5468_v53 = vpack.c.bf16 %v5287_v2, %v5287_v2  ;;  %v5482_v5 = vrot.slane %v5287_v2, 4  ;;  %v5845_v59 = vpack.c.b16 %v11332_v63, %v11319_v48  ;;  %v8882_v63 = vld [vmem:[#allocation2 + $0x678] sm:$0xff] }
 0x540   :  { %v5245_v42 = vpop.f32.mrf.mxu1  ;;  %v5067_v31 = vadd.f32 %v5066_v36, %v5018_v57  ;;  %v5118_v36 = vpop.f32.mrf.mxu0 }
 0x541   :  { %v5692_v38 = vunpack.c.l.b16 %v5468_v53  ;;  %v5246_v54 = vadd.f32 %v11252_v15, %v5245_v42  ;;  %v11341_v24 = vsel %vm421_vm0, %v5481_v34, %v5482_v5  ;;  %v5021_v42 = vadd.f32 %v5020_v6, %v11234_v25 }
 0x542   :  { %v5626_v45 = vsel %vm446_vm1, %v11341_v24, 0.0  ;;  %v5116_v30 = vadd.f32 %v5115_v29, %v5067_v31  ;;  %v8868_v29 = vld [vmem:[#allocation2 + $0x608] sm:$0xff] }
 0x543   :  { %v5272_v8 = vadd.f32 %v5246_v54, %v5137_v37  ;;  %v5798_v0 = vpack.c.b16 %v5692_v38, %v12217_v4  ;;  %v5642_v47 = vpack.c.bf16 %v5626_v45, %v5626_v45  ;;  %v5070_v43 = vadd.f32 %v5069_v16, %v5021_v42  ;;  %v8860_v45 = vld [vmem:[#allocation2 + $0x5c8] sm:$0xff]  ;;  %6351 = vmatpush.bf16.msrb.mxu2 %v8868_v29 }
 0x544   :  { %v5139_v6 = vmax.f32 %v5116_v30, 0.0  ;;  %6302 = vmatpush.bf16.msrb.mxu1 %v8860_v45 }
 0x545   :  { %v5288_v52 = vmax.f32 %v5272_v8, 0.0  ;;  %6275 = vmatmul.bf16.gmra.mxu0 %v5798_v0  ;;  %v11356_v54 = vunpack.c.l.b16 %v5642_v47  ;;  %v5119_v31 = vadd.f32 %v5118_v36, %v5070_v43 }
 0x547   :  { %v5469_v21 = vpack.c.bf16 %v5288_v52, %v5288_v52  ;;  %v5483_v34 = vrot.slane %v5288_v52, 4  ;;  %v5140_v30 = vmax.f32 %v5119_v31, 0.0 }
 0x548   :  { %v5248_v11 = vpop.f32.mrf.mxu1 }
 0x549   :  { %v5249_v39 = vadd.f32 %v11252_v15, %v5248_v11  ;;  %v5693_v2 = vunpack.c.l.b16 %v5469_v21  ;;  %v5496_v51 = vsel %vm421_vm0, %v5482_v5, %v5483_v34 }
 0x54a   :  { %v5580_v53 = vpack.c.bf16 %v5496_v51, %v5496_v51 }
 0x54b   :  { %v5273_v50 = vadd.f32 %v5249_v39, %v5138_v7  ;;  %v11351_v32 = vpack.c.b16 %v5693_v2, %v5692_v38  ;;  %v4925_v38 = vadd.f32 %v11183_v61, %v11218_v55  ;;  %v5071_v55 = vpop.f32.mrf.mxu3 }
 0x54c   :  { %v11354_v37 = vunpack.c.l.b16 %v5580_v53 }
 0x54d   :  { %v5289_v58 = vmax.f32 %v5273_v50, 0.0  ;;  %6182 = vmatmul.bf16.gmra.mxu2 %v11351_v32  ;;  %v4974_v7 = vadd.f32 %v11237_v49, %v4925_v38  ;;  %v5120_v50 = vpop.f32.mrf.mxu0 }
 0x54e   :  { %v5846_v5 = vpack.c.b16 %v11354_v37, %v11356_v54  ;;  %v8880_v54 = vld [vmem:[#allocation2 + $0x668] sm:$0xff] }
 0x54f   :  { %v5470_v8 = vpack.c.bf16 %v5289_v58, %v5289_v58  ;;  %v5484_v0 = vrot.slane %v5289_v58, 4  ;;  %v5023_v51 = vadd.f32 %v5022_v35, %v4974_v7  ;;  %v5025_v58 = vpop.f32.mrf.mxu2  ;;  %v8867_v7 = vld [vmem:[#allocation2 + $0x600] sm:$0xff] }
 0x550   :  { %v5250_v25 = vpop.f32.mrf.mxu1  ;;  %6352 = vmatpush.bf16.msrb.mxu2 %v8867_v7 }
 0x551   :  { %v5694_v57 = vunpack.c.l.b16 %v5470_v8  ;;  %v5251_v52 = vadd.f32 %v11252_v15, %v5250_v25  ;;  %v5495_v21 = vsel %vm421_vm0, %v5483_v34, %v5484_v0  ;;  %v5072_v8 = vadd.f32 %v5071_v55, %v5023_v51 }
 0x552   :  { %v5581_v13 = vpack.c.bf16 %v5495_v21, %v5495_v21 }
 0x553   :  { %v5274_v11 = vadd.f32 %v5251_v52, %v5139_v6  ;;  %v5799_v47 = vpack.c.b16 %v5694_v57, %v5693_v2  ;;  %v5026_v6 = vadd.f32 %v5025_v58, %v11245_v9  ;;  %v5121_v29 = vadd.f32 %v5120_v50, %v5072_v8  ;;  %v5074_v21 = vpop.f32.mrf.mxu3 }
 0x554   :  { %v11367_v39 = vunpack.c.l.b16 %v5581_v13  ;;  %v8843_v13 = vld [vmem:[#allocation2 + $0x540] sm:$0xff] }
 0x555   :  { %v5290_v16 = vmax.f32 %v5274_v11, 0.0  ;;  %6280 = vmatmul.bf16.gmra.mxu0 %v5799_v47  ;;  %v8859_v11 = vld [vmem:[#allocation2 + $0x5c0] sm:$0xff]  ;;  %v5075_v55 = vadd.f32 %v5074_v21, %v5026_v6  ;;  %6205 = vmatpush.bf16.msra.mxu3 %v8843_v13  ;;  %v5141_v51 = vmax.f32 %v5121_v29, 0.0 }
 0x556   :  { %v5751_v53 = vpack.c.b16 %v11367_v39, %v11354_v37  ;;  %6303 = vmatpush.bf16.msrb.mxu1 %v8859_v11  ;;  %v8878_v37 = vld [vmem:[#allocation2 + $0x658] sm:$0xff] }
 0x557   :  { %v5471_v42 = vpack.c.bf16 %v5290_v16, %v5290_v16  ;;  %v5485_v34 = vrot.slane %v5290_v16, 4  ;;  %v5027_v58 = vpop.f32.mrf.mxu2 }
 0x558   :  { %v5253_v49 = vpop.f32.mrf.mxu1 }
 0x559   :  { %v5254_v2 = vadd.f32 %v11252_v15, %v5253_v49  ;;  %v5695_v38 = vunpack.c.l.b16 %v5471_v42  ;;  %v5494_v36 = vsel %vm421_vm0, %v5484_v0, %v5485_v34  ;;  %7152 = vmatpush.bf16.msrb.mxu3 %v8882_v63 }
 0x55a   :  { %v5582_v43 = vpack.c.bf16 %v5494_v36, %v5494_v36 }
 0x55b   :  { %v5275_v35 = vadd.f32 %v5254_v2, %v5140_v30  ;;  %v11374_v25 = vpack.c.b16 %v5695_v38, %v5694_v57  ;;  %v4930_v57 = vadd.f32 %v11183_v61, %v11228_v3  ;;  %v5123_v30 = vpop.f32.mrf.mxu0 }
 0x55c   :  { %v11377_v52 = vunpack.c.l.b16 %v5582_v43  ;;  %v5124_v61 = vadd.f32 %v5123_v30, %v5075_v55 }
 0x55d   :  { %v5291_v45 = vmax.f32 %v5275_v35, 0.0  ;;  %6187 = vmatmul.bf16.gmra.mxu2 %v11374_v25  ;;  %v4979_v8 = vadd.f32 %v11249_v33, %v4930_v57 }
 0x55e   :  { %v5847_v47 = vpack.c.b16 %v11377_v52, %v11367_v39  ;;  %v5142_v21 = vmax.f32 %v5124_v61, 0.0  ;;  %v8877_v39 = vld [vmem:[#allocation2 + $0x650] sm:$0xff] }
 0x55f   :  { %v5472_v0 = vpack.c.bf16 %v5291_v45, %v5291_v45  ;;  %v5486_v31 = vrot.slane %v5291_v45, 4  ;;  %v5028_v43 = vadd.f32 %v5027_v58, %v4979_v8  ;;  %v85_v8 = vadd.s32 8, %v9118_v1 }
 0x560   :  { %v5255_v9 = vpop.f32.mrf.mxu1 }
 0x561   :  { %v5696_v16 = vunpack.c.l.b16 %v5472_v0  ;;  %v5256_v50 = vadd.f32 %v11252_v15, %v5255_v9  ;;  %v5493_v42 = vsel %vm421_vm0, %v5485_v34, %v5486_v31  ;;  %v5076_v34 = vpop.f32.mrf.mxu3 }
 0x562   :  { %v5583_v49 = vpack.c.bf16 %v5493_v42, %v5493_v42  ;;  %v5077_v7 = vadd.f32 %v5076_v34, %v5028_v43 }
 0x563   :  { %v5276_v2 = vadd.f32 %v5256_v50, %v5141_v51  ;;  %v5800_v36 = vpack.c.b16 %v5696_v16, %v5695_v38  ;;  %v5125_v9 = vpop.f32.mrf.mxu0 }
 0x564   :  { %v11388_v3 = vunpack.c.l.b16 %v5583_v49  ;;  %v5126_v50 = vadd.f32 %v5125_v9, %v5077_v7 }
 0x565   :  { %v5292_v35 = vmax.f32 %v5276_v2, 0.0  ;;  %6285 = vmatmul.bf16.gmra.mxu0 %v5800_v36 }
 0x566   :  { %v5752_v6 = vpack.c.b16 %v11388_v3, %v11377_v52  ;;  %v8893_v52 = vld [vmem:[#allocation2 + $0x6d0] sm:$0xff] }
 0x567   :  { %v5473_v29 = vpack.c.bf16 %v5292_v35, %v5292_v35  ;;  %v5487_v45 = vrot.slane %v5292_v35, 4 }
 0x568   :  { %v5258_v13 = vpop.f32.mrf.mxu1 }
 0x569   :  { %v5259_v11 = vadd.f32 %v11252_v15, %v5258_v13  ;;  %v5697_v33 = vunpack.c.l.b16 %v5473_v29  ;;  %v5492_v38 = vsel %vm421_vm0, %v5486_v31, %v5487_v45  ;;  %v5143_v31 = vmax.f32 %v5126_v50, 0.0 }
 0x56a   :  { %v5584_v0 = vpack.c.bf16 %v5492_v38, %v5492_v38 }
 0x56b   :  { %v5277_v57 = vadd.f32 %v5259_v11, %v5142_v21  ;;  %v11395_v55 = vpack.c.b16 %v5697_v33, %v5696_v16  ;;  %v111_v21 = vand.u32 63, %v85_v8 }
 0x56c   :  { %v11397_v51 = vunpack.c.l.b16 %v5584_v0 }
 0x56d   :  { %v5293_v42 = vmax.f32 %v5277_v57, 0.0  ;;  %6192 = vmatmul.bf16.gmra.mxu2 %v11395_v55  ;;  %vm11412_vm4 = vcmp.ge.s32.totalorder %v111_v21, 12 }
 0x56e   :  { %v5848_v30 = vpack.c.b16 %v11397_v51, %v11388_v3 }
 0x56f   :  { %v5488_v58 = vrot.slane %v5293_v42, 4  ;;  %v5617_v49 = vpack.c.bf16 %v5293_v42, %v5293_v42  ;;  %v8920_v42 = vld [vmem:[#allocation6 + $0xa8] sm:$0xff] }
 0x570   :  { %v5260_v2 = vpop.f32.mrf.mxu1 }
 0x571   :  { %v5793_v36 = vunpack.c.l.b16 %v5617_v49  ;;  %v5261_v16 = vadd.f32 %v11252_v15, %v5260_v2  ;;  %v5491_v61 = vsel %vm421_vm0, %v5487_v45, %v5488_v58 }
 0x572   :  { %v5585_v43 = vpack.c.bf16 %v5491_v61, %v5491_v61 }
 0x573   :  { %v5278_v35 = vadd.f32 %v5261_v16, %v5143_v31  ;;  %v5801_v29 = vpack.c.b16 %v5793_v36, %v5697_v33  ;;  %v11426_v16 = vpop.f32.mrf.mxu2 }
 0x574   :  { %v11406_v34 = vunpack.c.l.b16 %v5585_v43 }
 0x575   :  { %v5294_v13 = vmax.f32 %v5278_v35, 0.0  ;;  %6290 = vmatmul.bf16.gmra.mxu0 %v5801_v29 }
 0x576   :  { %v5753_v7 = vpack.c.b16 %v11406_v34, %v11397_v51 }
 0x577   :  { %v5310_v38 = vsel %vm10572_vm15, %v5294_v13, 0.0 }
 0x578   :  { %v5489_v0 = vrot.slane %v5310_v38, 4  ;;  %v5665_v45 = vpack.c.bf16 %v5310_v38, %v5310_v38 }
 0x57a   :  { %v5505_v33 = vsel %vm421_vm0, %v5489_v0, %v5474_v56  ;;  %v5889_v57 = vunpack.c.l.b16 %v5665_v45  ;;  %v5490_v9 = vsel %vm421_vm0, %v5488_v58, %v5489_v0  ;;  %v8898_v45 = vld [vmem:[#allocation2 + $0x6f8] sm:$0xff] }
 0x57b   :  { %v5555_v50 = vsel %vm11412_vm4, %v5505_v33, 0.0  ;;  %v5618_v49 = vsel %vm438_vm2, %v5505_v33, 0.0  ;;  %v5649_v8 = vpack.c.bf16 %v5490_v9, %v5490_v9  ;;  %v11437_v21 = vpop.f32.mrf.mxu2  ;;  %7250 = vmatpush.bf16.msra.mxu1 %v8898_v45  ;;  %v8879_v33 = vld [vmem:[#allocation2 + $0x660] sm:$0xff] }
 0x57c   :  { %v5571_v2 = vpack.c.bf16 %v5555_v50, %v5555_v50  ;;  %v5634_v31 = vpack.c.bf16 %v5618_v49, %v5618_v49  ;;  %v11428_v61 = vpack.c.b16 %v5889_v57, %v5793_v36  ;;  %v8897_v57 = vld [vmem:[#allocation2 + $0x6f0] sm:$0xff] }
 0x57d   :  { %6353 = vmatmul.bf16.vlgmr.msrb.gmra.mxu2 %v11269_v40  ;;  %v11431_v12 = vunpack.c.l.b16 %v5649_v8  ;;  %v8876_v8 = vld [vmem:[#allocation2 + $0x648] sm:$0xff] }
 0x57e   :  { %v5731_v56 = vunpack.c.l.b16 %v5571_v2  ;;  %v5826_v43 = vunpack.c.l.b16 %v5634_v31  ;;  %v8894_v2 = vld [vmem:[#allocation2 + $0x6d8] sm:$0xff] }
 0x57f   :  { %v5849_v58 = vpack.c.b16 %v11431_v12, %v11406_v34  ;;  %7251 = vmatpush.bf16.msra.mxu1 %v8897_v57 }
 0x580   :  { %v5746_v35 = vpack.c.b16 %v5731_v56, %v12217_v4  ;;  %v5842_v29 = vpack.c.b16 %v11277_v18, %v5826_v43  ;;  %v8875_v56 = vld [vmem:[#allocation2 + $0x640] sm:$0xff]  ;;  %v8890_v43 = vld [vmem:[#allocation2 + $0x6b8] sm:$0xff] }
 0x581   :  { %7201 = vmatpush.bf16.msrb.mxu0 %v8890_v43 }
 0x582   :  { %6206 = vmatmul.bf16.vlgmr.msra.gmra.mxu3 %v5746_v35  ;;  %6304 = vmatmul.bf16.vlgmr.msrb.gmra.mxu1 %v5842_v29  ;;  %v6256_v49 = vpop.f32.mrf.mxu0  ;;  %v8891_v35 = vld [vmem:[#allocation2 + $0x6c0] sm:$0xff] }
 0x58a   :  { %v6258_v3 = vpop.f32.mrf.mxu0 }
 0x58d   :  { %6358 = vmatmul.bf16.gmra.mxu2 %v11286_v23 }
 0x590   :  { %v11440_v36 = vpop.f32.mrf.mxu2 }
 0x592   :  { %6211 = vmatmul.bf16.gmra.mxu3 %v5747_v46  ;;  %6309 = vmatmul.bf16.gmra.mxu1 %v5843_v41  ;;  %v93_v46 = vadd.s32 72, %v9118_v1  ;;  %v6261_v29 = vpop.f32.mrf.mxu0 }
 0x594   :  { %v167_v22 = vand.u32 63, %v93_v46 }
 0x596   :  { %vm11471_vm5 = vcmp.ge.s32.totalorder %v167_v22, 12  ;;  %v11522_v22 = vld [vmem:[#allocation4 + $0x4] ss:$0 sm:$0xff] }
 0x597   :  { %v5563_v44 = vsel %vm11471_vm5, %v11341_v24, 0.0  ;;  %v8881_v24 = vld [vmem:[#allocation2 + $0x670] sm:$0xff]  ;;  %v6159_v34 = vadd.f32 %v11522_v22, %v11426_v16 }
 0x598   :  { %v11448_v13 = vpop.f32.mrf.mxu2  ;;  %7153 = vmatpush.bf16.msrb.mxu3 %v8881_v24  ;;  %v6161_v24 = vadd.f32 %v11522_v22, %v11437_v21 }
 0x59c   :  { %7154 = vmatpush.bf16.msrb.mxu3 %v8880_v54 }
 0x59d   :  { %6363 = vmatmul.bf16.gmra.mxu2 %v11305_v20 }
 0x5a0   :  { %v11451_v38 = vpop.f32.mrf.mxu2  ;;  %7155 = vmatpush.bf16.msrb.mxu3 %v8879_v33 }
 0x5a2   :  { %6216 = vmatmul.bf16.gmra.mxu3 %v5748_v28  ;;  %6314 = vmatmul.bf16.gmra.mxu1 %v5844_v26  ;;  %v5579_v26 = vpack.c.bf16 %v5563_v44, %v5563_v44 }
 0x5a4   :  { %v5739_v0 = vunpack.c.l.b16 %v5579_v26  ;;  %7156 = vmatpush.bf16.msrb.mxu3 %v8878_v37 }
 0x5a8   :  { %v11459_v18 = vpop.f32.mrf.mxu2  ;;  %7157 = vmatpush.bf16.msrb.mxu3 %v8877_v39 }
 0x5ac   :  { %7158 = vmatpush.bf16.msrb.mxu3 %v8876_v8 }
 0x5ad   :  { %6368 = vmatmul.bf16.gmra.mxu2 %v11329_v62 }
 0x5b0   :  { %v11463_v41 = vpop.f32.mrf.mxu2  ;;  %7159 = vmatpush.bf16.msrb.mxu3 %v8875_v56 }
 0x5b2   :  { %6221 = vmatmul.bf16.gmra.mxu3 %v5749_v14  ;;  %6319 = vmatmul.bf16.gmra.mxu1 %v5845_v59  ;;  %v5750_v14 = vpack.c.b16 %v5739_v0, %v12217_v4 }
 0x5b8   :  { %v11478_v28 = vpop.f32.mrf.mxu2 }
 0x5bd   :  { %6373 = vmatmul.bf16.gmra.mxu2 %v11351_v32 }
 0x5c0   :  { %v11481_v60 = vpop.f32.mrf.mxu2 }
 0x5c2   :  { %6226 = vmatmul.bf16.gmra.mxu3 %v5750_v14  ;;  %6324 = vmatmul.bf16.gmra.mxu1 %v5846_v5  ;;  %v8889_v14 = vld [vmem:[#allocation2 + $0x6b0] sm:$0xff] }
 0x5c3   :  { %7202 = vmatpush.bf16.msrb.mxu0 %v8889_v14  ;;  %v6166_v14 = vadd.f32 %v11522_v22, %v11448_v13 }
 0x5c8   :  { %v11487_v48 = vpop.f32.mrf.mxu2 }
 0x5cd   :  { %6378 = vmatmul.bf16.gmra.mxu2 %v11374_v25 }
 0x5d0   :  { %v11490_v59 = vpop.f32.mrf.mxu2 }
 0x5d2   :  { %6231 = vmatmul.bf16.gmra.mxu3 %v5751_v53  ;;  %6329 = vmatmul.bf16.gmra.mxu1 %v5847_v47  ;;  %v8896_v53 = vld [vmem:[#allocation2 + $0x6e8] sm:$0xff]  ;;  %v8895_v47 = vld [vmem:[#allocation2 + $0x6e0] sm:$0xff] }
 0x5d3   :  { %7252 = vmatpush.bf16.msra.mxu1 %v8896_v53 }
 0x5d7   :  { %7253 = vmatpush.bf16.msra.mxu1 %v8895_v47 }
 0x5d8   :  { %v11498_v5 = vpop.f32.mrf.mxu2 }
 0x5db   :  { %7254 = vmatpush.bf16.msra.mxu1 %v8894_v2  ;;  %v6164_v2 = vadd.f32 %v11522_v22, %v11440_v36 }
 0x5dd   :  { %6383 = vmatmul.bf16.gmra.mxu2 %v11395_v55 }
 0x5df   :  { %7255 = vmatpush.bf16.msra.mxu1 %v8893_v52 }
 0x5e0   :  { %v11501_v9 = vpop.f32.mrf.mxu2 }
 0x5e2   :  { %6236 = vmatmul.bf16.gmra.mxu3 %v5752_v6  ;;  %6334 = vmatmul.bf16.gmra.mxu1 %v5848_v30  ;;  %v8892_v6 = vld [vmem:[#allocation2 + $0x6c8] sm:$0xff] }
 0x5e3   :  { %7256 = vmatpush.bf16.msra.mxu1 %v8892_v6 }
 0x5e7   :  { %7257 = vmatpush.bf16.msra.mxu1 %v8891_v35 }
 0x5e8   :  { %v11509_v50 = vpop.f32.mrf.mxu2 }
 0x5ed   :  { %6388 = vmatmul.bf16.gmra.mxu2 %v11428_v61 }
 0x5f0   :  { %v11512_v31 = vpop.f32.mrf.mxu2 }
 0x5f2   :  { %6241 = vmatmul.bf16.gmra.mxu3 %v5753_v7  ;;  %6339 = vmatmul.bf16.gmra.mxu1 %v5849_v58  ;;  %v6263_v58 = vpop.f32.mrf.mxu0 }
 0x5f8   :  { %v11520_v30 = vpop.f32.mrf.mxu2 }
 0x5fa   :  { %v6266_v47 = vpop.f32.mrf.mxu0 }
 0x5ff   :  { %v6305_v46 = vpop.f32.mrf.mxu1 }
 0x600   :  { %v6354_v51 = vpop.f32.mrf.mxu2 }
 0x602   :  { %7160 = vmatmul.bf16.vlgmr.msrb.gmra.mxu3 %v11241_v19 }
 0x605   :  { %v6207_v7 = vpop.f32.mrf.mxu3 }
 0x606   :  { %v6208_v12 = vadd.f32 %v6207_v7, %v6159_v34 }
 0x607   :  { %v6307_v44 = vpop.f32.mrf.mxu1 }
 0x608   :  { %v6257_v26 = vadd.f32 %v6256_v49, %v6208_v12  ;;  %v6356_v0 = vpop.f32.mrf.mxu2  ;;  %v8888_v12 = vld [vmem:[#allocation2 + $0x6a8] sm:$0xff] }
 0x609   :  { %7203 = vmatpush.bf16.msrb.mxu0 %v8888_v12 }
 0x60a   :  { %v6306_v63 = vadd.f32 %v6305_v46, %v6257_v26 }
 0x60c   :  { %v6355_v45 = vadd.f32 %v6354_v51, %v6306_v63 }
 0x60d   :  { %v6209_v54 = vpop.f32.mrf.mxu3 }
 0x60e   :  { %v11529_v33 = vmax.f32 %v6355_v45, 0.0  ;;  %v6210_v57 = vadd.f32 %v6209_v54, %v6161_v24 }
 0x60f   :  { %v6310_v37 = vpop.f32.mrf.mxu1 }
 0x610   :  { %v6511_v16 = vpack.c.bf16 %v11529_v33, %v11529_v33  ;;  %v6259_v53 = vadd.f32 %v6258_v3, %v6210_v57  ;;  %v6359_v39 = vpop.f32.mrf.mxu2  ;;  %v6525_v46 = vrot.slane %v11529_v33, 4 }
 0x612   :  { %v6687_v49 = vunpack.c.l.b16 %v6511_v16  ;;  %v6308_v8 = vadd.f32 %v6307_v44, %v6259_v53 }
 0x614   :  { %v6797_v56 = vpack.c.b16 %v6687_v49, %v12217_v4  ;;  %v6357_v21 = vadd.f32 %v6356_v0, %v6308_v8  ;;  %v6268_v0 = vpop.f32.mrf.mxu0 }
 0x615   :  { %v6212_v52 = vpop.f32.mrf.mxu3 }
 0x616   :  { %v6395_v6 = vmax.f32 %v6357_v21, 0.0  ;;  %v6213_v43 = vadd.f32 %v6212_v52, %v6164_v2  ;;  %7258 = vmatmul.bf16.vlgmr.msra.gmra.mxu1 %v6797_v56 }
 0x617   :  { %v6312_v35 = vpop.f32.mrf.mxu1 }
 0x618   :  { %v6526_v51 = vrot.slane %v6395_v6, 4  ;;  %v6262_v34 = vadd.f32 %v6261_v29, %v6213_v43  ;;  %v6361_v3 = vpop.f32.mrf.mxu2  ;;  %v6512_v7 = vpack.c.bf16 %v6395_v6, %v6395_v6 }
 0x61a   :  { %v6311_v26 = vadd.f32 %v6310_v37, %v6262_v34  ;;  %v6688_v44 = vunpack.c.l.b16 %v6512_v7  ;;  %v6555_v36 = vsel %vm421_vm0, %v6525_v46, %v6526_v51 }
 0x61b   :  { %v6575_v2 = vpack.c.bf16 %v6555_v36, %v6555_v36 }
 0x61c   :  { %v6360_v63 = vadd.f32 %v6359_v39, %v6311_v26  ;;  %v11543_v24 = vpack.c.b16 %v6688_v44, %v6687_v49  ;;  %v6169_v39 = vadd.f32 %v11522_v22, %v11451_v38  ;;  %v6271_v43 = vpop.f32.mrf.mxu0  ;;  %v8887_v38 = vld [vmem:[#allocation2 + $0x6a0] sm:$0xff] }
 0x61d   :  { %v6214_v45 = vpop.f32.mrf.mxu3  ;;  %v11550_v7 = vunpack.c.l.b16 %v6575_v2  ;;  %7204 = vmatpush.bf16.msrb.mxu0 %v8887_v38 }
 0x61e   :  { %v6396_v29 = vmax.f32 %v6360_v63, 0.0  ;;  %v6215_v54 = vadd.f32 %v6214_v45, %v6166_v14  ;;  %7165 = vmatmul.bf16.gmra.mxu3 %v11543_v24 }
 0x61f   :  { %v6315_v57 = vpop.f32.mrf.mxu1 }
 0x620   :  { %v6527_v37 = vrot.slane %v6396_v29, 4  ;;  %v6264_v16 = vadd.f32 %v6263_v58, %v6215_v54  ;;  %v6364_v53 = vpop.f32.mrf.mxu2  ;;  %v6513_v8 = vpack.c.bf16 %v6396_v29, %v6396_v29 }
 0x622   :  { %v6313_v56 = vadd.f32 %v6312_v35, %v6264_v16  ;;  %v6689_v21 = vunpack.c.l.b16 %v6513_v8  ;;  %v6554_v52 = vsel %vm421_vm0, %v6526_v51, %v6527_v37  ;;  %v6171_v16 = vadd.f32 %v11522_v22, %v11459_v18 }
 0x623   :  { %v6576_v13 = vpack.c.bf16 %v6554_v52, %v6554_v52 }
 0x624   :  { %v6362_v49 = vadd.f32 %v6361_v3, %v6313_v56  ;;  %v6798_v6 = vpack.c.b16 %v6689_v21, %v6688_v44 }
 0x625   :  { %v6217_v34 = vpop.f32.mrf.mxu3  ;;  %v11552_v12 = vunpack.c.l.b16 %v6576_v13 }
 0x626   :  { %v6397_v58 = vmax.f32 %v6362_v49, 0.0  ;;  %v6218_v26 = vadd.f32 %v6217_v34, %v6169_v39  ;;  %7263 = vmatmul.bf16.gmra.mxu1 %v6798_v6 }
 0x627   :  { %v6317_v35 = vpop.f32.mrf.mxu1  ;;  %v6750_v36 = vpack.c.b16 %v11552_v12, %v11550_v7 }
 0x628   :  { %v6528_v51 = vrot.slane %v6397_v58, 4  ;;  %v6267_v14 = vadd.f32 %v6266_v47, %v6218_v26  ;;  %v6366_v63 = vpop.f32.mrf.mxu2  ;;  %v6514_v45 = vpack.c.bf16 %v6397_v58, %v6397_v58 }
 0x62a   :  { %v6316_v3 = vadd.f32 %v6315_v57, %v6267_v14  ;;  %v6690_v44 = vunpack.c.l.b16 %v6514_v45  ;;  %v6553_v29 = vsel %vm421_vm0, %v6527_v37, %v6528_v51  ;;  %v6273_v57 = vpop.f32.mrf.mxu0  ;;  %v6174_v14 = vadd.f32 %v11522_v22, %v11463_v41 }
 0x62b   :  { %v6577_v54 = vpack.c.bf16 %v6553_v29, %v6553_v29 }
 0x62c   :  { %v6365_v8 = vadd.f32 %v6364_v53, %v6316_v3  ;;  %v11560_v2 = vpack.c.b16 %v6690_v44, %v6689_v21 }
 0x62d   :  { %v6219_v56 = vpop.f32.mrf.mxu3  ;;  %v11562_v52 = vunpack.c.l.b16 %v6577_v54 }
 0x62e   :  { %v6398_v47 = vmax.f32 %v6365_v8, 0.0  ;;  %v6220_v13 = vadd.f32 %v6219_v56, %v6171_v16  ;;  %7170 = vmatmul.bf16.gmra.mxu3 %v11560_v2 }
 0x62f   :  { %v6320_v39 = vpop.f32.mrf.mxu1  ;;  %v6846_v49 = vpack.c.b16 %v11562_v52, %v11552_v12 }
 0x630   :  { %v6529_v37 = vrot.slane %v6398_v47, 4  ;;  %v6269_v6 = vadd.f32 %v6268_v0, %v6220_v13  ;;  %v6369_v34 = vpop.f32.mrf.mxu2  ;;  %v6515_v58 = vpack.c.bf16 %v6398_v47, %v6398_v47  ;;  %v8886_v13 = vld [vmem:[#allocation2 + $0x698] sm:$0xff] }
 0x631   :  { %7205 = vmatpush.bf16.msrb.mxu0 %v8886_v13 }
 0x632   :  { %v6318_v18 = vadd.f32 %v6317_v35, %v6269_v6  ;;  %v6691_v53 = vunpack.c.l.b16 %v6515_v58  ;;  %v6552_v21 = vsel %vm421_vm0, %v6528_v51, %v6529_v37  ;;  %v6276_v6 = vpop.f32.mrf.mxu0 }
 0x633   :  { %v6578_v26 = vpack.c.bf16 %v6552_v21, %v6552_v21 }
 0x634   :  { %v6367_v45 = vadd.f32 %v6366_v63, %v6318_v18  ;;  %v6799_v38 = vpack.c.b16 %v6691_v53, %v6690_v44  ;;  %v6176_v18 = vadd.f32 %v11522_v22, %v11478_v28 }
 0x635   :  { %v6222_v3 = vpop.f32.mrf.mxu3  ;;  %v11571_v29 = vunpack.c.l.b16 %v6578_v26 }
 0x636   :  { %v6399_v54 = vmax.f32 %v6367_v45, 0.0  ;;  %v6223_v16 = vadd.f32 %v6222_v3, %v6174_v14  ;;  %7268 = vmatmul.bf16.gmra.mxu1 %v6799_v38 }
 0x637   :  { %v6322_v0 = vpop.f32.mrf.mxu1 }
 0x638   :  { %v6530_v8 = vrot.slane %v6399_v54, 4  ;;  %v6272_v56 = vadd.f32 %v6271_v43, %v6223_v16  ;;  %v6371_v47 = vpop.f32.mrf.mxu2  ;;  %v6516_v51 = vpack.c.bf16 %v6399_v54, %v6399_v54 }
 0x63a   :  { %v6321_v58 = vadd.f32 %v6320_v39, %v6272_v56  ;;  %v6692_v41 = vunpack.c.l.b16 %v6516_v51  ;;  %v6551_v63 = vsel %vm421_vm0, %v6529_v37, %v6530_v8 }
 0x63b   :  { %v6579_v44 = vpack.c.bf16 %v6551_v63, %v6551_v63 }
 0x63c   :  { %v6370_v21 = vadd.f32 %v6369_v34, %v6321_v58  ;;  %v11579_v26 = vpack.c.b16 %v6692_v41, %v6691_v53  ;;  %v6278_v53 = vpop.f32.mrf.mxu0  ;;  %v6179_v58 = vadd.f32 %v11522_v22, %v11481_v60 }
 0x63d   :  { %v6224_v14 = vpop.f32.mrf.mxu3  ;;  %v11581_v45 = vunpack.c.l.b16 %v6579_v44 }
 0x63e   :  { %v6400_v43 = vmax.f32 %v6370_v21, 0.0  ;;  %v6225_v38 = vadd.f32 %v6224_v14, %v6176_v18  ;;  %7175 = vmatmul.bf16.gmra.mxu3 %v11579_v26 }
 0x63f   :  { %v6325_v39 = vpop.f32.mrf.mxu1 }
 0x640   :  { %v6531_v54 = vrot.slane %v6400_v43, 4  ;;  %v6274_v37 = vadd.f32 %v6273_v57, %v6225_v38  ;;  %v6374_v16 = vpop.f32.mrf.mxu2  ;;  %v6612_v56 = vpack.c.bf16 %v6400_v43, %v6400_v43 }
 0x642   :  { %v6323_v51 = vadd.f32 %v6322_v0, %v6274_v37  ;;  %v11586_v28 = vunpack.c.l.b16 %v6612_v56  ;;  %v6550_v34 = vsel %vm421_vm0, %v6530_v8, %v6531_v54  ;;  %v8885_v56 = vld [vmem:[#allocation2 + $0x690] sm:$0xff] }
 0x643   :  { %v6580_v13 = vpack.c.bf16 %v6550_v34, %v6550_v34  ;;  %7206 = vmatpush.bf16.msrb.mxu0 %v8885_v56 }
 0x644   :  { %v6372_v63 = vadd.f32 %v6371_v47, %v6323_v51  ;;  %v6800_v44 = vpack.c.b16 %v11586_v28, %v6692_v41  ;;  %v6181_v51 = vadd.f32 %v11522_v22, %v11487_v48 }
 0x645   :  { %v6227_v18 = vpop.f32.mrf.mxu3  ;;  %v11593_v21 = vunpack.c.l.b16 %v6580_v13 }
 0x646   :  { %v6401_v57 = vmax.f32 %v6372_v63, 0.0  ;;  %v6228_v14 = vadd.f32 %v6227_v18, %v6179_v58  ;;  %7273 = vmatmul.bf16.gmra.mxu1 %v6800_v44  ;;  %v6281_v63 = vpop.f32.mrf.mxu0 }
 0x647   :  { %v6327_v0 = vpop.f32.mrf.mxu1 }
 0x648   :  { %v6532_v38 = vrot.slane %v6401_v57, 4  ;;  %v6277_v8 = vadd.f32 %v6276_v6, %v6228_v14  ;;  %v6376_v37 = vpop.f32.mrf.mxu2  ;;  %v6660_v34 = vpack.c.bf16 %v6401_v57, %v6401_v57 }
 0x64a   :  { %v6326_v3 = vadd.f32 %v6325_v39, %v6277_v8  ;;  %v11597_v60 = vunpack.c.l.b16 %v6660_v34  ;;  %v6549_v47 = vsel %vm421_vm0, %v6531_v54, %v6532_v38 }
 0x64b   :  { %v6644_v41 = vpack.c.bf16 %v6549_v47, %v6549_v47  ;;  %v6184_v47 = vadd.f32 %v11522_v22, %v11490_v59  ;;  %v8913_v59 = vld [vmem:[#allocation2 + $0x770] sm:$0xff] }
 0x64c   :  { %v6375_v13 = vadd.f32 %v6374_v16, %v6326_v3 }
 0x64d   :  { %v6229_v6 = vpop.f32.mrf.mxu3  ;;  %v11605_v44 = vunpack.c.l.b16 %v6644_v41 }
 0x64e   :  { %v6402_v18 = vmax.f32 %v6375_v13, 0.0  ;;  %v6230_v39 = vadd.f32 %v6229_v6, %v6181_v51  ;;  %7180 = vmatmul.bf16.gmra.mxu3 %v11241_v19  ;;  %v8914_v13 = vld [vmem:[#allocation2 + $0x778] sm:$0xff] }
 0x64f   :  { %v6330_v57 = vpop.f32.mrf.mxu1  ;;  %7348 = vmatpush.bf16.msra.mxu3 %v8914_v13  ;;  %v8905_v13 = vld [vmem:[#allocation2 + $0x730] sm:$0xff] }
 0x650   :  { %v6533_v14 = vrot.slane %v6402_v18, 4  ;;  %v6279_v8 = vadd.f32 %v6278_v53, %v6230_v39  ;;  %v6519_v56 = vpack.c.bf16 %v6402_v18, %v6402_v18  ;;  %v6379_v48 = vpop.f32.mrf.mxu2 }
 0x652   :  { %v6328_v3 = vadd.f32 %v6327_v0, %v6279_v8  ;;  %v6695_v16 = vunpack.c.l.b16 %v6519_v56  ;;  %v11612_v34 = vsel %vm421_vm0, %v6532_v38, %v6533_v14  ;;  %v6283_v0 = vpop.f32.mrf.mxu0  ;;  %v8884_v8 = vld [vmem:[#allocation2 + $0x688] sm:$0xff]  ;;  %v8906_v56 = vld [vmem:[#allocation2 + $0x738] sm:$0xff] }
 0x653   :  { %v6629_v53 = vsel %vm446_vm1, %v11612_v34, 0.0  ;;  %7207 = vmatpush.bf16.msrb.mxu0 %v8884_v8  ;;  %7299 = vmatpush.bf16.msra.mxu2 %v8906_v56  ;;  %v8911_v8 = vld [vmem:[#allocation2 + $0x760] sm:$0xff] }
 0x654   :  { %v6377_v41 = vadd.f32 %v6376_v37, %v6328_v3  ;;  %v6801_v19 = vpack.c.b16 %v6695_v16, %v12217_v4  ;;  %v6645_v3 = vpack.c.bf16 %v6629_v53, %v6629_v53  ;;  %7349 = vmatpush.bf16.msra.mxu3 %v8913_v59 }
 0x655   :  { %v6232_v51 = vpop.f32.mrf.mxu3 }
 0x656   :  { %v6403_v6 = vmax.f32 %v6377_v41, 0.0  ;;  %v6233_v54 = vadd.f32 %v6232_v51, %v6184_v47  ;;  %7278 = vmatmul.bf16.gmra.mxu1 %v6801_v19  ;;  %v6186_v19 = vadd.f32 %v11522_v22, %v11498_v5 }
 0x657   :  { %v6332_v37 = vpop.f32.mrf.mxu1  ;;  %7300 = vmatpush.bf16.msra.mxu2 %v8905_v13 }
 0x658   :  { %v6534_v18 = vrot.slane %v6403_v6, 4  ;;  %v6282_v38 = vadd.f32 %v6281_v63, %v6233_v54  ;;  %v6520_v39 = vpack.c.bf16 %v6403_v6, %v6403_v6  ;;  %v6381_v41 = vpop.f32.mrf.mxu2  ;;  %v8912_v6 = vld [vmem:[#allocation2 + $0x768] sm:$0xff] }
 0x659   :  { %7350 = vmatpush.bf16.msra.mxu3 %v8912_v6 }
 0x65a   :  { %v6331_v43 = vadd.f32 %v6330_v57, %v6282_v38  ;;  %v6696_v58 = vunpack.c.l.b16 %v6520_v39  ;;  %v6547_v47 = vsel %vm421_vm0, %v6533_v14, %v6534_v18  ;;  %v11628_v57 = vunpack.c.l.b16 %v6645_v3  ;;  %v6286_v56 = vpop.f32.mrf.mxu0 }
 0x65b   :  { %v6583_v17 = vpack.c.bf16 %v6547_v47, %v6547_v47 }
 0x65c   :  { %v6380_v63 = vadd.f32 %v6379_v48, %v6331_v43  ;;  %v11624_v54 = vpack.c.b16 %v6696_v58, %v6695_v16  ;;  %v8904_v16 = vld [vmem:[#allocation2 + $0x728] sm:$0xff] }
 0x65d   :  { %v6234_v51 = vpop.f32.mrf.mxu3  ;;  %v11626_v53 = vunpack.c.l.b16 %v6583_v17  ;;  %7301 = vmatpush.bf16.msra.mxu2 %v8904_v16  ;;  %7351 = vmatpush.bf16.msra.mxu3 %v8911_v8 }
 0x65e   :  { %v6404_v38 = vmax.f32 %v6380_v63, 0.0  ;;  %v6235_v39 = vadd.f32 %v6234_v51, %v6186_v19  ;;  %7185 = vmatmul.bf16.gmra.mxu3 %v11624_v54  ;;  %v6189_v63 = vadd.f32 %v11522_v22, %v11501_v9  ;;  %v8902_v9 = vld [vmem:[#allocation2 + $0x718] sm:$0xff] }
 0x65f   :  { %v6335_v17 = vpop.f32.mrf.mxu1 }
 0x660   :  { %v6535_v5 = vrot.slane %v6404_v38, 4  ;;  %v6284_v43 = vadd.f32 %v6283_v0, %v6235_v39  ;;  %v6521_v48 = vpack.c.bf16 %v6404_v38, %v6404_v38  ;;  %v6384_v6 = vpop.f32.mrf.mxu2  ;;  %v8903_v38 = vld [vmem:[#allocation2 + $0x720] sm:$0xff]  ;;  %v8910_v39 = vld [vmem:[#allocation2 + $0x758] sm:$0xff] }
 0x661   :  { %7302 = vmatpush.bf16.msra.mxu2 %v8903_v38  ;;  %7352 = vmatpush.bf16.msra.mxu3 %v8910_v39 }
 0x662   :  { %v6333_v59 = vadd.f32 %v6332_v37, %v6284_v43  ;;  %v6697_v47 = vunpack.c.l.b16 %v6521_v48  ;;  %v6546_v3 = vsel %vm421_vm0, %v6534_v18, %v6535_v5  ;;  %v6288_v35 = vpop.f32.mrf.mxu0 }
 0x663   :  { %v6584_v19 = vpack.c.bf16 %v6546_v3, %v6546_v3  ;;  %v8883_v3 = vld [vmem:[#allocation2 + $0x680] sm:$0xff] }
 0x664   :  { %v6382_v51 = vadd.f32 %v6381_v41, %v6333_v59  ;;  %v6802_v13 = vpack.c.b16 %v6697_v47, %v6696_v58  ;;  %v8909_v41 = vld [vmem:[#allocation2 + $0x750] sm:$0xff]  ;;  %7208 = vmatpush.bf16.msrb.mxu0 %v8883_v3 }
 0x665   :  { %v6237_v0 = vpop.f32.mrf.mxu3  ;;  %v11637_v14 = vunpack.c.l.b16 %v6584_v19  ;;  %7303 = vmatpush.bf16.msra.mxu2 %v8902_v9  ;;  %7353 = vmatpush.bf16.msra.mxu3 %v8909_v41  ;;  %v8907_v9 = vld [vmem:[#allocation2 + $0x740] sm:$0xff] }
 0x666   :  { %v6405_v37 = vmax.f32 %v6382_v51, 0.0  ;;  %v6238_v43 = vadd.f32 %v6237_v0, %v6189_v63  ;;  %7283 = vmatmul.bf16.gmra.mxu1 %v6802_v13  ;;  %v8901_v63 = vld [vmem:[#allocation2 + $0x710] sm:$0xff]  ;;  %v8908_v51 = vld [vmem:[#allocation2 + $0x748] sm:$0xff]  ;;  %v6191_v0 = vadd.f32 %v11522_v22, %v11509_v50 }
 0x667   :  { %v6337_v39 = vpop.f32.mrf.mxu1  ;;  %v12233_v27 = vpack.c.b16 %v11637_v14, %v11626_v53 }
 0x668   :  { %v6536_v48 = vrot.slane %v6405_v37, 4  ;;  %v6287_v16 = vadd.f32 %v6286_v56, %v6238_v43  ;;  %v6522_v8 = vpack.c.bf16 %v6405_v37, %v6405_v37 }
 0x669   :  { %7304 = vmatpush.bf16.msra.mxu2 %v8901_v63  ;;  %7354 = vmatpush.bf16.msra.mxu3 %v8908_v51  ;;  %v6194_v63 = vadd.f32 %v11522_v22, %v11512_v31 }
 0x66a   :  { %v6336_v58 = vadd.f32 %v6335_v17, %v6287_v16  ;;  %v6698_v59 = vunpack.c.l.b16 %v6522_v8  ;;  %v6545_v19 = vsel %vm421_vm0, %v6535_v5, %v6536_v48  ;;  %v6386_v5 = vpop.f32.mrf.mxu2  ;;  %v8900_v8 = vld [vmem:[#allocation2 + $0x708] sm:$0xff]  ;;  %v6291_v50 = vpop.f32.mrf.mxu0 }
 0x66b   :  { %v6585_v13 = vpack.c.bf16 %v6545_v19, %v6545_v19  ;;  %v8922_v19 = vld [vmem:[#allocation6 + $0xb8] sm:$0xff] }
 0x66c   :  { %v6385_v38 = vadd.f32 %v6384_v6, %v6336_v58  ;;  %v11645_v56 = vpack.c.b16 %v6698_v59, %v6697_v47  ;;  %7483 = vmatpush.bf16.msra.mxu0 %v8922_v19  ;;  %v6196_v19 = vadd.f32 %v11522_v22, %v11520_v30  ;;  %v8921_v22 = vld [vmem:[#allocation6 + $0xb0] sm:$0xff] }
 0x66d   :  { %v6239_v17 = vpop.f32.mrf.mxu3  ;;  %v11647_v37 = vunpack.c.l.b16 %v6585_v13  ;;  %7305 = vmatpush.bf16.msra.mxu2 %v8900_v8  ;;  %7355 = vmatpush.bf16.msra.mxu3 %v8907_v9 }
 0x66e   :  { %v6406_v43 = vmax.f32 %v6385_v38, 0.0  ;;  %v6240_v16 = vadd.f32 %v6239_v17, %v6191_v0  ;;  %7190 = vmatmul.bf16.gmra.mxu3 %v11645_v56  ;;  %v8899_v0 = vld [vmem:[#allocation2 + $0x700] sm:$0xff] }
 0x670   :  { %v6537_v6 = vrot.slane %v6406_v43, 4  ;;  %v6289_v47 = vadd.f32 %v6288_v35, %v6240_v16  ;;  %v6523_v41 = vpack.c.bf16 %v6406_v43, %v6406_v43  ;;  %v6340_v16 = vpop.f32.mrf.mxu1  ;;  %7484 = vmatpush.bf16.msra.mxu0 %v8921_v22 }
 0x671   :  { %7306 = vmatpush.bf16.msra.mxu2 %v8899_v0 }
 0x672   :  { %v6338_v58 = vadd.f32 %v6337_v39, %v6289_v47  ;;  %v6699_v3 = vunpack.c.l.b16 %v6523_v41  ;;  %v6544_v13 = vsel %vm421_vm0, %v6536_v48, %v6537_v6  ;;  %v6389_v41 = vpop.f32.mrf.mxu2 }
 0x673   :  { %v6586_v38 = vpack.c.bf16 %v6544_v13, %v6544_v13 }
 0x674   :  { %v6387_v51 = vadd.f32 %v6386_v5, %v6338_v58  ;;  %v6803_v17 = vpack.c.b16 %v6699_v3, %v6698_v59  ;;  %7485 = vmatpush.bf16.msra.mxu0 %v8920_v42 }
 0x675   :  { %v6242_v18 = vpop.f32.mrf.mxu3  ;;  %v11656_v35 = vunpack.c.l.b16 %v6586_v38 }
 0x676   :  { %v6407_v39 = vmax.f32 %v6387_v51, 0.0  ;;  %v6243_v43 = vadd.f32 %v6242_v18, %v6194_v63  ;;  %7288 = vmatmul.bf16.gmra.mxu1 %v6803_v17 }
 0x677   :  { %v6755_v48 = vpack.c.b16 %v11656_v35, %v11647_v37 }
 0x678   :  { %v6538_v8 = vrot.slane %v6407_v39, 4  ;;  %v6292_v9 = vadd.f32 %v6291_v50, %v6243_v43  ;;  %v6524_v47 = vpack.c.bf16 %v6407_v39, %v6407_v39  ;;  %v6293_v50 = vpop.f32.mrf.mxu0 }
 0x67a   :  { %v6341_v31 = vadd.f32 %v6340_v16, %v6292_v9  ;;  %v6700_v5 = vunpack.c.l.b16 %v6524_v47  ;;  %v6543_v59 = vsel %vm421_vm0, %v6537_v6, %v6538_v8  ;;  %v6342_v16 = vpop.f32.mrf.mxu1  ;;  %v6391_v47 = vpop.f32.mrf.mxu2 }
 0x67b   :  { %v6587_v58 = vpack.c.bf16 %v6543_v59, %v6543_v59 }
 0x67c   :  { %v6390_v18 = vadd.f32 %v6389_v41, %v6341_v31  ;;  %v11664_v13 = vpack.c.b16 %v6700_v5, %v6699_v3 }
 0x67d   :  { %v6244_v0 = vpop.f32.mrf.mxu3  ;;  %v11666_v38 = vunpack.c.l.b16 %v6587_v58 }
 0x67e   :  { %v6408_v63 = vmax.f32 %v6390_v18, 0.0  ;;  %v6245_v51 = vadd.f32 %v6244_v0, %v6196_v19  ;;  %7195 = vmatmul.bf16.gmra.mxu3 %v11664_v13 }
 0x67f   :  { %v6851_v17 = vpack.c.b16 %v11666_v38, %v11656_v35 }
 0x680   :  { %v6539_v39 = vrot.slane %v6408_v63, 4  ;;  %v6294_v6 = vadd.f32 %v6293_v50, %v6245_v51  ;;  %v6620_v43 = vpack.c.bf16 %v6408_v63, %v6408_v63 }
 0x682   :  { %v6343_v9 = vadd.f32 %v6342_v16, %v6294_v6  ;;  %v11671_v30 = vunpack.c.l.b16 %v6620_v43  ;;  %v6542_v3 = vsel %vm421_vm0, %v6538_v8, %v6539_v39 }
 0x683   :  { %v6588_v41 = vpack.c.bf16 %v6542_v3, %v6542_v3 }
 0x684   :  { %v6392_v31 = vadd.f32 %v6391_v47, %v6343_v9  ;;  %v6804_v59 = vpack.c.b16 %v11671_v30, %v6700_v5 }
 0x685   :  { %v11676_v58 = vunpack.c.l.b16 %v6588_v41 }
 0x686   :  { %v6409_v19 = vmax.f32 %v6392_v31, 0.0  ;;  %7293 = vmatmul.bf16.gmra.mxu1 %v6804_v59 }
 0x687   :  { %v6756_v18 = vpack.c.b16 %v11676_v58, %v11666_v38 }
 0x688   :  { %v6540_v0 = vrot.slane %v6409_v19, 4  ;;  %v6668_v63 = vpack.c.bf16 %v6409_v19, %v6409_v19 }
 0x68a   :  { %v6556_v8 = vsel %vm421_vm0, %v6540_v0, %v6525_v46  ;;  %v6892_v51 = vunpack.c.l.b16 %v6668_v63  ;;  %v6541_v50 = vsel %vm421_vm0, %v6539_v39, %v6540_v0  ;;  %v12227_v39 = vpack.c.b16 %v11571_v29, %v11562_v52 }
 0x68b   :  { %v6558_v5 = vsel %vm11412_vm4, %v6556_v8, 0.0  ;;  %v6621_v6 = vsel %vm438_vm2, %v6556_v8, 0.0  ;;  %v6652_v43 = vpack.c.bf16 %v6541_v50, %v6541_v50  ;;  %v12231_v52 = vpack.c.b16 %v11605_v44, %v11593_v21 }
 0x68c   :  { %v6574_v16 = vpack.c.bf16 %v6558_v5, %v6558_v5  ;;  %v6637_v9 = vpack.c.bf16 %v6621_v6, %v6621_v6  ;;  %v6900_v22 = vpack.c.b16 %v6892_v51, %v11671_v30  ;;  %v12228_v30 = vpack.c.b16 %v11581_v45, %v11571_v29 }
 0x68d   :  { %v6844_v3 = vunpack.c.l.b16 %v6652_v43  ;;  %v6566_v29 = vsel %vm11471_vm5, %v11612_v34, 0.0  ;;  %v12234_v34 = vpack.c.b16 %v11647_v37, %v11637_v14  ;;  %v11743_v14 = vld [vmem:[#allocation4 + $0x5] ss:$0 sm:$0xff] }
 0x68e   :  { %7356 = vmatmul.bf16.vlgmr.msra.gmra.mxu3 %v11543_v24  ;;  %v6734_v33 = vunpack.c.l.b16 %v6574_v16  ;;  %v6829_v46 = vunpack.c.l.b16 %v6637_v9  ;;  %v8919_v24 = vld [vmem:[#allocation6 + $0xa0] sm:$0xff]  ;;  %v6582_v41 = vpack.c.bf16 %v6566_v29, %v6566_v29 }
 0x68f   :  { %v6852_v47 = vpack.c.b16 %v6844_v3, %v11676_v58  ;;  %7486 = vmatpush.bf16.msra.mxu0 %v8919_v24 }
 0x690   :  { %v6749_v1 = vpack.c.b16 %v6734_v33, %v12217_v4  ;;  %v6845_v15 = vpack.c.b16 %v11550_v7, %v6829_v46  ;;  %v7161_v7 = vpop.f32.mrf.mxu3  ;;  %v6742_v59 = vunpack.c.l.b16 %v6582_v41 }
 0x692   :  { %7209 = vmatmul.bf16.vlgmr.msrb.gmra.mxu0 %v6749_v1  ;;  %7307 = vmatmul.bf16.vlgmr.msra.gmra.mxu2 %v6845_v15 }
 0x698   :  { %v7163_v12 = vpop.f32.mrf.mxu3 }
 0x699   :  { %v7164_v37 = vadd.f32 %v11743_v14, %v7163_v12 }
 0x69e   :  { %7361 = vmatmul.bf16.gmra.mxu3 %v11560_v2  ;;  %v8918_v2 = vld [vmem:[#allocation6 + $0x98] sm:$0xff] }
 0x69f   :  { %7487 = vmatpush.bf16.msra.mxu0 %v8918_v2 }
 0x6a1   :  { %v7166_v31 = vpop.f32.mrf.mxu3 }
 0x6a2   :  { %7214 = vmatmul.bf16.gmra.mxu0 %v6750_v36  ;;  %7312 = vmatmul.bf16.gmra.mxu2 %v6846_v49  ;;  %v12229_v36 = vpack.c.b16 %v11597_v60, %v11586_v28  ;;  %v12230_v49 = vpack.c.b16 %v11593_v21, %v11581_v45  ;;  %v6753_v28 = vpack.c.b16 %v6742_v59, %v12217_v4  ;;  %v8916_v21 = vld [vmem:[#allocation6 + $0x88] sm:$0xff]  ;;  %v8915_v4 = vld [vmem:[#allocation6 + $0x80] sm:$0xff] }
 0x6a3   :  { %v12232_v45 = vpack.c.b16 %v11626_v53, %v11628_v57  ;;  %v7167_v0 = vadd.f32 %v11743_v14, %v7166_v31 }
 0x6a9   :  { %v7168_v60 = vpop.f32.mrf.mxu3 }
 0x6ae   :  { %7366 = vmatmul.bf16.gmra.mxu3 %v11579_v26  ;;  %v8917_v26 = vld [vmem:[#allocation6 + $0x90] sm:$0xff] }
 0x6af   :  { %7488 = vmatpush.bf16.msra.mxu0 %v8917_v26  ;;  %v7259_v26 = vpop.f32.mrf.mxu1 }
 0x6b1   :  { %v7171_v44 = vpop.f32.mrf.mxu3 }
 0x6b2   :  { %7219 = vmatmul.bf16.gmra.mxu0 %v12227_v39  ;;  %7317 = vmatmul.bf16.gmra.mxu2 %v12228_v30 }
 0x6b3   :  { %7489 = vmatpush.bf16.msra.mxu0 %v8916_v21 }
 0x6b7   :  { %7490 = vmatpush.bf16.msra.mxu0 %v8915_v4  ;;  %v7261_v21 = vpop.f32.mrf.mxu1 }
 0x6be   :  { %7371 = vmatmul.bf16.gmra.mxu3 %v12229_v36 }
 0x6c2   :  { %7224 = vmatmul.bf16.gmra.mxu0 %v12230_v49  ;;  %7322 = vmatmul.bf16.gmra.mxu2 %v12231_v52 }
 0x6ce   :  { %7376 = vmatmul.bf16.gmra.mxu3 %v11624_v54  ;;  %v7173_v54 = vpop.f32.mrf.mxu3 }
 0x6cf   :  { %v7174_v43 = vadd.f32 %v11743_v14, %v7173_v54  ;;  %v7264_v54 = vpop.f32.mrf.mxu1 }
 0x6d2   :  { %7229 = vmatmul.bf16.gmra.mxu0 %v6753_v28  ;;  %7327 = vmatmul.bf16.gmra.mxu2 %v12232_v45 }
 0x6d6   :  { %v7176_v57 = vpop.f32.mrf.mxu3 }
 0x6de   :  { %7381 = vmatmul.bf16.gmra.mxu3 %v11645_v56  ;;  %v7178_v53 = vpop.f32.mrf.mxu3  ;;  %v7162_v56 = vadd.f32 %v11743_v14, %v7161_v7 }
 0x6e2   :  { %7234 = vmatmul.bf16.gmra.mxu0 %v12233_v27  ;;  %7332 = vmatmul.bf16.gmra.mxu2 %v12234_v34 }
 0x6ee   :  { %7386 = vmatmul.bf16.gmra.mxu3 %v11664_v13 }
 0x6f2   :  { %7239 = vmatmul.bf16.gmra.mxu0 %v6755_v48  ;;  %7337 = vmatmul.bf16.gmra.mxu2 %v6851_v17  ;;  %v7181_v17 = vpop.f32.mrf.mxu3 }
 0x6fa   :  { %v7183_v63 = vpop.f32.mrf.mxu3 }
 0x6fb   :  { %v7184_v30 = vadd.f32 %v11743_v14, %v7183_v63 }
 0x6fe   :  { %7391 = vmatmul.bf16.gmra.mxu3 %v6900_v22  ;;  %v7177_v22 = vadd.f32 %v11743_v14, %v7176_v57 }
 0x702   :  { %7244 = vmatmul.bf16.gmra.mxu0 %v6756_v18  ;;  %7342 = vmatmul.bf16.gmra.mxu2 %v6852_v47  ;;  %v7169_v18 = vadd.f32 %v11743_v14, %v7168_v60  ;;  %v7186_v6 = vpop.f32.mrf.mxu3  ;;  %v7179_v47 = vadd.f32 %v11743_v14, %v7178_v53 }
 0x703   :  { %v7187_v36 = vadd.f32 %v11743_v14, %v7186_v6 }
 0x70f   :  { %v7210_v13 = vpop.f32.mrf.mxu0 }
 0x710   :  { %v11746_v19 = vadd.f32 %v7210_v13, %v7162_v56 }
 0x712   :  { %7491 = vmatmul.bf16.vlgmr.msra.gmra.mxu0 %v11269_v40  ;;  %v7172_v40 = vadd.f32 %v11743_v14, %v7171_v44 }
 0x715   :  { %v7308_v41 = vpop.f32.mrf.mxu2 }
 0x717   :  { %v7212_v35 = vpop.f32.mrf.mxu0 }
 0x718   :  { %v11750_v48 = vadd.f32 %v7212_v35, %v7164_v37  ;;  %v7266_v35 = vpop.f32.mrf.mxu1 }
 0x71d   :  { %v7310_v44 = vpop.f32.mrf.mxu2 }
 0x71f   :  { %v7215_v38 = vpop.f32.mrf.mxu0 }
 0x720   :  { %v11753_v58 = vadd.f32 %v7215_v38, %v7167_v0  ;;  %v7260_v0 = vadd.f32 %v7259_v26, %v11746_v19  ;;  %v7269_v6 = vpop.f32.mrf.mxu1 }
 0x722   :  { %7496 = vmatmul.bf16.gmra.mxu0 %v11286_v23  ;;  %v7188_v23 = vpop.f32.mrf.mxu3 }
 0x723   :  { %v7189_v29 = vadd.f32 %v11743_v14, %v7188_v23 }
 0x725   :  { %v7313_v57 = vpop.f32.mrf.mxu2 }
 0x727   :  { %v7217_v8 = vpop.f32.mrf.mxu0 }
 0x728   :  { %v11757_v51 = vadd.f32 %v7217_v8, %v7169_v18  ;;  %v7309_v18 = vadd.f32 %v7308_v41, %v7260_v0 }
 0x72a   :  { %v7191_v46 = vpop.f32.mrf.mxu3 }
 0x72b   :  { %v7192_v28 = vadd.f32 %v11743_v14, %v7191_v46 }
 0x72f   :  { %v7220_v50 = vpop.f32.mrf.mxu0 }
 0x730   :  { %v11760_v5 = vadd.f32 %v7220_v50, %v7172_v40  ;;  %v11802_v50 = vld [vmem:[#allocation7 + $0x2] ss:$0 sm:$0xff] }
 0x732   :  { %7501 = vmatmul.bf16.gmra.mxu0 %v11305_v20  ;;  %v7182_v20 = vadd.f32 %v11743_v14, %v7181_v17  ;;  %v7193_v42 = vpop.f32.mrf.mxu3  ;;  %v7315_v17 = vpop.f32.mrf.mxu2 }
 0x737   :  { %v7222_v16 = vpop.f32.mrf.mxu0 }
 0x738   :  { %v11764_v9 = vadd.f32 %v7222_v16, %v7174_v43  ;;  %v7262_v43 = vadd.f32 %v7261_v21, %v11750_v48 }
 0x73a   :  { %v7318_v16 = vpop.f32.mrf.mxu2 }
 0x73f   :  { %v7225_v3 = vpop.f32.mrf.mxu0 }
 0x740   :  { %v11767_v33 = vadd.f32 %v7225_v3, %v7177_v22  ;;  %v7311_v22 = vadd.f32 %v7310_v44, %v7262_v43 }
 0x742   :  { %7506 = vmatmul.bf16.gmra.mxu0 %v11329_v62  ;;  %v7196_v62 = vpop.f32.mrf.mxu3 }
 0x743   :  { %v7197_v53 = vadd.f32 %v11743_v14, %v7196_v62 }
 0x747   :  { %v7227_v1 = vpop.f32.mrf.mxu0 }
 0x748   :  { %v11771_v15 = vadd.f32 %v7227_v1, %v7179_v47  ;;  %v7265_v1 = vadd.f32 %v7264_v54, %v11753_v58 }
 0x74a   :  { %v7198_v52 = vpop.f32.mrf.mxu3  ;;  %v7314_v48 = vadd.f32 %v7313_v57, %v7265_v1 }
 0x74f   :  { %v7230_v24 = vpop.f32.mrf.mxu0 }
 0x750   :  { %v11774_v39 = vadd.f32 %v7230_v24, %v7182_v20 }
 0x752   :  { %7511 = vmatmul.bf16.gmra.mxu0 %v11351_v32  ;;  %v7357_v59 = vpop.f32.mrf.mxu3 }
 0x753   :  { %v7358_v40 = vadd.f32 %v7357_v59, %v7309_v18 }
 0x757   :  { %v7232_v2 = vpop.f32.mrf.mxu0 }
 0x758   :  { %v11778_v7 = vadd.f32 %v7232_v2, %v7184_v30  ;;  %v7320_v2 = vpop.f32.mrf.mxu2 }
 0x75a   :  { %v7359_v27 = vpop.f32.mrf.mxu3 }
 0x75b   :  { %v7360_v46 = vadd.f32 %v7359_v27, %v7311_v22 }
 0x75d   :  { %v7398_v24 = vmax.f32 %v7360_v46, 0.0 }
 0x75f   :  { %v7235_v12 = vpop.f32.mrf.mxu0 }
 0x760   :  { %v11781_v49 = vadd.f32 %v7235_v12, %v7187_v36 }
 0x762   :  { %7516 = vmatmul.bf16.gmra.mxu0 %v11374_v25  ;;  %v7194_v25 = vadd.f32 %v11743_v14, %v7193_v42  ;;  %v7362_v37 = vpop.f32.mrf.mxu3  ;;  %v7271_v42 = vpop.f32.mrf.mxu1 }
 0x763   :  { %v7363_v36 = vadd.f32 %v7362_v37, %v7314_v48 }
 0x767   :  { %v7237_v31 = vpop.f32.mrf.mxu0 }
 0x768   :  { %v11785_v32 = vadd.f32 %v7237_v31, %v7189_v29  ;;  %v7399_v29 = vmax.f32 %v7363_v36, 0.0 }
 0x76a   :  { %v7364_v8 = vpop.f32.mrf.mxu3  ;;  %v7274_v59 = vpop.f32.mrf.mxu1 }
 0x76f   :  { %v7240_v45 = vpop.f32.mrf.mxu0 }
 0x770   :  { %v11788_v60 = vadd.f32 %v7240_v45, %v7192_v28  ;;  %v7323_v45 = vpop.f32.mrf.mxu2 }
 0x772   :  { %7521 = vmatmul.bf16.gmra.mxu0 %v11395_v55  ;;  %v7199_v55 = vadd.f32 %v11743_v14, %v7198_v52  ;;  %v7367_v47 = vpop.f32.mrf.mxu3  ;;  %v7267_v52 = vadd.f32 %v7266_v35, %v11757_v51 }
 0x774   :  { %v7316_v41 = vadd.f32 %v7315_v17, %v7267_v52 }
 0x776   :  { %v7365_v21 = vadd.f32 %v7364_v8, %v7316_v41 }
 0x777   :  { %v7242_v34 = vpop.f32.mrf.mxu0 }
 0x778   :  { %v11792_v4 = vadd.f32 %v7242_v34, %v7194_v25  ;;  %v7270_v25 = vadd.f32 %v7269_v6, %v11760_v5  ;;  %v7400_v27 = vmax.f32 %v7365_v21, 0.0  ;;  %v7325_v17 = vpop.f32.mrf.mxu2 }
 0x77a   :  { %v7369_v58 = vpop.f32.mrf.mxu3  ;;  %v7319_v34 = vadd.f32 %v7318_v16, %v7270_v25 }
 0x77c   :  { %v7368_v37 = vadd.f32 %v7367_v47, %v7319_v34 }
 0x77e   :  { %v7401_v0 = vmax.f32 %v7368_v37, 0.0 }
 0x77f   :  { %v7245_v56 = vpop.f32.mrf.mxu0 }
 0x780   :  { %v11795_v13 = vadd.f32 %v7245_v56, %v7197_v53  ;;  %v7276_v56 = vpop.f32.mrf.mxu1 }
 0x782   :  { %7526 = vmatmul.bf16.gmra.mxu0 %v11428_v61  ;;  %v7397_v61 = vmax.f32 %v7358_v40, 0.0  ;;  %v7372_v57 = vpop.f32.mrf.mxu3 }
 0x787   :  { %v7247_v38 = vpop.f32.mrf.mxu0 }
 0x788   :  { %v11800_v63 = vadd.f32 %v7247_v38, %v7199_v55  ;;  %v7272_v55 = vadd.f32 %v7271_v42, %v11764_v9  ;;  %v7279_v16 = vpop.f32.mrf.mxu1  ;;  %v7328_v9 = vpop.f32.mrf.mxu2 }
 0x789   :  { %v7280_v52 = vadd.f32 %v7279_v16, %v11774_v39 }
 0x78a   :  { %v7321_v38 = vadd.f32 %v7320_v2, %v7272_v55  ;;  %v7374_v40 = vpop.f32.mrf.mxu3 }
 0x78c   :  { %v7370_v6 = vadd.f32 %v7369_v58, %v7321_v38 }
 0x78e   :  { %v7402_v22 = vmax.f32 %v7370_v6, 0.0 }
 0x78f   :  { %v7492_v23 = vpop.f32.mrf.mxu0 }
 0x790   :  { %v7493_v3 = vadd.f32 %v11802_v50, %v7492_v23  ;;  %v7275_v23 = vadd.f32 %v7274_v59, %v11767_v33  ;;  %v7281_v42 = vpop.f32.mrf.mxu1  ;;  %v7330_v2 = vpop.f32.mrf.mxu2 }
 0x792   :  { %v7532_v14 = vadd.f32 %v7493_v3, %v7397_v61  ;;  %v7324_v3 = vadd.f32 %v7323_v45, %v7275_v23  ;;  %v7377_v1 = vpop.f32.mrf.mxu3 }
 0x794   :  { %v7548_v19 = vmax.f32 %v7532_v14, 0.0 }
 0x796   :  { %7580 = vst [vmem:[%s11892_s5] sm:$0xff] %v7548_v19  ;;  %v7373_v19 = vadd.f32 %v7372_v57, %v7324_v3 }
 0x797   :  { %v7494_v20 = vpop.f32.mrf.mxu0 }
 0x798   :  { %v7495_v30 = vadd.f32 %v11802_v50, %v7494_v20  ;;  %v7277_v20 = vadd.f32 %v7276_v56, %v11771_v15 }
 0x79a   :  { %v7533_v62 = vadd.f32 %v7495_v30, %v7398_v24  ;;  %v7403_v24 = vmax.f32 %v7373_v19, 0.0  ;;  %v7326_v48 = vadd.f32 %v7325_v17, %v7277_v20  ;;  %v7379_v15 = vpop.f32.mrf.mxu3 }
 0x79c   :  { %v7549_v12 = vmax.f32 %v7533_v62, 0.0  ;;  %v7375_v36 = vadd.f32 %v7374_v40, %v7326_v48 }
 0x79e   :  { %7581 = vst [vmem:[%s11892_s5 + $0x8] sm:$0xff] %v7549_v12 }
 0x79f   :  { %v7497_v26 = vpop.f32.mrf.mxu0 }
 0x7a0   :  { %v7498_v31 = vadd.f32 %v11802_v50, %v7497_v26  ;;  %v7404_v26 = vmax.f32 %v7375_v36, 0.0 }
 0x7a2   :  { %v7534_v28 = vadd.f32 %v7498_v31, %v7399_v29  ;;  %v7329_v29 = vadd.f32 %v7328_v9, %v7280_v52  ;;  %v7284_v31 = vpop.f32.mrf.mxu1 }
 0x7a4   :  { %v7550_v44 = vmax.f32 %v7534_v28, 0.0  ;;  %v7333_v28 = vpop.f32.mrf.mxu2  ;;  %v7378_v45 = vadd.f32 %v7377_v1, %v7329_v29 }
 0x7a6   :  { %7582 = vst [vmem:[%s11892_s5 + $0x10] sm:$0xff] %v7550_v44  ;;  %v7282_v44 = vadd.f32 %v7281_v42, %v11778_v7  ;;  %v7285_v7 = vadd.f32 %v7284_v31, %v11781_v49 }
 0x7a7   :  { %v7499_v51 = vpop.f32.mrf.mxu0 }
 0x7a8   :  { %v7500_v54 = vadd.f32 %v11802_v50, %v7499_v51  ;;  %v7405_v51 = vmax.f32 %v7378_v45, 0.0  ;;  %v7334_v55 = vadd.f32 %v7333_v28, %v7285_v7 }
 0x7aa   :  { %v7535_v53 = vadd.f32 %v7500_v54, %v7400_v27  ;;  %v7331_v27 = vadd.f32 %v7330_v2, %v7282_v44  ;;  %v7382_v54 = vpop.f32.mrf.mxu3 }
 0x7ac   :  { %v7551_v35 = vmax.f32 %v7535_v53, 0.0  ;;  %v7286_v53 = vpop.f32.mrf.mxu1  ;;  %v7380_v56 = vadd.f32 %v7379_v15, %v7331_v27 }
 0x7ad   :  { %v7287_v6 = vadd.f32 %v7286_v53, %v11785_v32 }
 0x7ae   :  { %7583 = vst [vmem:[%s11892_s5 + $0x18] sm:$0xff] %v7551_v35  ;;  %v7335_v35 = vpop.f32.mrf.mxu2  ;;  %v7406_v17 = vmax.f32 %v7380_v56, 0.0 }
 0x7af   :  { %v7502_v5 = vpop.f32.mrf.mxu0  ;;  %v7336_v23 = vadd.f32 %v7335_v35, %v7287_v6 }
 0x7b0   :  { %v7503_v18 = vadd.f32 %v11802_v50, %v7502_v5 }
 0x7b2   :  { %v7536_v8 = vadd.f32 %v7503_v18, %v7401_v0  ;;  %v7384_v38 = vpop.f32.mrf.mxu3  ;;  %v7383_v18 = vadd.f32 %v7382_v54, %v7334_v55 }
 0x7b4   :  { %v7552_v43 = vmax.f32 %v7536_v8, 0.0  ;;  %v7289_v40 = vpop.f32.mrf.mxu1  ;;  %v7407_v16 = vmax.f32 %v7383_v18, 0.0 }
 0x7b6   :  { %7584 = vst [vmem:[%s11892_s5 + $0x20] sm:$0xff] %v7552_v43  ;;  %v7338_v49 = vpop.f32.mrf.mxu2 }
 0x7b7   :  { %v7504_v61 = vpop.f32.mrf.mxu0 }
 0x7b8   :  { %v7505_v14 = vadd.f32 %v11802_v50, %v7504_v61 }
 0x7ba   :  { %v7537_v46 = vadd.f32 %v7505_v14, %v7402_v22  ;;  %v7385_v22 = vadd.f32 %v7384_v38, %v7336_v23  ;;  %v7387_v14 = vpop.f32.mrf.mxu3 }
 0x7bc   :  { %v7553_v47 = vmax.f32 %v7537_v46, 0.0  ;;  %v7290_v46 = vadd.f32 %v7289_v40, %v11788_v60  ;;  %v7408_v19 = vmax.f32 %v7385_v22, 0.0  ;;  %v7291_v20 = vpop.f32.mrf.mxu1 }
 0x7be   :  { %7585 = vst [vmem:[%s11892_s5 + $0x28] sm:$0xff] %v7553_v47  ;;  %v7339_v47 = vadd.f32 %v7338_v49, %v7290_v46 }
 0x7bf   :  { %v7507_v33 = vpop.f32.mrf.mxu0 }
 0x7c0   :  { %v7508_v30 = vadd.f32 %v11802_v50, %v7507_v33  ;;  %v7340_v33 = vpop.f32.mrf.mxu2 }
 0x7c2   :  { %v7538_v62 = vadd.f32 %v7508_v30, %v7403_v24  ;;  %v7388_v24 = vadd.f32 %v7387_v14, %v7339_v47  ;;  %v7292_v30 = vadd.f32 %v7291_v20, %v11792_v4  ;;  %v7389_v60 = vpop.f32.mrf.mxu3 }
 0x7c4   :  { %v7554_v12 = vmax.f32 %v7538_v62, 0.0  ;;  %v7409_v62 = vmax.f32 %v7388_v24, 0.0  ;;  %v7341_v36 = vadd.f32 %v7340_v33, %v7292_v30  ;;  %v7294_v15 = vpop.f32.mrf.mxu1 }
 0x7c6   :  { %7586 = vst [vmem:[%s11892_s5 + $0x30] sm:$0xff] %v7554_v12 }
 0x7c7   :  { %v7509_v58 = vpop.f32.mrf.mxu0 }
 0x7c8   :  { %v7510_v41 = vadd.f32 %v11802_v50, %v7509_v58  ;;  %v7343_v58 = vpop.f32.mrf.mxu2 }
 0x7ca   :  { %v7539_v59 = vadd.f32 %v7510_v41, %v7404_v26  ;;  %v7390_v26 = vadd.f32 %v7389_v60, %v7341_v36  ;;  %v7295_v41 = vadd.f32 %v7294_v15, %v11795_v13  ;;  %v7392_v45 = vpop.f32.mrf.mxu3 }
 0x7cc   :  { %v7555_v21 = vmax.f32 %v7539_v59, 0.0  ;;  %v7410_v31 = vmax.f32 %v7390_v26, 0.0  ;;  %v7344_v59 = vadd.f32 %v7343_v58, %v7295_v41 }
 0x7ce   :  { %v7571_v39 = vsel %vm10396_vm13, %v7555_v21, 0.0  ;;  %v7393_v44 = vadd.f32 %v7392_v45, %v7344_v59 }
 0x7cf   :  { %7587 = vst [vmem:[%s11892_s5 + $0x38] sm:$0xff] %v7571_v39  ;;  %v7512_v25 = vpop.f32.mrf.mxu0 }
 0x7d0   :  { %v7513_v34 = vadd.f32 %v11802_v50, %v7512_v25  ;;  %v7296_v25 = vpop.f32.mrf.mxu1 }
 0x7d1   :  { %v7297_v27 = vadd.f32 %v7296_v25, %v11800_v63 }
 0x7d2   :  { %v7540_v57 = vadd.f32 %v7513_v34, %v7405_v51  ;;  %v7345_v51 = vpop.f32.mrf.mxu2  ;;  %v7411_v34 = vmax.f32 %v7393_v44, 0.0  ;;  %v7394_v56 = vpop.f32.mrf.mxu3 }
 0x7d3   :  { %v7346_v54 = vadd.f32 %v7345_v51, %v7297_v27 }
 0x7d4   :  { %v7556_v37 = vmax.f32 %v7540_v57, 0.0 }
 0x7d6   :  { %7588 = vst [vmem:[%s11892_s5 + $0x40] sm:$0xff] %v7556_v37  ;;  %v7395_v37 = vadd.f32 %v7394_v56, %v7346_v54 }
 0x7d7   :  { %v7514_v10 = vpop.f32.mrf.mxu0 }
 0x7d8   :  { %v7515_v5 = vadd.f32 %v11802_v50, %v7514_v10  ;;  %v7412_v10 = vmax.f32 %v7395_v37, 0.0 }
 0x7da   :  { %v7541_v0 = vadd.f32 %v7515_v5, %v7406_v17 }
 0x7dc   :  { %v7557_v8 = vmax.f32 %v7541_v0, 0.0 }
 0x7de   :  { %7589 = vst [vmem:[%s11892_s5 + $0x48] sm:$0xff] %v7557_v8 }
 0x7df   :  { %v7517_v43 = vpop.f32.mrf.mxu0 }
 0x7e0   :  { %v7518_v9 = vadd.f32 %v11802_v50, %v7517_v43 }
 0x7e2   :  { %v7542_v61 = vadd.f32 %v7518_v9, %v7407_v16 }
 0x7e4   :  { %v7558_v3 = vmax.f32 %v7542_v61, 0.0 }
 0x7e6   :  { %7590 = vst [vmem:[%s11892_s5 + $0x50] sm:$0xff] %v7558_v3 }
 0x7e7   :  { %v7519_v32 = vpop.f32.mrf.mxu0 }
 0x7e8   :  { %v7520_v1 = vadd.f32 %v11802_v50, %v7519_v32 }
 0x7ea   :  { %v7543_v42 = vadd.f32 %v7520_v1, %v7408_v19 }
 0x7ec   :  { %v7559_v48 = vmax.f32 %v7543_v42, 0.0 }
 0x7ee   :  { %7591 = vst [vmem:[%s11892_s5 + $0x58] sm:$0xff] %v7559_v48 }
 0x7ef   :  { %v7522_v2 = vpop.f32.mrf.mxu0 }
 0x7f0   :  { %v7523_v12 = vadd.f32 %v11802_v50, %v7522_v2 }
 0x7f2   :  { %v7544_v52 = vadd.f32 %v7523_v12, %v7409_v62 }
 0x7f4   :  { %v7560_v29 = vmax.f32 %v7544_v52, 0.0 }
 0x7f6   :  { %7592 = vst [vmem:[%s11892_s5 + $0x60] sm:$0xff] %v7560_v29 }
 0x7f7   :  { %v7524_v4 = vpop.f32.mrf.mxu0 }
 0x7f8   :  { %v7525_v28 = vadd.f32 %v11802_v50, %v7524_v4 }
 0x7fa   :  { %v7545_v21 = vadd.f32 %v7525_v28, %v7410_v31 }
 0x7fc   :  { %v7561_v39 = vmax.f32 %v7545_v21, 0.0 }
 0x7fe   :  { %7593 = vst [vmem:[%s11892_s5 + $0x68] sm:$0xff] %v7561_v39 }
 0x7ff   :  { %v7527_v13 = vpop.f32.mrf.mxu0 }
 0x800   :  { %v7528_v57 = vadd.f32 %v11802_v50, %v7527_v13 }
 0x802   :  { %v7546_v53 = vadd.f32 %v7528_v57, %v7411_v34 }
 0x804   :  { %v7562_v35 = vmax.f32 %v7546_v53, 0.0 }
 0x806   :  { %7594 = vst [vmem:[%s11892_s5 + $0x70] sm:$0xff] %v7562_v35 }
 0x807   :  { %v7529_v7 = vpop.f32.mrf.mxu0 }
 0x808   :  { %v7530_v63 = vadd.f32 %v11802_v50, %v7529_v7 }
 0x80a   :  { %v7547_v17 = vadd.f32 %v7530_v63, %v7412_v10 }
 0x80c   :  { %v7563_v55 = vmax.f32 %v7547_v17, 0.0 }
 0x80e   :  { %v7579_v5 = vsel %vm10572_vm15, %v7563_v55, 0.0 }
 0x80f   :  { %7595 = vst [vmem:[%s11892_s5 + $0x78] sm:$0xff] %v7579_v5 }
 0x810   :  { %7600 = vsyncpa [#allocation3], 1 }
 0x811   :  { %7601 = vsyncpa [#allocation5], 1 }
 0x812   :  { %7602 = vsyncpa [#allocation8], 1 }

</bundles_post_ra>
